<compile_context>
chip_gen: v7x
topology: tpu7x:2x2x1
jax: 0.10.0
libtpu: 0.0.40
codegen_flags: <defaults>
</compile_context>

<pallas_src>
import functools

import jax
import jax.numpy as jnp
from jax import lax
from jax.experimental import pallas as pl
from jax.experimental.pallas import tpu as pltpu

_EPS = 1e-5
_MAX_TM = 512          # row tile for matmul / elementwise / reduction kernels
_MAX_TK = 512          # K (reduction) tile for the matmul kernels


# ----------------------------------------------------------------------------
# tiling helpers
# ----------------------------------------------------------------------------

def _round_up(x, m):
    return ((x + m - 1) // m) * m


def _pick_row_tile(m, max_tile=_MAX_TM):
    """Largest legal row tile: full array if small, else a 128-mult divisor."""
    if m <= max_tile:
        return m
    for cand in (512, 256, 128):
        if cand <= max_tile and m % cand == 0:
            return cand
    return 128            # callers pad M up to a multiple of 128 in this case


def _pick_k_tile(k_arr, max_tile=_MAX_TK):
    """K tile must be a multiple of 128 or equal the full K width."""
    if k_arr <= max_tile or k_arr % 128 != 0:
        return k_arr
    for cand in (512, 256, 128):
        if k_arr % cand == 0:
            return cand
    return k_arr


# ----------------------------------------------------------------------------
# fused (BN+ReLU)->matmul kernel  (used for every conv and the classifier)
# ----------------------------------------------------------------------------

def _make_matmul_kernel(num_views, has_bn):
    def kernel(*refs):
        a_refs = refs[:num_views]
        b_ref = refs[num_views]
        pos = num_views + 1
        if has_bn:
            scale_ref, bias_ref = refs[pos], refs[pos + 1]
            pos += 2
        o_ref, acc_ref = refs[pos], refs[pos + 1]

        @pl.when(pl.program_id(1) == 0)
        def _init():
            acc_ref[...] = jnp.zeros_like(acc_ref)

        for p in range(num_views):
            a = a_refs[p][...]
            if has_bn:
                # BatchNorm-apply + ReLU prologue (f32 math, bf16 MXU input).
                a = jnp.maximum(
                    a.astype(jnp.float32) * scale_ref[...] + bias_ref[...], 0.0
                ).astype(jnp.bfloat16)
            acc_ref[...] += jnp.dot(a, b_ref[p],
                                    preferred_element_type=jnp.float32)

        @pl.when(pl.program_id(1) == pl.num_programs(1) - 1)
        def _finish():
            o_ref[...] = acc_ref[...].astype(o_ref.dtype)

    return kernel


def fused_matmul(a_views, b, scale=None, bias=None, out_dtype=jnp.bfloat16):
    """out = sum_p prologue(a_views[p]) @ b[p]   (K-tiled, f32 MXU accumulation).

    a_views   : list of P arrays, each (M, K_arr)            (cast to bf16)
    b         : (P, K_used, Cout), K_used <= K_arr; zero-padded rows as needed
    scale/bias: optional (1, K_arr) f32; prologue = relu(a*scale + bias), i.e.
                the preceding BatchNorm+ReLU fused into the matmul.
    Columns of `a` beyond K_used may hold anything: the matching B rows are 0.
    """
    num_views = len(a_views)
    M, k_arr = a_views[0].shape
    _, k_used, cout = b.shape
    assert k_used <= k_arr
    has_bn = scale is not None

    tm = _pick_row_tile(M)
    mp = _round_up(M, tm)
    if mp != M:
        a_views = [jnp.pad(a, ((0, mp - M), (0, 0))) for a in a_views]
    tk = _pick_k_tile(k_arr)
    n_k = -(-k_used // tk)
    if n_k * tk != k_used:
        b = jnp.pad(b, ((0, 0), (0, n_k * tk - k_used), (0, 0)))

    a_views = [a.astype(jnp.bfloat16) for a in a_views]
    b = b.astype(jnp.bfloat16)

    in_specs = [pl.BlockSpec((tm, tk), lambda i, k: (i, k))
                for _ in range(num_views)]
    in_specs.append(pl.BlockSpec((num_views, tk, cout), lambda i, k: (0, k, 0)))
    inputs = list(a_views) + [b]
    if has_bn:
        in_specs += [pl.BlockSpec((1, tk), lambda i, k: (0, k))] * 2
        inputs += [scale.astype(jnp.float32), bias.astype(jnp.float32)]

    out = pl.pallas_call(
        _make_matmul_kernel(num_views, has_bn),
        out_shape=jax.ShapeDtypeStruct((mp, cout), out_dtype),
        grid=(mp // tm, n_k),
        in_specs=in_specs,
        out_specs=pl.BlockSpec((tm, cout), lambda i, k: (i, 0)),
        scratch_shapes=[pltpu.VMEM((tm, cout), jnp.float32)],
        compiler_params=pltpu.CompilerParams(
            dimension_semantics=("parallel", "arbitrary")),
    )(*inputs)
    return out[:M] if mp != M else out


# ----------------------------------------------------------------------------
# batch moments (tiled, sum / sum-sq accumulated across the row grid)
# ----------------------------------------------------------------------------

def _moments_kernel(x_ref, sum_ref, ssq_ref):
    @pl.when(pl.program_id(0) == 0)
    def _init():
        sum_ref[...] = jnp.zeros_like(sum_ref)
        ssq_ref[...] = jnp.zeros_like(ssq_ref)

    x = x_ref[...].astype(jnp.float32)
    sum_ref[...] += jnp.sum(x, axis=0, keepdims=True)
    ssq_ref[...] += jnp.sum(x * x, axis=0, keepdims=True)


def pallas_moments(x2d):
    """Per-channel batch mean / biased variance over the row axis."""
    M, C = x2d.shape
    tm = _pick_row_tile(M)
    mp = _round_up(M, tm)
    if mp != M:
        x2d = jnp.pad(x2d, ((0, mp - M), (0, 0)))   # zero rows don't change sums
    s, ss = pl.pallas_call(
        _moments_kernel,
        out_shape=(jax.ShapeDtypeStruct((1, C), jnp.float32),
                   jax.ShapeDtypeStruct((1, C), jnp.float32)),
        grid=(mp // tm,),
        in_specs=[pl.BlockSpec((tm, C), lambda i: (i, 0))],
        out_specs=(pl.BlockSpec((1, C), lambda i: (0, 0)),
                   pl.BlockSpec((1, C), lambda i: (0, 0))),
        compiler_params=pltpu.CompilerParams(dimension_semantics=("arbitrary",)),
    )(x2d)
    mean = s / M
    var = jnp.maximum(ss / M - mean * mean, 0.0)
    return mean, var


def bn_fold(gamma, beta, mean, var, eps=_EPS):
    """Fold batch stats + affine params into a per-channel (scale, bias) pair.

    gamma/beta may be shorter than mean/var (the unwritten tail of a dense-block
    buffer); those channels are zero and multiply zero weight rows, so their
    scale/bias values are irrelevant.
    """
    cv = mean.shape[1]
    c = gamma.shape[0]
    if c != cv:
        gamma = jnp.pad(gamma, (0, cv - c), constant_values=1.0)
        beta = jnp.pad(beta, (0, cv - c))
    scale = gamma.reshape(1, cv) / jnp.sqrt(var + eps)
    bias = beta.reshape(1, cv) - mean * scale
    return scale, bias


# ----------------------------------------------------------------------------
# standalone BN-apply + ReLU (only where it cannot be fused into a matmul)
# ----------------------------------------------------------------------------

def _bn_relu_kernel(x_ref, scale_ref, bias_ref, o_ref):
    x = x_ref[...].astype(jnp.float32)
    o_ref[...] = jnp.maximum(x * scale_ref[...] + bias_ref[...],
                             0.0).astype(o_ref.dtype)


def pallas_bn_relu(x2d, scale, bias):
    M, C = x2d.shape
    tm = _pick_row_tile(M)
    mp = _round_up(M, tm)
    if mp != M:
        x2d = jnp.pad(x2d, ((0, mp - M), (0, 0)))
    out = pl.pallas_call(
        _bn_relu_kernel,
        out_shape=jax.ShapeDtypeStruct((mp, C), jnp.bfloat16),
        grid=(mp // tm,),
        in_specs=[pl.BlockSpec((tm, C), lambda i: (i, 0)),
                  pl.BlockSpec((1, C), lambda i: (0, 0)),
                  pl.BlockSpec((1, C), lambda i: (0, 0))],
        out_specs=pl.BlockSpec((tm, C), lambda i: (i, 0)),
        compiler_params=pltpu.CompilerParams(dimension_semantics=("parallel",)),
    )(x2d, scale.astype(jnp.float32), bias.astype(jnp.float32))
    return out[:M] if mp != M else out


# ----------------------------------------------------------------------------
# window pooling: k*k shifted views -> elementwise max / mean, tiled over rows
# ----------------------------------------------------------------------------

def _make_pool_kernel(num_views, op):
    def kernel(*refs):
        views = refs[:num_views]
        o_ref = refs[num_views]
        if op == "max":
            r = views[0][...]
            for p in range(1, num_views):
                r = jnp.maximum(r, views[p][...])
            o_ref[...] = r.astype(o_ref.dtype)
        else:
            r = views[0][...].astype(jnp.float32)
            for p in range(1, num_views):
                r = r + views[p][...].astype(jnp.float32)
            o_ref[...] = (r * (1.0 / num_views)).astype(o_ref.dtype)
    return kernel


def pallas_pool(views2d, op):
    num_views = len(views2d)
    M, C = views2d[0].shape
    tm = _pick_row_tile(M)
    mp = _round_up(M, tm)
    if mp != M:
        views2d = [jnp.pad(v, ((0, mp - M), (0, 0))) for v in views2d]
    out = pl.pallas_call(
        _make_pool_kernel(num_views, op),
        out_shape=jax.ShapeDtypeStruct((mp, C), jnp.bfloat16),
        grid=(mp // tm,),
        in_specs=[pl.BlockSpec((tm, C), lambda i: (i, 0))] * num_views,
        out_specs=pl.BlockSpec((tm, C), lambda i: (i, 0)),
        compiler_params=pltpu.CompilerParams(dimension_semantics=("parallel",)),
    )(*views2d)
    return out[:M] if mp != M else out


# ----------------------------------------------------------------------------
# norm5 + ReLU + adaptive_avg_pool2d((1,1)) fused into one reduction kernel
# ----------------------------------------------------------------------------

def _global_pool_kernel(x_ref, scale_ref, bias_ref, o_ref, acc_ref, *, inv_hw):
    @pl.when(pl.program_id(0) == 0)
    def _init():
        acc_ref[...] = jnp.zeros_like(acc_ref)

    x = x_ref[...].astype(jnp.float32)                      # (N, thw, C)
    y = jnp.maximum(x * scale_ref[...] + bias_ref[...], 0.0)
    acc_ref[...] += jnp.sum(y, axis=1)

    @pl.when(pl.program_id(0) == pl.num_programs(0) - 1)
    def _finish():
        o_ref[...] = (acc_ref[...] * inv_hw).astype(o_ref.dtype)


def pallas_global_avgpool_bn_relu(x3d, scale, bias):
    """x3d: (N, HW, C) -> (N, C) = mean_HW relu(x*scale + bias)."""
    N, HW, C = x3d.shape
    thw = HW
    if HW > 512:
        for cand in (512, 256, 128, 64, 32, 16, 8):
            if HW % cand == 0:
                thw = cand
                break
    return pl.pallas_call(
        functools.partial(_global_pool_kernel, inv_hw=1.0 / HW),
        out_shape=jax.ShapeDtypeStruct((N, C), jnp.bfloat16),
        grid=(HW // thw,),
        in_specs=[pl.BlockSpec((N, thw, C), lambda s: (0, s, 0)),
                  pl.BlockSpec((1, 1, C), lambda s: (0, 0, 0)),
                  pl.BlockSpec((1, 1, C), lambda s: (0, 0, 0))],
        out_specs=pl.BlockSpec((N, C), lambda s: (0, 0)),
        scratch_shapes=[pltpu.VMEM((N, C), jnp.float32)],
        compiler_params=pltpu.CompilerParams(dimension_semantics=("arbitrary",)),
    )(x3d, scale.reshape(1, 1, C).astype(jnp.float32),
      bias.reshape(1, 1, C).astype(jnp.float32))


# ----------------------------------------------------------------------------
# JAX glue: shifted views, conv wrappers
# ----------------------------------------------------------------------------

def extract_patch_views(x_nhwc, kh, kw, stride, pad, pad_value=0.0):
    """Return kh*kw shifted/strided views (each flattened to (N*Ho*Wo, C))."""
    N, H, W, C = x_nhwc.shape
    if pad:
        x_nhwc = jnp.pad(x_nhwc, ((0, 0), (pad, pad), (pad, pad), (0, 0)),
                         constant_values=pad_value)
    Hp, Wp = H + 2 * pad, W + 2 * pad
    Ho = (Hp - kh) // stride + 1
    Wo = (Wp - kw) // stride + 1
    views = []
    for i in range(kh):
        for j in range(kw):
            v = lax.slice(x_nhwc, (0, i, j, 0),
                          (N, i + (Ho - 1) * stride + 1,
                           j + (Wo - 1) * stride + 1, C),
                          (1, stride, stride, 1))
            views.append(v.reshape(N * Ho * Wo, C))
    return views, (N, Ho, Wo, C)


def conv_1x1_fused(x2d, w_io, scale, bias):
    """BN+ReLU fused into a 1x1 conv: relu(x*scale+bias) @ W.  x2d: (M, K_arr),
    w_io: (Cin, Cout) with Cin <= K_arr (extra buffer channels hit zero rows)."""
    cin, cout = w_io.shape
    return fused_matmul([x2d], w_io.reshape(1, cin, cout), scale, bias)


def conv_3x3(x_nhwc, w_hwio):
    """3x3 / stride 1 / pad 1 conv via 9 shifted views + in-kernel accumulation.
    (No BN prologue: PyTorch zero-pads *after* ReLU, so fusion would be wrong.)"""
    kh, kw, cin, cout = w_hwio.shape
    views, _ = extract_patch_views(x_nhwc, kh, kw, 1, 1, 0.0)
    return fused_matmul(views, w_hwio.reshape(kh * kw, cin, cout))


# ----------------------------------------------------------------------------
# dense block / transition
# ----------------------------------------------------------------------------

def dense_block(x_spatial, x_mean, x_var, layer_params, growth):
    n, h, w, c0 = x_spatial.shape
    num_layers = len(layer_params)
    c_total = c0 + num_layers * growth
    m = n * h * w

    # Preallocated full-width feature buffer (replaces per-layer torch.cat):
    # each layer writes its growth_rate channel slice.
    buf = jnp.zeros((m, c_total), jnp.bfloat16)
    buf = lax.dynamic_update_slice(
        buf, x_spatial.reshape(m, c0).astype(jnp.bfloat16), (0, 0))
    # Per-channel batch statistics of the buffer.  A channel's statistics never
    # change once written, so each channel's moments are computed exactly once.
    mean_vec = jnp.zeros((1, c_total), jnp.float32)
    var_vec = jnp.zeros((1, c_total), jnp.float32)
    mean_vec = lax.dynamic_update_slice(mean_vec, x_mean, (0, 0))
    var_vec = lax.dynamic_update_slice(var_vec, x_var, (0, 0))

    for li, lp in enumerate(layer_params):
        cin = c0 + li * growth

        # norm1 + relu1 + conv1 (1x1), with BN+ReLU fused into the matmul.
        g1, b1 = lp["norm1"]
        scale1, bias1 = bn_fold(g1, b1, mean_vec, var_vec)
        w1 = lp["conv1"].reshape(cin, lp["conv1"].shape[3])
        y1 = conv_1x1_fused(buf, w1, scale1, bias1)

        # norm2 + relu2 (standalone: 3x3 conv's zero padding follows the ReLU)
        g2, b2 = lp["norm2"]
        m2, v2 = pallas_moments(y1)
        scale2, bias2 = bn_fold(g2, b2, m2, v2)
        y1 = pallas_bn_relu(y1, scale2, bias2)

        # conv2 (3x3, pad 1) via shifted views
        inter = y1.shape[1]
        y2 = conv_3x3(y1.reshape(n, h, w, inter), lp["conv2"])
        # TODO(synk): F.dropout (drop_rate > 0) not implemented (no-op at 0).

        buf = lax.dynamic_update_slice(buf, y2, (0, cin))
        m_new, v_new = pallas_moments(y2)
        mean_vec = lax.dynamic_update_slice(mean_vec, m_new, (0, cin))
        var_vec = lax.dynamic_update_slice(var_vec, v_new, (0, cin))

    return buf, mean_vec, var_vec, (n, h, w, c_total)


def transition(buf, mean_vec, var_vec, dims, tp):
    n, h, w, c = dims
    scale, bias = bn_fold(tp["norm"][0], tp["norm"][1], mean_vec, var_vec)
    wt = tp["conv"].reshape(c, c // 2)
    y = conv_1x1_fused(buf, wt, scale, bias)               # norm+relu+conv (1x1)
    y = y.reshape(n, h, w, c // 2)
    views, (n2, ho, wo, c2) = extract_patch_views(y, 2, 2, 2, 0, 0.0)
    y = pallas_pool(views, "mean")                         # AvgPool2d(2, 2)
    m2, v2 = pallas_moments(y)
    return y.reshape(n2, ho, wo, c2), m2, v2


# ----------------------------------------------------------------------------
# parameter init (deterministic, mirrors the module's __init__)
# ----------------------------------------------------------------------------

def _kaiming_normal(key, kh, kw, cin, cout):
    fan_in = kh * kw * cin
    std = (2.0 / fan_in) ** 0.5
    return jax.random.normal(key, (kh, kw, cin, cout), jnp.float32) * std


def init_densenet_params(key, growth_rate, block_config, num_init_features,
                         bn_size, num_classes):
    keys = iter(jax.random.split(key, 512))
    params = {}
    params["conv0"] = _kaiming_normal(next(keys), 7, 7, 3, num_init_features)
    params["norm0"] = (jnp.ones(num_init_features, jnp.float32),
                       jnp.zeros(num_init_features, jnp.float32))
    num_features = num_init_features
    blocks = []
    for bi, num_layers in enumerate(block_config):
        layers = []
        for li in range(num_layers):
            cin = num_features + li * growth_rate
            inter = bn_size * growth_rate
            layers.append({
                "norm1": (jnp.ones(cin, jnp.float32), jnp.zeros(cin, jnp.float32)),
                "conv1": _kaiming_normal(next(keys), 1, 1, cin, inter),
                "norm2": (jnp.ones(inter, jnp.float32), jnp.zeros(inter, jnp.float32)),
                "conv2": _kaiming_normal(next(keys), 3, 3, inter, growth_rate),
            })
        blocks.append(layers)
        num_features += num_layers * growth_rate
        if bi != len(block_config) - 1:
            params[f"transition{bi + 1}"] = {
                "norm": (jnp.ones(num_features, jnp.float32),
                         jnp.zeros(num_features, jnp.float32)),
                "conv": _kaiming_normal(next(keys), 1, 1, num_features,
                                        num_features // 2),
            }
            num_features //= 2
    params["blocks"] = blocks
    params["norm5"] = (jnp.ones(num_features, jnp.float32),
                       jnp.zeros(num_features, jnp.float32))
    bound = 1.0 / (num_features ** 0.5)  # PyTorch Linear default weight range
    params["classifier_w"] = jax.random.uniform(
        next(keys), (num_features, num_classes), jnp.float32, -bound, bound)
    params["classifier_b"] = jnp.zeros((1, num_classes), jnp.float32)
    return params, num_features


# ----------------------------------------------------------------------------
# forward pass
# ----------------------------------------------------------------------------

def densenet_forward(x_nchw, params, block_config, growth_rate):
    x = jnp.transpose(x_nchw.astype(jnp.float32), (0, 2, 3, 1))   # NCHW -> NHWC
    n = x.shape[0]

    # conv0 (7x7 / s2 / p3): single im2col matmul -- the 3-channel input image
    # is tiny, so its 49x patch blowup is negligible; the hot 3x3 dense-layer
    # convs below avoid HBM im2col entirely.
    w0 = params["conv0"]
    views, (n, ho, wo, _) = extract_patch_views(x, 7, 7, 2, 3, 0.0)
    cols = jnp.concatenate(views, axis=1)                          # (M, 147)
    y0 = fused_matmul([cols], w0.reshape(1, 7 * 7 * 3, w0.shape[3]))
    c0f = y0.shape[1]

    # norm0 + relu0 (batch statistics), then pool0 (MaxPool 3x3 / s2 / p1).
    m0, v0 = pallas_moments(y0)
    s0, b0 = bn_fold(params["norm0"][0], params["norm0"][1], m0, v0)
    y0 = pallas_bn_relu(y0, s0, b0)
    # post-ReLU values are >= 0, so zero padding is equivalent to -inf padding
    pviews, (n, hp, wp, _) = extract_patch_views(
        y0.reshape(n, ho, wo, c0f), 3, 3, 2, 1, 0.0)
    xb = pallas_pool(pviews, "max").reshape(n, hp, wp, c0f)
    xm, xv = pallas_moments(xb.reshape(-1, c0f))

    buf = mean_vec = var_vec = None
    dims = xb.shape
    for bi, _ in enumerate(block_config):
        buf, mean_vec, var_vec, dims = dense_block(
            xb, xm, xv, params["blocks"][bi], growth_rate)
        if bi != len(block_config) - 1:
            xb, xm, xv = transition(buf, mean_vec, var_vec, dims,
                                    params[f"transition{bi + 1}"])

    # norm5 + F.relu + adaptive_avg_pool2d((1,1)) fused into one kernel.
    n, h, w, c = dims
    s5, b5 = bn_fold(params["norm5"][0], params["norm5"][1], mean_vec, var_vec)
    pooled = pallas_global_avgpool_bn_relu(buf.reshape(n, h * w, c), s5, b5)

    # classifier (no row padding; zero-initialized bias added outside the kernel)
    wc = params["classifier_w"]
    logits = fused_matmul([pooled], wc.reshape(1, wc.shape[0], wc.shape[1]),
                          out_dtype=jnp.float32)
    return logits + params["classifier_b"]


# ----------------------------------------------------------------------------
# demo
# ----------------------------------------------------------------------------

if __name__ == "__main__":
    # Small DenseNet configuration (same architecture family, scaled down).
    growth_rate = 8
    block_config = (2, 2)
    num_init_features = 16
    bn_size = 2
    num_classes = 10

    key = jax.random.PRNGKey(0)
    k_params, k_input = jax.random.split(key)

    params, _ = init_densenet_params(
        k_params, growth_rate, block_config, num_init_features, bn_size,
        num_classes)

    x = jax.random.normal(k_input, (2, 3, 32, 32), jnp.float32)  # NCHW input

    fwd = jax.jit(functools.partial(densenet_forward, params=params,
                                    block_config=block_config,
                                    growth_rate=growth_rate))
    logits = fwd(x)
    jax.block_until_ready(logits)

    assert logits.shape == (2, num_classes)
    assert bool(jnp.all(jnp.isfinite(logits)))
    print("KERNEL_OK")
</pallas_src>

<mosaic_0001>
module attributes {stable_mosaic.version = 11 : i64} {
  func.func @kernel(%arg0: i32, %arg1: i32, %arg2: memref<512x147xbf16, #tpu.memory_space<vmem>>, %arg3: memref<1x147x16xbf16, #tpu.memory_space<vmem>>, %arg4: memref<512x16xbf16, #tpu.memory_space<vmem>>, %arg5: memref<512x16xf32, #tpu.memory_space<vmem>>) attributes {dimension_semantics = [#tpu.dimension_semantics<parallel>, #tpu.dimension_semantics<arbitrary>], iteration_bounds = array<i64: 1, 1>, scalar_prefetch = 0 : i64, scratch_operands = 1 : i64, tpu.core_type = #tpu.core_type<tc>, window_params = [{transform_indices = @transform_0, window_bounds = array<i64: 512, 147>}, {transform_indices = @transform_1, window_bounds = array<i64: 1, 147, 16>}, {transform_indices = @transform_2, window_bounds = array<i64: 512, 16>}]} {
    %c0_i32 = arith.constant 0 : i32
    %0 = arith.cmpi eq, %arg1, %c0_i32 : i32
    %1 = arith.extui %0 : i1 to i32
    %c0_i32_0 = arith.constant 0 : i32
    %2 = arith.cmpi ne, %1, %c0_i32_0 : i32
    scf.if %2 {
      %cst_11 = arith.constant 0.000000e+00 : f32
      %13 = vector.broadcast %cst_11 : f32 to vector<512x16xf32>
      %c0_12 = arith.constant 0 : index
      %c0_13 = arith.constant 0 : index
      %14 = vector.load %arg5[%c0_12, %c0_13] : memref<512x16xf32, #tpu.memory_space<vmem>>, vector<512x16xf32>
      tpu.vector_store %arg5[%c0_12, %c0_13], %13 {strides = array<i32>} : memref<512x16xf32, #tpu.memory_space<vmem>>, vector<512x16xf32>,
    } else {
    }
    %c0 = arith.constant 0 : index
    %c0_1 = arith.constant 0 : index
    %3 = vector.load %arg2[%c0, %c0_1] : memref<512x147xbf16, #tpu.memory_space<vmem>>, vector<512x147xbf16>
    %c0_2 = arith.constant 0 : index
    %c0_3 = arith.constant 0 : index
    %4 = vector.load %arg5[%c0_2, %c0_3] : memref<512x16xf32, #tpu.memory_space<vmem>>, vector<512x16xf32>
    %c0_4 = arith.constant 0 : index
    %c0_5 = arith.constant 0 : index
    %c0_6 = arith.constant 0 : index
    %5 = vector.load %arg3[%c0_4, %c0_5, %c0_6] : memref<1x147x16xbf16, #tpu.memory_space<vmem>>, vector<1x147x16xbf16>
    %6 = vector.shape_cast %5 : vector<1x147x16xbf16> to vector<147x16xbf16>
    %cst = arith.constant dense<0.000000e+00> : vector<512x16xf32>
    %7 = tpu.matmul %3, %6, %cst {dimension_numbers = #tpu.dot_dimension_numbers<[1], [0], [0], [1], [0, 0, 1, 1], [], []>} : vector<512x147xbf16>, vector<147x16xbf16>, vector<512x16xf32> -> vector<512x16xf32>
    %8 = arith.addf %4, %7 : vector<512x16xf32>
    %c0_7 = arith.constant 0 : index
    %c0_8 = arith.constant 0 : index
    %9 = vector.load %arg5[%c0_7, %c0_8] : memref<512x16xf32, #tpu.memory_space<vmem>>, vector<512x16xf32>
    tpu.vector_store %arg5[%c0_7, %c0_8], %8 {strides = array<i32>} : memref<512x16xf32, #tpu.memory_space<vmem>>, vector<512x16xf32>,
    %c0_i32_9 = arith.constant 0 : i32
    %10 = arith.cmpi eq, %arg1, %c0_i32_9 : i32
    %11 = arith.extui %10 : i1 to i32
    %c0_i32_10 = arith.constant 0 : i32
    %12 = arith.cmpi ne, %11, %c0_i32_10 : i32
    scf.if %12 {
      %c0_11 = arith.constant 0 : index
      %c0_12 = arith.constant 0 : index
      %13 = vector.load %arg5[%c0_11, %c0_12] : memref<512x16xf32, #tpu.memory_space<vmem>>, vector<512x16xf32>
      %14 = arith.truncf %13 : vector<512x16xf32> to vector<512x16xbf16>
      %c0_13 = arith.constant 0 : index
      %c0_14 = arith.constant 0 : index
      %15 = vector.load %arg4[%c0_13, %c0_14] : memref<512x16xbf16, #tpu.memory_space<vmem>>, vector<512x16xbf16>
      tpu.vector_store %arg4[%c0_13, %c0_14], %14 {strides = array<i32>} : memref<512x16xbf16, #tpu.memory_space<vmem>>, vector<512x16xbf16>,
    } else {
    }
    return
  }
  func.func @transform_0(%arg0: i32, %arg1: i32) -> (i32, i32) {
    %c0_i32 = arith.constant 0 : i32
    return %arg0, %arg1 : i32, i32
  }
  func.func @transform_1(%arg0: i32, %arg1: i32) -> (i32, i32, i32) {
    %c0_i32 = arith.constant 0 : i32
    %c0_i32_0 = arith.constant 0 : i32
    %c0_i32_1 = arith.constant 0 : i32
    return %c0_i32, %arg1, %c0_i32_0 : i32, i32, i32
  }
  func.func @transform_2(%arg0: i32, %arg1: i32) -> (i32, i32) {
    %c0_i32 = arith.constant 0 : i32
    %c0_i32_0 = arith.constant 0 : i32
    return %arg0, %c0_i32 : i32, i32
  }
}

module attributes {stable_mosaic.version = 11 : i64} {
  func.func @_moments_kernel(%arg0: i32, %arg1: memref<512x16xbf16, #tpu.memory_space<vmem>>, %arg2: memref<1x16xf32, #tpu.memory_space<vmem>>, %arg3: memref<1x16xf32, #tpu.memory_space<vmem>>) attributes {dimension_semantics = [#tpu.dimension_semantics<arbitrary>], iteration_bounds = array<i64: 1>, scalar_prefetch = 0 : i64, scratch_operands = 0 : i64, tpu.core_type = #tpu.core_type<tc>, window_params = [{transform_indices = @transform_0, window_bounds = array<i64: 512, 16>}, {pipeline_mode = #tpu.pipeline_mode<synchronous>, transform_indices = @transform_1, window_bounds = array<i64: 1, 16>}, {pipeline_mode = #tpu.pipeline_mode<synchronous>, transform_indices = @transform_2, window_bounds = array<i64: 1, 16>}]} {
    %c0_i32 = arith.constant 0 : i32
    %0 = arith.cmpi eq, %arg0, %c0_i32 : i32
    %1 = arith.extui %0 : i1 to i32
    %c0_i32_0 = arith.constant 0 : i32
    %2 = arith.cmpi ne, %1, %c0_i32_0 : i32
    scf.if %2 {
      %cst_11 = arith.constant 0.000000e+00 : f32
      %16 = vector.broadcast %cst_11 : f32 to vector<1x16xf32>
      %c0_12 = arith.constant 0 : index
      %c0_13 = arith.constant 0 : index
      %17 = vector.load %arg2[%c0_12, %c0_13] : memref<1x16xf32, #tpu.memory_space<vmem>>, vector<1x16xf32>
      tpu.vector_store %arg2[%c0_12, %c0_13], %16 {strides = array<i32>} : memref<1x16xf32, #tpu.memory_space<vmem>>, vector<1x16xf32>,
      %cst_14 = arith.constant 0.000000e+00 : f32
      %18 = vector.broadcast %cst_14 : f32 to vector<1x16xf32>
      %c0_15 = arith.constant 0 : index
      %c0_16 = arith.constant 0 : index
      %19 = vector.load %arg3[%c0_15, %c0_16] : memref<1x16xf32, #tpu.memory_space<vmem>>, vector<1x16xf32>
      tpu.vector_store %arg3[%c0_15, %c0_16], %18 {strides = array<i32>} : memref<1x16xf32, #tpu.memory_space<vmem>>, vector<1x16xf32>,
    } else {
    }
    %c0 = arith.constant 0 : index
    %c0_1 = arith.constant 0 : index
    %3 = vector.load %arg1[%c0, %c0_1] : memref<512x16xbf16, #tpu.memory_space<vmem>>, vector<512x16xbf16>
    %4 = arith.extf %3 : vector<512x16xbf16> to vector<512x16xf32>
    %c0_2 = arith.constant 0 : index
    %c0_3 = arith.constant 0 : index
    %5 = vector.load %arg2[%c0_2, %c0_3] : memref<1x16xf32, #tpu.memory_space<vmem>>, vector<1x16xf32>
    %cst = arith.constant dense<0.000000e+00> : vector<16xf32>
    %6 = vector.multi_reduction <add>, %4, %cst [0] : vector<512x16xf32> to vector<16xf32>
    %7 = vector.shape_cast %6 : vector<16xf32> to vector<1x16xf32>
    %8 = arith.addf %5, %7 : vector<1x16xf32>
    %c0_4 = arith.constant 0 : index
    %c0_5 = arith.constant 0 : index
    %9 = vector.load %arg2[%c0_4, %c0_5] : memref<1x16xf32, #tpu.memory_space<vmem>>, vector<1x16xf32>
    tpu.vector_store %arg2[%c0_4, %c0_5], %8 {strides = array<i32>} : memref<1x16xf32, #tpu.memory_space<vmem>>, vector<1x16xf32>,
    %c0_6 = arith.constant 0 : index
    %c0_7 = arith.constant 0 : index
    %10 = vector.load %arg3[%c0_6, %c0_7] : memref<1x16xf32, #tpu.memory_space<vmem>>, vector<1x16xf32>
    %11 = arith.mulf %4, %4 : vector<512x16xf32>
    %cst_8 = arith.constant dense<0.000000e+00> : vector<16xf32>
    %12 = vector.multi_reduction <add>, %11, %cst_8 [0] : vector<512x16xf32> to vector<16xf32>
    %13 = vector.shape_cast %12 : vector<16xf32> to vector<1x16xf32>
    %14 = arith.addf %10, %13 : vector<1x16xf32>
    %c0_9 = arith.constant 0 : index
    %c0_10 = arith.constant 0 : index
    %15 = vector.load %arg3[%c0_9, %c0_10] : memref<1x16xf32, #tpu.memory_space<vmem>>, vector<1x16xf32>
    tpu.vector_store %arg3[%c0_9, %c0_10], %14 {strides = array<i32>} : memref<1x16xf32, #tpu.memory_space<vmem>>, vector<1x16xf32>,
    return
  }
  func.func @transform_0(%arg0: i32) -> (i32, i32) {
    %c0_i32 = arith.constant 0 : i32
    %c0_i32_0 = arith.constant 0 : i32
    return %arg0, %c0_i32 : i32, i32
  }
  func.func @transform_1(%arg0: i32) -> (i32, i32) {
    %c0_i32 = arith.constant 0 : i32
    %c0_i32_0 = arith.constant 0 : i32
    %c0_i32_1 = arith.constant 0 : i32
    return %c0_i32, %c0_i32_0 : i32, i32
  }
  func.func @transform_2(%arg0: i32) -> (i32, i32) {
    %c0_i32 = arith.constant 0 : i32
    %c0_i32_0 = arith.constant 0 : i32
    %c0_i32_1 = arith.constant 0 : i32
    return %c0_i32, %c0_i32_0 : i32, i32
  }
}

module attributes {stable_mosaic.version = 11 : i64} {
  func.func @_bn_relu_kernel(%arg0: i32, %arg1: memref<512x16xbf16, #tpu.memory_space<vmem>>, %arg2: memref<1x16xf32, #tpu.memory_space<vmem>>, %arg3: memref<1x16xf32, #tpu.memory_space<vmem>>, %arg4: memref<512x16xbf16, #tpu.memory_space<vmem>>) attributes {dimension_semantics = [#tpu.dimension_semantics<parallel>], iteration_bounds = array<i64: 1>, scalar_prefetch = 0 : i64, scratch_operands = 0 : i64, tpu.core_type = #tpu.core_type<tc>, window_params = [{transform_indices = @transform_0, window_bounds = array<i64: 512, 16>}, {pipeline_mode = #tpu.pipeline_mode<synchronous>, transform_indices = @transform_1, window_bounds = array<i64: 1, 16>}, {pipeline_mode = #tpu.pipeline_mode<synchronous>, transform_indices = @transform_2, window_bounds = array<i64: 1, 16>}, {transform_indices = @transform_3, window_bounds = array<i64: 512, 16>}]} {
    %c0 = arith.constant 0 : index
    %c0_0 = arith.constant 0 : index
    %0 = vector.load %arg1[%c0, %c0_0] : memref<512x16xbf16, #tpu.memory_space<vmem>>, vector<512x16xbf16>
    %1 = arith.extf %0 : vector<512x16xbf16> to vector<512x16xf32>
    %c0_1 = arith.constant 0 : index
    %c0_2 = arith.constant 0 : index
    %2 = vector.load %arg2[%c0_1, %c0_2] : memref<1x16xf32, #tpu.memory_space<vmem>>, vector<1x16xf32>
    %3 = vector.broadcast %2 : vector<1x16xf32> to vector<512x16xf32>
    %4 = arith.mulf %1, %3 : vector<512x16xf32>
    %c0_3 = arith.constant 0 : index
    %c0_4 = arith.constant 0 : index
    %5 = vector.load %arg3[%c0_3, %c0_4] : memref<1x16xf32, #tpu.memory_space<vmem>>, vector<1x16xf32>
    %6 = vector.broadcast %5 : vector<1x16xf32> to vector<512x16xf32>
    %7 = arith.addf %4, %6 : vector<512x16xf32>
    %cst = arith.constant 0.000000e+00 : f32
    %8 = vector.broadcast %cst : f32 to vector<512x16xf32>
    %9 = arith.maximumf %7, %8 : vector<512x16xf32>
    %10 = arith.truncf %9 : vector<512x16xf32> to vector<512x16xbf16>
    %c0_5 = arith.constant 0 : index
    %c0_6 = arith.constant 0 : index
    %11 = vector.load %arg4[%c0_5, %c0_6] : memref<512x16xbf16, #tpu.memory_space<vmem>>, vector<512x16xbf16>
    tpu.vector_store %arg4[%c0_5, %c0_6], %10 {strides = array<i32>} : memref<512x16xbf16, #tpu.memory_space<vmem>>, vector<512x16xbf16>,
    return
  }
  func.func @transform_0(%arg0: i32) -> (i32, i32) {
    %c0_i32 = arith.constant 0 : i32
    %c0_i32_0 = arith.constant 0 : i32
    return %arg0, %c0_i32 : i32, i32
  }
  func.func @transform_1(%arg0: i32) -> (i32, i32) {
    %c0_i32 = arith.constant 0 : i32
    %c0_i32_0 = arith.constant 0 : i32
    %c0_i32_1 = arith.constant 0 : i32
    return %c0_i32, %c0_i32_0 : i32, i32
  }
  func.func @transform_2(%arg0: i32) -> (i32, i32) {
    %c0_i32 = arith.constant 0 : i32
    %c0_i32_0 = arith.constant 0 : i32
    %c0_i32_1 = arith.constant 0 : i32
    return %c0_i32, %c0_i32_0 : i32, i32
  }
  func.func @transform_3(%arg0: i32) -> (i32, i32) {
    %c0_i32 = arith.constant 0 : i32
    %c0_i32_0 = arith.constant 0 : i32
    return %arg0, %c0_i32 : i32, i32
  }
}

module attributes {stable_mosaic.version = 11 : i64} {
  func.func @_moments_kernel(%arg0: i32, %arg1: memref<128x16xbf16, #tpu.memory_space<vmem>>, %arg2: memref<1x16xf32, #tpu.memory_space<vmem>>, %arg3: memref<1x16xf32, #tpu.memory_space<vmem>>) attributes {dimension_semantics = [#tpu.dimension_semantics<arbitrary>], iteration_bounds = array<i64: 1>, scalar_prefetch = 0 : i64, scratch_operands = 0 : i64, tpu.core_type = #tpu.core_type<tc>, window_params = [{transform_indices = @transform_0, window_bounds = array<i64: 128, 16>}, {pipeline_mode = #tpu.pipeline_mode<synchronous>, transform_indices = @transform_1, window_bounds = array<i64: 1, 16>}, {pipeline_mode = #tpu.pipeline_mode<synchronous>, transform_indices = @transform_2, window_bounds = array<i64: 1, 16>}]} {
    %c0_i32 = arith.constant 0 : i32
    %0 = arith.cmpi eq, %arg0, %c0_i32 : i32
    %1 = arith.extui %0 : i1 to i32
    %c0_i32_0 = arith.constant 0 : i32
    %2 = arith.cmpi ne, %1, %c0_i32_0 : i32
    scf.if %2 {
      %cst_11 = arith.constant 0.000000e+00 : f32
      %16 = vector.broadcast %cst_11 : f32 to vector<1x16xf32>
      %c0_12 = arith.constant 0 : index
      %c0_13 = arith.constant 0 : index
      %17 = vector.load %arg2[%c0_12, %c0_13] : memref<1x16xf32, #tpu.memory_space<vmem>>, vector<1x16xf32>
      tpu.vector_store %arg2[%c0_12, %c0_13], %16 {strides = array<i32>} : memref<1x16xf32, #tpu.memory_space<vmem>>, vector<1x16xf32>,
      %cst_14 = arith.constant 0.000000e+00 : f32
      %18 = vector.broadcast %cst_14 : f32 to vector<1x16xf32>
      %c0_15 = arith.constant 0 : index
      %c0_16 = arith.constant 0 : index
      %19 = vector.load %arg3[%c0_15, %c0_16] : memref<1x16xf32, #tpu.memory_space<vmem>>, vector<1x16xf32>
      tpu.vector_store %arg3[%c0_15, %c0_16], %18 {strides = array<i32>} : memref<1x16xf32, #tpu.memory_space<vmem>>, vector<1x16xf32>,
    } else {
    }
    %c0 = arith.constant 0 : index
    %c0_1 = arith.constant 0 : index
    %3 = vector.load %arg1[%c0, %c0_1] : memref<128x16xbf16, #tpu.memory_space<vmem>>, vector<128x16xbf16>
    %4 = arith.extf %3 : vector<128x16xbf16> to vector<128x16xf32>
    %c0_2 = arith.constant 0 : index
    %c0_3 = arith.constant 0 : index
    %5 = vector.load %arg2[%c0_2, %c0_3] : memref<1x16xf32, #tpu.memory_space<vmem>>, vector<1x16xf32>
    %cst = arith.constant dense<0.000000e+00> : vector<16xf32>
    %6 = vector.multi_reduction <add>, %4, %cst [0] : vector<128x16xf32> to vector<16xf32>
    %7 = vector.shape_cast %6 : vector<16xf32> to vector<1x16xf32>
    %8 = arith.addf %5, %7 : vector<1x16xf32>
    %c0_4 = arith.constant 0 : index
    %c0_5 = arith.constant 0 : index
    %9 = vector.load %arg2[%c0_4, %c0_5] : memref<1x16xf32, #tpu.memory_space<vmem>>, vector<1x16xf32>
    tpu.vector_store %arg2[%c0_4, %c0_5], %8 {strides = array<i32>} : memref<1x16xf32, #tpu.memory_space<vmem>>, vector<1x16xf32>,
    %c0_6 = arith.constant 0 : index
    %c0_7 = arith.constant 0 : index
    %10 = vector.load %arg3[%c0_6, %c0_7] : memref<1x16xf32, #tpu.memory_space<vmem>>, vector<1x16xf32>
    %11 = arith.mulf %4, %4 : vector<128x16xf32>
    %cst_8 = arith.constant dense<0.000000e+00> : vector<16xf32>
    %12 = vector.multi_reduction <add>, %11, %cst_8 [0] : vector<128x16xf32> to vector<16xf32>
    %13 = vector.shape_cast %12 : vector<16xf32> to vector<1x16xf32>
    %14 = arith.addf %10, %13 : vector<1x16xf32>
    %c0_9 = arith.constant 0 : index
    %c0_10 = arith.constant 0 : index
    %15 = vector.load %arg3[%c0_9, %c0_10] : memref<1x16xf32, #tpu.memory_space<vmem>>, vector<1x16xf32>
    tpu.vector_store %arg3[%c0_9, %c0_10], %14 {strides = array<i32>} : memref<1x16xf32, #tpu.memory_space<vmem>>, vector<1x16xf32>,
    return
  }
  func.func @transform_0(%arg0: i32) -> (i32, i32) {
    %c0_i32 = arith.constant 0 : i32
    %c0_i32_0 = arith.constant 0 : i32
    return %arg0, %c0_i32 : i32, i32
  }
  func.func @transform_1(%arg0: i32) -> (i32, i32) {
    %c0_i32 = arith.constant 0 : i32
    %c0_i32_0 = arith.constant 0 : i32
    %c0_i32_1 = arith.constant 0 : i32
    return %c0_i32, %c0_i32_0 : i32, i32
  }
  func.func @transform_2(%arg0: i32) -> (i32, i32) {
    %c0_i32 = arith.constant 0 : i32
    %c0_i32_0 = arith.constant 0 : i32
    %c0_i32_1 = arith.constant 0 : i32
    return %c0_i32, %c0_i32_0 : i32, i32
  }
}

module attributes {stable_mosaic.version = 11 : i64} {
  func.func @kernel(%arg0: i32, %arg1: memref<128x16xbf16, #tpu.memory_space<vmem>>, %arg2: memref<128x16xbf16, #tpu.memory_space<vmem>>, %arg3: memref<128x16xbf16, #tpu.memory_space<vmem>>, %arg4: memref<128x16xbf16, #tpu.memory_space<vmem>>, %arg5: memref<128x16xbf16, #tpu.memory_space<vmem>>, %arg6: memref<128x16xbf16, #tpu.memory_space<vmem>>, %arg7: memref<128x16xbf16, #tpu.memory_space<vmem>>, %arg8: memref<128x16xbf16, #tpu.memory_space<vmem>>, %arg9: memref<128x16xbf16, #tpu.memory_space<vmem>>, %arg10: memref<128x16xbf16, #tpu.memory_space<vmem>>) attributes {dimension_semantics = [#tpu.dimension_semantics<parallel>], iteration_bounds = array<i64: 1>, scalar_prefetch = 0 : i64, scratch_operands = 0 : i64, tpu.core_type = #tpu.core_type<tc>, window_params = [{transform_indices = @transform_0, window_bounds = array<i64: 128, 16>}, {transform_indices = @transform_1, window_bounds = array<i64: 128, 16>}, {transform_indices = @transform_2, window_bounds = array<i64: 128, 16>}, {transform_indices = @transform_3, window_bounds = array<i64: 128, 16>}, {transform_indices = @transform_4, window_bounds = array<i64: 128, 16>}, {transform_indices = @transform_5, window_bounds = array<i64: 128, 16>}, {transform_indices = @transform_6, window_bounds = array<i64: 128, 16>}, {transform_indices = @transform_7, window_bounds = array<i64: 128, 16>}, {transform_indices = @transform_8, window_bounds = array<i64: 128, 16>}, {transform_indices = @transform_9, window_bounds = array<i64: 128, 16>}]} {
    %c0 = arith.constant 0 : index
    %c0_0 = arith.constant 0 : index
    %0 = vector.load %arg1[%c0, %c0_0] : memref<128x16xbf16, #tpu.memory_space<vmem>>, vector<128x16xbf16>
    %c0_1 = arith.constant 0 : index
    %c0_2 = arith.constant 0 : index
    %1 = vector.load %arg2[%c0_1, %c0_2] : memref<128x16xbf16, #tpu.memory_space<vmem>>, vector<128x16xbf16>
    %2 = arith.maximumf %0, %1 : vector<128x16xbf16>
    %c0_3 = arith.constant 0 : index
    %c0_4 = arith.constant 0 : index
    %3 = vector.load %arg3[%c0_3, %c0_4] : memref<128x16xbf16, #tpu.memory_space<vmem>>, vector<128x16xbf16>
    %4 = arith.maximumf %2, %3 : vector<128x16xbf16>
    %c0_5 = arith.constant 0 : index
    %c0_6 = arith.constant 0 : index
    %5 = vector.load %arg4[%c0_5, %c0_6] : memref<128x16xbf16, #tpu.memory_space<vmem>>, vector<128x16xbf16>
    %6 = arith.maximumf %4, %5 : vector<128x16xbf16>
    %c0_7 = arith.constant 0 : index
    %c0_8 = arith.constant 0 : index
    %7 = vector.load %arg5[%c0_7, %c0_8] : memref<128x16xbf16, #tpu.memory_space<vmem>>, vector<128x16xbf16>
    %8 = arith.maximumf %6, %7 : vector<128x16xbf16>
    %c0_9 = arith.constant 0 : index
    %c0_10 = arith.constant 0 : index
    %9 = vector.load %arg6[%c0_9, %c0_10] : memref<128x16xbf16, #tpu.memory_space<vmem>>, vector<128x16xbf16>
    %10 = arith.maximumf %8, %9 : vector<128x16xbf16>
    %c0_11 = arith.constant 0 : index
    %c0_12 = arith.constant 0 : index
    %11 = vector.load %arg7[%c0_11, %c0_12] : memref<128x16xbf16, #tpu.memory_space<vmem>>, vector<128x16xbf16>
    %12 = arith.maximumf %10, %11 : vector<128x16xbf16>
    %c0_13 = arith.constant 0 : index
    %c0_14 = arith.constant 0 : index
    %13 = vector.load %arg8[%c0_13, %c0_14] : memref<128x16xbf16, #tpu.memory_space<vmem>>, vector<128x16xbf16>
    %14 = arith.maximumf %12, %13 : vector<128x16xbf16>
    %c0_15 = arith.constant 0 : index
    %c0_16 = arith.constant 0 : index
    %15 = vector.load %arg9[%c0_15, %c0_16] : memref<128x16xbf16, #tpu.memory_space<vmem>>, vector<128x16xbf16>
    %16 = arith.maximumf %14, %15 : vector<128x16xbf16>
    %c0_17 = arith.constant 0 : index
    %c0_18 = arith.constant 0 : index
    %17 = vector.load %arg10[%c0_17, %c0_18] : memref<128x16xbf16, #tpu.memory_space<vmem>>, vector<128x16xbf16>
    tpu.vector_store %arg10[%c0_17, %c0_18], %16 {strides = array<i32>} : memref<128x16xbf16, #tpu.memory_space<vmem>>, vector<128x16xbf16>,
    return
  }
  func.func @transform_0(%arg0: i32) -> (i32, i32) {
    %c0_i32 = arith.constant 0 : i32
    %c0_i32_0 = arith.constant 0 : i32
    return %arg0, %c0_i32 : i32, i32
  }
  func.func @transform_1(%arg0: i32) -> (i32, i32) {
    %c0_i32 = arith.constant 0 : i32
    %c0_i32_0 = arith.constant 0 : i32
    return %arg0, %c0_i32 : i32, i32
  }
  func.func @transform_2(%arg0: i32) -> (i32, i32) {
    %c0_i32 = arith.constant 0 : i32
    %c0_i32_0 = arith.constant 0 : i32
    return %arg0, %c0_i32 : i32, i32
  }
  func.func @transform_3(%arg0: i32) -> (i32, i32) {
    %c0_i32 = arith.constant 0 : i32
    %c0_i32_0 = arith.constant 0 : i32
    return %arg0, %c0_i32 : i32, i32
  }
  func.func @transform_4(%arg0: i32) -> (i32, i32) {
    %c0_i32 = arith.constant 0 : i32
    %c0_i32_0 = arith.constant 0 : i32
    return %arg0, %c0_i32 : i32, i32
  }
  func.func @transform_5(%arg0: i32) -> (i32, i32) {
    %c0_i32 = arith.constant 0 : i32
    %c0_i32_0 = arith.constant 0 : i32
    return %arg0, %c0_i32 : i32, i32
  }
  func.func @transform_6(%arg0: i32) -> (i32, i32) {
    %c0_i32 = arith.constant 0 : i32
    %c0_i32_0 = arith.constant 0 : i32
    return %arg0, %c0_i32 : i32, i32
  }
  func.func @transform_7(%arg0: i32) -> (i32, i32) {
    %c0_i32 = arith.constant 0 : i32
    %c0_i32_0 = arith.constant 0 : i32
    return %arg0, %c0_i32 : i32, i32
  }
  func.func @transform_8(%arg0: i32) -> (i32, i32) {
    %c0_i32 = arith.constant 0 : i32
    %c0_i32_0 = arith.constant 0 : i32
    return %arg0, %c0_i32 : i32, i32
  }
  func.func @transform_9(%arg0: i32) -> (i32, i32) {
    %c0_i32 = arith.constant 0 : i32
    %c0_i32_0 = arith.constant 0 : i32
    return %arg0, %c0_i32 : i32, i32
  }
}

module attributes {stable_mosaic.version = 11 : i64} {
  func.func @kernel(%arg0: i32, %arg1: i32, %arg2: memref<128x32xbf16, #tpu.memory_space<vmem>>, %arg3: memref<1x32x16xbf16, #tpu.memory_space<vmem>>, %arg4: memref<1x32xf32, #tpu.memory_space<vmem>>, %arg5: memref<1x32xf32, #tpu.memory_space<vmem>>, %arg6: memref<128x16xbf16, #tpu.memory_space<vmem>>, %arg7: memref<128x16xf32, #tpu.memory_space<vmem>>) attributes {dimension_semantics = [#tpu.dimension_semantics<parallel>, #tpu.dimension_semantics<arbitrary>], iteration_bounds = array<i64: 1, 1>, scalar_prefetch = 0 : i64, scratch_operands = 1 : i64, tpu.core_type = #tpu.core_type<tc>, window_params = [{transform_indices = @transform_0, window_bounds = array<i64: 128, 32>}, {transform_indices = @transform_1, window_bounds = array<i64: 1, 32, 16>}, {transform_indices = @transform_2, window_bounds = array<i64: 1, 32>}, {transform_indices = @transform_3, window_bounds = array<i64: 1, 32>}, {transform_indices = @transform_4, window_bounds = array<i64: 128, 16>}]} {
    %c0_i32 = arith.constant 0 : i32
    %0 = arith.cmpi eq, %arg1, %c0_i32 : i32
    %1 = arith.extui %0 : i1 to i32
    %c0_i32_0 = arith.constant 0 : i32
    %2 = arith.cmpi ne, %1, %c0_i32_0 : i32
    scf.if %2 {
      %cst_16 = arith.constant 0.000000e+00 : f32
      %23 = vector.broadcast %cst_16 : f32 to vector<128x16xf32>
      %c0_17 = arith.constant 0 : index
      %c0_18 = arith.constant 0 : index
      %24 = vector.load %arg7[%c0_17, %c0_18] : memref<128x16xf32, #tpu.memory_space<vmem>>, vector<128x16xf32>
      tpu.vector_store %arg7[%c0_17, %c0_18], %23 {strides = array<i32>} : memref<128x16xf32, #tpu.memory_space<vmem>>, vector<128x16xf32>,
    } else {
    }
    %c0 = arith.constant 0 : index
    %c0_1 = arith.constant 0 : index
    %3 = vector.load %arg2[%c0, %c0_1] : memref<128x32xbf16, #tpu.memory_space<vmem>>, vector<128x32xbf16>
    %4 = arith.extf %3 : vector<128x32xbf16> to vector<128x32xf32>
    %c0_2 = arith.constant 0 : index
    %c0_3 = arith.constant 0 : index
    %5 = vector.load %arg4[%c0_2, %c0_3] : memref<1x32xf32, #tpu.memory_space<vmem>>, vector<1x32xf32>
    %6 = vector.broadcast %5 : vector<1x32xf32> to vector<128x32xf32>
    %7 = arith.mulf %4, %6 : vector<128x32xf32>
    %c0_4 = arith.constant 0 : index
    %c0_5 = arith.constant 0 : index
    %8 = vector.load %arg5[%c0_4, %c0_5] : memref<1x32xf32, #tpu.memory_space<vmem>>, vector<1x32xf32>
    %9 = vector.broadcast %8 : vector<1x32xf32> to vector<128x32xf32>
    %10 = arith.addf %7, %9 : vector<128x32xf32>
    %cst = arith.constant 0.000000e+00 : f32
    %11 = vector.broadcast %cst : f32 to vector<128x32xf32>
    %12 = arith.maximumf %10, %11 : vector<128x32xf32>
    %13 = arith.truncf %12 : vector<128x32xf32> to vector<128x32xbf16>
    %c0_6 = arith.constant 0 : index
    %c0_7 = arith.constant 0 : index
    %14 = vector.load %arg7[%c0_6, %c0_7] : memref<128x16xf32, #tpu.memory_space<vmem>>, vector<128x16xf32>
    %c0_8 = arith.constant 0 : index
    %c0_9 = arith.constant 0 : index
    %c0_10 = arith.constant 0 : index
    %15 = vector.load %arg3[%c0_8, %c0_9, %c0_10] : memref<1x32x16xbf16, #tpu.memory_space<vmem>>, vector<1x32x16xbf16>
    %16 = vector.shape_cast %15 : vector<1x32x16xbf16> to vector<32x16xbf16>
    %cst_11 = arith.constant dense<0.000000e+00> : vector<128x16xf32>
    %17 = tpu.matmul %13, %16, %cst_11 {dimension_numbers = #tpu.dot_dimension_numbers<[1], [0], [0], [1], [0, 0, 1, 1], [], []>} : vector<128x32xbf16>, vector<32x16xbf16>, vector<128x16xf32> -> vector<128x16xf32>
    %18 = arith.addf %14, %17 : vector<128x16xf32>
    %c0_12 = arith.constant 0 : index
    %c0_13 = arith.constant 0 : index
    %19 = vector.load %arg7[%c0_12, %c0_13] : memref<128x16xf32, #tpu.memory_space<vmem>>, vector<128x16xf32>
    tpu.vector_store %arg7[%c0_12, %c0_13], %18 {strides = array<i32>} : memref<128x16xf32, #tpu.memory_space<vmem>>, vector<128x16xf32>,
    %c0_i32_14 = arith.constant 0 : i32
    %20 = arith.cmpi eq, %arg1, %c0_i32_14 : i32
    %21 = arith.extui %20 : i1 to i32
    %c0_i32_15 = arith.constant 0 : i32
    %22 = arith.cmpi ne, %21, %c0_i32_15 : i32
    scf.if %22 {
      %c0_16 = arith.constant 0 : index
      %c0_17 = arith.constant 0 : index
      %23 = vector.load %arg7[%c0_16, %c0_17] : memref<128x16xf32, #tpu.memory_space<vmem>>, vector<128x16xf32>
      %24 = arith.truncf %23 : vector<128x16xf32> to vector<128x16xbf16>
      %c0_18 = arith.constant 0 : index
      %c0_19 = arith.constant 0 : index
      %25 = vector.load %arg6[%c0_18, %c0_19] : memref<128x16xbf16, #tpu.memory_space<vmem>>, vector<128x16xbf16>
      tpu.vector_store %arg6[%c0_18, %c0_19], %24 {strides = array<i32>} : memref<128x16xbf16, #tpu.memory_space<vmem>>, vector<128x16xbf16>,
    } else {
    }
    return
  }
  func.func @transform_0(%arg0: i32, %arg1: i32) -> (i32, i32) {
    %c0_i32 = arith.constant 0 : i32
    return %arg0, %arg1 : i32, i32
  }
  func.func @transform_1(%arg0: i32, %arg1: i32) -> (i32, i32, i32) {
    %c0_i32 = arith.constant 0 : i32
    %c0_i32_0 = arith.constant 0 : i32
    %c0_i32_1 = arith.constant 0 : i32
    return %c0_i32, %arg1, %c0_i32_0 : i32, i32, i32
  }
  func.func @transform_2(%arg0: i32, %arg1: i32) -> (i32, i32) {
    %c0_i32 = arith.constant 0 : i32
    %c0_i32_0 = arith.constant 0 : i32
    return %c0_i32, %arg1 : i32, i32
  }
  func.func @transform_3(%arg0: i32, %arg1: i32) -> (i32, i32) {
    %c0_i32 = arith.constant 0 : i32
    %c0_i32_0 = arith.constant 0 : i32
    return %c0_i32, %arg1 : i32, i32
  }
  func.func @transform_4(%arg0: i32, %arg1: i32) -> (i32, i32) {
    %c0_i32 = arith.constant 0 : i32
    %c0_i32_0 = arith.constant 0 : i32
    return %arg0, %c0_i32 : i32, i32
  }
}

module attributes {stable_mosaic.version = 11 : i64} {
  func.func @_bn_relu_kernel(%arg0: i32, %arg1: memref<128x16xbf16, #tpu.memory_space<vmem>>, %arg2: memref<1x16xf32, #tpu.memory_space<vmem>>, %arg3: memref<1x16xf32, #tpu.memory_space<vmem>>, %arg4: memref<128x16xbf16, #tpu.memory_space<vmem>>) attributes {dimension_semantics = [#tpu.dimension_semantics<parallel>], iteration_bounds = array<i64: 1>, scalar_prefetch = 0 : i64, scratch_operands = 0 : i64, tpu.core_type = #tpu.core_type<tc>, window_params = [{transform_indices = @transform_0, window_bounds = array<i64: 128, 16>}, {pipeline_mode = #tpu.pipeline_mode<synchronous>, transform_indices = @transform_1, window_bounds = array<i64: 1, 16>}, {pipeline_mode = #tpu.pipeline_mode<synchronous>, transform_indices = @transform_2, window_bounds = array<i64: 1, 16>}, {transform_indices = @transform_3, window_bounds = array<i64: 128, 16>}]} {
    %c0 = arith.constant 0 : index
    %c0_0 = arith.constant 0 : index
    %0 = vector.load %arg1[%c0, %c0_0] : memref<128x16xbf16, #tpu.memory_space<vmem>>, vector<128x16xbf16>
    %1 = arith.extf %0 : vector<128x16xbf16> to vector<128x16xf32>
    %c0_1 = arith.constant 0 : index
    %c0_2 = arith.constant 0 : index
    %2 = vector.load %arg2[%c0_1, %c0_2] : memref<1x16xf32, #tpu.memory_space<vmem>>, vector<1x16xf32>
    %3 = vector.broadcast %2 : vector<1x16xf32> to vector<128x16xf32>
    %4 = arith.mulf %1, %3 : vector<128x16xf32>
    %c0_3 = arith.constant 0 : index
    %c0_4 = arith.constant 0 : index
    %5 = vector.load %arg3[%c0_3, %c0_4] : memref<1x16xf32, #tpu.memory_space<vmem>>, vector<1x16xf32>
    %6 = vector.broadcast %5 : vector<1x16xf32> to vector<128x16xf32>
    %7 = arith.addf %4, %6 : vector<128x16xf32>
    %cst = arith.constant 0.000000e+00 : f32
    %8 = vector.broadcast %cst : f32 to vector<128x16xf32>
    %9 = arith.maximumf %7, %8 : vector<128x16xf32>
    %10 = arith.truncf %9 : vector<128x16xf32> to vector<128x16xbf16>
    %c0_5 = arith.constant 0 : index
    %c0_6 = arith.constant 0 : index
    %11 = vector.load %arg4[%c0_5, %c0_6] : memref<128x16xbf16, #tpu.memory_space<vmem>>, vector<128x16xbf16>
    tpu.vector_store %arg4[%c0_5, %c0_6], %10 {strides = array<i32>} : memref<128x16xbf16, #tpu.memory_space<vmem>>, vector<128x16xbf16>,
    return
  }
  func.func @transform_0(%arg0: i32) -> (i32, i32) {
    %c0_i32 = arith.constant 0 : i32
    %c0_i32_0 = arith.constant 0 : i32
    return %arg0, %c0_i32 : i32, i32
  }
  func.func @transform_1(%arg0: i32) -> (i32, i32) {
    %c0_i32 = arith.constant 0 : i32
    %c0_i32_0 = arith.constant 0 : i32
    %c0_i32_1 = arith.constant 0 : i32
    return %c0_i32, %c0_i32_0 : i32, i32
  }
  func.func @transform_2(%arg0: i32) -> (i32, i32) {
    %c0_i32 = arith.constant 0 : i32
    %c0_i32_0 = arith.constant 0 : i32
    %c0_i32_1 = arith.constant 0 : i32
    return %c0_i32, %c0_i32_0 : i32, i32
  }
  func.func @transform_3(%arg0: i32) -> (i32, i32) {
    %c0_i32 = arith.constant 0 : i32
    %c0_i32_0 = arith.constant 0 : i32
    return %arg0, %c0_i32 : i32, i32
  }
}

module attributes {stable_mosaic.version = 11 : i64} {
  func.func @kernel(%arg0: i32, %arg1: i32, %arg2: memref<128x16xbf16, #tpu.memory_space<vmem>>, %arg3: memref<128x16xbf16, #tpu.memory_space<vmem>>, %arg4: memref<128x16xbf16, #tpu.memory_space<vmem>>, %arg5: memref<128x16xbf16, #tpu.memory_space<vmem>>, %arg6: memref<128x16xbf16, #tpu.memory_space<vmem>>, %arg7: memref<128x16xbf16, #tpu.memory_space<vmem>>, %arg8: memref<128x16xbf16, #tpu.memory_space<vmem>>, %arg9: memref<128x16xbf16, #tpu.memory_space<vmem>>, %arg10: memref<128x16xbf16, #tpu.memory_space<vmem>>, %arg11: memref<9x16x8xbf16, #tpu.memory_space<vmem>>, %arg12: memref<128x8xbf16, #tpu.memory_space<vmem>>, %arg13: memref<128x8xf32, #tpu.memory_space<vmem>>) attributes {dimension_semantics = [#tpu.dimension_semantics<parallel>, #tpu.dimension_semantics<arbitrary>], iteration_bounds = array<i64: 1, 1>, scalar_prefetch = 0 : i64, scratch_operands = 1 : i64, tpu.core_type = #tpu.core_type<tc>, window_params = [{transform_indices = @transform_0, window_bounds = array<i64: 128, 16>}, {transform_indices = @transform_1, window_bounds = array<i64: 128, 16>}, {transform_indices = @transform_2, window_bounds = array<i64: 128, 16>}, {transform_indices = @transform_3, window_bounds = array<i64: 128, 16>}, {transform_indices = @transform_4, window_bounds = array<i64: 128, 16>}, {transform_indices = @transform_5, window_bounds = array<i64: 128, 16>}, {transform_indices = @transform_6, window_bounds = array<i64: 128, 16>}, {transform_indices = @transform_7, window_bounds = array<i64: 128, 16>}, {transform_indices = @transform_8, window_bounds = array<i64: 128, 16>}, {transform_indices = @transform_9, window_bounds = array<i64: 9, 16, 8>}, {transform_indices = @transform_10, window_bounds = array<i64: 128, 8>}]} {
    %c0_i32 = arith.constant 0 : i32
    %0 = arith.cmpi eq, %arg1, %c0_i32 : i32
    %1 = arith.extui %0 : i1 to i32
    %c0_i32_0 = arith.constant 0 : i32
    %2 = arith.cmpi ne, %1, %c0_i32_0 : i32
    scf.if %2 {
      %cst_83 = arith.constant 0.000000e+00 : f32
      %69 = vector.broadcast %cst_83 : f32 to vector<128x8xf32>
      %c0_84 = arith.constant 0 : index
      %c0_85 = arith.constant 0 : index
      %70 = vector.load %arg13[%c0_84, %c0_85] : memref<128x8xf32, #tpu.memory_space<vmem>>, vector<128x8xf32>
      tpu.vector_store %arg13[%c0_84, %c0_85], %69 {strides = array<i32>} : memref<128x8xf32, #tpu.memory_space<vmem>>, vector<128x8xf32>,
    } else {
    }
    %c0 = arith.constant 0 : index
    %c0_1 = arith.constant 0 : index
    %3 = vector.load %arg2[%c0, %c0_1] : memref<128x16xbf16, #tpu.memory_space<vmem>>, vector<128x16xbf16>
    %c0_2 = arith.constant 0 : index
    %c0_3 = arith.constant 0 : index
    %4 = vector.load %arg13[%c0_2, %c0_3] : memref<128x8xf32, #tpu.memory_space<vmem>>, vector<128x8xf32>
    %c0_4 = arith.constant 0 : index
    %c0_5 = arith.constant 0 : index
    %c0_6 = arith.constant 0 : index
    %5 = vector.load %arg11[%c0_4, %c0_5, %c0_6] : memref<9x16x8xbf16, #tpu.memory_space<vmem>>, vector<1x16x8xbf16>
    %6 = vector.shape_cast %5 : vector<1x16x8xbf16> to vector<16x8xbf16>
    %cst = arith.constant dense<0.000000e+00> : vector<128x8xf32>
    %7 = tpu.matmul %3, %6, %cst {dimension_numbers = #tpu.dot_dimension_numbers<[1], [0], [0], [1], [0, 0, 1, 1], [], []>} : vector<128x16xbf16>, vector<16x8xbf16>, vector<128x8xf32> -> vector<128x8xf32>
    %8 = arith.addf %4, %7 : vector<128x8xf32>
    %c0_7 = arith.constant 0 : index
    %c0_8 = arith.constant 0 : index
    %9 = vector.load %arg13[%c0_7, %c0_8] : memref<128x8xf32, #tpu.memory_space<vmem>>, vector<128x8xf32>
    tpu.vector_store %arg13[%c0_7, %c0_8], %8 {strides = array<i32>} : memref<128x8xf32, #tpu.memory_space<vmem>>, vector<128x8xf32>,
    %c0_9 = arith.constant 0 : index
    %c0_10 = arith.constant 0 : index
    %10 = vector.load %arg3[%c0_9, %c0_10] : memref<128x16xbf16, #tpu.memory_space<vmem>>, vector<128x16xbf16>
    %c0_11 = arith.constant 0 : index
    %c0_12 = arith.constant 0 : index
    %11 = vector.load %arg13[%c0_11, %c0_12] : memref<128x8xf32, #tpu.memory_space<vmem>>, vector<128x8xf32>
    %c1 = arith.constant 1 : index
    %c0_13 = arith.constant 0 : index
    %c0_14 = arith.constant 0 : index
    %12 = vector.load %arg11[%c1, %c0_13, %c0_14] : memref<9x16x8xbf16, #tpu.memory_space<vmem>>, vector<1x16x8xbf16>
    %13 = vector.shape_cast %12 : vector<1x16x8xbf16> to vector<16x8xbf16>
    %cst_15 = arith.constant dense<0.000000e+00> : vector<128x8xf32>
    %14 = tpu.matmul %10, %13, %cst_15 {dimension_numbers = #tpu.dot_dimension_numbers<[1], [0], [0], [1], [0, 0, 1, 1], [], []>} : vector<128x16xbf16>, vector<16x8xbf16>, vector<128x8xf32> -> vector<128x8xf32>
    %15 = arith.addf %11, %14 : vector<128x8xf32>
    %c0_16 = arith.constant 0 : index
    %c0_17 = arith.constant 0 : index
    %16 = vector.load %arg13[%c0_16, %c0_17] : memref<128x8xf32, #tpu.memory_space<vmem>>, vector<128x8xf32>
    tpu.vector_store %arg13[%c0_16, %c0_17], %15 {strides = array<i32>} : memref<128x8xf32, #tpu.memory_space<vmem>>, vector<128x8xf32>,
    %c0_18 = arith.constant 0 : index
    %c0_19 = arith.constant 0 : index
    %17 = vector.load %arg4[%c0_18, %c0_19] : memref<128x16xbf16, #tpu.memory_space<vmem>>, vector<128x16xbf16>
    %c0_20 = arith.constant 0 : index
    %c0_21 = arith.constant 0 : index
    %18 = vector.load %arg13[%c0_20, %c0_21] : memref<128x8xf32, #tpu.memory_space<vmem>>, vector<128x8xf32>
    %c2 = arith.constant 2 : index
    %c0_22 = arith.constant 0 : index
    %c0_23 = arith.constant 0 : index
    %19 = vector.load %arg11[%c2, %c0_22, %c0_23] : memref<9x16x8xbf16, #tpu.memory_space<vmem>>, vector<1x16x8xbf16>
    %20 = vector.shape_cast %19 : vector<1x16x8xbf16> to vector<16x8xbf16>
    %cst_24 = arith.constant dense<0.000000e+00> : vector<128x8xf32>
    %21 = tpu.matmul %17, %20, %cst_24 {dimension_numbers = #tpu.dot_dimension_numbers<[1], [0], [0], [1], [0, 0, 1, 1], [], []>} : vector<128x16xbf16>, vector<16x8xbf16>, vector<128x8xf32> -> vector<128x8xf32>
    %22 = arith.addf %18, %21 : vector<128x8xf32>
    %c0_25 = arith.constant 0 : index
    %c0_26 = arith.constant 0 : index
    %23 = vector.load %arg13[%c0_25, %c0_26] : memref<128x8xf32, #tpu.memory_space<vmem>>, vector<128x8xf32>
    tpu.vector_store %arg13[%c0_25, %c0_26], %22 {strides = array<i32>} : memref<128x8xf32, #tpu.memory_space<vmem>>, vector<128x8xf32>,
    %c0_27 = arith.constant 0 : index
    %c0_28 = arith.constant 0 : index
    %24 = vector.load %arg5[%c0_27, %c0_28] : memref<128x16xbf16, #tpu.memory_space<vmem>>, vector<128x16xbf16>
    %c0_29 = arith.constant 0 : index
    %c0_30 = arith.constant 0 : index
    %25 = vector.load %arg13[%c0_29, %c0_30] : memref<128x8xf32, #tpu.memory_space<vmem>>, vector<128x8xf32>
    %c3 = arith.constant 3 : index
    %c0_31 = arith.constant 0 : index
    %c0_32 = arith.constant 0 : index
    %26 = vector.load %arg11[%c3, %c0_31, %c0_32] : memref<9x16x8xbf16, #tpu.memory_space<vmem>>, vector<1x16x8xbf16>
    %27 = vector.shape_cast %26 : vector<1x16x8xbf16> to vector<16x8xbf16>
    %cst_33 = arith.constant dense<0.000000e+00> : vector<128x8xf32>
    %28 = tpu.matmul %24, %27, %cst_33 {dimension_numbers = #tpu.dot_dimension_numbers<[1], [0], [0], [1], [0, 0, 1, 1], [], []>} : vector<128x16xbf16>, vector<16x8xbf16>, vector<128x8xf32> -> vector<128x8xf32>
    %29 = arith.addf %25, %28 : vector<128x8xf32>
    %c0_34 = arith.constant 0 : index
    %c0_35 = arith.constant 0 : index
    %30 = vector.load %arg13[%c0_34, %c0_35] : memref<128x8xf32, #tpu.memory_space<vmem>>, vector<128x8xf32>
    tpu.vector_store %arg13[%c0_34, %c0_35], %29 {strides = array<i32>} : memref<128x8xf32, #tpu.memory_space<vmem>>, vector<128x8xf32>,
    %c0_36 = arith.constant 0 : index
    %c0_37 = arith.constant 0 : index
    %31 = vector.load %arg6[%c0_36, %c0_37] : memref<128x16xbf16, #tpu.memory_space<vmem>>, vector<128x16xbf16>
    %c0_38 = arith.constant 0 : index
    %c0_39 = arith.constant 0 : index
    %32 = vector.load %arg13[%c0_38, %c0_39] : memref<128x8xf32, #tpu.memory_space<vmem>>, vector<128x8xf32>
    %c4 = arith.constant 4 : index
    %c0_40 = arith.constant 0 : index
    %c0_41 = arith.constant 0 : index
    %33 = vector.load %arg11[%c4, %c0_40, %c0_41] : memref<9x16x8xbf16, #tpu.memory_space<vmem>>, vector<1x16x8xbf16>
    %34 = vector.shape_cast %33 : vector<1x16x8xbf16> to vector<16x8xbf16>
    %cst_42 = arith.constant dense<0.000000e+00> : vector<128x8xf32>
    %35 = tpu.matmul %31, %34, %cst_42 {dimension_numbers = #tpu.dot_dimension_numbers<[1], [0], [0], [1], [0, 0, 1, 1], [], []>} : vector<128x16xbf16>, vector<16x8xbf16>, vector<128x8xf32> -> vector<128x8xf32>
    %36 = arith.addf %32, %35 : vector<128x8xf32>
    %c0_43 = arith.constant 0 : index
    %c0_44 = arith.constant 0 : index
    %37 = vector.load %arg13[%c0_43, %c0_44] : memref<128x8xf32, #tpu.memory_space<vmem>>, vector<128x8xf32>
    tpu.vector_store %arg13[%c0_43, %c0_44], %36 {strides = array<i32>} : memref<128x8xf32, #tpu.memory_space<vmem>>, vector<128x8xf32>,
    %c0_45 = arith.constant 0 : index
    %c0_46 = arith.constant 0 : index
    %38 = vector.load %arg7[%c0_45, %c0_46] : memref<128x16xbf16, #tpu.memory_space<vmem>>, vector<128x16xbf16>
    %c0_47 = arith.constant 0 : index
    %c0_48 = arith.constant 0 : index
    %39 = vector.load %arg13[%c0_47, %c0_48] : memref<128x8xf32, #tpu.memory_space<vmem>>, vector<128x8xf32>
    %c5 = arith.constant 5 : index
    %c0_49 = arith.constant 0 : index
    %c0_50 = arith.constant 0 : index
    %40 = vector.load %arg11[%c5, %c0_49, %c0_50] : memref<9x16x8xbf16, #tpu.memory_space<vmem>>, vector<1x16x8xbf16>
    %41 = vector.shape_cast %40 : vector<1x16x8xbf16> to vector<16x8xbf16>
    %cst_51 = arith.constant dense<0.000000e+00> : vector<128x8xf32>
    %42 = tpu.matmul %38, %41, %cst_51 {dimension_numbers = #tpu.dot_dimension_numbers<[1], [0], [0], [1], [0, 0, 1, 1], [], []>} : vector<128x16xbf16>, vector<16x8xbf16>, vector<128x8xf32> -> vector<128x8xf32>
    %43 = arith.addf %39, %42 : vector<128x8xf32>
    %c0_52 = arith.constant 0 : index
    %c0_53 = arith.constant 0 : index
    %44 = vector.load %arg13[%c0_52, %c0_53] : memref<128x8xf32, #tpu.memory_space<vmem>>, vector<128x8xf32>
    tpu.vector_store %arg13[%c0_52, %c0_53], %43 {strides = array<i32>} : memref<128x8xf32, #tpu.memory_space<vmem>>, vector<128x8xf32>,
    %c0_54 = arith.constant 0 : index
    %c0_55 = arith.constant 0 : index
    %45 = vector.load %arg8[%c0_54, %c0_55] : memref<128x16xbf16, #tpu.memory_space<vmem>>, vector<128x16xbf16>
    %c0_56 = arith.constant 0 : index
    %c0_57 = arith.constant 0 : index
    %46 = vector.load %arg13[%c0_56, %c0_57] : memref<128x8xf32, #tpu.memory_space<vmem>>, vector<128x8xf32>
    %c6 = arith.constant 6 : index
    %c0_58 = arith.constant 0 : index
    %c0_59 = arith.constant 0 : index
    %47 = vector.load %arg11[%c6, %c0_58, %c0_59] : memref<9x16x8xbf16, #tpu.memory_space<vmem>>, vector<1x16x8xbf16>
    %48 = vector.shape_cast %47 : vector<1x16x8xbf16> to vector<16x8xbf16>
    %cst_60 = arith.constant dense<0.000000e+00> : vector<128x8xf32>
    %49 = tpu.matmul %45, %48, %cst_60 {dimension_numbers = #tpu.dot_dimension_numbers<[1], [0], [0], [1], [0, 0, 1, 1], [], []>} : vector<128x16xbf16>, vector<16x8xbf16>, vector<128x8xf32> -> vector<128x8xf32>
    %50 = arith.addf %46, %49 : vector<128x8xf32>
    %c0_61 = arith.constant 0 : index
    %c0_62 = arith.constant 0 : index
    %51 = vector.load %arg13[%c0_61, %c0_62] : memref<128x8xf32, #tpu.memory_space<vmem>>, vector<128x8xf32>
    tpu.vector_store %arg13[%c0_61, %c0_62], %50 {strides = array<i32>} : memref<128x8xf32, #tpu.memory_space<vmem>>, vector<128x8xf32>,
    %c0_63 = arith.constant 0 : index
    %c0_64 = arith.constant 0 : index
    %52 = vector.load %arg9[%c0_63, %c0_64] : memref<128x16xbf16, #tpu.memory_space<vmem>>, vector<128x16xbf16>
    %c0_65 = arith.constant 0 : index
    %c0_66 = arith.constant 0 : index
    %53 = vector.load %arg13[%c0_65, %c0_66] : memref<128x8xf32, #tpu.memory_space<vmem>>, vector<128x8xf32>
    %c7 = arith.constant 7 : index
    %c0_67 = arith.constant 0 : index
    %c0_68 = arith.constant 0 : index
    %54 = vector.load %arg11[%c7, %c0_67, %c0_68] : memref<9x16x8xbf16, #tpu.memory_space<vmem>>, vector<1x16x8xbf16>
    %55 = vector.shape_cast %54 : vector<1x16x8xbf16> to vector<16x8xbf16>
    %cst_69 = arith.constant dense<0.000000e+00> : vector<128x8xf32>
    %56 = tpu.matmul %52, %55, %cst_69 {dimension_numbers = #tpu.dot_dimension_numbers<[1], [0], [0], [1], [0, 0, 1, 1], [], []>} : vector<128x16xbf16>, vector<16x8xbf16>, vector<128x8xf32> -> vector<128x8xf32>
    %57 = arith.addf %53, %56 : vector<128x8xf32>
    %c0_70 = arith.constant 0 : index
    %c0_71 = arith.constant 0 : index
    %58 = vector.load %arg13[%c0_70, %c0_71] : memref<128x8xf32, #tpu.memory_space<vmem>>, vector<128x8xf32>
    tpu.vector_store %arg13[%c0_70, %c0_71], %57 {strides = array<i32>} : memref<128x8xf32, #tpu.memory_space<vmem>>, vector<128x8xf32>,
    %c0_72 = arith.constant 0 : index
    %c0_73 = arith.constant 0 : index
    %59 = vector.load %arg10[%c0_72, %c0_73] : memref<128x16xbf16, #tpu.memory_space<vmem>>, vector<128x16xbf16>
    %c0_74 = arith.constant 0 : index
    %c0_75 = arith.constant 0 : index
    %60 = vector.load %arg13[%c0_74, %c0_75] : memref<128x8xf32, #tpu.memory_space<vmem>>, vector<128x8xf32>
    %c8 = arith.constant 8 : index
    %c0_76 = arith.constant 0 : index
    %c0_77 = arith.constant 0 : index
    %61 = vector.load %arg11[%c8, %c0_76, %c0_77] : memref<9x16x8xbf16, #tpu.memory_space<vmem>>, vector<1x16x8xbf16>
    %62 = vector.shape_cast %61 : vector<1x16x8xbf16> to vector<16x8xbf16>
    %cst_78 = arith.constant dense<0.000000e+00> : vector<128x8xf32>
    %63 = tpu.matmul %59, %62, %cst_78 {dimension_numbers = #tpu.dot_dimension_numbers<[1], [0], [0], [1], [0, 0, 1, 1], [], []>} : vector<128x16xbf16>, vector<16x8xbf16>, vector<128x8xf32> -> vector<128x8xf32>
    %64 = arith.addf %60, %63 : vector<128x8xf32>
    %c0_79 = arith.constant 0 : index
    %c0_80 = arith.constant 0 : index
    %65 = vector.load %arg13[%c0_79, %c0_80] : memref<128x8xf32, #tpu.memory_space<vmem>>, vector<128x8xf32>
    tpu.vector_store %arg13[%c0_79, %c0_80], %64 {strides = array<i32>} : memref<128x8xf32, #tpu.memory_space<vmem>>, vector<128x8xf32>,
    %c0_i32_81 = arith.constant 0 : i32
    %66 = arith.cmpi eq, %arg1, %c0_i32_81 : i32
    %67 = arith.extui %66 : i1 to i32
    %c0_i32_82 = arith.constant 0 : i32
    %68 = arith.cmpi ne, %67, %c0_i32_82 : i32
    scf.if %68 {
      %c0_83 = arith.constant 0 : index
      %c0_84 = arith.constant 0 : index
      %69 = vector.load %arg13[%c0_83, %c0_84] : memref<128x8xf32, #tpu.memory_space<vmem>>, vector<128x8xf32>
      %70 = arith.truncf %69 : vector<128x8xf32> to vector<128x8xbf16>
      %c0_85 = arith.constant 0 : index
      %c0_86 = arith.constant 0 : index
      %71 = vector.load %arg12[%c0_85, %c0_86] : memref<128x8xbf16, #tpu.memory_space<vmem>>, vector<128x8xbf16>
      tpu.vector_store %arg12[%c0_85, %c0_86], %70 {strides = array<i32>} : memref<128x8xbf16, #tpu.memory_space<vmem>>, vector<128x8xbf16>,
    } else {
    }
    return
  }
  func.func @transform_0(%arg0: i32, %arg1: i32) -> (i32, i32) {
    %c0_i32 = arith.constant 0 : i32
    return %arg0, %arg1 : i32, i32
  }
  func.func @transform_1(%arg0: i32, %arg1: i32) -> (i32, i32) {
    %c0_i32 = arith.constant 0 : i32
    return %arg0, %arg1 : i32, i32
  }
  func.func @transform_2(%arg0: i32, %arg1: i32) -> (i32, i32) {
    %c0_i32 = arith.constant 0 : i32
    return %arg0, %arg1 : i32, i32
  }
  func.func @transform_3(%arg0: i32, %arg1: i32) -> (i32, i32) {
    %c0_i32 = arith.constant 0 : i32
    return %arg0, %arg1 : i32, i32
  }
  func.func @transform_4(%arg0: i32, %arg1: i32) -> (i32, i32) {
    %c0_i32 = arith.constant 0 : i32
    return %arg0, %arg1 : i32, i32
  }
  func.func @transform_5(%arg0: i32, %arg1: i32) -> (i32, i32) {
    %c0_i32 = arith.constant 0 : i32
    return %arg0, %arg1 : i32, i32
  }
  func.func @transform_6(%arg0: i32, %arg1: i32) -> (i32, i32) {
    %c0_i32 = arith.constant 0 : i32
    return %arg0, %arg1 : i32, i32
  }
  func.func @transform_7(%arg0: i32, %arg1: i32) -> (i32, i32) {
    %c0_i32 = arith.constant 0 : i32
    return %arg0, %arg1 : i32, i32
  }
  func.func @transform_8(%arg0: i32, %arg1: i32) -> (i32, i32) {
    %c0_i32 = arith.constant 0 : i32
    return %arg0, %arg1 : i32, i32
  }
  func.func @transform_9(%arg0: i32, %arg1: i32) -> (i32, i32, i32) {
    %c0_i32 = arith.constant 0 : i32
    %c0_i32_0 = arith.constant 0 : i32
    %c0_i32_1 = arith.constant 0 : i32
    return %c0_i32, %arg1, %c0_i32_0 : i32, i32, i32
  }
  func.func @transform_10(%arg0: i32, %arg1: i32) -> (i32, i32) {
    %c0_i32 = arith.constant 0 : i32
    %c0_i32_0 = arith.constant 0 : i32
    return %arg0, %c0_i32 : i32, i32
  }
}

module attributes {stable_mosaic.version = 11 : i64} {
  func.func @_moments_kernel(%arg0: i32, %arg1: memref<128x8xbf16, #tpu.memory_space<vmem>>, %arg2: memref<1x8xf32, #tpu.memory_space<vmem>>, %arg3: memref<1x8xf32, #tpu.memory_space<vmem>>) attributes {dimension_semantics = [#tpu.dimension_semantics<arbitrary>], iteration_bounds = array<i64: 1>, scalar_prefetch = 0 : i64, scratch_operands = 0 : i64, tpu.core_type = #tpu.core_type<tc>, window_params = [{transform_indices = @transform_0, window_bounds = array<i64: 128, 8>}, {pipeline_mode = #tpu.pipeline_mode<synchronous>, transform_indices = @transform_1, window_bounds = array<i64: 1, 8>}, {pipeline_mode = #tpu.pipeline_mode<synchronous>, transform_indices = @transform_2, window_bounds = array<i64: 1, 8>}]} {
    %c0_i32 = arith.constant 0 : i32
    %0 = arith.cmpi eq, %arg0, %c0_i32 : i32
    %1 = arith.extui %0 : i1 to i32
    %c0_i32_0 = arith.constant 0 : i32
    %2 = arith.cmpi ne, %1, %c0_i32_0 : i32
    scf.if %2 {
      %cst_11 = arith.constant 0.000000e+00 : f32
      %16 = vector.broadcast %cst_11 : f32 to vector<1x8xf32>
      %c0_12 = arith.constant 0 : index
      %c0_13 = arith.constant 0 : index
      %17 = vector.load %arg2[%c0_12, %c0_13] : memref<1x8xf32, #tpu.memory_space<vmem>>, vector<1x8xf32>
      tpu.vector_store %arg2[%c0_12, %c0_13], %16 {strides = array<i32>} : memref<1x8xf32, #tpu.memory_space<vmem>>, vector<1x8xf32>,
      %cst_14 = arith.constant 0.000000e+00 : f32
      %18 = vector.broadcast %cst_14 : f32 to vector<1x8xf32>
      %c0_15 = arith.constant 0 : index
      %c0_16 = arith.constant 0 : index
      %19 = vector.load %arg3[%c0_15, %c0_16] : memref<1x8xf32, #tpu.memory_space<vmem>>, vector<1x8xf32>
      tpu.vector_store %arg3[%c0_15, %c0_16], %18 {strides = array<i32>} : memref<1x8xf32, #tpu.memory_space<vmem>>, vector<1x8xf32>,
    } else {
    }
    %c0 = arith.constant 0 : index
    %c0_1 = arith.constant 0 : index
    %3 = vector.load %arg1[%c0, %c0_1] : memref<128x8xbf16, #tpu.memory_space<vmem>>, vector<128x8xbf16>
    %4 = arith.extf %3 : vector<128x8xbf16> to vector<128x8xf32>
    %c0_2 = arith.constant 0 : index
    %c0_3 = arith.constant 0 : index
    %5 = vector.load %arg2[%c0_2, %c0_3] : memref<1x8xf32, #tpu.memory_space<vmem>>, vector<1x8xf32>
    %cst = arith.constant dense<0.000000e+00> : vector<8xf32>
    %6 = vector.multi_reduction <add>, %4, %cst [0] : vector<128x8xf32> to vector<8xf32>
    %7 = vector.shape_cast %6 : vector<8xf32> to vector<1x8xf32>
    %8 = arith.addf %5, %7 : vector<1x8xf32>
    %c0_4 = arith.constant 0 : index
    %c0_5 = arith.constant 0 : index
    %9 = vector.load %arg2[%c0_4, %c0_5] : memref<1x8xf32, #tpu.memory_space<vmem>>, vector<1x8xf32>
    tpu.vector_store %arg2[%c0_4, %c0_5], %8 {strides = array<i32>} : memref<1x8xf32, #tpu.memory_space<vmem>>, vector<1x8xf32>,
    %c0_6 = arith.constant 0 : index
    %c0_7 = arith.constant 0 : index
    %10 = vector.load %arg3[%c0_6, %c0_7] : memref<1x8xf32, #tpu.memory_space<vmem>>, vector<1x8xf32>
    %11 = arith.mulf %4, %4 : vector<128x8xf32>
    %cst_8 = arith.constant dense<0.000000e+00> : vector<8xf32>
    %12 = vector.multi_reduction <add>, %11, %cst_8 [0] : vector<128x8xf32> to vector<8xf32>
    %13 = vector.shape_cast %12 : vector<8xf32> to vector<1x8xf32>
    %14 = arith.addf %10, %13 : vector<1x8xf32>
    %c0_9 = arith.constant 0 : index
    %c0_10 = arith.constant 0 : index
    %15 = vector.load %arg3[%c0_9, %c0_10] : memref<1x8xf32, #tpu.memory_space<vmem>>, vector<1x8xf32>
    tpu.vector_store %arg3[%c0_9, %c0_10], %14 {strides = array<i32>} : memref<1x8xf32, #tpu.memory_space<vmem>>, vector<1x8xf32>,
    return
  }
  func.func @transform_0(%arg0: i32) -> (i32, i32) {
    %c0_i32 = arith.constant 0 : i32
    %c0_i32_0 = arith.constant 0 : i32
    return %arg0, %c0_i32 : i32, i32
  }
  func.func @transform_1(%arg0: i32) -> (i32, i32) {
    %c0_i32 = arith.constant 0 : i32
    %c0_i32_0 = arith.constant 0 : i32
    %c0_i32_1 = arith.constant 0 : i32
    return %c0_i32, %c0_i32_0 : i32, i32
  }
  func.func @transform_2(%arg0: i32) -> (i32, i32) {
    %c0_i32 = arith.constant 0 : i32
    %c0_i32_0 = arith.constant 0 : i32
    %c0_i32_1 = arith.constant 0 : i32
    return %c0_i32, %c0_i32_0 : i32, i32
  }
}

module attributes {stable_mosaic.version = 11 : i64} {
  func.func @_moments_kernel(%arg0: i32, %arg1: memref<32x16xbf16, #tpu.memory_space<vmem>>, %arg2: memref<1x16xf32, #tpu.memory_space<vmem>>, %arg3: memref<1x16xf32, #tpu.memory_space<vmem>>) attributes {dimension_semantics = [#tpu.dimension_semantics<arbitrary>], iteration_bounds = array<i64: 1>, scalar_prefetch = 0 : i64, scratch_operands = 0 : i64, tpu.core_type = #tpu.core_type<tc>, window_params = [{transform_indices = @transform_0, window_bounds = array<i64: 32, 16>}, {pipeline_mode = #tpu.pipeline_mode<synchronous>, transform_indices = @transform_1, window_bounds = array<i64: 1, 16>}, {pipeline_mode = #tpu.pipeline_mode<synchronous>, transform_indices = @transform_2, window_bounds = array<i64: 1, 16>}]} {
    %c0_i32 = arith.constant 0 : i32
    %0 = arith.cmpi eq, %arg0, %c0_i32 : i32
    %1 = arith.extui %0 : i1 to i32
    %c0_i32_0 = arith.constant 0 : i32
    %2 = arith.cmpi ne, %1, %c0_i32_0 : i32
    scf.if %2 {
      %cst_11 = arith.constant 0.000000e+00 : f32
      %16 = vector.broadcast %cst_11 : f32 to vector<1x16xf32>
      %c0_12 = arith.constant 0 : index
      %c0_13 = arith.constant 0 : index
      %17 = vector.load %arg2[%c0_12, %c0_13] : memref<1x16xf32, #tpu.memory_space<vmem>>, vector<1x16xf32>
      tpu.vector_store %arg2[%c0_12, %c0_13], %16 {strides = array<i32>} : memref<1x16xf32, #tpu.memory_space<vmem>>, vector<1x16xf32>,
      %cst_14 = arith.constant 0.000000e+00 : f32
      %18 = vector.broadcast %cst_14 : f32 to vector<1x16xf32>
      %c0_15 = arith.constant 0 : index
      %c0_16 = arith.constant 0 : index
      %19 = vector.load %arg3[%c0_15, %c0_16] : memref<1x16xf32, #tpu.memory_space<vmem>>, vector<1x16xf32>
      tpu.vector_store %arg3[%c0_15, %c0_16], %18 {strides = array<i32>} : memref<1x16xf32, #tpu.memory_space<vmem>>, vector<1x16xf32>,
    } else {
    }
    %c0 = arith.constant 0 : index
    %c0_1 = arith.constant 0 : index
    %3 = vector.load %arg1[%c0, %c0_1] : memref<32x16xbf16, #tpu.memory_space<vmem>>, vector<32x16xbf16>
    %4 = arith.extf %3 : vector<32x16xbf16> to vector<32x16xf32>
    %c0_2 = arith.constant 0 : index
    %c0_3 = arith.constant 0 : index
    %5 = vector.load %arg2[%c0_2, %c0_3] : memref<1x16xf32, #tpu.memory_space<vmem>>, vector<1x16xf32>
    %cst = arith.constant dense<0.000000e+00> : vector<16xf32>
    %6 = vector.multi_reduction <add>, %4, %cst [0] : vector<32x16xf32> to vector<16xf32>
    %7 = vector.shape_cast %6 : vector<16xf32> to vector<1x16xf32>
    %8 = arith.addf %5, %7 : vector<1x16xf32>
    %c0_4 = arith.constant 0 : index
    %c0_5 = arith.constant 0 : index
    %9 = vector.load %arg2[%c0_4, %c0_5] : memref<1x16xf32, #tpu.memory_space<vmem>>, vector<1x16xf32>
    tpu.vector_store %arg2[%c0_4, %c0_5], %8 {strides = array<i32>} : memref<1x16xf32, #tpu.memory_space<vmem>>, vector<1x16xf32>,
    %c0_6 = arith.constant 0 : index
    %c0_7 = arith.constant 0 : index
    %10 = vector.load %arg3[%c0_6, %c0_7] : memref<1x16xf32, #tpu.memory_space<vmem>>, vector<1x16xf32>
    %11 = arith.mulf %4, %4 : vector<32x16xf32>
    %cst_8 = arith.constant dense<0.000000e+00> : vector<16xf32>
    %12 = vector.multi_reduction <add>, %11, %cst_8 [0] : vector<32x16xf32> to vector<16xf32>
    %13 = vector.shape_cast %12 : vector<16xf32> to vector<1x16xf32>
    %14 = arith.addf %10, %13 : vector<1x16xf32>
    %c0_9 = arith.constant 0 : index
    %c0_10 = arith.constant 0 : index
    %15 = vector.load %arg3[%c0_9, %c0_10] : memref<1x16xf32, #tpu.memory_space<vmem>>, vector<1x16xf32>
    tpu.vector_store %arg3[%c0_9, %c0_10], %14 {strides = array<i32>} : memref<1x16xf32, #tpu.memory_space<vmem>>, vector<1x16xf32>,
    return
  }
  func.func @transform_0(%arg0: i32) -> (i32, i32) {
    %c0_i32 = arith.constant 0 : i32
    %c0_i32_0 = arith.constant 0 : i32
    return %arg0, %c0_i32 : i32, i32
  }
  func.func @transform_1(%arg0: i32) -> (i32, i32) {
    %c0_i32 = arith.constant 0 : i32
    %c0_i32_0 = arith.constant 0 : i32
    %c0_i32_1 = arith.constant 0 : i32
    return %c0_i32, %c0_i32_0 : i32, i32
  }
  func.func @transform_2(%arg0: i32) -> (i32, i32) {
    %c0_i32 = arith.constant 0 : i32
    %c0_i32_0 = arith.constant 0 : i32
    %c0_i32_1 = arith.constant 0 : i32
    return %c0_i32, %c0_i32_0 : i32, i32
  }
}

module attributes {stable_mosaic.version = 11 : i64} {
  func.func @kernel(%arg0: i32, %arg1: memref<32x16xbf16, #tpu.memory_space<vmem>>, %arg2: memref<32x16xbf16, #tpu.memory_space<vmem>>, %arg3: memref<32x16xbf16, #tpu.memory_space<vmem>>, %arg4: memref<32x16xbf16, #tpu.memory_space<vmem>>, %arg5: memref<32x16xbf16, #tpu.memory_space<vmem>>) attributes {dimension_semantics = [#tpu.dimension_semantics<parallel>], iteration_bounds = array<i64: 1>, scalar_prefetch = 0 : i64, scratch_operands = 0 : i64, tpu.core_type = #tpu.core_type<tc>, window_params = [{transform_indices = @transform_0, window_bounds = array<i64: 32, 16>}, {transform_indices = @transform_1, window_bounds = array<i64: 32, 16>}, {transform_indices = @transform_2, window_bounds = array<i64: 32, 16>}, {transform_indices = @transform_3, window_bounds = array<i64: 32, 16>}, {transform_indices = @transform_4, window_bounds = array<i64: 32, 16>}]} {
    %c0 = arith.constant 0 : index
    %c0_0 = arith.constant 0 : index
    %0 = vector.load %arg1[%c0, %c0_0] : memref<32x16xbf16, #tpu.memory_space<vmem>>, vector<32x16xbf16>
    %1 = arith.extf %0 : vector<32x16xbf16> to vector<32x16xf32>
    %c0_1 = arith.constant 0 : index
    %c0_2 = arith.constant 0 : index
    %2 = vector.load %arg2[%c0_1, %c0_2] : memref<32x16xbf16, #tpu.memory_space<vmem>>, vector<32x16xbf16>
    %3 = arith.extf %2 : vector<32x16xbf16> to vector<32x16xf32>
    %4 = arith.addf %1, %3 : vector<32x16xf32>
    %c0_3 = arith.constant 0 : index
    %c0_4 = arith.constant 0 : index
    %5 = vector.load %arg3[%c0_3, %c0_4] : memref<32x16xbf16, #tpu.memory_space<vmem>>, vector<32x16xbf16>
    %6 = arith.extf %5 : vector<32x16xbf16> to vector<32x16xf32>
    %7 = arith.addf %4, %6 : vector<32x16xf32>
    %c0_5 = arith.constant 0 : index
    %c0_6 = arith.constant 0 : index
    %8 = vector.load %arg4[%c0_5, %c0_6] : memref<32x16xbf16, #tpu.memory_space<vmem>>, vector<32x16xbf16>
    %9 = arith.extf %8 : vector<32x16xbf16> to vector<32x16xf32>
    %10 = arith.addf %7, %9 : vector<32x16xf32>
    %cst = arith.constant 2.500000e-01 : f32
    %11 = vector.broadcast %cst : f32 to vector<32x16xf32>
    %12 = arith.mulf %10, %11 : vector<32x16xf32>
    %13 = arith.truncf %12 : vector<32x16xf32> to vector<32x16xbf16>
    %c0_7 = arith.constant 0 : index
    %c0_8 = arith.constant 0 : index
    %14 = vector.load %arg5[%c0_7, %c0_8] : memref<32x16xbf16, #tpu.memory_space<vmem>>, vector<32x16xbf16>
    tpu.vector_store %arg5[%c0_7, %c0_8], %13 {strides = array<i32>} : memref<32x16xbf16, #tpu.memory_space<vmem>>, vector<32x16xbf16>,
    return
  }
  func.func @transform_0(%arg0: i32) -> (i32, i32) {
    %c0_i32 = arith.constant 0 : i32
    %c0_i32_0 = arith.constant 0 : i32
    return %arg0, %c0_i32 : i32, i32
  }
  func.func @transform_1(%arg0: i32) -> (i32, i32) {
    %c0_i32 = arith.constant 0 : i32
    %c0_i32_0 = arith.constant 0 : i32
    return %arg0, %c0_i32 : i32, i32
  }
  func.func @transform_2(%arg0: i32) -> (i32, i32) {
    %c0_i32 = arith.constant 0 : i32
    %c0_i32_0 = arith.constant 0 : i32
    return %arg0, %c0_i32 : i32, i32
  }
  func.func @transform_3(%arg0: i32) -> (i32, i32) {
    %c0_i32 = arith.constant 0 : i32
    %c0_i32_0 = arith.constant 0 : i32
    return %arg0, %c0_i32 : i32, i32
  }
  func.func @transform_4(%arg0: i32) -> (i32, i32) {
    %c0_i32 = arith.constant 0 : i32
    %c0_i32_0 = arith.constant 0 : i32
    return %arg0, %c0_i32 : i32, i32
  }
}

module attributes {stable_mosaic.version = 11 : i64} {
  func.func @kernel(%arg0: i32, %arg1: i32, %arg2: memref<32x32xbf16, #tpu.memory_space<vmem>>, %arg3: memref<1x32x16xbf16, #tpu.memory_space<vmem>>, %arg4: memref<1x32xf32, #tpu.memory_space<vmem>>, %arg5: memref<1x32xf32, #tpu.memory_space<vmem>>, %arg6: memref<32x16xbf16, #tpu.memory_space<vmem>>, %arg7: memref<32x16xf32, #tpu.memory_space<vmem>>) attributes {dimension_semantics = [#tpu.dimension_semantics<parallel>, #tpu.dimension_semantics<arbitrary>], iteration_bounds = array<i64: 1, 1>, scalar_prefetch = 0 : i64, scratch_operands = 1 : i64, tpu.core_type = #tpu.core_type<tc>, window_params = [{transform_indices = @transform_0, window_bounds = array<i64: 32, 32>}, {transform_indices = @transform_1, window_bounds = array<i64: 1, 32, 16>}, {transform_indices = @transform_2, window_bounds = array<i64: 1, 32>}, {transform_indices = @transform_3, window_bounds = array<i64: 1, 32>}, {transform_indices = @transform_4, window_bounds = array<i64: 32, 16>}]} {
    %c0_i32 = arith.constant 0 : i32
    %0 = arith.cmpi eq, %arg1, %c0_i32 : i32
    %1 = arith.extui %0 : i1 to i32
    %c0_i32_0 = arith.constant 0 : i32
    %2 = arith.cmpi ne, %1, %c0_i32_0 : i32
    scf.if %2 {
      %cst_16 = arith.constant 0.000000e+00 : f32
      %23 = vector.broadcast %cst_16 : f32 to vector<32x16xf32>
      %c0_17 = arith.constant 0 : index
      %c0_18 = arith.constant 0 : index
      %24 = vector.load %arg7[%c0_17, %c0_18] : memref<32x16xf32, #tpu.memory_space<vmem>>, vector<32x16xf32>
      tpu.vector_store %arg7[%c0_17, %c0_18], %23 {strides = array<i32>} : memref<32x16xf32, #tpu.memory_space<vmem>>, vector<32x16xf32>,
    } else {
    }
    %c0 = arith.constant 0 : index
    %c0_1 = arith.constant 0 : index
    %3 = vector.load %arg2[%c0, %c0_1] : memref<32x32xbf16, #tpu.memory_space<vmem>>, vector<32x32xbf16>
    %4 = arith.extf %3 : vector<32x32xbf16> to vector<32x32xf32>
    %c0_2 = arith.constant 0 : index
    %c0_3 = arith.constant 0 : index
    %5 = vector.load %arg4[%c0_2, %c0_3] : memref<1x32xf32, #tpu.memory_space<vmem>>, vector<1x32xf32>
    %6 = vector.broadcast %5 : vector<1x32xf32> to vector<32x32xf32>
    %7 = arith.mulf %4, %6 : vector<32x32xf32>
    %c0_4 = arith.constant 0 : index
    %c0_5 = arith.constant 0 : index
    %8 = vector.load %arg5[%c0_4, %c0_5] : memref<1x32xf32, #tpu.memory_space<vmem>>, vector<1x32xf32>
    %9 = vector.broadcast %8 : vector<1x32xf32> to vector<32x32xf32>
    %10 = arith.addf %7, %9 : vector<32x32xf32>
    %cst = arith.constant 0.000000e+00 : f32
    %11 = vector.broadcast %cst : f32 to vector<32x32xf32>
    %12 = arith.maximumf %10, %11 : vector<32x32xf32>
    %13 = arith.truncf %12 : vector<32x32xf32> to vector<32x32xbf16>
    %c0_6 = arith.constant 0 : index
    %c0_7 = arith.constant 0 : index
    %14 = vector.load %arg7[%c0_6, %c0_7] : memref<32x16xf32, #tpu.memory_space<vmem>>, vector<32x16xf32>
    %c0_8 = arith.constant 0 : index
    %c0_9 = arith.constant 0 : index
    %c0_10 = arith.constant 0 : index
    %15 = vector.load %arg3[%c0_8, %c0_9, %c0_10] : memref<1x32x16xbf16, #tpu.memory_space<vmem>>, vector<1x32x16xbf16>
    %16 = vector.shape_cast %15 : vector<1x32x16xbf16> to vector<32x16xbf16>
    %cst_11 = arith.constant dense<0.000000e+00> : vector<32x16xf32>
    %17 = tpu.matmul %13, %16, %cst_11 {dimension_numbers = #tpu.dot_dimension_numbers<[1], [0], [0], [1], [0, 0, 1, 1], [], []>} : vector<32x32xbf16>, vector<32x16xbf16>, vector<32x16xf32> -> vector<32x16xf32>
    %18 = arith.addf %14, %17 : vector<32x16xf32>
    %c0_12 = arith.constant 0 : index
    %c0_13 = arith.constant 0 : index
    %19 = vector.load %arg7[%c0_12, %c0_13] : memref<32x16xf32, #tpu.memory_space<vmem>>, vector<32x16xf32>
    tpu.vector_store %arg7[%c0_12, %c0_13], %18 {strides = array<i32>} : memref<32x16xf32, #tpu.memory_space<vmem>>, vector<32x16xf32>,
    %c0_i32_14 = arith.constant 0 : i32
    %20 = arith.cmpi eq, %arg1, %c0_i32_14 : i32
    %21 = arith.extui %20 : i1 to i32
    %c0_i32_15 = arith.constant 0 : i32
    %22 = arith.cmpi ne, %21, %c0_i32_15 : i32
    scf.if %22 {
      %c0_16 = arith.constant 0 : index
      %c0_17 = arith.constant 0 : index
      %23 = vector.load %arg7[%c0_16, %c0_17] : memref<32x16xf32, #tpu.memory_space<vmem>>, vector<32x16xf32>
      %24 = arith.truncf %23 : vector<32x16xf32> to vector<32x16xbf16>
      %c0_18 = arith.constant 0 : index
      %c0_19 = arith.constant 0 : index
      %25 = vector.load %arg6[%c0_18, %c0_19] : memref<32x16xbf16, #tpu.memory_space<vmem>>, vector<32x16xbf16>
      tpu.vector_store %arg6[%c0_18, %c0_19], %24 {strides = array<i32>} : memref<32x16xbf16, #tpu.memory_space<vmem>>, vector<32x16xbf16>,
    } else {
    }
    return
  }
  func.func @transform_0(%arg0: i32, %arg1: i32) -> (i32, i32) {
    %c0_i32 = arith.constant 0 : i32
    return %arg0, %arg1 : i32, i32
  }
  func.func @transform_1(%arg0: i32, %arg1: i32) -> (i32, i32, i32) {
    %c0_i32 = arith.constant 0 : i32
    %c0_i32_0 = arith.constant 0 : i32
    %c0_i32_1 = arith.constant 0 : i32
    return %c0_i32, %arg1, %c0_i32_0 : i32, i32, i32
  }
  func.func @transform_2(%arg0: i32, %arg1: i32) -> (i32, i32) {
    %c0_i32 = arith.constant 0 : i32
    %c0_i32_0 = arith.constant 0 : i32
    return %c0_i32, %arg1 : i32, i32
  }
  func.func @transform_3(%arg0: i32, %arg1: i32) -> (i32, i32) {
    %c0_i32 = arith.constant 0 : i32
    %c0_i32_0 = arith.constant 0 : i32
    return %c0_i32, %arg1 : i32, i32
  }
  func.func @transform_4(%arg0: i32, %arg1: i32) -> (i32, i32) {
    %c0_i32 = arith.constant 0 : i32
    %c0_i32_0 = arith.constant 0 : i32
    return %arg0, %c0_i32 : i32, i32
  }
}

module attributes {stable_mosaic.version = 11 : i64} {
  func.func @_bn_relu_kernel(%arg0: i32, %arg1: memref<32x16xbf16, #tpu.memory_space<vmem>>, %arg2: memref<1x16xf32, #tpu.memory_space<vmem>>, %arg3: memref<1x16xf32, #tpu.memory_space<vmem>>, %arg4: memref<32x16xbf16, #tpu.memory_space<vmem>>) attributes {dimension_semantics = [#tpu.dimension_semantics<parallel>], iteration_bounds = array<i64: 1>, scalar_prefetch = 0 : i64, scratch_operands = 0 : i64, tpu.core_type = #tpu.core_type<tc>, window_params = [{transform_indices = @transform_0, window_bounds = array<i64: 32, 16>}, {pipeline_mode = #tpu.pipeline_mode<synchronous>, transform_indices = @transform_1, window_bounds = array<i64: 1, 16>}, {pipeline_mode = #tpu.pipeline_mode<synchronous>, transform_indices = @transform_2, window_bounds = array<i64: 1, 16>}, {transform_indices = @transform_3, window_bounds = array<i64: 32, 16>}]} {
    %c0 = arith.constant 0 : index
    %c0_0 = arith.constant 0 : index
    %0 = vector.load %arg1[%c0, %c0_0] : memref<32x16xbf16, #tpu.memory_space<vmem>>, vector<32x16xbf16>
    %1 = arith.extf %0 : vector<32x16xbf16> to vector<32x16xf32>
    %c0_1 = arith.constant 0 : index
    %c0_2 = arith.constant 0 : index
    %2 = vector.load %arg2[%c0_1, %c0_2] : memref<1x16xf32, #tpu.memory_space<vmem>>, vector<1x16xf32>
    %3 = vector.broadcast %2 : vector<1x16xf32> to vector<32x16xf32>
    %4 = arith.mulf %1, %3 : vector<32x16xf32>
    %c0_3 = arith.constant 0 : index
    %c0_4 = arith.constant 0 : index
    %5 = vector.load %arg3[%c0_3, %c0_4] : memref<1x16xf32, #tpu.memory_space<vmem>>, vector<1x16xf32>
    %6 = vector.broadcast %5 : vector<1x16xf32> to vector<32x16xf32>
    %7 = arith.addf %4, %6 : vector<32x16xf32>
    %cst = arith.constant 0.000000e+00 : f32
    %8 = vector.broadcast %cst : f32 to vector<32x16xf32>
    %9 = arith.maximumf %7, %8 : vector<32x16xf32>
    %10 = arith.truncf %9 : vector<32x16xf32> to vector<32x16xbf16>
    %c0_5 = arith.constant 0 : index
    %c0_6 = arith.constant 0 : index
    %11 = vector.load %arg4[%c0_5, %c0_6] : memref<32x16xbf16, #tpu.memory_space<vmem>>, vector<32x16xbf16>
    tpu.vector_store %arg4[%c0_5, %c0_6], %10 {strides = array<i32>} : memref<32x16xbf16, #tpu.memory_space<vmem>>, vector<32x16xbf16>,
    return
  }
  func.func @transform_0(%arg0: i32) -> (i32, i32) {
    %c0_i32 = arith.constant 0 : i32
    %c0_i32_0 = arith.constant 0 : i32
    return %arg0, %c0_i32 : i32, i32
  }
  func.func @transform_1(%arg0: i32) -> (i32, i32) {
    %c0_i32 = arith.constant 0 : i32
    %c0_i32_0 = arith.constant 0 : i32
    %c0_i32_1 = arith.constant 0 : i32
    return %c0_i32, %c0_i32_0 : i32, i32
  }
  func.func @transform_2(%arg0: i32) -> (i32, i32) {
    %c0_i32 = arith.constant 0 : i32
    %c0_i32_0 = arith.constant 0 : i32
    %c0_i32_1 = arith.constant 0 : i32
    return %c0_i32, %c0_i32_0 : i32, i32
  }
  func.func @transform_3(%arg0: i32) -> (i32, i32) {
    %c0_i32 = arith.constant 0 : i32
    %c0_i32_0 = arith.constant 0 : i32
    return %arg0, %c0_i32 : i32, i32
  }
}

module attributes {stable_mosaic.version = 11 : i64} {
  func.func @kernel(%arg0: i32, %arg1: i32, %arg2: memref<32x16xbf16, #tpu.memory_space<vmem>>, %arg3: memref<32x16xbf16, #tpu.memory_space<vmem>>, %arg4: memref<32x16xbf16, #tpu.memory_space<vmem>>, %arg5: memref<32x16xbf16, #tpu.memory_space<vmem>>, %arg6: memref<32x16xbf16, #tpu.memory_space<vmem>>, %arg7: memref<32x16xbf16, #tpu.memory_space<vmem>>, %arg8: memref<32x16xbf16, #tpu.memory_space<vmem>>, %arg9: memref<32x16xbf16, #tpu.memory_space<vmem>>, %arg10: memref<32x16xbf16, #tpu.memory_space<vmem>>, %arg11: memref<9x16x8xbf16, #tpu.memory_space<vmem>>, %arg12: memref<32x8xbf16, #tpu.memory_space<vmem>>, %arg13: memref<32x8xf32, #tpu.memory_space<vmem>>) attributes {dimension_semantics = [#tpu.dimension_semantics<parallel>, #tpu.dimension_semantics<arbitrary>], iteration_bounds = array<i64: 1, 1>, scalar_prefetch = 0 : i64, scratch_operands = 1 : i64, tpu.core_type = #tpu.core_type<tc>, window_params = [{transform_indices = @transform_0, window_bounds = array<i64: 32, 16>}, {transform_indices = @transform_1, window_bounds = array<i64: 32, 16>}, {transform_indices = @transform_2, window_bounds = array<i64: 32, 16>}, {transform_indices = @transform_3, window_bounds = array<i64: 32, 16>}, {transform_indices = @transform_4, window_bounds = array<i64: 32, 16>}, {transform_indices = @transform_5, window_bounds = array<i64: 32, 16>}, {transform_indices = @transform_6, window_bounds = array<i64: 32, 16>}, {transform_indices = @transform_7, window_bounds = array<i64: 32, 16>}, {transform_indices = @transform_8, window_bounds = array<i64: 32, 16>}, {transform_indices = @transform_9, window_bounds = array<i64: 9, 16, 8>}, {transform_indices = @transform_10, window_bounds = array<i64: 32, 8>}]} {
    %c0_i32 = arith.constant 0 : i32
    %0 = arith.cmpi eq, %arg1, %c0_i32 : i32
    %1 = arith.extui %0 : i1 to i32
    %c0_i32_0 = arith.constant 0 : i32
    %2 = arith.cmpi ne, %1, %c0_i32_0 : i32
    scf.if %2 {
      %cst_83 = arith.constant 0.000000e+00 : f32
      %69 = vector.broadcast %cst_83 : f32 to vector<32x8xf32>
      %c0_84 = arith.constant 0 : index
      %c0_85 = arith.constant 0 : index
      %70 = vector.load %arg13[%c0_84, %c0_85] : memref<32x8xf32, #tpu.memory_space<vmem>>, vector<32x8xf32>
      tpu.vector_store %arg13[%c0_84, %c0_85], %69 {strides = array<i32>} : memref<32x8xf32, #tpu.memory_space<vmem>>, vector<32x8xf32>,
    } else {
    }
    %c0 = arith.constant 0 : index
    %c0_1 = arith.constant 0 : index
    %3 = vector.load %arg2[%c0, %c0_1] : memref<32x16xbf16, #tpu.memory_space<vmem>>, vector<32x16xbf16>
    %c0_2 = arith.constant 0 : index
    %c0_3 = arith.constant 0 : index
    %4 = vector.load %arg13[%c0_2, %c0_3] : memref<32x8xf32, #tpu.memory_space<vmem>>, vector<32x8xf32>
    %c0_4 = arith.constant 0 : index
    %c0_5 = arith.constant 0 : index
    %c0_6 = arith.constant 0 : index
    %5 = vector.load %arg11[%c0_4, %c0_5, %c0_6] : memref<9x16x8xbf16, #tpu.memory_space<vmem>>, vector<1x16x8xbf16>
    %6 = vector.shape_cast %5 : vector<1x16x8xbf16> to vector<16x8xbf16>
    %cst = arith.constant dense<0.000000e+00> : vector<32x8xf32>
    %7 = tpu.matmul %3, %6, %cst {dimension_numbers = #tpu.dot_dimension_numbers<[1], [0], [0], [1], [0, 0, 1, 1], [], []>} : vector<32x16xbf16>, vector<16x8xbf16>, vector<32x8xf32> -> vector<32x8xf32>
    %8 = arith.addf %4, %7 : vector<32x8xf32>
    %c0_7 = arith.constant 0 : index
    %c0_8 = arith.constant 0 : index
    %9 = vector.load %arg13[%c0_7, %c0_8] : memref<32x8xf32, #tpu.memory_space<vmem>>, vector<32x8xf32>
    tpu.vector_store %arg13[%c0_7, %c0_8], %8 {strides = array<i32>} : memref<32x8xf32, #tpu.memory_space<vmem>>, vector<32x8xf32>,
    %c0_9 = arith.constant 0 : index
    %c0_10 = arith.constant 0 : index
    %10 = vector.load %arg3[%c0_9, %c0_10] : memref<32x16xbf16, #tpu.memory_space<vmem>>, vector<32x16xbf16>
    %c0_11 = arith.constant 0 : index
    %c0_12 = arith.constant 0 : index
    %11 = vector.load %arg13[%c0_11, %c0_12] : memref<32x8xf32, #tpu.memory_space<vmem>>, vector<32x8xf32>
    %c1 = arith.constant 1 : index
    %c0_13 = arith.constant 0 : index
    %c0_14 = arith.constant 0 : index
    %12 = vector.load %arg11[%c1, %c0_13, %c0_14] : memref<9x16x8xbf16, #tpu.memory_space<vmem>>, vector<1x16x8xbf16>
    %13 = vector.shape_cast %12 : vector<1x16x8xbf16> to vector<16x8xbf16>
    %cst_15 = arith.constant dense<0.000000e+00> : vector<32x8xf32>
    %14 = tpu.matmul %10, %13, %cst_15 {dimension_numbers = #tpu.dot_dimension_numbers<[1], [0], [0], [1], [0, 0, 1, 1], [], []>} : vector<32x16xbf16>, vector<16x8xbf16>, vector<32x8xf32> -> vector<32x8xf32>
    %15 = arith.addf %11, %14 : vector<32x8xf32>
    %c0_16 = arith.constant 0 : index
    %c0_17 = arith.constant 0 : index
    %16 = vector.load %arg13[%c0_16, %c0_17] : memref<32x8xf32, #tpu.memory_space<vmem>>, vector<32x8xf32>
    tpu.vector_store %arg13[%c0_16, %c0_17], %15 {strides = array<i32>} : memref<32x8xf32, #tpu.memory_space<vmem>>, vector<32x8xf32>,
    %c0_18 = arith.constant 0 : index
    %c0_19 = arith.constant 0 : index
    %17 = vector.load %arg4[%c0_18, %c0_19] : memref<32x16xbf16, #tpu.memory_space<vmem>>, vector<32x16xbf16>
    %c0_20 = arith.constant 0 : index
    %c0_21 = arith.constant 0 : index
    %18 = vector.load %arg13[%c0_20, %c0_21] : memref<32x8xf32, #tpu.memory_space<vmem>>, vector<32x8xf32>
    %c2 = arith.constant 2 : index
    %c0_22 = arith.constant 0 : index
    %c0_23 = arith.constant 0 : index
    %19 = vector.load %arg11[%c2, %c0_22, %c0_23] : memref<9x16x8xbf16, #tpu.memory_space<vmem>>, vector<1x16x8xbf16>
    %20 = vector.shape_cast %19 : vector<1x16x8xbf16> to vector<16x8xbf16>
    %cst_24 = arith.constant dense<0.000000e+00> : vector<32x8xf32>
    %21 = tpu.matmul %17, %20, %cst_24 {dimension_numbers = #tpu.dot_dimension_numbers<[1], [0], [0], [1], [0, 0, 1, 1], [], []>} : vector<32x16xbf16>, vector<16x8xbf16>, vector<32x8xf32> -> vector<32x8xf32>
    %22 = arith.addf %18, %21 : vector<32x8xf32>
    %c0_25 = arith.constant 0 : index
    %c0_26 = arith.constant 0 : index
    %23 = vector.load %arg13[%c0_25, %c0_26] : memref<32x8xf32, #tpu.memory_space<vmem>>, vector<32x8xf32>
    tpu.vector_store %arg13[%c0_25, %c0_26], %22 {strides = array<i32>} : memref<32x8xf32, #tpu.memory_space<vmem>>, vector<32x8xf32>,
    %c0_27 = arith.constant 0 : index
    %c0_28 = arith.constant 0 : index
    %24 = vector.load %arg5[%c0_27, %c0_28] : memref<32x16xbf16, #tpu.memory_space<vmem>>, vector<32x16xbf16>
    %c0_29 = arith.constant 0 : index
    %c0_30 = arith.constant 0 : index
    %25 = vector.load %arg13[%c0_29, %c0_30] : memref<32x8xf32, #tpu.memory_space<vmem>>, vector<32x8xf32>
    %c3 = arith.constant 3 : index
    %c0_31 = arith.constant 0 : index
    %c0_32 = arith.constant 0 : index
    %26 = vector.load %arg11[%c3, %c0_31, %c0_32] : memref<9x16x8xbf16, #tpu.memory_space<vmem>>, vector<1x16x8xbf16>
    %27 = vector.shape_cast %26 : vector<1x16x8xbf16> to vector<16x8xbf16>
    %cst_33 = arith.constant dense<0.000000e+00> : vector<32x8xf32>
    %28 = tpu.matmul %24, %27, %cst_33 {dimension_numbers = #tpu.dot_dimension_numbers<[1], [0], [0], [1], [0, 0, 1, 1], [], []>} : vector<32x16xbf16>, vector<16x8xbf16>, vector<32x8xf32> -> vector<32x8xf32>
    %29 = arith.addf %25, %28 : vector<32x8xf32>
    %c0_34 = arith.constant 0 : index
    %c0_35 = arith.constant 0 : index
    %30 = vector.load %arg13[%c0_34, %c0_35] : memref<32x8xf32, #tpu.memory_space<vmem>>, vector<32x8xf32>
    tpu.vector_store %arg13[%c0_34, %c0_35], %29 {strides = array<i32>} : memref<32x8xf32, #tpu.memory_space<vmem>>, vector<32x8xf32>,
    %c0_36 = arith.constant 0 : index
    %c0_37 = arith.constant 0 : index
    %31 = vector.load %arg6[%c0_36, %c0_37] : memref<32x16xbf16, #tpu.memory_space<vmem>>, vector<32x16xbf16>
    %c0_38 = arith.constant 0 : index
    %c0_39 = arith.constant 0 : index
    %32 = vector.load %arg13[%c0_38, %c0_39] : memref<32x8xf32, #tpu.memory_space<vmem>>, vector<32x8xf32>
    %c4 = arith.constant 4 : index
    %c0_40 = arith.constant 0 : index
    %c0_41 = arith.constant 0 : index
    %33 = vector.load %arg11[%c4, %c0_40, %c0_41] : memref<9x16x8xbf16, #tpu.memory_space<vmem>>, vector<1x16x8xbf16>
    %34 = vector.shape_cast %33 : vector<1x16x8xbf16> to vector<16x8xbf16>
    %cst_42 = arith.constant dense<0.000000e+00> : vector<32x8xf32>
    %35 = tpu.matmul %31, %34, %cst_42 {dimension_numbers = #tpu.dot_dimension_numbers<[1], [0], [0], [1], [0, 0, 1, 1], [], []>} : vector<32x16xbf16>, vector<16x8xbf16>, vector<32x8xf32> -> vector<32x8xf32>
    %36 = arith.addf %32, %35 : vector<32x8xf32>
    %c0_43 = arith.constant 0 : index
    %c0_44 = arith.constant 0 : index
    %37 = vector.load %arg13[%c0_43, %c0_44] : memref<32x8xf32, #tpu.memory_space<vmem>>, vector<32x8xf32>
    tpu.vector_store %arg13[%c0_43, %c0_44], %36 {strides = array<i32>} : memref<32x8xf32, #tpu.memory_space<vmem>>, vector<32x8xf32>,
    %c0_45 = arith.constant 0 : index
    %c0_46 = arith.constant 0 : index
    %38 = vector.load %arg7[%c0_45, %c0_46] : memref<32x16xbf16, #tpu.memory_space<vmem>>, vector<32x16xbf16>
    %c0_47 = arith.constant 0 : index
    %c0_48 = arith.constant 0 : index
    %39 = vector.load %arg13[%c0_47, %c0_48] : memref<32x8xf32, #tpu.memory_space<vmem>>, vector<32x8xf32>
    %c5 = arith.constant 5 : index
    %c0_49 = arith.constant 0 : index
    %c0_50 = arith.constant 0 : index
    %40 = vector.load %arg11[%c5, %c0_49, %c0_50] : memref<9x16x8xbf16, #tpu.memory_space<vmem>>, vector<1x16x8xbf16>
    %41 = vector.shape_cast %40 : vector<1x16x8xbf16> to vector<16x8xbf16>
    %cst_51 = arith.constant dense<0.000000e+00> : vector<32x8xf32>
    %42 = tpu.matmul %38, %41, %cst_51 {dimension_numbers = #tpu.dot_dimension_numbers<[1], [0], [0], [1], [0, 0, 1, 1], [], []>} : vector<32x16xbf16>, vector<16x8xbf16>, vector<32x8xf32> -> vector<32x8xf32>
    %43 = arith.addf %39, %42 : vector<32x8xf32>
    %c0_52 = arith.constant 0 : index
    %c0_53 = arith.constant 0 : index
    %44 = vector.load %arg13[%c0_52, %c0_53] : memref<32x8xf32, #tpu.memory_space<vmem>>, vector<32x8xf32>
    tpu.vector_store %arg13[%c0_52, %c0_53], %43 {strides = array<i32>} : memref<32x8xf32, #tpu.memory_space<vmem>>, vector<32x8xf32>,
    %c0_54 = arith.constant 0 : index
    %c0_55 = arith.constant 0 : index
    %45 = vector.load %arg8[%c0_54, %c0_55] : memref<32x16xbf16, #tpu.memory_space<vmem>>, vector<32x16xbf16>
    %c0_56 = arith.constant 0 : index
    %c0_57 = arith.constant 0 : index
    %46 = vector.load %arg13[%c0_56, %c0_57] : memref<32x8xf32, #tpu.memory_space<vmem>>, vector<32x8xf32>
    %c6 = arith.constant 6 : index
    %c0_58 = arith.constant 0 : index
    %c0_59 = arith.constant 0 : index
    %47 = vector.load %arg11[%c6, %c0_58, %c0_59] : memref<9x16x8xbf16, #tpu.memory_space<vmem>>, vector<1x16x8xbf16>
    %48 = vector.shape_cast %47 : vector<1x16x8xbf16> to vector<16x8xbf16>
    %cst_60 = arith.constant dense<0.000000e+00> : vector<32x8xf32>
    %49 = tpu.matmul %45, %48, %cst_60 {dimension_numbers = #tpu.dot_dimension_numbers<[1], [0], [0], [1], [0, 0, 1, 1], [], []>} : vector<32x16xbf16>, vector<16x8xbf16>, vector<32x8xf32> -> vector<32x8xf32>
    %50 = arith.addf %46, %49 : vector<32x8xf32>
    %c0_61 = arith.constant 0 : index
    %c0_62 = arith.constant 0 : index
    %51 = vector.load %arg13[%c0_61, %c0_62] : memref<32x8xf32, #tpu.memory_space<vmem>>, vector<32x8xf32>
    tpu.vector_store %arg13[%c0_61, %c0_62], %50 {strides = array<i32>} : memref<32x8xf32, #tpu.memory_space<vmem>>, vector<32x8xf32>,
    %c0_63 = arith.constant 0 : index
    %c0_64 = arith.constant 0 : index
    %52 = vector.load %arg9[%c0_63, %c0_64] : memref<32x16xbf16, #tpu.memory_space<vmem>>, vector<32x16xbf16>
    %c0_65 = arith.constant 0 : index
    %c0_66 = arith.constant 0 : index
    %53 = vector.load %arg13[%c0_65, %c0_66] : memref<32x8xf32, #tpu.memory_space<vmem>>, vector<32x8xf32>
    %c7 = arith.constant 7 : index
    %c0_67 = arith.constant 0 : index
    %c0_68 = arith.constant 0 : index
    %54 = vector.load %arg11[%c7, %c0_67, %c0_68] : memref<9x16x8xbf16, #tpu.memory_space<vmem>>, vector<1x16x8xbf16>
    %55 = vector.shape_cast %54 : vector<1x16x8xbf16> to vector<16x8xbf16>
    %cst_69 = arith.constant dense<0.000000e+00> : vector<32x8xf32>
    %56 = tpu.matmul %52, %55, %cst_69 {dimension_numbers = #tpu.dot_dimension_numbers<[1], [0], [0], [1], [0, 0, 1, 1], [], []>} : vector<32x16xbf16>, vector<16x8xbf16>, vector<32x8xf32> -> vector<32x8xf32>
    %57 = arith.addf %53, %56 : vector<32x8xf32>
    %c0_70 = arith.constant 0 : index
    %c0_71 = arith.constant 0 : index
    %58 = vector.load %arg13[%c0_70, %c0_71] : memref<32x8xf32, #tpu.memory_space<vmem>>, vector<32x8xf32>
    tpu.vector_store %arg13[%c0_70, %c0_71], %57 {strides = array<i32>} : memref<32x8xf32, #tpu.memory_space<vmem>>, vector<32x8xf32>,
    %c0_72 = arith.constant 0 : index
    %c0_73 = arith.constant 0 : index
    %59 = vector.load %arg10[%c0_72, %c0_73] : memref<32x16xbf16, #tpu.memory_space<vmem>>, vector<32x16xbf16>
    %c0_74 = arith.constant 0 : index
    %c0_75 = arith.constant 0 : index
    %60 = vector.load %arg13[%c0_74, %c0_75] : memref<32x8xf32, #tpu.memory_space<vmem>>, vector<32x8xf32>
    %c8 = arith.constant 8 : index
    %c0_76 = arith.constant 0 : index
    %c0_77 = arith.constant 0 : index
    %61 = vector.load %arg11[%c8, %c0_76, %c0_77] : memref<9x16x8xbf16, #tpu.memory_space<vmem>>, vector<1x16x8xbf16>
    %62 = vector.shape_cast %61 : vector<1x16x8xbf16> to vector<16x8xbf16>
    %cst_78 = arith.constant dense<0.000000e+00> : vector<32x8xf32>
    %63 = tpu.matmul %59, %62, %cst_78 {dimension_numbers = #tpu.dot_dimension_numbers<[1], [0], [0], [1], [0, 0, 1, 1], [], []>} : vector<32x16xbf16>, vector<16x8xbf16>, vector<32x8xf32> -> vector<32x8xf32>
    %64 = arith.addf %60, %63 : vector<32x8xf32>
    %c0_79 = arith.constant 0 : index
    %c0_80 = arith.constant 0 : index
    %65 = vector.load %arg13[%c0_79, %c0_80] : memref<32x8xf32, #tpu.memory_space<vmem>>, vector<32x8xf32>
    tpu.vector_store %arg13[%c0_79, %c0_80], %64 {strides = array<i32>} : memref<32x8xf32, #tpu.memory_space<vmem>>, vector<32x8xf32>,
    %c0_i32_81 = arith.constant 0 : i32
    %66 = arith.cmpi eq, %arg1, %c0_i32_81 : i32
    %67 = arith.extui %66 : i1 to i32
    %c0_i32_82 = arith.constant 0 : i32
    %68 = arith.cmpi ne, %67, %c0_i32_82 : i32
    scf.if %68 {
      %c0_83 = arith.constant 0 : index
      %c0_84 = arith.constant 0 : index
      %69 = vector.load %arg13[%c0_83, %c0_84] : memref<32x8xf32, #tpu.memory_space<vmem>>, vector<32x8xf32>
      %70 = arith.truncf %69 : vector<32x8xf32> to vector<32x8xbf16>
      %c0_85 = arith.constant 0 : index
      %c0_86 = arith.constant 0 : index
      %71 = vector.load %arg12[%c0_85, %c0_86] : memref<32x8xbf16, #tpu.memory_space<vmem>>, vector<32x8xbf16>
      tpu.vector_store %arg12[%c0_85, %c0_86], %70 {strides = array<i32>} : memref<32x8xbf16, #tpu.memory_space<vmem>>, vector<32x8xbf16>,
    } else {
    }
    return
  }
  func.func @transform_0(%arg0: i32, %arg1: i32) -> (i32, i32) {
    %c0_i32 = arith.constant 0 : i32
    return %arg0, %arg1 : i32, i32
  }
  func.func @transform_1(%arg0: i32, %arg1: i32) -> (i32, i32) {
    %c0_i32 = arith.constant 0 : i32
    return %arg0, %arg1 : i32, i32
  }
  func.func @transform_2(%arg0: i32, %arg1: i32) -> (i32, i32) {
    %c0_i32 = arith.constant 0 : i32
    return %arg0, %arg1 : i32, i32
  }
  func.func @transform_3(%arg0: i32, %arg1: i32) -> (i32, i32) {
    %c0_i32 = arith.constant 0 : i32
    return %arg0, %arg1 : i32, i32
  }
  func.func @transform_4(%arg0: i32, %arg1: i32) -> (i32, i32) {
    %c0_i32 = arith.constant 0 : i32
    return %arg0, %arg1 : i32, i32
  }
  func.func @transform_5(%arg0: i32, %arg1: i32) -> (i32, i32) {
    %c0_i32 = arith.constant 0 : i32
    return %arg0, %arg1 : i32, i32
  }
  func.func @transform_6(%arg0: i32, %arg1: i32) -> (i32, i32) {
    %c0_i32 = arith.constant 0 : i32
    return %arg0, %arg1 : i32, i32
  }
  func.func @transform_7(%arg0: i32, %arg1: i32) -> (i32, i32) {
    %c0_i32 = arith.constant 0 : i32
    return %arg0, %arg1 : i32, i32
  }
  func.func @transform_8(%arg0: i32, %arg1: i32) -> (i32, i32) {
    %c0_i32 = arith.constant 0 : i32
    return %arg0, %arg1 : i32, i32
  }
  func.func @transform_9(%arg0: i32, %arg1: i32) -> (i32, i32, i32) {
    %c0_i32 = arith.constant 0 : i32
    %c0_i32_0 = arith.constant 0 : i32
    %c0_i32_1 = arith.constant 0 : i32
    return %c0_i32, %arg1, %c0_i32_0 : i32, i32, i32
  }
  func.func @transform_10(%arg0: i32, %arg1: i32) -> (i32, i32) {
    %c0_i32 = arith.constant 0 : i32
    %c0_i32_0 = arith.constant 0 : i32
    return %arg0, %c0_i32 : i32, i32
  }
}

module attributes {stable_mosaic.version = 11 : i64} {
  func.func @_moments_kernel(%arg0: i32, %arg1: memref<32x8xbf16, #tpu.memory_space<vmem>>, %arg2: memref<1x8xf32, #tpu.memory_space<vmem>>, %arg3: memref<1x8xf32, #tpu.memory_space<vmem>>) attributes {dimension_semantics = [#tpu.dimension_semantics<arbitrary>], iteration_bounds = array<i64: 1>, scalar_prefetch = 0 : i64, scratch_operands = 0 : i64, tpu.core_type = #tpu.core_type<tc>, window_params = [{transform_indices = @transform_0, window_bounds = array<i64: 32, 8>}, {pipeline_mode = #tpu.pipeline_mode<synchronous>, transform_indices = @transform_1, window_bounds = array<i64: 1, 8>}, {pipeline_mode = #tpu.pipeline_mode<synchronous>, transform_indices = @transform_2, window_bounds = array<i64: 1, 8>}]} {
    %c0_i32 = arith.constant 0 : i32
    %0 = arith.cmpi eq, %arg0, %c0_i32 : i32
    %1 = arith.extui %0 : i1 to i32
    %c0_i32_0 = arith.constant 0 : i32
    %2 = arith.cmpi ne, %1, %c0_i32_0 : i32
    scf.if %2 {
      %cst_11 = arith.constant 0.000000e+00 : f32
      %16 = vector.broadcast %cst_11 : f32 to vector<1x8xf32>
      %c0_12 = arith.constant 0 : index
      %c0_13 = arith.constant 0 : index
      %17 = vector.load %arg2[%c0_12, %c0_13] : memref<1x8xf32, #tpu.memory_space<vmem>>, vector<1x8xf32>
      tpu.vector_store %arg2[%c0_12, %c0_13], %16 {strides = array<i32>} : memref<1x8xf32, #tpu.memory_space<vmem>>, vector<1x8xf32>,
      %cst_14 = arith.constant 0.000000e+00 : f32
      %18 = vector.broadcast %cst_14 : f32 to vector<1x8xf32>
      %c0_15 = arith.constant 0 : index
      %c0_16 = arith.constant 0 : index
      %19 = vector.load %arg3[%c0_15, %c0_16] : memref<1x8xf32, #tpu.memory_space<vmem>>, vector<1x8xf32>
      tpu.vector_store %arg3[%c0_15, %c0_16], %18 {strides = array<i32>} : memref<1x8xf32, #tpu.memory_space<vmem>>, vector<1x8xf32>,
    } else {
    }
    %c0 = arith.constant 0 : index
    %c0_1 = arith.constant 0 : index
    %3 = vector.load %arg1[%c0, %c0_1] : memref<32x8xbf16, #tpu.memory_space<vmem>>, vector<32x8xbf16>
    %4 = arith.extf %3 : vector<32x8xbf16> to vector<32x8xf32>
    %c0_2 = arith.constant 0 : index
    %c0_3 = arith.constant 0 : index
    %5 = vector.load %arg2[%c0_2, %c0_3] : memref<1x8xf32, #tpu.memory_space<vmem>>, vector<1x8xf32>
    %cst = arith.constant dense<0.000000e+00> : vector<8xf32>
    %6 = vector.multi_reduction <add>, %4, %cst [0] : vector<32x8xf32> to vector<8xf32>
    %7 = vector.shape_cast %6 : vector<8xf32> to vector<1x8xf32>
    %8 = arith.addf %5, %7 : vector<1x8xf32>
    %c0_4 = arith.constant 0 : index
    %c0_5 = arith.constant 0 : index
    %9 = vector.load %arg2[%c0_4, %c0_5] : memref<1x8xf32, #tpu.memory_space<vmem>>, vector<1x8xf32>
    tpu.vector_store %arg2[%c0_4, %c0_5], %8 {strides = array<i32>} : memref<1x8xf32, #tpu.memory_space<vmem>>, vector<1x8xf32>,
    %c0_6 = arith.constant 0 : index
    %c0_7 = arith.constant 0 : index
    %10 = vector.load %arg3[%c0_6, %c0_7] : memref<1x8xf32, #tpu.memory_space<vmem>>, vector<1x8xf32>
    %11 = arith.mulf %4, %4 : vector<32x8xf32>
    %cst_8 = arith.constant dense<0.000000e+00> : vector<8xf32>
    %12 = vector.multi_reduction <add>, %11, %cst_8 [0] : vector<32x8xf32> to vector<8xf32>
    %13 = vector.shape_cast %12 : vector<8xf32> to vector<1x8xf32>
    %14 = arith.addf %10, %13 : vector<1x8xf32>
    %c0_9 = arith.constant 0 : index
    %c0_10 = arith.constant 0 : index
    %15 = vector.load %arg3[%c0_9, %c0_10] : memref<1x8xf32, #tpu.memory_space<vmem>>, vector<1x8xf32>
    tpu.vector_store %arg3[%c0_9, %c0_10], %14 {strides = array<i32>} : memref<1x8xf32, #tpu.memory_space<vmem>>, vector<1x8xf32>,
    return
  }
  func.func @transform_0(%arg0: i32) -> (i32, i32) {
    %c0_i32 = arith.constant 0 : i32
    %c0_i32_0 = arith.constant 0 : i32
    return %arg0, %c0_i32 : i32, i32
  }
  func.func @transform_1(%arg0: i32) -> (i32, i32) {
    %c0_i32 = arith.constant 0 : i32
    %c0_i32_0 = arith.constant 0 : i32
    %c0_i32_1 = arith.constant 0 : i32
    return %c0_i32, %c0_i32_0 : i32, i32
  }
  func.func @transform_2(%arg0: i32) -> (i32, i32) {
    %c0_i32 = arith.constant 0 : i32
    %c0_i32_0 = arith.constant 0 : i32
    %c0_i32_1 = arith.constant 0 : i32
    return %c0_i32, %c0_i32_0 : i32, i32
  }
}

module attributes {stable_mosaic.version = 11 : i64} {
  func.func @_global_pool_kernel(%arg0: i32, %arg1: memref<2x16x32xbf16, #tpu.memory_space<vmem>>, %arg2: memref<1x1x32xf32, #tpu.memory_space<vmem>>, %arg3: memref<1x1x32xf32, #tpu.memory_space<vmem>>, %arg4: memref<2x32xbf16, #tpu.memory_space<vmem>>, %arg5: memref<2x32xf32, #tpu.memory_space<vmem>>) attributes {dimension_semantics = [#tpu.dimension_semantics<arbitrary>], iteration_bounds = array<i64: 1>, scalar_prefetch = 0 : i64, scratch_operands = 1 : i64, tpu.core_type = #tpu.core_type<tc>, window_params = [{transform_indices = @transform_0, window_bounds = array<i64: 2, 16, 32>}, {pipeline_mode = #tpu.pipeline_mode<synchronous>, transform_indices = @transform_1, window_bounds = array<i64: 1, 1, 32>}, {pipeline_mode = #tpu.pipeline_mode<synchronous>, transform_indices = @transform_2, window_bounds = array<i64: 1, 1, 32>}, {pipeline_mode = #tpu.pipeline_mode<synchronous>, transform_indices = @transform_3, window_bounds = array<i64: 2, 32>}]} {
    %c0_i32 = arith.constant 0 : i32
    %0 = arith.cmpi eq, %arg0, %c0_i32 : i32
    %1 = arith.extui %0 : i1 to i32
    %c0_i32_0 = arith.constant 0 : i32
    %2 = arith.cmpi ne, %1, %c0_i32_0 : i32
    scf.if %2 {
      %cst_16 = arith.constant 0.000000e+00 : f32
      %20 = vector.broadcast %cst_16 : f32 to vector<2x32xf32>
      %c0_17 = arith.constant 0 : index
      %c0_18 = arith.constant 0 : index
      %21 = vector.load %arg5[%c0_17, %c0_18] : memref<2x32xf32, #tpu.memory_space<vmem>>, vector<2x32xf32>
      tpu.vector_store %arg5[%c0_17, %c0_18], %20 {strides = array<i32>} : memref<2x32xf32, #tpu.memory_space<vmem>>, vector<2x32xf32>,
    } else {
    }
    %c0 = arith.constant 0 : index
    %c0_1 = arith.constant 0 : index
    %c0_2 = arith.constant 0 : index
    %3 = vector.load %arg1[%c0, %c0_1, %c0_2] : memref<2x16x32xbf16, #tpu.memory_space<vmem>>, vector<2x16x32xbf16>
    %4 = arith.extf %3 : vector<2x16x32xbf16> to vector<2x16x32xf32>
    %c0_3 = arith.constant 0 : index
    %c0_4 = arith.constant 0 : index
    %c0_5 = arith.constant 0 : index
    %5 = vector.load %arg2[%c0_3, %c0_4, %c0_5] : memref<1x1x32xf32, #tpu.memory_space<vmem>>, vector<1x1x32xf32>
    %6 = vector.broadcast %5 : vector<1x1x32xf32> to vector<2x16x32xf32>
    %7 = arith.mulf %4, %6 : vector<2x16x32xf32>
    %c0_6 = arith.constant 0 : index
    %c0_7 = arith.constant 0 : index
    %c0_8 = arith.constant 0 : index
    %8 = vector.load %arg3[%c0_6, %c0_7, %c0_8] : memref<1x1x32xf32, #tpu.memory_space<vmem>>, vector<1x1x32xf32>
    %9 = vector.broadcast %8 : vector<1x1x32xf32> to vector<2x16x32xf32>
    %10 = arith.addf %7, %9 : vector<2x16x32xf32>
    %cst = arith.constant 0.000000e+00 : f32
    %11 = vector.broadcast %cst : f32 to vector<2x16x32xf32>
    %12 = arith.maximumf %10, %11 : vector<2x16x32xf32>
    %c0_9 = arith.constant 0 : index
    %c0_10 = arith.constant 0 : index
    %13 = vector.load %arg5[%c0_9, %c0_10] : memref<2x32xf32, #tpu.memory_space<vmem>>, vector<2x32xf32>
    %cst_11 = arith.constant dense<0.000000e+00> : vector<2x32xf32>
    %14 = vector.multi_reduction <add>, %12, %cst_11 [1] : vector<2x16x32xf32> to vector<2x32xf32>
    %15 = arith.addf %13, %14 : vector<2x32xf32>
    %c0_12 = arith.constant 0 : index
    %c0_13 = arith.constant 0 : index
    %16 = vector.load %arg5[%c0_12, %c0_13] : memref<2x32xf32, #tpu.memory_space<vmem>>, vector<2x32xf32>
    tpu.vector_store %arg5[%c0_12, %c0_13], %15 {strides = array<i32>} : memref<2x32xf32, #tpu.memory_space<vmem>>, vector<2x32xf32>,
    %c0_i32_14 = arith.constant 0 : i32
    %17 = arith.cmpi eq, %arg0, %c0_i32_14 : i32
    %18 = arith.extui %17 : i1 to i32
    %c0_i32_15 = arith.constant 0 : i32
    %19 = arith.cmpi ne, %18, %c0_i32_15 : i32
    scf.if %19 {
      %c0_16 = arith.constant 0 : index
      %c0_17 = arith.constant 0 : index
      %20 = vector.load %arg5[%c0_16, %c0_17] : memref<2x32xf32, #tpu.memory_space<vmem>>, vector<2x32xf32>
      %cst_18 = arith.constant 6.250000e-02 : f32
      %21 = vector.broadcast %cst_18 : f32 to vector<2x32xf32>
      %22 = arith.mulf %20, %21 : vector<2x32xf32>
      %23 = arith.truncf %22 : vector<2x32xf32> to vector<2x32xbf16>
      %c0_19 = arith.constant 0 : index
      %c0_20 = arith.constant 0 : index
      %24 = vector.load %arg4[%c0_19, %c0_20] : memref<2x32xbf16, #tpu.memory_space<vmem>>, vector<2x32xbf16>
      tpu.vector_store %arg4[%c0_19, %c0_20], %23 {strides = array<i32>} : memref<2x32xbf16, #tpu.memory_space<vmem>>, vector<2x32xbf16>,
    } else {
    }
    return
  }
  func.func @transform_0(%arg0: i32) -> (i32, i32, i32) {
    %c0_i32 = arith.constant 0 : i32
    %c0_i32_0 = arith.constant 0 : i32
    %c0_i32_1 = arith.constant 0 : i32
    return %c0_i32, %arg0, %c0_i32_0 : i32, i32, i32
  }
  func.func @transform_1(%arg0: i32) -> (i32, i32, i32) {
    %c0_i32 = arith.constant 0 : i32
    %c0_i32_0 = arith.constant 0 : i32
    %c0_i32_1 = arith.constant 0 : i32
    %c0_i32_2 = arith.constant 0 : i32
    return %c0_i32, %c0_i32_0, %c0_i32_1 : i32, i32, i32
  }
  func.func @transform_2(%arg0: i32) -> (i32, i32, i32) {
    %c0_i32 = arith.constant 0 : i32
    %c0_i32_0 = arith.constant 0 : i32
    %c0_i32_1 = arith.constant 0 : i32
    %c0_i32_2 = arith.constant 0 : i32
    return %c0_i32, %c0_i32_0, %c0_i32_1 : i32, i32, i32
  }
  func.func @transform_3(%arg0: i32) -> (i32, i32) {
    %c0_i32 = arith.constant 0 : i32
    %c0_i32_0 = arith.constant 0 : i32
    %c0_i32_1 = arith.constant 0 : i32
    return %c0_i32, %c0_i32_0 : i32, i32
  }
}

module attributes {stable_mosaic.version = 11 : i64} {
  func.func @kernel(%arg0: i32, %arg1: i32, %arg2: memref<2x32xbf16, #tpu.memory_space<vmem>>, %arg3: memref<1x32x10xbf16, #tpu.memory_space<vmem>>, %arg4: memref<2x10xf32, #tpu.memory_space<vmem>>, %arg5: memref<2x10xf32, #tpu.memory_space<vmem>>) attributes {dimension_semantics = [#tpu.dimension_semantics<parallel>, #tpu.dimension_semantics<arbitrary>], iteration_bounds = array<i64: 1, 1>, scalar_prefetch = 0 : i64, scratch_operands = 1 : i64, tpu.core_type = #tpu.core_type<tc>, window_params = [{transform_indices = @transform_0, window_bounds = array<i64: 2, 32>}, {transform_indices = @transform_1, window_bounds = array<i64: 1, 32, 10>}, {transform_indices = @transform_2, window_bounds = array<i64: 2, 10>}]} {
    %c0_i32 = arith.constant 0 : i32
    %0 = arith.cmpi eq, %arg1, %c0_i32 : i32
    %1 = arith.extui %0 : i1 to i32
    %c0_i32_0 = arith.constant 0 : i32
    %2 = arith.cmpi ne, %1, %c0_i32_0 : i32
    scf.if %2 {
      %cst_11 = arith.constant 0.000000e+00 : f32
      %13 = vector.broadcast %cst_11 : f32 to vector<2x10xf32>
      %c0_12 = arith.constant 0 : index
      %c0_13 = arith.constant 0 : index
      %14 = vector.load %arg5[%c0_12, %c0_13] : memref<2x10xf32, #tpu.memory_space<vmem>>, vector<2x10xf32>
      tpu.vector_store %arg5[%c0_12, %c0_13], %13 {strides = array<i32>} : memref<2x10xf32, #tpu.memory_space<vmem>>, vector<2x10xf32>,
    } else {
    }
    %c0 = arith.constant 0 : index
    %c0_1 = arith.constant 0 : index
    %3 = vector.load %arg2[%c0, %c0_1] : memref<2x32xbf16, #tpu.memory_space<vmem>>, vector<2x32xbf16>
    %c0_2 = arith.constant 0 : index
    %c0_3 = arith.constant 0 : index
    %4 = vector.load %arg5[%c0_2, %c0_3] : memref<2x10xf32, #tpu.memory_space<vmem>>, vector<2x10xf32>
    %c0_4 = arith.constant 0 : index
    %c0_5 = arith.constant 0 : index
    %c0_6 = arith.constant 0 : index
    %5 = vector.load %arg3[%c0_4, %c0_5, %c0_6] : memref<1x32x10xbf16, #tpu.memory_space<vmem>>, vector<1x32x10xbf16>
    %6 = vector.shape_cast %5 : vector<1x32x10xbf16> to vector<32x10xbf16>
    %cst = arith.constant dense<0.000000e+00> : vector<2x10xf32>
    %7 = tpu.matmul %3, %6, %cst {dimension_numbers = #tpu.dot_dimension_numbers<[1], [0], [0], [1], [0, 0, 1, 1], [], []>} : vector<2x32xbf16>, vector<32x10xbf16>, vector<2x10xf32> -> vector<2x10xf32>
    %8 = arith.addf %4, %7 : vector<2x10xf32>
    %c0_7 = arith.constant 0 : index
    %c0_8 = arith.constant 0 : index
    %9 = vector.load %arg5[%c0_7, %c0_8] : memref<2x10xf32, #tpu.memory_space<vmem>>, vector<2x10xf32>
    tpu.vector_store %arg5[%c0_7, %c0_8], %8 {strides = array<i32>} : memref<2x10xf32, #tpu.memory_space<vmem>>, vector<2x10xf32>,
    %c0_i32_9 = arith.constant 0 : i32
    %10 = arith.cmpi eq, %arg1, %c0_i32_9 : i32
    %11 = arith.extui %10 : i1 to i32
    %c0_i32_10 = arith.constant 0 : i32
    %12 = arith.cmpi ne, %11, %c0_i32_10 : i32
    scf.if %12 {
      %c0_11 = arith.constant 0 : index
      %c0_12 = arith.constant 0 : index
      %13 = vector.load %arg5[%c0_11, %c0_12] : memref<2x10xf32, #tpu.memory_space<vmem>>, vector<2x10xf32>
      %c0_13 = arith.constant 0 : index
      %c0_14 = arith.constant 0 : index
      %14 = vector.load %arg4[%c0_13, %c0_14] : memref<2x10xf32, #tpu.memory_space<vmem>>, vector<2x10xf32>
      tpu.vector_store %arg4[%c0_13, %c0_14], %13 {strides = array<i32>} : memref<2x10xf32, #tpu.memory_space<vmem>>, vector<2x10xf32>,
    } else {
    }
    return
  }
  func.func @transform_0(%arg0: i32, %arg1: i32) -> (i32, i32) {
    %c0_i32 = arith.constant 0 : i32
    return %arg0, %arg1 : i32, i32
  }
  func.func @transform_1(%arg0: i32, %arg1: i32) -> (i32, i32, i32) {
    %c0_i32 = arith.constant 0 : i32
    %c0_i32_0 = arith.constant 0 : i32
    %c0_i32_1 = arith.constant 0 : i32
    return %c0_i32, %arg1, %c0_i32_0 : i32, i32, i32
  }
  func.func @transform_2(%arg0: i32, %arg1: i32) -> (i32, i32) {
    %c0_i32 = arith.constant 0 : i32
    %c0_i32_0 = arith.constant 0 : i32
    return %arg0, %c0_i32 : i32, i32
  }
}

</mosaic_0001>

<bundles_post_ra>
// kernel: densenet_forward.31
= control target key start
LH: loop header
LB: loop body
LE: loop exit
PB: predicated region body
PF: predicated region fallthrough
CT: control target
= control target key end

     0   :  { %vm14_vm0 = vcmask 122880   ;;  %v651_v0 = vmov 0.0   ;;  %vm146_vm1 = vcmask 130048   ;;  %s1446_s1 = inlined_call_operand.vmem [shape: f32[1,16], index: 1, kind: output, shape index: {0}]   ;;  %s1447_s2 = inlined_call_operand.vmem [shape: f32[1,16], index: 2, kind: output, shape index: {1}]   ;;  %s1448_s0 = inlined_call_operand.vmem [shape: bf16[512,16], index: 0, kind: input, shape index: {}]  }
   0x1   :  { %15 = vst.msk [vmem:[%s1446_s1] sm:$0x1] %vm14_vm0, %v651_v0  ;;  %16 = vst.msk [vmem:[%s1447_s2] sm:$0x1] %vm14_vm0, %v651_v0  ;;  %v492_v1 = vld [vmem:[%s1448_s0] sm:$0xff]   ;;  %v619_v2 = vld [vmem:[%s1448_s0 + $0x8] sm:$0xff]  }
   0x2   :  { %v620_v3 = vld [vmem:[%s1448_s0 + $0x10] sm:$0xff]   ;;  %v621_v4 = vld [vmem:[%s1448_s0 + $0x18] sm:$0xff]   ;;  %v622_v5 = vld [vmem:[%s1448_s0 + $0x20] sm:$0xff]   ;;  %v693_v7 = vunpack.c.l.bf16 %v492_v1  ;;  %v695_v8 = vunpack.c.h.bf16 %v492_v1  ;;  %v697_v9 = vunpack.c.l.bf16 %v619_v2  ;;  %v705_v12 = vunpack.c.h.bf16 %v619_v2 }
   0x3   :  { %v623_v6 = vld [vmem:[%s1448_s0 + $0x28] sm:$0xff]   ;;  %v636_v11 = vld [vmem:[%s1448_s0 + $0x90] sm:$0xff]   ;;  %v707_v13 = vunpack.c.l.bf16 %v620_v3  ;;  %v709_v14 = vunpack.c.h.bf16 %v620_v3  ;;  %v711_v15 = vunpack.c.l.bf16 %v621_v4  ;;  %v637_v16 = vld [vmem:[%s1448_s0 + $0x98] sm:$0xff]   ;;  %v719_v18 = vunpack.c.h.bf16 %v621_v4 }
   0x4   :  { %v635_v10 = vld [vmem:[%s1448_s0 + $0x88] sm:$0xff]   ;;  %v638_v17 = vld [vmem:[%s1448_s0 + $0xa0] sm:$0xff]   ;;  %v721_v19 = vunpack.c.l.bf16 %v622_v5  ;;  %v723_v20 = vunpack.c.h.bf16 %v622_v5  ;;  %v725_v21 = vunpack.c.l.bf16 %v623_v6  ;;  %v727_v22 = vunpack.c.h.bf16 %v623_v6  ;;  %v640_v27 = vld [vmem:[%s1448_s0 + $0xb0] sm:$0xff]  }
   0x5   :  { %v729_v23 = vunpack.c.l.bf16 %v635_v10  ;;  %v731_v24 = vunpack.c.h.bf16 %v635_v10  ;;  %v733_v25 = vunpack.c.l.bf16 %v636_v11  ;;  %v639_v26 = vld [vmem:[%s1448_s0 + $0xa8] sm:$0xff]   ;;  %v741_v28 = vunpack.c.h.bf16 %v636_v11  ;;  %v641_v32 = vld [vmem:[%s1448_s0 + $0xb8] sm:$0xff]   ;;  %v642_v34 = vld [vmem:[%s1448_s0 + $0xc0] sm:$0xff]  }
   0x6   :  { %v743_v29 = vunpack.c.l.bf16 %v637_v16  ;;  %v745_v30 = vunpack.c.h.bf16 %v637_v16  ;;  %v747_v31 = vunpack.c.l.bf16 %v638_v17  ;;  %v752_v33 = vunpack.c.h.bf16 %v638_v17  ;;  %v643_v35 = vld [vmem:[%s1448_s0 + $0xc8] sm:$0xff]   ;;  %v644_v42 = vld [vmem:[%s1448_s0 + $0xd0] sm:$0xff]   ;;  %v645_v47 = vld [vmem:[%s1448_s0 + $0xd8] sm:$0xff]  }
   0x7   :  { %v147_v36 = vsel %vm146_vm1, %v693_v7, 0.0  ;;  %v148_v37 = vsel %vm146_vm1, %v695_v8, 0.0  ;;  %v150_v38 = vsel %vm146_vm1, %v697_v9, 0.0  ;;  %v766_v39 = vunpack.c.l.bf16 %v639_v26  ;;  %v646_v48 = vld [vmem:[%s1448_s0 + $0xe0] sm:$0xff]   ;;  %v647_v53 = vld [vmem:[%s1448_s0 + $0xe8] sm:$0xff]   ;;  %v648_v58 = vld [vmem:[%s1448_s0 + $0xf0] sm:$0xff]  }
   0x8   :  { %v768_v40 = vunpack.c.h.bf16 %v639_v26  ;;  %v770_v41 = vunpack.c.l.bf16 %v640_v27  ;;  %v149_v43 = vadd.f32 %v148_v37, %v147_v36  ;;  %v775_v44 = vunpack.c.h.bf16 %v640_v27  ;;  %v649_v59 = vld [vmem:[%s1448_s0 + $0xf8] sm:$0xff]  }
   0x9   :  { %v777_v45 = vunpack.c.l.bf16 %v641_v32  ;;  %v779_v46 = vunpack.c.h.bf16 %v641_v32  ;;  %v152_v49 = vsel %vm146_vm1, %v705_v12, 0.0  ;;  %v789_v50 = vunpack.c.l.bf16 %v642_v34 }
   0xa   :  { %v791_v51 = vunpack.c.h.bf16 %v642_v34  ;;  %v793_v52 = vunpack.c.l.bf16 %v643_v35  ;;  %v151_v54 = vadd.f32 %v150_v38, %v149_v43  ;;  %v798_v55 = vunpack.c.h.bf16 %v643_v35 }
   0xb   :  { %v800_v56 = vunpack.c.l.bf16 %v644_v42  ;;  %v802_v57 = vunpack.c.h.bf16 %v644_v42  ;;  %v154_v60 = vsel %vm146_vm1, %v707_v13, 0.0  ;;  %v812_v61 = vunpack.c.l.bf16 %v645_v47 }
   0xc   :  { %v814_v62 = vunpack.c.h.bf16 %v645_v47  ;;  %v816_v63 = vunpack.c.l.bf16 %v646_v48  ;;  %v153_v0 = vadd.f32 %v152_v49, %v151_v54  ;;  %v818_v1 = vunpack.c.h.bf16 %v646_v48 }
   0xd   :  { %v820_v2 = vunpack.c.l.bf16 %v647_v53  ;;  %v822_v3 = vunpack.c.h.bf16 %v647_v53  ;;  %v156_v4 = vsel %vm146_vm1, %v709_v14, 0.0  ;;  %v826_v5 = vunpack.c.l.bf16 %v648_v58 }
   0xe   :  { %1471 = vst [vmem:[#allocation2_spill] sm:$0xff] %v814_v62  ;;  %1472 = vst [vmem:[#allocation3_spill] sm:$0xff] %v816_v63  ;;  %v828_v6 = vunpack.c.h.bf16 %v648_v58  ;;  %v830_v10 = vunpack.c.l.bf16 %v649_v59  ;;  %v155_v11 = vadd.f32 %v154_v60, %v153_v0  ;;  %v832_v16 = vunpack.c.h.bf16 %v649_v59 }
   0xf   :  { %1473 = vst [vmem:[#allocation4_spill] sm:$0xff] %v818_v1  ;;  %1474 = vst [vmem:[#allocation5_spill] sm:$0xff] %v820_v2  ;;  %v158_v17 = vsel %vm146_vm1, %v711_v15, 0.0  ;;  %v160_v26 = vsel %vm146_vm1, %v719_v18, 0.0  ;;  %v162_v27 = vsel %vm146_vm1, %v721_v19, 0.0  ;;  %v164_v34 = vsel %vm146_vm1, %v723_v20, 0.0 }
  0x10   :  { %1475 = vst [vmem:[#allocation6_spill] sm:$0xff] %v822_v3  ;;  %1476 = vst [vmem:[#allocation7_spill] sm:$0xff] %v826_v5  ;;  %v157_v32 = vadd.f32 %v156_v4, %v155_v11  ;;  %v166_v35 = vsel %vm146_vm1, %v725_v21, 0.0  ;;  %v846_v36 = vsel %vm146_vm1, %v729_v23, 0.0  ;;  %v850_v37 = vsel %vm146_vm1, %v731_v24, 0.0 }
  0x11   :  { %1477 = vst [vmem:[#allocation8_spill] sm:$0xff] %v828_v6  ;;  %1478 = vst [vmem:[#allocation9_spill] sm:$0xff] %v830_v10  ;;  %v854_v38 = vsel %vm146_vm1, %v733_v25, 0.0  ;;  %v858_v42 = vsel %vm146_vm1, %v741_v28, 0.0  ;;  %v862_v43 = vsel %vm146_vm1, %v743_v29, 0.0  ;;  %v866_v48 = vsel %vm146_vm1, %v745_v30, 0.0 }
  0x12   :  { %1479 = vst [vmem:[#allocation10_spill] sm:$0xff] %v832_v16  ;;  %1480 = vst [vmem:[#allocation11_spill] sm:$0xff] %v846_v36  ;;  %v159_v47 = vadd.f32 %v158_v17, %v157_v32  ;;  %v870_v49 = vsel %vm146_vm1, %v747_v31, 0.0  ;;  %v874_v53 = vsel %vm146_vm1, %v752_v33, 0.0  ;;  %v878_v54 = vsel %vm146_vm1, %v766_v39, 0.0 }
  0x13   :  { %1481 = vst [vmem:[#allocation12_spill] sm:$0xff] %v850_v37  ;;  %1482 = vst [vmem:[#allocation13_spill] sm:$0xff] %v854_v38  ;;  %v882_v58 = vsel %vm146_vm1, %v768_v40, 0.0  ;;  %v886_v59 = vsel %vm146_vm1, %v770_v41, 0.0  ;;  %v890_v60 = vsel %vm146_vm1, %v775_v44, 0.0  ;;  %v894_v4 = vsel %vm146_vm1, %v777_v45, 0.0 }
  0x14   :  { %1483 = vst [vmem:[#allocation14_spill] sm:$0xff] %v858_v42  ;;  %1484 = vst [vmem:[#allocation15_spill] sm:$0xff] %v862_v43  ;;  %v161_v0 = vadd.f32 %v160_v26, %v159_v47  ;;  %v898_v11 = vsel %vm146_vm1, %v779_v46, 0.0  ;;  %v902_v17 = vsel %vm146_vm1, %v789_v50, 0.0  ;;  %v906_v32 = vsel %vm146_vm1, %v791_v51, 0.0 }
  0x15   :  { %1485 = vst [vmem:[#allocation16_spill] sm:$0xff] %v866_v48  ;;  %1486 = vst [vmem:[#allocation17_spill] sm:$0xff] %v870_v49  ;;  %v914_v26 = vsel %vm146_vm1, %v798_v55, 0.0  ;;  %v918_v47 = vsel %vm146_vm1, %v800_v56, 0.0 }
  0x16   :  { %1487 = vst [vmem:[#allocation18_spill] sm:$0xff] %v874_v53  ;;  %1488 = vst [vmem:[#allocation19_spill] sm:$0xff] %v878_v54  ;;  %v630_v53 = vld [vmem:[%s1448_s0 + $0x60] sm:$0xff]  }
  0x17   :  { %1489 = vst [vmem:[#allocation20_spill] sm:$0xff] %v882_v58  ;;  %1490 = vst [vmem:[#allocation21_spill] sm:$0xff] %v886_v59 }
  0x18   :  { %1491 = vst [vmem:[#allocation22_spill] sm:$0xff] %v890_v60  ;;  %1492 = vst [vmem:[#allocation23_spill] sm:$0xff] %v894_v4  ;;  %v910_v60 = vsel %vm146_vm1, %v793_v52, 0.0  ;;  %v627_v4 = vld [vmem:[%s1448_s0 + $0x48] sm:$0xff]  }
  0x19   :  { %1493 = vst [vmem:[#allocation24_spill] sm:$0xff] %v898_v11  ;;  %1494 = vst [vmem:[#allocation25_spill] sm:$0xff] %v902_v17  ;;  %v624_v17 = vld [vmem:[%s1448_s0 + $0x30] sm:$0xff]   ;;  %v163_v11 = vadd.f32 %v162_v27, %v161_v0  ;;  %v626_v27 = vld [vmem:[%s1448_s0 + $0x40] sm:$0xff]   ;;  %v943_v0 = vsel %vm146_vm1, %v816_v63, 0.0  ;;  %v999_v43 = vunpack.c.l.bf16 %v627_v4  ;;  %v1001_v42 = vunpack.c.h.bf16 %v627_v4 }
  0x1a   :  { %1495 = vst [vmem:[#allocation26_spill] sm:$0xff] %v906_v32  ;;  %1496 = vst [vmem:[#allocation27_spill] sm:$0xff] %v910_v60  ;;  %v925_v32 = vsel %vm146_vm1, %v802_v57, 0.0  ;;  %v929_v60 = vsel %vm146_vm1, %v812_v61, 0.0  ;;  %v972_v58 = vunpack.c.l.bf16 %v624_v17  ;;  %v997_v48 = vunpack.c.h.bf16 %v626_v27  ;;  %v633_v4 = vld [vmem:[%s1448_s0 + $0x78] sm:$0xff]  }
  0x1b   :  { %1497 = vst [vmem:[#allocation28_spill] sm:$0xff] %v914_v26  ;;  %1498 = vst [vmem:[#allocation29_spill] sm:$0xff] %v918_v47  ;;  %v933_v26 = vsel %vm146_vm1, %v814_v62, 0.0  ;;  %v625_v47 = vld [vmem:[%s1448_s0 + $0x38] sm:$0xff]   ;;  %v165_v59 = vadd.f32 %v164_v34, %v163_v11  ;;  %v628_v34 = vld [vmem:[%s1448_s0 + $0x50] sm:$0xff]   ;;  %v1036_v63 = vunpack.c.l.bf16 %v633_v4 }
  0x1c   :  { %1499 = vst [vmem:[#allocation30_spill] sm:$0xff] %v925_v32  ;;  %1500 = vst [vmem:[#allocation31_spill] sm:$0xff] %v929_v60  ;;  %v947_v32 = vsel %vm146_vm1, %v818_v1, 0.0  ;;  %v951_v60 = vsel %vm146_vm1, %v820_v2, 0.0  ;;  %v629_v11 = vld [vmem:[%s1448_s0 + $0x58] sm:$0xff]   ;;  %v990_v54 = vunpack.c.h.bf16 %v625_v47  ;;  %v170_v38 = vsel %vm146_vm1, %v972_v58, 0.0 }
  0x1d   :  { %1501 = vst [vmem:[#allocation32_spill] sm:$0xff] %v933_v26  ;;  %1502 = vst [vmem:[#allocation33_spill] sm:$0xff] %v943_v0  ;;  %v955_v26 = vsel %vm146_vm1, %v822_v3, 0.0  ;;  %v962_v0 = vsel %vm146_vm1, %v826_v5, 0.0  ;;  %v167_v49 = vadd.f32 %v166_v35, %v165_v59  ;;  %v1011_v37 = vunpack.c.l.bf16 %v628_v34 }
  0x1e   :  { %1503 = vst [vmem:[#allocation34_spill] sm:$0xff] %v947_v32  ;;  %1504 = vst [vmem:[#allocation35_spill] sm:$0xff] %v951_v60  ;;  %v966_v32 = vsel %vm146_vm1, %v828_v6, 0.0  ;;  %v970_v60 = vsel %vm146_vm1, %v830_v10, 0.0  ;;  %v1013_v35 = vunpack.c.h.bf16 %v628_v34  ;;  %v1015_v59 = vunpack.c.l.bf16 %v629_v11 }
  0x1f   :  { %1505 = vst [vmem:[#allocation36_spill] sm:$0xff] %v955_v26  ;;  %1506 = vst [vmem:[#allocation37_spill] sm:$0xff] %v962_v0  ;;  %v974_v26 = vunpack.c.h.bf16 %v624_v17  ;;  %v168_v0 = vsel %vm146_vm1, %v727_v22, 0.0  ;;  %v992_v17 = vunpack.c.l.bf16 %v626_v27  ;;  %v1020_v36 = vunpack.c.h.bf16 %v629_v11 }
  0x20   :  { %1507 = vst [vmem:[#allocation38_spill] sm:$0xff] %v966_v32  ;;  %1508 = vst [vmem:[#allocation39_spill] sm:$0xff] %v970_v60  ;;  %v986_v32 = vsel %vm146_vm1, %v832_v16, 0.0  ;;  %v988_v60 = vunpack.c.l.bf16 %v625_v47  ;;  %v632_v47 = vld [vmem:[%s1448_s0 + $0x70] sm:$0xff]   ;;  %v169_v27 = vadd.f32 %v168_v0, %v167_v49  ;;  %v1022_v16 = vunpack.c.l.bf16 %v630_v53 }
  0x21   :  { %1509 = vst [vmem:[#allocation40_spill] sm:$0xff] %v986_v32  ;;  %1510 = vst [vmem:[#allocation41_spill] sm:$0xff] %v997_v48  ;;  %v631_v32 = vld [vmem:[%s1448_s0 + $0x68] sm:$0xff]   ;;  %v1024_v10 = vunpack.c.h.bf16 %v630_v53  ;;  %v172_v6 = vsel %vm146_vm1, %v974_v26, 0.0  ;;  %v1032_v3 = vunpack.c.l.bf16 %v632_v47  ;;  %v1034_v1 = vunpack.c.h.bf16 %v632_v47 }
  0x22   :  { %1511 = vst [vmem:[#allocation42_spill] sm:$0xff] %v999_v43  ;;  %1512 = vst [vmem:[#allocation43_spill] sm:$0xff] %v1001_v42  ;;  %v1028_v5 = vunpack.c.l.bf16 %v631_v32  ;;  %v1030_v34 = vunpack.c.h.bf16 %v631_v32  ;;  %v171_v2 = vadd.f32 %v170_v38, %v169_v27  ;;  %v1038_v49 = vunpack.c.h.bf16 %v633_v4 }
  0x23   :  { %1513 = vst [vmem:[#allocation44_spill] sm:$0xff] %v1013_v35  ;;  %1514 = vst [vmem:[#allocation45_spill] sm:$0xff] %v1015_v59  ;;  %v174_v53 = vsel %vm146_vm1, %v988_v60, 0.0  ;;  %v176_v11 = vsel %vm146_vm1, %v990_v54, 0.0  ;;  %v178_v32 = vsel %vm146_vm1, %v992_v17, 0.0  ;;  %v180_v62 = vsel %vm146_vm1, %v997_v48, 0.0 }
  0x24   :  { %1515 = vst [vmem:[#allocation46_spill] sm:$0xff] %v1020_v36  ;;  %1516 = vst [vmem:[#allocation47_spill] sm:$0xff] %v1022_v16  ;;  %v173_v0 = vadd.f32 %v172_v6, %v171_v2  ;;  %v182_v38 = vsel %vm146_vm1, %v999_v43, 0.0  ;;  %v184_v47 = vsel %vm146_vm1, %v1001_v42, 0.0  ;;  %v186_v4 = vsel %vm146_vm1, %v1011_v37, 0.0 }
  0x25   :  { %1517 = vst [vmem:[#allocation48_spill] sm:$0xff] %v1024_v10  ;;  %1518 = vst [vmem:[#allocation49_spill] sm:$0xff] %v1028_v5  ;;  %v188_v2 = vsel %vm146_vm1, %v1013_v35, 0.0  ;;  %v1058_v27 = vsel %vm146_vm1, %v1015_v59, 0.0  ;;  %v1062_v48 = vsel %vm146_vm1, %v1020_v36, 0.0  ;;  %v1066_v43 = vsel %vm146_vm1, %v1022_v16, 0.0 }
  0x26   :  { %1519 = vst [vmem:[#allocation50_spill] sm:$0xff] %v1030_v34  ;;  %1520 = vst [vmem:[#allocation51_spill] sm:$0xff] %v1032_v3  ;;  %v175_v6 = vadd.f32 %v174_v53, %v173_v0  ;;  %v1070_v42 = vsel %vm146_vm1, %v1024_v10, 0.0  ;;  %v1074_v35 = vsel %vm146_vm1, %v1028_v5, 0.0  ;;  %v1078_v53 = vsel %vm146_vm1, %v1030_v34, 0.0 }
  0x27   :  { %1521 = vst [vmem:[#allocation52_spill] sm:$0xff] %v1034_v1  ;;  %1522 = vst [vmem:[#allocation53_spill] sm:$0xff] %v1036_v63  ;;  %v1082_v0 = vsel %vm146_vm1, %v1032_v3, 0.0  ;;  %v1086_v16 = vsel %vm146_vm1, %v1034_v1, 0.0  ;;  %v1090_v10 = vsel %vm146_vm1, %v1036_v63, 0.0  ;;  %v284_v5 = vmul.f32 %v693_v7, %v693_v7 }
  0x28   :  { %v177_v36 = vadd.f32 %v176_v11, %v175_v6  ;;  %v285_v34 = vmul.f32 %v695_v8, %v695_v8  ;;  %v286_v59 = vmul.f32 %v697_v9, %v697_v9  ;;  %v287_v11 = vmul.f32 %v705_v12, %v705_v12 }
  0x29   :  { %v288_v6 = vmul.f32 %v707_v13, %v707_v13  ;;  %v289_v63 = vmul.f32 %v709_v14, %v709_v14  ;;  %v290_v3 = vmul.f32 %v711_v15, %v711_v15  ;;  %v291_v7 = vmul.f32 %v719_v18, %v719_v18 }
  0x2a   :  { %v179_v1 = vadd.f32 %v178_v32, %v177_v36  ;;  %v292_v8 = vmul.f32 %v721_v19, %v721_v19  ;;  %v293_v9 = vmul.f32 %v723_v20, %v723_v20  ;;  %v294_v12 = vmul.f32 %v725_v21, %v725_v21 }
  0x2b   :  { %v295_v13 = vmul.f32 %v727_v22, %v727_v22  ;;  %v296_v14 = vmul.f32 %v972_v58, %v972_v58  ;;  %v1120_v15 = vmul.f32 %v974_v26, %v974_v26  ;;  %v1124_v18 = vmul.f32 %v988_v60, %v988_v60 }
  0x2c   :  { %v181_v36 = vadd.f32 %v180_v62, %v179_v1  ;;  %v318_v19 = vmul.f32 %v729_v23, %v729_v23  ;;  %v319_v20 = vmul.f32 %v731_v24, %v731_v24  ;;  %v320_v21 = vmul.f32 %v733_v25, %v733_v25 }
  0x2d   :  { %v321_v22 = vmul.f32 %v741_v28, %v741_v28  ;;  %v322_v1 = vmul.f32 %v743_v29, %v743_v29  ;;  %v323_v58 = vmul.f32 %v745_v30, %v745_v30  ;;  %v324_v60 = vmul.f32 %v747_v31, %v747_v31 }
  0x2e   :  { %v183_v62 = vadd.f32 %v182_v38, %v181_v36  ;;  %v325_v23 = vmul.f32 %v752_v33, %v752_v33  ;;  %v326_v24 = vmul.f32 %v766_v39, %v766_v39  ;;  %v348_v25 = vsel %vm146_vm1, %v284_v5, 0.0 }
  0x2f   :  { %v349_v28 = vsel %vm146_vm1, %v285_v34, 0.0  ;;  %v327_v29 = vmul.f32 %v768_v40, %v768_v40  ;;  %v351_v30 = vsel %vm146_vm1, %v286_v59, 0.0  ;;  %v328_v31 = vmul.f32 %v770_v41, %v770_v41 }
  0x30   :  { %v185_v26 = vadd.f32 %v184_v47, %v183_v62  ;;  %v350_v32 = vadd.f32 %v349_v28, %v348_v25  ;;  %v329_v33 = vmul.f32 %v775_v44, %v775_v44  ;;  %v330_v39 = vmul.f32 %v777_v45, %v777_v45  ;;  %v1526_v28 = vld [vmem:[#allocation5_spill] sm:$0xff] }
  0x31   :  { %v353_v5 = vsel %vm146_vm1, %v287_v11, 0.0  ;;  %v331_v34 = vmul.f32 %v779_v46, %v779_v46  ;;  %v332_v40 = vmul.f32 %v789_v50, %v789_v50  ;;  %v333_v59 = vmul.f32 %v791_v51, %v791_v51  ;;  %v1523_v51 = vld [vmem:[#allocation2_spill] sm:$0xff] }
  0x32   :  { %v187_v38 = vadd.f32 %v186_v4, %v185_v26  ;;  %v352_v47 = vadd.f32 %v351_v30, %v350_v32  ;;  %v334_v41 = vmul.f32 %v793_v52, %v793_v52  ;;  %v335_v44 = vmul.f32 %v798_v55, %v798_v55  ;;  %v1524_v52 = vld [vmem:[#allocation3_spill] sm:$0xff]  ;;  %v1527_v32 = vld [vmem:[#allocation6_spill] sm:$0xff] }
  0x33   :  { %v355_v45 = vsel %vm146_vm1, %v288_v6, 0.0  ;;  %v336_v4 = vmul.f32 %v800_v56, %v800_v56  ;;  %v337_v46 = vmul.f32 %v802_v57, %v802_v57  ;;  %v338_v36 = vmul.f32 %v812_v61, %v812_v61  ;;  %v1525_v6 = vld [vmem:[#allocation4_spill] sm:$0xff]  ;;  %v1528_v30 = vld [vmem:[#allocation7_spill] sm:$0xff] }
  0x34   :  { %v189_v11 = vadd.f32 %v188_v2, %v187_v38  ;;  %v354_v50 = vadd.f32 %v353_v5, %v352_v47  ;;  %v339_v62 = vmul.f32 %v1523_v51, %v1523_v51  ;;  %v340_v25 = vmul.f32 %v1524_v52, %v1524_v52  ;;  %v1529_v38 = vld [vmem:[#allocation8_spill] sm:$0xff]  ;;  %v1531_v52 = vld [vmem:[#allocation10_spill] sm:$0xff] }
  0x35   :  { %v357_v55 = vsel %vm146_vm1, %v289_v63, 0.0  ;;  %v341_v56 = vmul.f32 %v1525_v6, %v1525_v6  ;;  %v342_v57 = vmul.f32 %v1526_v28, %v1526_v28  ;;  %v343_v61 = vmul.f32 %v1527_v32, %v1527_v32 }
  0x36   :  { %v191_v2 = vadd.f32 %v1058_v27, %v189_v11  ;;  %v356_v26 = vadd.f32 %v355_v45, %v354_v50  ;;  %v344_v5 = vmul.f32 %v1528_v30, %v1528_v30  ;;  %v345_v47 = vmul.f32 %v1529_v38, %v1529_v38  ;;  %v1530_v11 = vld [vmem:[#allocation9_spill] sm:$0xff] }
  0x37   :  { %v359_v63 = vsel %vm146_vm1, %v290_v3, 0.0  ;;  %v346_v51 = vmul.f32 %v1530_v11, %v1530_v11  ;;  %v347_v6 = vmul.f32 %v1531_v52, %v1531_v52  ;;  %v361_v50 = vsel %vm146_vm1, %v291_v7, 0.0 }
  0x38   :  { %v193_v27 = vadd.f32 %v1062_v48, %v191_v2  ;;  %v358_v45 = vadd.f32 %v357_v55, %v356_v26  ;;  %v363_v28 = vsel %vm146_vm1, %v292_v8, 0.0  ;;  %v365_v32 = vsel %vm146_vm1, %v293_v9, 0.0 }
  0x39   :  { %v367_v30 = vsel %vm146_vm1, %v294_v12, 0.0  ;;  %v369_v48 = vsel %vm146_vm1, %v295_v13, 0.0  ;;  %v371_v2 = vsel %vm146_vm1, %v296_v14, 0.0  ;;  %v1203_v11 = vsel %vm146_vm1, %v318_v19, 0.0 }
  0x3a   :  { %v195_v38 = vadd.f32 %v1066_v43, %v193_v27  ;;  %v360_v3 = vadd.f32 %v359_v63, %v358_v45  ;;  %v1206_v55 = vsel %vm146_vm1, %v319_v20, 0.0  ;;  %v1209_v7 = vsel %vm146_vm1, %v320_v21, 0.0 }
  0x3b   :  { %v1212_v8 = vsel %vm146_vm1, %v321_v22, 0.0  ;;  %v1216_v12 = vsel %vm146_vm1, %v322_v1, 0.0  ;;  %v1219_v13 = vsel %vm146_vm1, %v323_v58, 0.0  ;;  %v1222_v14 = vsel %vm146_vm1, %v324_v60, 0.0 }
  0x3c   :  { %v197_v9 = vadd.f32 %v1070_v42, %v195_v38  ;;  %v362_v43 = vadd.f32 %v361_v50, %v360_v3  ;;  %v1225_v19 = vsel %vm146_vm1, %v325_v23, 0.0  ;;  %v1228_v20 = vsel %vm146_vm1, %v326_v24, 0.0 }
  0x3d   :  { %v1231_v21 = vsel %vm146_vm1, %v327_v29, 0.0  ;;  %v1235_v1 = vsel %vm146_vm1, %v328_v31, 0.0  ;;  %v1238_v58 = vsel %vm146_vm1, %v329_v33, 0.0  ;;  %v1241_v60 = vsel %vm146_vm1, %v330_v39, 0.0 }
  0x3e   :  { %v199_v42 = vadd.f32 %v1074_v35, %v197_v9  ;;  %v364_v22 = vadd.f32 %v363_v28, %v362_v43  ;;  %v1244_v23 = vsel %vm146_vm1, %v331_v34, 0.0  ;;  %v1247_v24 = vsel %vm146_vm1, %v332_v40, 0.0 }
  0x3f   :  { %v1250_v29 = vsel %vm146_vm1, %v333_v59, 0.0  ;;  %v1254_v31 = vsel %vm146_vm1, %v334_v41, 0.0  ;;  %v1257_v33 = vsel %vm146_vm1, %v335_v44, 0.0  ;;  %v1260_v39 = vsel %vm146_vm1, %v336_v4, 0.0 }
  0x40   :  { %v201_v35 = vadd.f32 %v1078_v53, %v199_v42  ;;  %v366_v26 = vadd.f32 %v365_v32, %v364_v22  ;;  %v1263_v34 = vsel %vm146_vm1, %v337_v46, 0.0  ;;  %v1266_v40 = vsel %vm146_vm1, %v338_v36, 0.0  ;;  %v634_v53 = vld [vmem:[%s1448_s0 + $0x80] sm:$0xff]  }
  0x41   :  { %v1269_v59 = vsel %vm146_vm1, %v339_v62, 0.0  ;;  %v1276_v63 = vsel %vm146_vm1, %v340_v25, 0.0  ;;  %v1279_v4 = vsel %vm146_vm1, %v341_v56, 0.0  ;;  %v1282_v46 = vsel %vm146_vm1, %v342_v57, 0.0 }
  0x42   :  { %v203_v41 = vadd.f32 %v1082_v0, %v201_v35  ;;  %v368_v44 = vadd.f32 %v367_v30, %v366_v26  ;;  %v1285_v36 = vsel %vm146_vm1, %v343_v61, 0.0  ;;  %v1288_v62 = vsel %vm146_vm1, %v344_v5, 0.0  ;;  %v1535_v26 = vld [vmem:[#allocation11_spill] sm:$0xff] }
  0x43   :  { %v1291_v27 = vsel %vm146_vm1, %v345_v47, 0.0  ;;  %v1295_v25 = vsel %vm146_vm1, %v346_v51, 0.0  ;;  %v1298_v56 = vsel %vm146_vm1, %v347_v6, 0.0  ;;  %v1300_v57 = vunpack.c.l.bf16 %v634_v53 }
  0x44   :  { %v205_v0 = vadd.f32 %v1086_v16, %v203_v41  ;;  %v370_v52 = vadd.f32 %v369_v48, %v368_v44  ;;  %v208_v61 = vsel %vm146_vm1, %v1038_v49, 0.0  ;;  %v299_v5 = vmul.f32 %v990_v54, %v990_v54 }
  0x45   :  { %v373_v47 = vsel %vm146_vm1, %v1120_v15, 0.0  ;;  %v1309_v50 = vunpack.c.h.bf16 %v634_v53  ;;  %v210_v51 = vsel %vm146_vm1, %v1300_v57, 0.0  ;;  %v300_v6 = vmul.f32 %v992_v17, %v992_v17  ;;  %v1532_v15 = vld [vmem:[#allocation41_spill] sm:$0xff] }
  0x46   :  { %v207_v16 = vadd.f32 %v1090_v10, %v205_v0  ;;  %v372_v45 = vadd.f32 %v371_v2, %v370_v52  ;;  %v375_v28 = vsel %vm146_vm1, %v1124_v18, 0.0  ;;  %v301_v10 = vmul.f32 %v1532_v15, %v1532_v15  ;;  %v1533_v2 = vld [vmem:[#allocation42_spill] sm:$0xff]  ;;  %v1534_v18 = vld [vmem:[#allocation43_spill] sm:$0xff]  ;;  %v1536_v52 = vld [vmem:[#allocation12_spill] sm:$0xff] }
  0x47   :  { %v212_v54 = vsel %vm146_vm1, %v1309_v50, 0.0  ;;  %v377_v38 = vsel %vm146_vm1, %v299_v5, 0.0  ;;  %v302_v9 = vmul.f32 %v1533_v2, %v1533_v2  ;;  %v379_v17 = vsel %vm146_vm1, %v300_v6, 0.0  ;;  %v1540_v15 = vld [vmem:[#allocation14_spill] sm:$0xff]  ;;  %v1542_v2 = vld [vmem:[#allocation15_spill] sm:$0xff] }
  0x48   :  { %v209_v32 = vadd.f32 %v208_v61, %v207_v16  ;;  %v374_v30 = vadd.f32 %v373_v47, %v372_v45  ;;  %v303_v22 = vmul.f32 %v1534_v18, %v1534_v18  ;;  %v381_v35 = vsel %vm146_vm1, %v301_v10, 0.0  ;;  %v1537_v47 = vld [vmem:[#allocation44_spill] sm:$0xff] }
  0x49   :  { %v304_v44 = vmul.f32 %v1011_v37, %v1011_v37  ;;  %v383_v0 = vsel %vm146_vm1, %v302_v9, 0.0  ;;  %v305_v16 = vmul.f32 %v1537_v47, %v1537_v47 }
  0x4a   :  { %v211_v3 = vadd.f32 %v210_v51, %v209_v32  ;;  %v376_v48 = vadd.f32 %v375_v28, %v374_v30  ;;  %v385_v45 = vsel %vm146_vm1, %v303_v22, 0.0  ;;  %v1538_v51 = vld [vmem:[#allocation13_spill] sm:$0xff]  ;;  %v1544_v22 = vld [vmem:[#allocation16_spill] sm:$0xff] }
  0x4b   :  { %v1539_v32 = vld [vmem:[#allocation45_spill] sm:$0xff] }
  0x4c   :  { %v213_v43 = vadd.f32 %v212_v54, %v211_v3  ;;  %v378_v42 = vadd.f32 %v377_v38, %v376_v48  ;;  %v306_v30 = vmul.f32 %v1539_v32, %v1539_v32  ;;  %v387_v54 = vsel %vm146_vm1, %v304_v44, 0.0  ;;  %v1541_v38 = vld [vmem:[#allocation46_spill] sm:$0xff] }
  0x4d   :  { %v307_v3 = vmul.f32 %v1541_v38, %v1541_v38  ;;  %v389_v48 = vsel %vm146_vm1, %v305_v16, 0.0 }
  0x4e   :  { %v215_v53 = vadd.f32 %v1535_v26, %v213_v43  ;;  %v380_v41 = vadd.f32 %v379_v17, %v378_v42  ;;  %v1543_v43 = vld [vmem:[#allocation47_spill] sm:$0xff]  ;;  %v391_v18 = vsel %vm146_vm1, %v306_v30, 0.0 }
  0x4f   :  { %v308_v42 = vmul.f32 %v1543_v43, %v1543_v43  ;;  %v393_v44 = vsel %vm146_vm1, %v307_v3, 0.0 }
  0x50   :  { %v217_v61 = vadd.f32 %v1536_v52, %v215_v53  ;;  %v382_v5 = vadd.f32 %v381_v35, %v380_v41  ;;  %v1545_v53 = vld [vmem:[#allocation48_spill] sm:$0xff] }
  0x51   :  { %v309_v41 = vmul.f32 %v1545_v53, %v1545_v53  ;;  %v395_v16 = vsel %vm146_vm1, %v308_v42, 0.0 }
  0x52   :  { %v219_v6 = vadd.f32 %v1538_v51, %v217_v61  ;;  %v384_v28 = vadd.f32 %v383_v0, %v382_v5  ;;  %v1546_v0 = vld [vmem:[#allocation17_spill] sm:$0xff] }
  0x53   :  { %v1547_v5 = vld [vmem:[#allocation49_spill] sm:$0xff]  ;;  %v397_v30 = vsel %vm146_vm1, %v309_v41, 0.0 }
  0x54   :  { %v221_v37 = vadd.f32 %v1540_v15, %v219_v6  ;;  %v386_v10 = vadd.f32 %v385_v45, %v384_v28  ;;  %v310_v47 = vmul.f32 %v1547_v5, %v1547_v5  ;;  %v1548_v45 = vld [vmem:[#allocation18_spill] sm:$0xff] }
  0x55   :  { %v1549_v28 = vld [vmem:[#allocation50_spill] sm:$0xff] }
  0x56   :  { %v223_v9 = vadd.f32 %v1542_v2, %v221_v37  ;;  %v388_v17 = vadd.f32 %v387_v54, %v386_v10  ;;  %v311_v32 = vmul.f32 %v1549_v28, %v1549_v28  ;;  %v1550_v54 = vld [vmem:[#allocation19_spill] sm:$0xff]  ;;  %v399_v3 = vsel %vm146_vm1, %v310_v47, 0.0  ;;  %v1558_v28 = vld [vmem:[#allocation24_spill] sm:$0xff] }
  0x57   :  { %v1551_v10 = vld [vmem:[#allocation51_spill] sm:$0xff] }
  0x58   :  { %v225_v35 = vadd.f32 %v1544_v22, %v223_v9  ;;  %v390_v26 = vadd.f32 %v389_v48, %v388_v17  ;;  %v312_v38 = vmul.f32 %v1551_v10, %v1551_v10  ;;  %v1552_v48 = vld [vmem:[#allocation20_spill] sm:$0xff]  ;;  %v401_v42 = vsel %vm146_vm1, %v311_v32, 0.0  ;;  %v1557_v47 = vld [vmem:[#allocation23_spill] sm:$0xff] }
  0x59   :  { %v1553_v17 = vld [vmem:[#allocation52_spill] sm:$0xff] }
  0x5a   :  { %v227_v52 = vadd.f32 %v1546_v0, %v225_v35  ;;  %v392_v61 = vadd.f32 %v391_v18, %v390_v26  ;;  %v313_v43 = vmul.f32 %v1553_v17, %v1553_v17  ;;  %v1554_v18 = vld [vmem:[#allocation21_spill] sm:$0xff]  ;;  %v403_v41 = vsel %vm146_vm1, %v312_v38, 0.0 }
  0x5b   :  { %v1555_v26 = vld [vmem:[#allocation53_spill] sm:$0xff] }
  0x5c   :  { %v229_v51 = vadd.f32 %v1548_v45, %v227_v52  ;;  %v394_v6 = vadd.f32 %v393_v44, %v392_v61  ;;  %v314_v53 = vmul.f32 %v1555_v26, %v1555_v26  ;;  %v1556_v44 = vld [vmem:[#allocation22_spill] sm:$0xff]  ;;  %v315_v61 = vmul.f32 %v1038_v49, %v1038_v49 }
  0x5d   :  { %v405_v5 = vsel %vm146_vm1, %v313_v43, 0.0 }
  0x5e   :  { %v231_v15 = vadd.f32 %v1550_v54, %v229_v51  ;;  %v396_v37 = vadd.f32 %v395_v16, %v394_v6  ;;  %v316_v51 = vmul.f32 %v1300_v57, %v1300_v57  ;;  %v407_v6 = vsel %vm146_vm1, %v314_v53, 0.0  ;;  %v1564_v53 = vld [vmem:[#allocation30_spill] sm:$0xff] }
  0x5f   :  { %v317_v54 = vmul.f32 %v1309_v50, %v1309_v50 }
  0x60   :  { %v233_v2 = vadd.f32 %v1552_v48, %v231_v15  ;;  %v398_v9 = vadd.f32 %v397_v30, %v396_v37  ;;  %v409_v15 = vsel %vm146_vm1, %v315_v61, 0.0  ;;  %v1559_v37 = vld [vmem:[#allocation25_spill] sm:$0xff]  ;;  %v411_v38 = vsel %vm146_vm1, %v316_v51, 0.0 }
  0x61   :  { %v413_v57 = vsel %vm146_vm1, %v317_v54, 0.0 }
  0x62   :  { %v235_v22 = vadd.f32 %v1554_v18, %v233_v2  ;;  %v400_v35 = vadd.f32 %v399_v3, %v398_v9  ;;  %v1560_v3 = vld [vmem:[#allocation26_spill] sm:$0xff]  ;;  %v1561_v9 = vld [vmem:[#allocation27_spill] sm:$0xff] }
  0x64   :  { %v237_v0 = vadd.f32 %v1556_v44, %v235_v22  ;;  %v402_v52 = vadd.f32 %v401_v42, %v400_v35  ;;  %v1562_v42 = vld [vmem:[#allocation28_spill] sm:$0xff]  ;;  %v1563_v35 = vld [vmem:[#allocation29_spill] sm:$0xff] }
  0x66   :  { %v239_v16 = vadd.f32 %v1557_v47, %v237_v0  ;;  %v404_v45 = vadd.f32 %v403_v41, %v402_v52  ;;  %v1565_v0 = vld [vmem:[#allocation31_spill] sm:$0xff] }
  0x68   :  { %v241_v32 = vadd.f32 %v1558_v28, %v239_v16  ;;  %v406_v30 = vadd.f32 %v405_v5, %v404_v45  ;;  %v1566_v5 = vld [vmem:[#allocation32_spill] sm:$0xff]  ;;  %v1567_v45 = vld [vmem:[#allocation33_spill] sm:$0xff]  ;;  %v1568_v28 = vld [vmem:[#allocation34_spill] sm:$0xff] }
  0x6a   :  { %v243_v49 = vadd.f32 %v1559_v37, %v241_v32  ;;  %v408_v10 = vadd.f32 %v407_v6, %v406_v30  ;;  %v1569_v30 = vld [vmem:[#allocation35_spill] sm:$0xff] }
  0x6c   :  { %v245_v48 = vadd.f32 %v1560_v3, %v243_v49  ;;  %v410_v2 = vadd.f32 %v409_v15, %v408_v10  ;;  %v1570_v15 = vld [vmem:[#allocation36_spill] sm:$0xff]  ;;  %v1571_v49 = vld [vmem:[#allocation37_spill] sm:$0xff] }
  0x6e   :  { %v247_v17 = vadd.f32 %v1561_v9, %v245_v48  ;;  %v412_v43 = vadd.f32 %v411_v38, %v410_v2  ;;  %v1572_v38 = vld [vmem:[#allocation38_spill] sm:$0xff]  ;;  %v1573_v48 = vld [vmem:[#allocation39_spill] sm:$0xff] }
  0x70   :  { %v249_v18 = vadd.f32 %v1562_v42, %v247_v17  ;;  %v414_v22 = vadd.f32 %v413_v57, %v412_v43  ;;  %v1574_v57 = vld [vmem:[#allocation40_spill] sm:$0xff] }
  0x72   :  { %v251_v50 = vadd.f32 %v1563_v35, %v249_v18  ;;  %v416_v26 = vadd.f32 %v1203_v11, %v414_v22 }
  0x74   :  { %v253_v41 = vadd.f32 %v1564_v53, %v251_v50  ;;  %v418_v44 = vadd.f32 %v1206_v55, %v416_v26 }
  0x76   :  { %v255_v52 = vadd.f32 %v1565_v0, %v253_v41  ;;  %v420_v61 = vadd.f32 %v1209_v7, %v418_v44 }
  0x78   :  { %v257_v47 = vadd.f32 %v1566_v5, %v255_v52  ;;  %v422_v16 = vadd.f32 %v1212_v8, %v420_v61 }
  0x7a   :  { %v259_v51 = vadd.f32 %v1567_v45, %v257_v47  ;;  %v424_v6 = vadd.f32 %v1216_v12, %v422_v16 }
  0x7c   :  { %v261_v32 = vadd.f32 %v1568_v28, %v259_v51  ;;  %v426_v11 = vadd.f32 %v1219_v13, %v424_v6 }
  0x7e   :  { %v263_v54 = vadd.f32 %v1569_v30, %v261_v32  ;;  %v428_v55 = vadd.f32 %v1222_v14, %v426_v11 }
  0x80   :  { %v265_v37 = vadd.f32 %v1570_v15, %v263_v54  ;;  %v430_v7 = vadd.f32 %v1225_v19, %v428_v55 }
  0x82   :  { %v267_v10 = vadd.f32 %v1571_v49, %v265_v37  ;;  %v432_v8 = vadd.f32 %v1228_v20, %v430_v7 }
  0x84   :  { %v269_v3 = vadd.f32 %v1572_v38, %v267_v10  ;;  %v434_v12 = vadd.f32 %v1231_v21, %v432_v8 }
  0x86   :  { %v271_v2 = vadd.f32 %v1573_v48, %v269_v3  ;;  %v436_v13 = vadd.f32 %v1235_v1, %v434_v12  ;;  %v145_v1 = vld [vmem:[%s1446_s1] sm:$0x1] }
  0x88   :  { %v273_v9 = vadd.f32 %v1574_v57, %v271_v2  ;;  %v438_v14 = vadd.f32 %v1238_v58, %v436_v13 }
  0x8a   :  { %v274_v17 = vrot.slane %v273_v9, 4  ;;  %v440_v43 = vadd.f32 %v1241_v60, %v438_v14 }
  0x8c   :  { %v275_v19 = vadd.f32 %v274_v17, %v273_v9  ;;  %v442_v42 = vadd.f32 %v1244_v23, %v440_v43 }
  0x8e   :  { %v276_v18 = vrot.slane %v275_v19, 2  ;;  %v444_v20 = vadd.f32 %v1247_v24, %v442_v42 }
  0x90   :  { %v277_v22 = vadd.f32 %v276_v18, %v275_v19  ;;  %v446_v21 = vadd.f32 %v1250_v29, %v444_v20 }
  0x92   :  { %v278_v35 = vrot.slane %v277_v22, 1  ;;  %v448_v50 = vadd.f32 %v1254_v31, %v446_v21 }
  0x94   :  { %v279_v58 = vadd.f32 %v278_v35, %v277_v22  ;;  %v450_v26 = vadd.f32 %v1257_v33, %v448_v50 }
  0x96   :  { %v280_v60 = vadd.f32 %v279_v58, %v145_v1  ;;  %v452_v53 = vadd.f32 %v1260_v39, %v450_v26 }
  0x98   :  { %282 = vst.msk [vmem:[%s1446_s1] sm:$0x1] %vm14_vm0, %v280_v60  ;;  %v454_v23 = vadd.f32 %v1263_v34, %v452_v53 }
  0x9a   :  { %v456_v24 = vadd.f32 %v1266_v40, %v454_v23 }
  0x9c   :  { %v458_v29 = vadd.f32 %v1269_v59, %v456_v24 }
  0x9e   :  { %v460_v31 = vadd.f32 %v1276_v63, %v458_v29  ;;  %v283_v63 = vld [vmem:[%s1447_s2] sm:$0x1] }
  0xa0   :  { %v462_v41 = vadd.f32 %v1279_v4, %v460_v31 }
  0xa2   :  { %v464_v33 = vadd.f32 %v1282_v46, %v462_v41 }
  0xa4   :  { %v466_v44 = vadd.f32 %v1285_v36, %v464_v33 }
  0xa6   :  { %v468_v39 = vadd.f32 %v1288_v62, %v466_v44 }
  0xa8   :  { %v470_v0 = vadd.f32 %v1291_v27, %v468_v39 }
  0xaa   :  { %v472_v52 = vadd.f32 %v1295_v25, %v470_v0 }
  0xac   :  { %v474_v34 = vadd.f32 %v1298_v56, %v472_v52 }
  0xae   :  { %v475_v61 = vrot.slane %v474_v34, 4 }
  0xb0   :  { %v476_v40 = vadd.f32 %v475_v61, %v474_v34 }
  0xb2   :  { %v477_v5 = vrot.slane %v476_v40, 2 }
  0xb4   :  { %v478_v59 = vadd.f32 %v477_v5, %v476_v40 }
  0xb6   :  { %v479_v47 = vrot.slane %v478_v59, 1 }
  0xb8   :  { %v480_v4 = vadd.f32 %v479_v47, %v478_v59 }
  0xba   :  { %v481_v46 = vadd.f32 %v480_v4, %v283_v63 }
  0xbc   :  { %482 = vst.msk [vmem:[%s1447_s2] sm:$0x1] %vm14_vm0, %v481_v46 }

// kernel: densenet_forward.32
= control target key start
LH: loop header
LB: loop body
LE: loop exit
PB: predicated region body
PF: predicated region fallthrough
CT: control target
= control target key end

     0   :  { %vm604_vm0 = vcmask 125952   ;;  %s1472_s0 = inlined_call_operand.vmem [shape: bf16[512,16], index: 0, kind: input, shape index: {}]   ;;  %s1473_s1 = inlined_call_operand.vmem [shape: f32[1,16], index: 1, kind: input, shape index: {}]   ;;  %s1474_s2 = inlined_call_operand.vmem [shape: f32[1,16], index: 2, kind: input, shape index: {}]   ;;  %s1475_s3 = inlined_call_operand.vmem [shape: bf16[512,16], index: 3, kind: output, shape index: {}]  }
   0x1   :  { %v804_v0 = vld [vmem:[%s1472_s0] sm:$0xff]   ;;  %v931_v4 = vld [vmem:[%s1472_s0 + $0x8] sm:$0xff]   ;;  %v932_v5 = vld [vmem:[%s1472_s0 + $0x10] sm:$0xff]  }
   0x2   :  { %v988_v1 = vld [vmem:[%s1473_s1] ss:$0 sm:$0xff]  ;;  %v805_v2 = vunpack.c.l.bf16 %v804_v0  ;;  %v806_v3 = vunpack.c.h.bf16 %v804_v0  ;;  %v933_v6 = vld [vmem:[%s1472_s0 + $0x18] sm:$0xff]   ;;  %v809_v8 = vunpack.c.l.bf16 %v931_v4  ;;  %v810_v9 = vunpack.c.h.bf16 %v931_v4  ;;  %v935_v41 = vld [vmem:[%s1472_s0 + $0x28] sm:$0xff]  }
   0x3   :  { %v1002_v7 = vld [vmem:[%s1474_s2] ss:$0 sm:$0xff]  ;;  %v813_v10 = vunpack.c.l.bf16 %v932_v5  ;;  %v814_v11 = vunpack.c.h.bf16 %v932_v5  ;;  %v817_v14 = vunpack.c.l.bf16 %v933_v6  ;;  %v818_v15 = vunpack.c.h.bf16 %v933_v6  ;;  %v936_v42 = vld [vmem:[%s1472_s0 + $0x30] sm:$0xff]   ;;  %v937_v47 = vld [vmem:[%s1472_s0 + $0x38] sm:$0xff]  }
   0x4   :  { %v149_v12 = vmul.f32 %v805_v2, %v988_v1  ;;  %v150_v13 = vmul.f32 %v806_v3, %v988_v1  ;;  %v151_v16 = vmul.f32 %v809_v8, %v988_v1  ;;  %v152_v17 = vmul.f32 %v810_v9, %v988_v1  ;;  %v934_v36 = vld [vmem:[%s1472_s0 + $0x20] sm:$0xff]  }
   0x5   :  { %v153_v18 = vmul.f32 %v813_v10, %v988_v1  ;;  %v154_v19 = vmul.f32 %v814_v11, %v988_v1  ;;  %v155_v22 = vmul.f32 %v817_v14, %v988_v1  ;;  %v156_v23 = vmul.f32 %v818_v15, %v988_v1 }
   0x6   :  { %v220_v20 = vadd.f32 %v1002_v7, %v149_v12  ;;  %v221_v21 = vadd.f32 %v1002_v7, %v150_v13  ;;  %v222_v24 = vadd.f32 %v1002_v7, %v151_v16  ;;  %v223_v25 = vadd.f32 %v1002_v7, %v152_v17 }
   0x7   :  { %v224_v26 = vadd.f32 %v1002_v7, %v153_v18  ;;  %v225_v27 = vadd.f32 %v1002_v7, %v154_v19  ;;  %v226_v30 = vadd.f32 %v1002_v7, %v155_v22  ;;  %v227_v31 = vadd.f32 %v1002_v7, %v156_v23  ;;  %v938_v18 = vld [vmem:[%s1472_s0 + $0x40] sm:$0xff]   ;;  %v939_v23 = vld [vmem:[%s1472_s0 + $0x48] sm:$0xff]  }
   0x8   :  { %v284_v28 = vmax.f32 %v220_v20, 0.0  ;;  %v285_v29 = vmax.f32 %v221_v21, 0.0  ;;  %v286_v32 = vmax.f32 %v222_v24, 0.0  ;;  %v287_v33 = vmax.f32 %v223_v25, 0.0  ;;  %v940_v24 = vld [vmem:[%s1472_s0 + $0x50] sm:$0xff]  }
   0x9   :  { %v288_v34 = vmax.f32 %v224_v26, 0.0  ;;  %v289_v35 = vmax.f32 %v225_v27, 0.0  ;;  %v290_v39 = vmax.f32 %v226_v30, 0.0  ;;  %v291_v40 = vmax.f32 %v227_v31, 0.0 }
   0xa   :  { %v739_v37 = vpack.c.bf16 %v284_v28, %v284_v28  ;;  %v740_v38 = vpack.c.bf16 %v285_v29, %v285_v29  ;;  %v741_v43 = vpack.c.bf16 %v286_v32, %v286_v32  ;;  %v742_v44 = vpack.c.bf16 %v287_v33, %v287_v33  ;;  %v941_v29 = vld [vmem:[%s1472_s0 + $0x58] sm:$0xff]  }
   0xb   :  { %v743_v45 = vpack.c.bf16 %v288_v34, %v288_v34  ;;  %v744_v46 = vpack.c.bf16 %v289_v35, %v289_v35  ;;  %v745_v48 = vpack.c.bf16 %v290_v39, %v290_v39  ;;  %v746_v49 = vpack.c.bf16 %v291_v40, %v291_v40 }
   0xc   :  { %605 = vst.msk [vmem:[%s1475_s3] sm:$0xf] %vm604_vm0, %v739_v37  ;;  %606 = vst.msk [vmem:[%s1475_s3 + $0x4] sm:$0xf] %vm604_vm0, %v740_v38  ;;  %v821_v50 = vunpack.c.l.bf16 %v934_v36  ;;  %v822_v51 = vunpack.c.h.bf16 %v934_v36  ;;  %v825_v52 = vunpack.c.l.bf16 %v935_v41  ;;  %v826_v53 = vunpack.c.h.bf16 %v935_v41 }
   0xd   :  { %607 = vst.msk [vmem:[%s1475_s3 + $0x8] sm:$0xf] %vm604_vm0, %v741_v43  ;;  %608 = vst.msk [vmem:[%s1475_s3 + $0xc] sm:$0xf] %vm604_vm0, %v742_v44  ;;  %v829_v54 = vunpack.c.l.bf16 %v936_v42  ;;  %v830_v55 = vunpack.c.h.bf16 %v936_v42  ;;  %v833_v58 = vunpack.c.l.bf16 %v937_v47  ;;  %v834_v59 = vunpack.c.h.bf16 %v937_v47 }
   0xe   :  { %609 = vst.msk [vmem:[%s1475_s3 + $0x10] sm:$0xf] %vm604_vm0, %v743_v45  ;;  %610 = vst.msk [vmem:[%s1475_s3 + $0x14] sm:$0xf] %vm604_vm0, %v744_v46  ;;  %v157_v56 = vmul.f32 %v821_v50, %v988_v1  ;;  %v158_v57 = vmul.f32 %v822_v51, %v988_v1  ;;  %v159_v60 = vmul.f32 %v825_v52, %v988_v1  ;;  %v837_v32 = vunpack.c.l.bf16 %v938_v18 }
   0xf   :  { %611 = vst.msk [vmem:[%s1475_s3 + $0x18] sm:$0xf] %vm604_vm0, %v745_v48  ;;  %612 = vst.msk [vmem:[%s1475_s3 + $0x1c] sm:$0xf] %vm604_vm0, %v746_v49  ;;  %v160_v61 = vmul.f32 %v826_v53, %v988_v1  ;;  %v161_v62 = vmul.f32 %v829_v54, %v988_v1  ;;  %v162_v63 = vmul.f32 %v830_v55, %v988_v1  ;;  %v838_v33 = vunpack.c.h.bf16 %v938_v18 }
  0x10   :  { %v228_v0 = vadd.f32 %v1002_v7, %v157_v56  ;;  %v229_v2 = vadd.f32 %v1002_v7, %v158_v57  ;;  %v163_v3 = vmul.f32 %v833_v58, %v988_v1  ;;  %v164_v4 = vmul.f32 %v834_v59, %v988_v1 }
  0x11   :  { %v230_v5 = vadd.f32 %v1002_v7, %v159_v60  ;;  %v231_v6 = vadd.f32 %v1002_v7, %v160_v61  ;;  %v232_v8 = vadd.f32 %v1002_v7, %v161_v62  ;;  %v233_v9 = vadd.f32 %v1002_v7, %v162_v63  ;;  %v942_v62 = vld [vmem:[%s1472_s0 + $0x60] sm:$0xff]  }
  0x12   :  { %v292_v10 = vmax.f32 %v228_v0, 0.0  ;;  %v293_v11 = vmax.f32 %v229_v2, 0.0  ;;  %v234_v12 = vadd.f32 %v1002_v7, %v163_v3  ;;  %v235_v13 = vadd.f32 %v1002_v7, %v164_v4  ;;  %v943_v4 = vld [vmem:[%s1472_s0 + $0x68] sm:$0xff]  }
  0x13   :  { %v294_v14 = vmax.f32 %v230_v5, 0.0  ;;  %v295_v15 = vmax.f32 %v231_v6, 0.0  ;;  %v296_v16 = vmax.f32 %v232_v8, 0.0  ;;  %v297_v17 = vmax.f32 %v233_v9, 0.0  ;;  %v944_v5 = vld [vmem:[%s1472_s0 + $0x70] sm:$0xff]  }
  0x14   :  { %v747_v19 = vpack.c.bf16 %v292_v10, %v292_v10  ;;  %v748_v20 = vpack.c.bf16 %v293_v11, %v293_v11  ;;  %v298_v21 = vmax.f32 %v234_v12, 0.0  ;;  %v299_v22 = vmax.f32 %v235_v13, 0.0  ;;  %v945_v11 = vld [vmem:[%s1472_s0 + $0x78] sm:$0xff]  }
  0x15   :  { %v749_v25 = vpack.c.bf16 %v294_v14, %v294_v14  ;;  %v750_v26 = vpack.c.bf16 %v295_v15, %v295_v15  ;;  %v751_v27 = vpack.c.bf16 %v296_v16, %v296_v16  ;;  %v752_v28 = vpack.c.bf16 %v297_v17, %v297_v17 }
  0x16   :  { %613 = vst.msk [vmem:[%s1475_s3 + $0x20] sm:$0xf] %vm604_vm0, %v747_v19  ;;  %614 = vst.msk [vmem:[%s1475_s3 + $0x24] sm:$0xf] %vm604_vm0, %v748_v20  ;;  %v753_v30 = vpack.c.bf16 %v298_v21, %v298_v21  ;;  %v754_v31 = vpack.c.bf16 %v299_v22, %v299_v22  ;;  %v841_v34 = vunpack.c.l.bf16 %v939_v23  ;;  %v842_v35 = vunpack.c.h.bf16 %v939_v23 }
  0x17   :  { %615 = vst.msk [vmem:[%s1475_s3 + $0x28] sm:$0xf] %vm604_vm0, %v749_v25  ;;  %616 = vst.msk [vmem:[%s1475_s3 + $0x2c] sm:$0xf] %vm604_vm0, %v750_v26  ;;  %v845_v36 = vunpack.c.l.bf16 %v940_v24  ;;  %v846_v37 = vunpack.c.h.bf16 %v940_v24  ;;  %v165_v38 = vmul.f32 %v837_v32, %v988_v1  ;;  %v166_v39 = vmul.f32 %v838_v33, %v988_v1 }
  0x18   :  { %617 = vst.msk [vmem:[%s1475_s3 + $0x30] sm:$0xf] %vm604_vm0, %v751_v27  ;;  %618 = vst.msk [vmem:[%s1475_s3 + $0x34] sm:$0xf] %vm604_vm0, %v752_v28  ;;  %v849_v40 = vunpack.c.l.bf16 %v941_v29  ;;  %v850_v41 = vunpack.c.h.bf16 %v941_v29  ;;  %v167_v42 = vmul.f32 %v841_v34, %v988_v1  ;;  %v168_v43 = vmul.f32 %v842_v35, %v988_v1 }
  0x19   :  { %619 = vst.msk [vmem:[%s1475_s3 + $0x38] sm:$0xf] %vm604_vm0, %v753_v30  ;;  %620 = vst.msk [vmem:[%s1475_s3 + $0x3c] sm:$0xf] %vm604_vm0, %v754_v31  ;;  %v169_v44 = vmul.f32 %v845_v36, %v988_v1  ;;  %v170_v45 = vmul.f32 %v846_v37, %v988_v1  ;;  %v236_v46 = vadd.f32 %v1002_v7, %v165_v38  ;;  %v853_v14 = vunpack.c.l.bf16 %v942_v62 }
  0x1a   :  { %v237_v47 = vadd.f32 %v1002_v7, %v166_v39  ;;  %v171_v48 = vmul.f32 %v849_v40, %v988_v1  ;;  %v172_v49 = vmul.f32 %v850_v41, %v988_v1  ;;  %v238_v50 = vadd.f32 %v1002_v7, %v167_v42 }
  0x1b   :  { %v239_v51 = vadd.f32 %v1002_v7, %v168_v43  ;;  %v240_v52 = vadd.f32 %v1002_v7, %v169_v44  ;;  %v241_v53 = vadd.f32 %v1002_v7, %v170_v45  ;;  %v300_v54 = vmax.f32 %v236_v46, 0.0  ;;  %v946_v44 = vld [vmem:[%s1472_s0 + $0x80] sm:$0xff]  }
  0x1c   :  { %v301_v55 = vmax.f32 %v237_v47, 0.0  ;;  %v242_v56 = vadd.f32 %v1002_v7, %v171_v48  ;;  %v243_v57 = vadd.f32 %v1002_v7, %v172_v49  ;;  %v302_v58 = vmax.f32 %v238_v50, 0.0  ;;  %v947_v49 = vld [vmem:[%s1472_s0 + $0x88] sm:$0xff]   ;;  %v948_v50 = vld [vmem:[%s1472_s0 + $0x90] sm:$0xff]  }
  0x1d   :  { %v303_v59 = vmax.f32 %v239_v51, 0.0  ;;  %v304_v60 = vmax.f32 %v240_v52, 0.0  ;;  %v305_v61 = vmax.f32 %v241_v53, 0.0  ;;  %v755_v63 = vpack.c.bf16 %v300_v54, %v300_v54 }
  0x1e   :  { %v756_v0 = vpack.c.bf16 %v301_v55, %v301_v55  ;;  %v306_v2 = vmax.f32 %v242_v56, 0.0  ;;  %v307_v3 = vmax.f32 %v243_v57, 0.0  ;;  %v757_v6 = vpack.c.bf16 %v302_v58, %v302_v58  ;;  %v949_v55 = vld [vmem:[%s1472_s0 + $0x98] sm:$0xff]  }
  0x1f   :  { %v758_v8 = vpack.c.bf16 %v303_v59, %v303_v59  ;;  %v759_v9 = vpack.c.bf16 %v304_v60, %v304_v60  ;;  %v760_v10 = vpack.c.bf16 %v305_v61, %v305_v61  ;;  %621 = vst.msk [vmem:[%s1475_s3 + $0x40] sm:$0xf] %vm604_vm0, %v755_v63  ;;  %v854_v15 = vunpack.c.h.bf16 %v942_v62 }
  0x20   :  { %622 = vst.msk [vmem:[%s1475_s3 + $0x44] sm:$0xf] %vm604_vm0, %v756_v0  ;;  %v761_v12 = vpack.c.bf16 %v306_v2, %v306_v2  ;;  %v762_v13 = vpack.c.bf16 %v307_v3, %v307_v3  ;;  %623 = vst.msk [vmem:[%s1475_s3 + $0x48] sm:$0xf] %vm604_vm0, %v757_v6  ;;  %v857_v16 = vunpack.c.l.bf16 %v943_v4  ;;  %v858_v17 = vunpack.c.h.bf16 %v943_v4 }
  0x21   :  { %624 = vst.msk [vmem:[%s1475_s3 + $0x4c] sm:$0xf] %vm604_vm0, %v758_v8  ;;  %625 = vst.msk [vmem:[%s1475_s3 + $0x50] sm:$0xf] %vm604_vm0, %v759_v9  ;;  %v861_v18 = vunpack.c.l.bf16 %v944_v5  ;;  %v862_v19 = vunpack.c.h.bf16 %v944_v5  ;;  %v173_v20 = vmul.f32 %v853_v14, %v988_v1  ;;  %v174_v21 = vmul.f32 %v854_v15, %v988_v1 }
  0x22   :  { %626 = vst.msk [vmem:[%s1475_s3 + $0x54] sm:$0xf] %vm604_vm0, %v760_v10  ;;  %627 = vst.msk [vmem:[%s1475_s3 + $0x58] sm:$0xf] %vm604_vm0, %v761_v12  ;;  %v865_v22 = vunpack.c.l.bf16 %v945_v11  ;;  %v866_v23 = vunpack.c.h.bf16 %v945_v11  ;;  %v175_v24 = vmul.f32 %v857_v16, %v988_v1  ;;  %v176_v25 = vmul.f32 %v858_v17, %v988_v1 }
  0x23   :  { %628 = vst.msk [vmem:[%s1475_s3 + $0x5c] sm:$0xf] %vm604_vm0, %v762_v13  ;;  %v177_v26 = vmul.f32 %v861_v18, %v988_v1  ;;  %v178_v27 = vmul.f32 %v862_v19, %v988_v1  ;;  %v244_v28 = vadd.f32 %v1002_v7, %v173_v20  ;;  %v245_v29 = vadd.f32 %v1002_v7, %v174_v21 }
  0x24   :  { %v179_v30 = vmul.f32 %v865_v22, %v988_v1  ;;  %v180_v31 = vmul.f32 %v866_v23, %v988_v1  ;;  %v246_v32 = vadd.f32 %v1002_v7, %v175_v24  ;;  %v247_v33 = vadd.f32 %v1002_v7, %v176_v25 }
  0x25   :  { %v248_v34 = vadd.f32 %v1002_v7, %v177_v26  ;;  %v249_v35 = vadd.f32 %v1002_v7, %v178_v27  ;;  %v308_v36 = vmax.f32 %v244_v28, 0.0  ;;  %v309_v37 = vmax.f32 %v245_v29, 0.0  ;;  %v950_v26 = vld [vmem:[%s1472_s0 + $0xa0] sm:$0xff]  }
  0x26   :  { %v250_v38 = vadd.f32 %v1002_v7, %v179_v30  ;;  %v251_v39 = vadd.f32 %v1002_v7, %v180_v31  ;;  %v310_v40 = vmax.f32 %v246_v32, 0.0  ;;  %v311_v41 = vmax.f32 %v247_v33, 0.0  ;;  %v951_v31 = vld [vmem:[%s1472_s0 + $0xa8] sm:$0xff]   ;;  %v952_v32 = vld [vmem:[%s1472_s0 + $0xb0] sm:$0xff]  }
  0x27   :  { %v312_v42 = vmax.f32 %v248_v34, 0.0  ;;  %v313_v43 = vmax.f32 %v249_v35, 0.0  ;;  %v763_v45 = vpack.c.bf16 %v308_v36, %v308_v36  ;;  %v764_v46 = vpack.c.bf16 %v309_v37, %v309_v37  ;;  %v953_v37 = vld [vmem:[%s1472_s0 + $0xb8] sm:$0xff]  }
  0x28   :  { %v314_v47 = vmax.f32 %v250_v38, 0.0  ;;  %v315_v48 = vmax.f32 %v251_v39, 0.0  ;;  %v765_v51 = vpack.c.bf16 %v310_v40, %v310_v40  ;;  %v766_v52 = vpack.c.bf16 %v311_v41, %v311_v41 }
  0x29   :  { %v767_v53 = vpack.c.bf16 %v312_v42, %v312_v42  ;;  %v768_v54 = vpack.c.bf16 %v313_v43, %v313_v43  ;;  %629 = vst.msk [vmem:[%s1475_s3 + $0x60] sm:$0xf] %vm604_vm0, %v763_v45  ;;  %630 = vst.msk [vmem:[%s1475_s3 + $0x64] sm:$0xf] %vm604_vm0, %v764_v46  ;;  %v869_v58 = vunpack.c.l.bf16 %v946_v44  ;;  %v870_v59 = vunpack.c.h.bf16 %v946_v44 }
  0x2a   :  { %v769_v56 = vpack.c.bf16 %v314_v47, %v314_v47  ;;  %v770_v57 = vpack.c.bf16 %v315_v48, %v315_v48  ;;  %631 = vst.msk [vmem:[%s1475_s3 + $0x68] sm:$0xf] %vm604_vm0, %v765_v51  ;;  %632 = vst.msk [vmem:[%s1475_s3 + $0x6c] sm:$0xf] %vm604_vm0, %v766_v52  ;;  %v873_v60 = vunpack.c.l.bf16 %v947_v49  ;;  %v874_v61 = vunpack.c.h.bf16 %v947_v49 }
  0x2b   :  { %633 = vst.msk [vmem:[%s1475_s3 + $0x70] sm:$0xf] %vm604_vm0, %v767_v53  ;;  %634 = vst.msk [vmem:[%s1475_s3 + $0x74] sm:$0xf] %vm604_vm0, %v768_v54  ;;  %v877_v62 = vunpack.c.l.bf16 %v948_v50  ;;  %v878_v63 = vunpack.c.h.bf16 %v948_v50  ;;  %v181_v0 = vmul.f32 %v869_v58, %v988_v1  ;;  %v182_v2 = vmul.f32 %v870_v59, %v988_v1 }
  0x2c   :  { %635 = vst.msk [vmem:[%s1475_s3 + $0x78] sm:$0xf] %vm604_vm0, %v769_v56  ;;  %636 = vst.msk [vmem:[%s1475_s3 + $0x7c] sm:$0xf] %vm604_vm0, %v770_v57  ;;  %v881_v3 = vunpack.c.l.bf16 %v949_v55  ;;  %v882_v4 = vunpack.c.h.bf16 %v949_v55  ;;  %v183_v5 = vmul.f32 %v873_v60, %v988_v1  ;;  %v184_v6 = vmul.f32 %v874_v61, %v988_v1 }
  0x2d   :  { %v185_v8 = vmul.f32 %v877_v62, %v988_v1  ;;  %v186_v9 = vmul.f32 %v878_v63, %v988_v1  ;;  %v252_v10 = vadd.f32 %v1002_v7, %v181_v0  ;;  %v253_v11 = vadd.f32 %v1002_v7, %v182_v2 }
  0x2e   :  { %v187_v12 = vmul.f32 %v881_v3, %v988_v1  ;;  %v188_v13 = vmul.f32 %v882_v4, %v988_v1  ;;  %v254_v14 = vadd.f32 %v1002_v7, %v183_v5  ;;  %v255_v15 = vadd.f32 %v1002_v7, %v184_v6 }
  0x2f   :  { %v256_v16 = vadd.f32 %v1002_v7, %v185_v8  ;;  %v257_v17 = vadd.f32 %v1002_v7, %v186_v9  ;;  %v316_v18 = vmax.f32 %v252_v10, 0.0  ;;  %v317_v19 = vmax.f32 %v253_v11, 0.0  ;;  %v954_v8 = vld [vmem:[%s1472_s0 + $0xc0] sm:$0xff]  }
  0x30   :  { %v258_v20 = vadd.f32 %v1002_v7, %v187_v12  ;;  %v259_v21 = vadd.f32 %v1002_v7, %v188_v13  ;;  %v318_v22 = vmax.f32 %v254_v14, 0.0  ;;  %v319_v23 = vmax.f32 %v255_v15, 0.0  ;;  %v955_v13 = vld [vmem:[%s1472_s0 + $0xc8] sm:$0xff]   ;;  %v956_v14 = vld [vmem:[%s1472_s0 + $0xd0] sm:$0xff]  }
  0x31   :  { %v320_v24 = vmax.f32 %v256_v16, 0.0  ;;  %v321_v25 = vmax.f32 %v257_v17, 0.0  ;;  %v771_v27 = vpack.c.bf16 %v316_v18, %v316_v18  ;;  %v772_v28 = vpack.c.bf16 %v317_v19, %v317_v19  ;;  %v957_v19 = vld [vmem:[%s1472_s0 + $0xd8] sm:$0xff]  }
  0x32   :  { %v322_v29 = vmax.f32 %v258_v20, 0.0  ;;  %v323_v30 = vmax.f32 %v259_v21, 0.0  ;;  %v773_v33 = vpack.c.bf16 %v318_v22, %v318_v22  ;;  %v774_v34 = vpack.c.bf16 %v319_v23, %v319_v23 }
  0x33   :  { %v775_v35 = vpack.c.bf16 %v320_v24, %v320_v24  ;;  %v776_v36 = vpack.c.bf16 %v321_v25, %v321_v25  ;;  %637 = vst.msk [vmem:[%s1475_s3 + $0x80] sm:$0xf] %vm604_vm0, %v771_v27  ;;  %638 = vst.msk [vmem:[%s1475_s3 + $0x84] sm:$0xf] %vm604_vm0, %v772_v28  ;;  %v885_v40 = vunpack.c.l.bf16 %v950_v26  ;;  %v886_v41 = vunpack.c.h.bf16 %v950_v26 }
  0x34   :  { %v777_v38 = vpack.c.bf16 %v322_v29, %v322_v29  ;;  %v778_v39 = vpack.c.bf16 %v323_v30, %v323_v30  ;;  %639 = vst.msk [vmem:[%s1475_s3 + $0x88] sm:$0xf] %vm604_vm0, %v773_v33  ;;  %640 = vst.msk [vmem:[%s1475_s3 + $0x8c] sm:$0xf] %vm604_vm0, %v774_v34  ;;  %v889_v42 = vunpack.c.l.bf16 %v951_v31  ;;  %v890_v43 = vunpack.c.h.bf16 %v951_v31 }
  0x35   :  { %641 = vst.msk [vmem:[%s1475_s3 + $0x90] sm:$0xf] %vm604_vm0, %v775_v35  ;;  %642 = vst.msk [vmem:[%s1475_s3 + $0x94] sm:$0xf] %vm604_vm0, %v776_v36  ;;  %v893_v44 = vunpack.c.l.bf16 %v952_v32  ;;  %v894_v45 = vunpack.c.h.bf16 %v952_v32  ;;  %v189_v46 = vmul.f32 %v885_v40, %v988_v1  ;;  %v190_v47 = vmul.f32 %v886_v41, %v988_v1 }
  0x36   :  { %643 = vst.msk [vmem:[%s1475_s3 + $0x98] sm:$0xf] %vm604_vm0, %v777_v38  ;;  %644 = vst.msk [vmem:[%s1475_s3 + $0x9c] sm:$0xf] %vm604_vm0, %v778_v39  ;;  %v897_v48 = vunpack.c.l.bf16 %v953_v37  ;;  %v898_v49 = vunpack.c.h.bf16 %v953_v37  ;;  %v191_v50 = vmul.f32 %v889_v42, %v988_v1  ;;  %v192_v51 = vmul.f32 %v890_v43, %v988_v1 }
  0x37   :  { %v193_v52 = vmul.f32 %v893_v44, %v988_v1  ;;  %v194_v53 = vmul.f32 %v894_v45, %v988_v1  ;;  %v260_v54 = vadd.f32 %v1002_v7, %v189_v46  ;;  %v261_v55 = vadd.f32 %v1002_v7, %v190_v47 }
  0x38   :  { %v195_v56 = vmul.f32 %v897_v48, %v988_v1  ;;  %v196_v57 = vmul.f32 %v898_v49, %v988_v1  ;;  %v262_v58 = vadd.f32 %v1002_v7, %v191_v50  ;;  %v263_v59 = vadd.f32 %v1002_v7, %v192_v51 }
  0x39   :  { %v264_v60 = vadd.f32 %v1002_v7, %v193_v52  ;;  %v265_v61 = vadd.f32 %v1002_v7, %v194_v53  ;;  %v324_v62 = vmax.f32 %v260_v54, 0.0  ;;  %v325_v63 = vmax.f32 %v261_v55, 0.0  ;;  %v958_v52 = vld [vmem:[%s1472_s0 + $0xe0] sm:$0xff]  }
  0x3a   :  { %v266_v0 = vadd.f32 %v1002_v7, %v195_v56  ;;  %v267_v2 = vadd.f32 %v1002_v7, %v196_v57  ;;  %v326_v3 = vmax.f32 %v262_v58, 0.0  ;;  %v327_v4 = vmax.f32 %v263_v59, 0.0  ;;  %v959_v57 = vld [vmem:[%s1472_s0 + $0xe8] sm:$0xff]   ;;  %v960_v58 = vld [vmem:[%s1472_s0 + $0xf0] sm:$0xff]  }
  0x3b   :  { %v328_v5 = vmax.f32 %v264_v60, 0.0  ;;  %v329_v6 = vmax.f32 %v265_v61, 0.0  ;;  %v779_v9 = vpack.c.bf16 %v324_v62, %v324_v62  ;;  %v780_v10 = vpack.c.bf16 %v325_v63, %v325_v63  ;;  %v961_v63 = vld [vmem:[%s1472_s0 + $0xf8] sm:$0xff]  }
  0x3c   :  { %v330_v11 = vmax.f32 %v266_v0, 0.0  ;;  %v331_v12 = vmax.f32 %v267_v2, 0.0  ;;  %v781_v15 = vpack.c.bf16 %v326_v3, %v326_v3  ;;  %v782_v16 = vpack.c.bf16 %v327_v4, %v327_v4 }
  0x3d   :  { %v783_v17 = vpack.c.bf16 %v328_v5, %v328_v5  ;;  %v784_v18 = vpack.c.bf16 %v329_v6, %v329_v6  ;;  %645 = vst.msk [vmem:[%s1475_s3 + $0xa0] sm:$0xf] %vm604_vm0, %v779_v9  ;;  %646 = vst.msk [vmem:[%s1475_s3 + $0xa4] sm:$0xf] %vm604_vm0, %v780_v10  ;;  %v901_v22 = vunpack.c.l.bf16 %v954_v8  ;;  %v902_v23 = vunpack.c.h.bf16 %v954_v8 }
  0x3e   :  { %v785_v20 = vpack.c.bf16 %v330_v11, %v330_v11  ;;  %v786_v21 = vpack.c.bf16 %v331_v12, %v331_v12  ;;  %647 = vst.msk [vmem:[%s1475_s3 + $0xa8] sm:$0xf] %vm604_vm0, %v781_v15  ;;  %648 = vst.msk [vmem:[%s1475_s3 + $0xac] sm:$0xf] %vm604_vm0, %v782_v16  ;;  %v905_v24 = vunpack.c.l.bf16 %v955_v13  ;;  %v906_v25 = vunpack.c.h.bf16 %v955_v13 }
  0x3f   :  { %649 = vst.msk [vmem:[%s1475_s3 + $0xb0] sm:$0xf] %vm604_vm0, %v783_v17  ;;  %650 = vst.msk [vmem:[%s1475_s3 + $0xb4] sm:$0xf] %vm604_vm0, %v784_v18  ;;  %v909_v26 = vunpack.c.l.bf16 %v956_v14  ;;  %v910_v27 = vunpack.c.h.bf16 %v956_v14  ;;  %v197_v28 = vmul.f32 %v901_v22, %v988_v1  ;;  %v198_v29 = vmul.f32 %v902_v23, %v988_v1 }
  0x40   :  { %651 = vst.msk [vmem:[%s1475_s3 + $0xb8] sm:$0xf] %vm604_vm0, %v785_v20  ;;  %652 = vst.msk [vmem:[%s1475_s3 + $0xbc] sm:$0xf] %vm604_vm0, %v786_v21  ;;  %v913_v30 = vunpack.c.l.bf16 %v957_v19  ;;  %v914_v31 = vunpack.c.h.bf16 %v957_v19  ;;  %v199_v32 = vmul.f32 %v905_v24, %v988_v1  ;;  %v200_v33 = vmul.f32 %v906_v25, %v988_v1 }
  0x41   :  { %v201_v34 = vmul.f32 %v909_v26, %v988_v1  ;;  %v202_v35 = vmul.f32 %v910_v27, %v988_v1  ;;  %v268_v36 = vadd.f32 %v1002_v7, %v197_v28  ;;  %v269_v37 = vadd.f32 %v1002_v7, %v198_v29 }
  0x42   :  { %v203_v38 = vmul.f32 %v913_v30, %v988_v1  ;;  %v204_v39 = vmul.f32 %v914_v31, %v988_v1  ;;  %v270_v40 = vadd.f32 %v1002_v7, %v199_v32  ;;  %v271_v41 = vadd.f32 %v1002_v7, %v200_v33 }
  0x43   :  { %v272_v42 = vadd.f32 %v1002_v7, %v201_v34  ;;  %v273_v43 = vadd.f32 %v1002_v7, %v202_v35  ;;  %v332_v44 = vmax.f32 %v268_v36, 0.0  ;;  %v333_v45 = vmax.f32 %v269_v37, 0.0 }
  0x44   :  { %v274_v46 = vadd.f32 %v1002_v7, %v203_v38  ;;  %v275_v47 = vadd.f32 %v1002_v7, %v204_v39  ;;  %v334_v48 = vmax.f32 %v270_v40, 0.0  ;;  %v335_v49 = vmax.f32 %v271_v41, 0.0 }
  0x45   :  { %v336_v50 = vmax.f32 %v272_v42, 0.0  ;;  %v337_v51 = vmax.f32 %v273_v43, 0.0  ;;  %v787_v53 = vpack.c.bf16 %v332_v44, %v332_v44  ;;  %v788_v54 = vpack.c.bf16 %v333_v45, %v333_v45 }
  0x46   :  { %v338_v55 = vmax.f32 %v274_v46, 0.0  ;;  %v339_v56 = vmax.f32 %v275_v47, 0.0  ;;  %v789_v59 = vpack.c.bf16 %v334_v48, %v334_v48  ;;  %v790_v60 = vpack.c.bf16 %v335_v49, %v335_v49 }
  0x47   :  { %v791_v61 = vpack.c.bf16 %v336_v50, %v336_v50  ;;  %v792_v62 = vpack.c.bf16 %v337_v51, %v337_v51  ;;  %653 = vst.msk [vmem:[%s1475_s3 + $0xc0] sm:$0xf] %vm604_vm0, %v787_v53  ;;  %654 = vst.msk [vmem:[%s1475_s3 + $0xc4] sm:$0xf] %vm604_vm0, %v788_v54  ;;  %v917_v3 = vunpack.c.l.bf16 %v958_v52  ;;  %v918_v4 = vunpack.c.h.bf16 %v958_v52 }
  0x48   :  { %v793_v0 = vpack.c.bf16 %v338_v55, %v338_v55  ;;  %v794_v2 = vpack.c.bf16 %v339_v56, %v339_v56  ;;  %655 = vst.msk [vmem:[%s1475_s3 + $0xc8] sm:$0xf] %vm604_vm0, %v789_v59  ;;  %656 = vst.msk [vmem:[%s1475_s3 + $0xcc] sm:$0xf] %vm604_vm0, %v790_v60  ;;  %v921_v5 = vunpack.c.l.bf16 %v959_v57  ;;  %v922_v6 = vunpack.c.h.bf16 %v959_v57 }
  0x49   :  { %657 = vst.msk [vmem:[%s1475_s3 + $0xd0] sm:$0xf] %vm604_vm0, %v791_v61  ;;  %658 = vst.msk [vmem:[%s1475_s3 + $0xd4] sm:$0xf] %vm604_vm0, %v792_v62  ;;  %v925_v8 = vunpack.c.l.bf16 %v960_v58  ;;  %v926_v9 = vunpack.c.h.bf16 %v960_v58  ;;  %v205_v10 = vmul.f32 %v917_v3, %v988_v1  ;;  %v206_v11 = vmul.f32 %v918_v4, %v988_v1 }
  0x4a   :  { %659 = vst.msk [vmem:[%s1475_s3 + $0xd8] sm:$0xf] %vm604_vm0, %v793_v0  ;;  %660 = vst.msk [vmem:[%s1475_s3 + $0xdc] sm:$0xf] %vm604_vm0, %v794_v2  ;;  %v929_v12 = vunpack.c.l.bf16 %v961_v63  ;;  %v930_v13 = vunpack.c.h.bf16 %v961_v63  ;;  %v207_v14 = vmul.f32 %v921_v5, %v988_v1  ;;  %v208_v15 = vmul.f32 %v922_v6, %v988_v1 }
  0x4b   :  { %v209_v16 = vmul.f32 %v925_v8, %v988_v1  ;;  %v210_v17 = vmul.f32 %v926_v9, %v988_v1  ;;  %v276_v18 = vadd.f32 %v1002_v7, %v205_v10  ;;  %v277_v19 = vadd.f32 %v1002_v7, %v206_v11 }
  0x4c   :  { %v211_v20 = vmul.f32 %v929_v12, %v988_v1  ;;  %v212_v21 = vmul.f32 %v930_v13, %v988_v1  ;;  %v278_v22 = vadd.f32 %v1002_v7, %v207_v14  ;;  %v279_v23 = vadd.f32 %v1002_v7, %v208_v15 }
  0x4d   :  { %v280_v24 = vadd.f32 %v1002_v7, %v209_v16  ;;  %v281_v25 = vadd.f32 %v1002_v7, %v210_v17  ;;  %v340_v26 = vmax.f32 %v276_v18, 0.0  ;;  %v341_v27 = vmax.f32 %v277_v19, 0.0 }
  0x4e   :  { %v282_v28 = vadd.f32 %v1002_v7, %v211_v20  ;;  %v283_v29 = vadd.f32 %v1002_v7, %v212_v21  ;;  %v342_v30 = vmax.f32 %v278_v22, 0.0  ;;  %v343_v31 = vmax.f32 %v279_v23, 0.0 }
  0x4f   :  { %v344_v32 = vmax.f32 %v280_v24, 0.0  ;;  %v345_v33 = vmax.f32 %v281_v25, 0.0  ;;  %v795_v34 = vpack.c.bf16 %v340_v26, %v340_v26  ;;  %v796_v1 = vpack.c.bf16 %v341_v27, %v341_v27 }
  0x50   :  { %v346_v35 = vmax.f32 %v282_v28, 0.0  ;;  %v347_v36 = vmax.f32 %v283_v29, 0.0  ;;  %v797_v37 = vpack.c.bf16 %v342_v30, %v342_v30  ;;  %v798_v38 = vpack.c.bf16 %v343_v31, %v343_v31 }
  0x51   :  { %v799_v39 = vpack.c.bf16 %v344_v32, %v344_v32  ;;  %v800_v40 = vpack.c.bf16 %v345_v33, %v345_v33  ;;  %661 = vst.msk [vmem:[%s1475_s3 + $0xe0] sm:$0xf] %vm604_vm0, %v795_v34  ;;  %662 = vst.msk [vmem:[%s1475_s3 + $0xe4] sm:$0xf] %vm604_vm0, %v796_v1 }
  0x52   :  { %v801_v7 = vpack.c.bf16 %v346_v35, %v346_v35  ;;  %v802_v41 = vpack.c.bf16 %v347_v36, %v347_v36  ;;  %663 = vst.msk [vmem:[%s1475_s3 + $0xe8] sm:$0xf] %vm604_vm0, %v797_v37  ;;  %664 = vst.msk [vmem:[%s1475_s3 + $0xec] sm:$0xf] %vm604_vm0, %v798_v38 }
  0x53   :  { %665 = vst.msk [vmem:[%s1475_s3 + $0xf0] sm:$0xf] %vm604_vm0, %v799_v39  ;;  %666 = vst.msk [vmem:[%s1475_s3 + $0xf4] sm:$0xf] %vm604_vm0, %v800_v40 }
  0x54   :  { %667 = vst.msk [vmem:[%s1475_s3 + $0xf8] sm:$0xf] %vm604_vm0, %v801_v7  ;;  %668 = vst.msk [vmem:[%s1475_s3 + $0xfc] sm:$0xf] %vm604_vm0, %v802_v41 }

// kernel: densenet_forward.30
= control target key start
LH: loop header
LB: loop body
LE: loop exit
PB: predicated region body
PF: predicated region fallthrough
CT: control target
= control target key end

     0   :  { %v1850_v0 = vmov 0   ;;  %vm573_vm0 = vcmask 154624   ;;  %vm670_vm1 = vcmask 1040384   ;;  %vm671_vm2 = vcmask 1041408   ;;  %s2574_s1 = inlined_call_operand.vmem [shape: bf16[1,147,16], index: 1, kind: input, shape index: {}]   ;;  %s2575_s0 = inlined_call_operand.vmem [shape: bf16[512,147], index: 0, kind: input, shape index: {}]   ;;  %s2576_s2 = inlined_call_operand.vmem [shape: bf16[512,16], index: 2, kind: output, shape index: {}]  }
   0x1   :  { %677 = vmatprep.subr.bf16.mxu0 %v1850_v0  ;;  %1721 = vmatprep.subr.bf16.mxu1 %v1850_v0  ;;  %v1744_v1 = vld [vmem:[%s2574_s1] sm:$0xff]   ;;  %v1745_v2 = vld [vmem:[%s2574_s1 + $0x8] sm:$0xff]   ;;  %v1746_v3 = vld [vmem:[%s2574_s1 + $0x10] sm:$0xff]   ;;  %v1851_v11 = vmov 65535   ;;  %vm16_vm3 = vcmask 130048   ;;  %v1852_v17 = vmov 0.0  }
   0x2   :  { %678 = vmatpush1.bf16.msra.mxu0 %v1744_v1  ;;  %1731 = vmatpush1.bf16.msra.mxu1 %v1744_v1  ;;  %v1747_v4 = vld [vmem:[%s2574_s1 + $0x18] sm:$0xff]   ;;  %v1756_v5 = vld [vmem:[%s2575_s0 + $0x4] ss:$8 sps:$4 sm:$0xff]   ;;  %v1750_v9 = vld [vmem:[%s2574_s1 + $0x30] sm:$0xff]   ;;  %v672_v12 = vsel %vm670_vm1, 4294967295, %v1851_v11  ;;  %17 = vst.msk [vmem:[#allocation2] sm:$0xff] %vm16_vm3, %v1852_v17 }
   0x3   :  { %679 = vmatprep.subr.bf16.mxu0 %v1850_v0  ;;  %1722 = vmatprep.subr.bf16.mxu1 %v1850_v0  ;;  %v1759_v6 = vld [vmem:[%s2575_s0 + $0x104] ss:$8 sps:$4 sm:$0xff]   ;;  %v1751_v10 = vld [vmem:[%s2574_s1 + $0x38] sm:$0xff]   ;;  %v1753_v14 = vld [vmem:[%s2574_s1 + $0x48] ss:$0 sps:$4 sm:$0x33]  }
   0x4   :  { %1561 = vmatprep.mubr.msk.bf16.mxu0 %vm573_vm0, %v1756_v5  ;;  %v1748_v7 = vld [vmem:[%s2574_s1 + $0x20] sm:$0xff]   ;;  %1577 = vmatprep.mubr.msk.bf16.mxu1 %vm573_vm0, %v1759_v6  ;;  %v1749_v8 = vld [vmem:[%s2574_s1 + $0x28] sm:$0xff]   ;;  %v673_v15 = vsel %vm671_vm2, %v672_v12, 0  ;;  %18 = vst.msk [vmem:[#allocation2 + $0x8] sm:$0xff] %vm16_vm3, %v1852_v17  ;;  %19 = vst.msk [vmem:[#allocation2 + $0x10] sm:$0xff] %vm16_vm3, %v1852_v17  ;;  %vm1418_vm4 = vcmask 125952  }
   0x5   :  { %v1752_v13 = vld [vmem:[%s2574_s1 + $0x40] sm:$0xff]   ;;  %v1906_v16 = vand.u32 %v1753_v14, %v673_v15  ;;  %20 = vst.msk [vmem:[#allocation2 + $0x18] sm:$0xff] %vm16_vm3, %v1852_v17  ;;  %21 = vst.msk [vmem:[#allocation2 + $0x20] sm:$0xff] %vm16_vm3, %v1852_v17  ;;  %v1760_v20 = vld [vmem:[%s2575_s0 + $0x14] ss:$8 sps:$4 sm:$0xff]  }
   0x6   :  { %680 = vmatpush1.bf16.msra.mxu0 %v1745_v2  ;;  %1732 = vmatpush1.bf16.msra.mxu1 %v1745_v2  ;;  %22 = vst.msk [vmem:[#allocation2 + $0x28] sm:$0xff] %vm16_vm3, %v1852_v17  ;;  %23 = vst.msk [vmem:[#allocation2 + $0x30] sm:$0xff] %vm16_vm3, %v1852_v17  ;;  %v1754_v18 = vld [vmem:[%s2575_s0] ss:$8 sps:$4 sm:$0xff]   ;;  %v1762_v21 = vld [vmem:[%s2575_s0 + $0x114] ss:$8 sps:$4 sm:$0xff]  }
   0x7   :  { %681 = vmatprep.subr.bf16.mxu0 %v1850_v0  ;;  %1723 = vmatprep.subr.bf16.mxu1 %v1850_v0  ;;  %24 = vst.msk [vmem:[#allocation2 + $0x38] sm:$0xff] %vm16_vm3, %v1852_v17  ;;  %25 = vst.msk [vmem:[#allocation2 + $0x40] sm:$0xff] %vm16_vm3, %v1852_v17  ;;  %v1757_v19 = vld [vmem:[%s2575_s0 + $0x100] ss:$8 sps:$4 sm:$0xff]   ;;  %v1764_v22 = vld [vmem:[%s2575_s0 + $0x10] ss:$8 sps:$4 sm:$0xff]  }
   0x8   :  { %26 = vst.msk [vmem:[#allocation2 + $0x48] sm:$0xff] %vm16_vm3, %v1852_v17  ;;  %27 = vst.msk [vmem:[#allocation2 + $0x50] sm:$0xff] %vm16_vm3, %v1852_v17  ;;  %v1765_v23 = vld [vmem:[%s2575_s0 + $0x110] ss:$8 sps:$4 sm:$0xff]   ;;  %v1766_v24 = vld [vmem:[%s2575_s0 + $0x24] ss:$8 sps:$4 sm:$0xff]  }
   0x9   :  { %28 = vst.msk [vmem:[#allocation2 + $0x58] sm:$0xff] %vm16_vm3, %v1852_v17  ;;  %29 = vst.msk [vmem:[#allocation2 + $0x60] sm:$0xff] %vm16_vm3, %v1852_v17  ;;  %v1768_v25 = vld [vmem:[%s2575_s0 + $0x124] ss:$8 sps:$4 sm:$0xff]   ;;  %v1770_v26 = vld [vmem:[%s2575_s0 + $0x20] ss:$8 sps:$4 sm:$0xff]  }
   0xa   :  { %682 = vmatpush1.bf16.msra.mxu0 %v1746_v3  ;;  %1733 = vmatpush1.bf16.msra.mxu1 %v1746_v3  ;;  %30 = vst.msk [vmem:[#allocation2 + $0x68] sm:$0xff] %vm16_vm3, %v1852_v17  ;;  %31 = vst.msk [vmem:[#allocation2 + $0x70] sm:$0xff] %vm16_vm3, %v1852_v17  ;;  %v1771_v27 = vld [vmem:[%s2575_s0 + $0x120] ss:$8 sps:$4 sm:$0xff]   ;;  %v1772_v28 = vld [vmem:[%s2575_s0 + $0x34] ss:$8 sps:$4 sm:$0xff]  }
   0xb   :  { %683 = vmatprep.subr.bf16.mxu0 %v1850_v0  ;;  %1724 = vmatprep.subr.bf16.mxu1 %v1850_v0  ;;  %32 = vst.msk [vmem:[#allocation2 + $0x78] sm:$0xff] %vm16_vm3, %v1852_v17  ;;  %33 = vst.msk [vmem:[#allocation2 + $0x80] sm:$0xff] %vm16_vm3, %v1852_v17  ;;  %v1774_v29 = vld [vmem:[%s2575_s0 + $0x134] ss:$8 sps:$4 sm:$0xff]   ;;  %v1776_v30 = vld [vmem:[%s2575_s0 + $0x30] ss:$8 sps:$4 sm:$0xff]  }
   0xc   :  { %34 = vst.msk [vmem:[#allocation2 + $0x88] sm:$0xff] %vm16_vm3, %v1852_v17  ;;  %35 = vst.msk [vmem:[#allocation2 + $0x90] sm:$0xff] %vm16_vm3, %v1852_v17  ;;  %v1777_v31 = vld [vmem:[%s2575_s0 + $0x130] ss:$8 sps:$4 sm:$0xff]   ;;  %v1778_v32 = vld [vmem:[%s2575_s0 + $0x44] ss:$8 sps:$4 sm:$0xff]  }
   0xd   :  { %36 = vst.msk [vmem:[#allocation2 + $0x98] sm:$0xff] %vm16_vm3, %v1852_v17  ;;  %37 = vst.msk [vmem:[#allocation2 + $0xa0] sm:$0xff] %vm16_vm3, %v1852_v17  ;;  %v1780_v33 = vld [vmem:[%s2575_s0 + $0x144] ss:$8 sps:$4 sm:$0xff]   ;;  %v1782_v34 = vld [vmem:[%s2575_s0 + $0x40] ss:$8 sps:$4 sm:$0xff]  }
   0xe   :  { %684 = vmatpush1.bf16.msra.mxu0 %v1747_v4  ;;  %1734 = vmatpush1.bf16.msra.mxu1 %v1747_v4  ;;  %38 = vst.msk [vmem:[#allocation2 + $0xa8] sm:$0xff] %vm16_vm3, %v1852_v17  ;;  %39 = vst.msk [vmem:[#allocation2 + $0xb0] sm:$0xff] %vm16_vm3, %v1852_v17  ;;  %v1783_v35 = vld [vmem:[%s2575_s0 + $0x140] ss:$8 sps:$4 sm:$0xff]   ;;  %v1784_v36 = vld [vmem:[%s2575_s0 + $0x54] ss:$8 sps:$4 sm:$0xff]  }
   0xf   :  { %685 = vmatprep.subr.bf16.mxu0 %v1850_v0  ;;  %1725 = vmatprep.subr.bf16.mxu1 %v1850_v0  ;;  %40 = vst.msk [vmem:[#allocation2 + $0xb8] sm:$0xff] %vm16_vm3, %v1852_v17  ;;  %41 = vst.msk [vmem:[#allocation2 + $0xc0] sm:$0xff] %vm16_vm3, %v1852_v17  ;;  %v1786_v37 = vld [vmem:[%s2575_s0 + $0x154] ss:$8 sps:$4 sm:$0xff]   ;;  %v1788_v38 = vld [vmem:[%s2575_s0 + $0x50] ss:$8 sps:$4 sm:$0xff]  }
  0x10   :  { %42 = vst.msk [vmem:[#allocation2 + $0xc8] sm:$0xff] %vm16_vm3, %v1852_v17  ;;  %43 = vst.msk [vmem:[#allocation2 + $0xd0] sm:$0xff] %vm16_vm3, %v1852_v17  ;;  %v1789_v39 = vld [vmem:[%s2575_s0 + $0x150] ss:$8 sps:$4 sm:$0xff]   ;;  %v1790_v40 = vld [vmem:[%s2575_s0 + $0x64] ss:$8 sps:$4 sm:$0xff]  }
  0x11   :  { %44 = vst.msk [vmem:[#allocation2 + $0xd8] sm:$0xff] %vm16_vm3, %v1852_v17  ;;  %45 = vst.msk [vmem:[#allocation2 + $0xe0] sm:$0xff] %vm16_vm3, %v1852_v17  ;;  %v1792_v41 = vld [vmem:[%s2575_s0 + $0x164] ss:$8 sps:$4 sm:$0xff]   ;;  %v1794_v42 = vld [vmem:[%s2575_s0 + $0x60] ss:$8 sps:$4 sm:$0xff]  }
  0x12   :  { %686 = vmatpush1.bf16.msra.mxu0 %v1748_v7  ;;  %1735 = vmatpush1.bf16.msra.mxu1 %v1748_v7  ;;  %46 = vst.msk [vmem:[#allocation2 + $0xe8] sm:$0xff] %vm16_vm3, %v1852_v17  ;;  %47 = vst.msk [vmem:[#allocation2 + $0xf0] sm:$0xff] %vm16_vm3, %v1852_v17  ;;  %v1795_v43 = vld [vmem:[%s2575_s0 + $0x160] ss:$8 sps:$4 sm:$0xff]   ;;  %v1796_v44 = vld [vmem:[%s2575_s0 + $0x74] ss:$8 sps:$4 sm:$0xff]  }
  0x13   :  { %687 = vmatprep.subr.bf16.mxu0 %v1850_v0  ;;  %1726 = vmatprep.subr.bf16.mxu1 %v1850_v0  ;;  %48 = vst.msk [vmem:[#allocation2 + $0xf8] sm:$0xff] %vm16_vm3, %v1852_v17  ;;  %49 = vst.msk [vmem:[#allocation2 + $0x100] sm:$0xff] %vm16_vm3, %v1852_v17  ;;  %v1798_v45 = vld [vmem:[%s2575_s0 + $0x174] ss:$8 sps:$4 sm:$0xff]   ;;  %v1800_v46 = vld [vmem:[%s2575_s0 + $0x70] ss:$8 sps:$4 sm:$0xff]  }
  0x14   :  { %50 = vst.msk [vmem:[#allocation2 + $0x108] sm:$0xff] %vm16_vm3, %v1852_v17  ;;  %51 = vst.msk [vmem:[#allocation2 + $0x110] sm:$0xff] %vm16_vm3, %v1852_v17  ;;  %v1801_v47 = vld [vmem:[%s2575_s0 + $0x170] ss:$8 sps:$4 sm:$0xff]   ;;  %v1802_v48 = vld [vmem:[%s2575_s0 + $0x84] ss:$8 sps:$4 sm:$0xff]  }
  0x15   :  { %52 = vst.msk [vmem:[#allocation2 + $0x118] sm:$0xff] %vm16_vm3, %v1852_v17  ;;  %53 = vst.msk [vmem:[#allocation2 + $0x120] sm:$0xff] %vm16_vm3, %v1852_v17  ;;  %v1804_v49 = vld [vmem:[%s2575_s0 + $0x184] ss:$8 sps:$4 sm:$0xff]   ;;  %v1806_v50 = vld [vmem:[%s2575_s0 + $0x80] ss:$8 sps:$4 sm:$0xff]  }
  0x16   :  { %688 = vmatpush1.bf16.msra.mxu0 %v1749_v8  ;;  %1736 = vmatpush1.bf16.msra.mxu1 %v1749_v8  ;;  %54 = vst.msk [vmem:[#allocation2 + $0x128] sm:$0xff] %vm16_vm3, %v1852_v17  ;;  %55 = vst.msk [vmem:[#allocation2 + $0x130] sm:$0xff] %vm16_vm3, %v1852_v17  ;;  %v1807_v51 = vld [vmem:[%s2575_s0 + $0x180] ss:$8 sps:$4 sm:$0xff]   ;;  %v1808_v52 = vld [vmem:[%s2575_s0 + $0x94] ss:$8 sps:$4 sm:$0xff]  }
  0x17   :  { %689 = vmatprep.subr.bf16.mxu0 %v1850_v0  ;;  %1727 = vmatprep.subr.bf16.mxu1 %v1850_v0  ;;  %56 = vst.msk [vmem:[#allocation2 + $0x138] sm:$0xff] %vm16_vm3, %v1852_v17  ;;  %57 = vst.msk [vmem:[#allocation2 + $0x140] sm:$0xff] %vm16_vm3, %v1852_v17  ;;  %v1810_v53 = vld [vmem:[%s2575_s0 + $0x194] ss:$8 sps:$4 sm:$0xff]   ;;  %v1812_v54 = vld [vmem:[%s2575_s0 + $0x90] ss:$8 sps:$4 sm:$0xff]  }
  0x18   :  { %58 = vst.msk [vmem:[#allocation2 + $0x148] sm:$0xff] %vm16_vm3, %v1852_v17  ;;  %59 = vst.msk [vmem:[#allocation2 + $0x150] sm:$0xff] %vm16_vm3, %v1852_v17  ;;  %v1813_v55 = vld [vmem:[%s2575_s0 + $0x190] ss:$8 sps:$4 sm:$0xff]   ;;  %v1814_v56 = vld [vmem:[%s2575_s0 + $0xa4] ss:$8 sps:$4 sm:$0xff]  }
  0x19   :  { %60 = vst.msk [vmem:[#allocation2 + $0x158] sm:$0xff] %vm16_vm3, %v1852_v17  ;;  %61 = vst.msk [vmem:[#allocation2 + $0x160] sm:$0xff] %vm16_vm3, %v1852_v17  ;;  %v1816_v57 = vld [vmem:[%s2575_s0 + $0x1a4] ss:$8 sps:$4 sm:$0xff]   ;;  %v1818_v58 = vld [vmem:[%s2575_s0 + $0xa0] ss:$8 sps:$4 sm:$0xff]  }
  0x1a   :  { %690 = vmatpush1.bf16.msra.mxu0 %v1750_v9  ;;  %1737 = vmatpush1.bf16.msra.mxu1 %v1750_v9  ;;  %62 = vst.msk [vmem:[#allocation2 + $0x168] sm:$0xff] %vm16_vm3, %v1852_v17  ;;  %63 = vst.msk [vmem:[#allocation2 + $0x170] sm:$0xff] %vm16_vm3, %v1852_v17  ;;  %v1819_v59 = vld [vmem:[%s2575_s0 + $0x1a0] ss:$8 sps:$4 sm:$0xff]   ;;  %v1820_v60 = vld [vmem:[%s2575_s0 + $0xb4] ss:$8 sps:$4 sm:$0xff]  }
  0x1b   :  { %691 = vmatprep.subr.bf16.mxu0 %v1850_v0  ;;  %1728 = vmatprep.subr.bf16.mxu1 %v1850_v0  ;;  %64 = vst.msk [vmem:[#allocation2 + $0x178] sm:$0xff] %vm16_vm3, %v1852_v17  ;;  %65 = vst.msk [vmem:[#allocation2 + $0x180] sm:$0xff] %vm16_vm3, %v1852_v17  ;;  %v1822_v61 = vld [vmem:[%s2575_s0 + $0x1b4] ss:$8 sps:$4 sm:$0xff]   ;;  %v1824_v62 = vld [vmem:[%s2575_s0 + $0xb0] ss:$8 sps:$4 sm:$0xff]  }
  0x1c   :  { %66 = vst.msk [vmem:[#allocation2 + $0x188] sm:$0xff] %vm16_vm3, %v1852_v17  ;;  %67 = vst.msk [vmem:[#allocation2 + $0x190] sm:$0xff] %vm16_vm3, %v1852_v17  ;;  %v1825_v63 = vld [vmem:[%s2575_s0 + $0x1b0] ss:$8 sps:$4 sm:$0xff]   ;;  %v1828_v1 = vld [vmem:[%s2575_s0 + $0x1c4] ss:$8 sps:$4 sm:$0xff]  }
  0x1d   :  { %68 = vst.msk [vmem:[#allocation2 + $0x198] sm:$0xff] %vm16_vm3, %v1852_v17  ;;  %69 = vst.msk [vmem:[#allocation2 + $0x1a0] sm:$0xff] %vm16_vm3, %v1852_v17  ;;  %v1830_v2 = vld [vmem:[%s2575_s0 + $0xc0] ss:$8 sps:$4 sm:$0xff]   ;;  %v1832_v4 = vld [vmem:[%s2575_s0 + $0xd4] ss:$8 sps:$4 sm:$0xff]  }
  0x1e   :  { %692 = vmatpush1.bf16.msra.mxu0 %v1751_v10  ;;  %1738 = vmatpush1.bf16.msra.mxu1 %v1751_v10  ;;  %70 = vst.msk [vmem:[#allocation2 + $0x1a8] sm:$0xff] %vm16_vm3, %v1852_v17  ;;  %71 = vst.msk [vmem:[#allocation2 + $0x1b0] sm:$0xff] %vm16_vm3, %v1852_v17  ;;  %v1831_v3 = vld [vmem:[%s2575_s0 + $0x1c0] ss:$8 sps:$4 sm:$0xff]   ;;  %v1834_v5 = vld [vmem:[%s2575_s0 + $0x1d4] ss:$8 sps:$4 sm:$0xff]  }
  0x1f   :  { %693 = vmatprep.subr.bf16.mxu0 %v1850_v0  ;;  %1729 = vmatprep.subr.bf16.mxu1 %v1850_v0  ;;  %72 = vst.msk [vmem:[#allocation2 + $0x1b8] sm:$0xff] %vm16_vm3, %v1852_v17  ;;  %73 = vst.msk [vmem:[#allocation2 + $0x1c0] sm:$0xff] %vm16_vm3, %v1852_v17  ;;  %v1836_v6 = vld [vmem:[%s2575_s0 + $0xd0] ss:$8 sps:$4 sm:$0xff]   ;;  %v1838_v8 = vld [vmem:[%s2575_s0 + $0xe4] ss:$8 sps:$4 sm:$0xff]  }
  0x20   :  { %74 = vst.msk [vmem:[#allocation2 + $0x1c8] sm:$0xff] %vm16_vm3, %v1852_v17  ;;  %75 = vst.msk [vmem:[#allocation2 + $0x1d0] sm:$0xff] %vm16_vm3, %v1852_v17  ;;  %v1837_v7 = vld [vmem:[%s2575_s0 + $0x1d0] ss:$8 sps:$4 sm:$0xff]   ;;  %v1840_v9 = vld [vmem:[%s2575_s0 + $0x1e4] ss:$8 sps:$4 sm:$0xff]  }
  0x21   :  { %76 = vst.msk [vmem:[#allocation2 + $0x1d8] sm:$0xff] %vm16_vm3, %v1852_v17  ;;  %77 = vst.msk [vmem:[#allocation2 + $0x1e0] sm:$0xff] %vm16_vm3, %v1852_v17  ;;  %v1842_v10 = vld [vmem:[%s2575_s0 + $0xe0] ss:$8 sps:$4 sm:$0xff]   ;;  %v1844_v12 = vld [vmem:[%s2575_s0 + $0xf4] ss:$8 sps:$4 sm:$0xff]  }
  0x22   :  { %694 = vmatpush1.bf16.msra.mxu0 %v1752_v13  ;;  %1739 = vmatpush1.bf16.msra.mxu1 %v1752_v13  ;;  %78 = vst.msk [vmem:[#allocation2 + $0x1e8] sm:$0xff] %vm16_vm3, %v1852_v17  ;;  %79 = vst.msk [vmem:[#allocation2 + $0x1f0] sm:$0xff] %vm16_vm3, %v1852_v17  ;;  %v1843_v11 = vld [vmem:[%s2575_s0 + $0x1e0] ss:$8 sps:$4 sm:$0xff]   ;;  %v1846_v13 = vld [vmem:[%s2575_s0 + $0x1f4] ss:$8 sps:$4 sm:$0xff]  }
  0x23   :  { %695 = vmatprep.subr.bf16.mxu0 %v1850_v0  ;;  %1730 = vmatprep.subr.bf16.mxu1 %v1850_v0  ;;  %80 = vst.msk [vmem:[#allocation2 + $0x1f8] sm:$0xff] %vm16_vm3, %v1852_v17  ;;  %v1826_v0 = vld [vmem:[%s2575_s0 + $0xc4] ss:$8 sps:$4 sm:$0xff]   ;;  %v1848_v14 = vld [vmem:[%s2575_s0 + $0xf0] ss:$8 sps:$4 sm:$0xff]  }
  0x24   :  { %v1849_v15 = vld [vmem:[%s2575_s0 + $0x1f0] ss:$8 sps:$4 sm:$0xff]   ;;  %v177_v17 = vld [vmem:[#allocation2 + $0x100] sm:$0xff] }
  0x26   :  { %696 = vmatpush1.bf16.msra.mxu0 %v1906_v16  ;;  %1740 = vmatpush1.bf16.msra.mxu1 %v1906_v16  ;;  %v145_v16 = vld [vmem:[#allocation2] sm:$0xff] }
  0x29   :  { %710 = vmatmul.mubr.bf16.vlgmr.msra.gmra.mrb[0].mxu0 %v1754_v18  ;;  %838 = vmatmul.mubr.bf16.vlgmr.msra.gmra.mrb[0].mxu1 %v1757_v19 }
  0x2a   :  { %1562 = vmatprep.mubr.msk.bf16.mxu0 %vm573_vm0, %v1760_v20  ;;  %1578 = vmatprep.mubr.msk.bf16.mxu1 %vm573_vm0, %v1762_v21  ;;  %v146_v20 = vld [vmem:[#allocation2 + $0x8] sm:$0xff] }
  0x2b   :  { %v178_v21 = vld [vmem:[#allocation2 + $0x108] sm:$0xff] }
  0x31   :  { %718 = vmatmul.mubr.bf16.gmra.mrb[4].mxu0 %v1764_v22  ;;  %846 = vmatmul.mubr.bf16.gmra.mrb[4].mxu1 %v1765_v23 }
  0x32   :  { %1563 = vmatprep.mubr.msk.bf16.mxu0 %vm573_vm0, %v1766_v24  ;;  %1579 = vmatprep.mubr.msk.bf16.mxu1 %vm573_vm0, %v1768_v25 }
  0x39   :  { %726 = vmatmul.mubr.bf16.gmra.mrb[8].mxu0 %v1770_v26  ;;  %854 = vmatmul.mubr.bf16.gmra.mrb[8].mxu1 %v1771_v27 }
  0x3a   :  { %1564 = vmatprep.mubr.msk.bf16.mxu0 %vm573_vm0, %v1772_v28  ;;  %1580 = vmatprep.mubr.msk.bf16.mxu1 %vm573_vm0, %v1774_v29 }
  0x41   :  { %734 = vmatmul.mubr.bf16.gmra.mrb[12].mxu0 %v1776_v30  ;;  %862 = vmatmul.mubr.bf16.gmra.mrb[12].mxu1 %v1777_v31 }
  0x42   :  { %1565 = vmatprep.mubr.msk.bf16.mxu0 %vm573_vm0, %v1778_v32  ;;  %1581 = vmatprep.mubr.msk.bf16.mxu1 %vm573_vm0, %v1780_v33  ;;  %v147_v32 = vld [vmem:[#allocation2 + $0x10] sm:$0xff] }
  0x43   :  { %v179_v33 = vld [vmem:[#allocation2 + $0x110] sm:$0xff] }
  0x49   :  { %742 = vmatmul.mubr.bf16.gmra.mrb[16].mxu0 %v1782_v34  ;;  %870 = vmatmul.mubr.bf16.gmra.mrb[16].mxu1 %v1783_v35 }
  0x4a   :  { %1566 = vmatprep.mubr.msk.bf16.mxu0 %vm573_vm0, %v1784_v36  ;;  %1582 = vmatprep.mubr.msk.bf16.mxu1 %vm573_vm0, %v1786_v37  ;;  %v148_v36 = vld [vmem:[#allocation2 + $0x18] sm:$0xff] }
  0x4b   :  { %v180_v37 = vld [vmem:[#allocation2 + $0x118] sm:$0xff] }
  0x51   :  { %750 = vmatmul.mubr.bf16.gmra.mrb[20].mxu0 %v1788_v38  ;;  %878 = vmatmul.mubr.bf16.gmra.mrb[20].mxu1 %v1789_v39 }
  0x52   :  { %1567 = vmatprep.mubr.msk.bf16.mxu0 %vm573_vm0, %v1790_v40  ;;  %1583 = vmatprep.mubr.msk.bf16.mxu1 %vm573_vm0, %v1792_v41 }
  0x59   :  { %758 = vmatmul.mubr.bf16.gmra.mrb[24].mxu0 %v1794_v42  ;;  %886 = vmatmul.mubr.bf16.gmra.mrb[24].mxu1 %v1795_v43 }
  0x5a   :  { %1568 = vmatprep.mubr.msk.bf16.mxu0 %vm573_vm0, %v1796_v44  ;;  %1584 = vmatprep.mubr.msk.bf16.mxu1 %vm573_vm0, %v1798_v45 }
  0x61   :  { %766 = vmatmul.mubr.bf16.gmra.mrb[28].mxu0 %v1800_v46  ;;  %894 = vmatmul.mubr.bf16.gmra.mrb[28].mxu1 %v1801_v47 }
  0x62   :  { %1569 = vmatprep.mubr.msk.bf16.mxu0 %vm573_vm0, %v1802_v48  ;;  %1585 = vmatprep.mubr.msk.bf16.mxu1 %vm573_vm0, %v1804_v49 }
  0x69   :  { %774 = vmatmul.mubr.bf16.gmra.mrb[32].mxu0 %v1806_v50  ;;  %902 = vmatmul.mubr.bf16.gmra.mrb[32].mxu1 %v1807_v51 }
  0x6a   :  { %1570 = vmatprep.mubr.msk.bf16.mxu0 %vm573_vm0, %v1808_v52  ;;  %1586 = vmatprep.mubr.msk.bf16.mxu1 %vm573_vm0, %v1810_v53 }
  0x71   :  { %782 = vmatmul.mubr.bf16.gmra.mrb[36].mxu0 %v1812_v54  ;;  %910 = vmatmul.mubr.bf16.gmra.mrb[36].mxu1 %v1813_v55 }
  0x72   :  { %1571 = vmatprep.mubr.msk.bf16.mxu0 %vm573_vm0, %v1814_v56  ;;  %1587 = vmatprep.mubr.msk.bf16.mxu1 %vm573_vm0, %v1816_v57  ;;  %v149_v56 = vld [vmem:[#allocation2 + $0x20] sm:$0xff] }
  0x73   :  { %v181_v57 = vld [vmem:[#allocation2 + $0x120] sm:$0xff] }
  0x79   :  { %790 = vmatmul.mubr.bf16.gmra.mrb[40].mxu0 %v1818_v58  ;;  %918 = vmatmul.mubr.bf16.gmra.mrb[40].mxu1 %v1819_v59 }
  0x7a   :  { %1572 = vmatprep.mubr.msk.bf16.mxu0 %vm573_vm0, %v1820_v60  ;;  %1588 = vmatprep.mubr.msk.bf16.mxu1 %vm573_vm0, %v1822_v61  ;;  %v150_v60 = vld [vmem:[#allocation2 + $0x28] sm:$0xff] }
  0x7b   :  { %v182_v61 = vld [vmem:[#allocation2 + $0x128] sm:$0xff] }
  0x81   :  { %798 = vmatmul.mubr.bf16.gmra.mrb[44].mxu0 %v1824_v62  ;;  %926 = vmatmul.mubr.bf16.gmra.mrb[44].mxu1 %v1825_v63 }
  0x82   :  { %1573 = vmatprep.mubr.msk.bf16.mxu0 %vm573_vm0, %v1826_v0  ;;  %1589 = vmatprep.mubr.msk.bf16.mxu1 %vm573_vm0, %v1828_v1 }
  0x89   :  { %806 = vmatmul.mubr.bf16.gmra.mrb[48].mxu0 %v1830_v2  ;;  %934 = vmatmul.mubr.bf16.gmra.mrb[48].mxu1 %v1831_v3 }
  0x8a   :  { %1574 = vmatprep.mubr.msk.bf16.mxu0 %vm573_vm0, %v1832_v4  ;;  %1590 = vmatprep.mubr.msk.bf16.mxu1 %vm573_vm0, %v1834_v5 }
  0x91   :  { %814 = vmatmul.mubr.bf16.gmra.mrb[52].mxu0 %v1836_v6  ;;  %942 = vmatmul.mubr.bf16.gmra.mrb[52].mxu1 %v1837_v7 }
  0x92   :  { %1575 = vmatprep.mubr.msk.bf16.mxu0 %vm573_vm0, %v1838_v8  ;;  %1591 = vmatprep.mubr.msk.bf16.mxu1 %vm573_vm0, %v1840_v9 }
  0x99   :  { %822 = vmatmul.mubr.bf16.gmra.mrb[56].mxu0 %v1842_v10  ;;  %950 = vmatmul.mubr.bf16.gmra.mrb[56].mxu1 %v1843_v11 }
  0x9a   :  { %1576 = vmatprep.mubr.msk.bf16.mxu0 %vm573_vm0, %v1844_v12  ;;  %1592 = vmatprep.mubr.msk.bf16.mxu1 %vm573_vm0, %v1846_v13 }
  0xa1   :  { %830 = vmatmul.mubr.bf16.gmra.mrb[60].mxu0 %v1848_v14  ;;  %958 = vmatmul.mubr.bf16.gmra.mrb[60].mxu1 %v1849_v15 }
  0xfc   :  { %v711_v18 = vpop.f32.mrb[0].mxu0  ;;  %v839_v19 = vpop.f32.mrb[0].mxu1 }
  0xfd   :  { %v966_v22 = vadd.f32 %v711_v18, %v145_v16  ;;  %v998_v23 = vadd.f32 %v839_v19, %v177_v17  ;;  %v713_v24 = vpop.f32.mrb[1].mxu0  ;;  %v841_v25 = vpop.f32.mrb[1].mxu1  ;;  %v151_v16 = vld [vmem:[#allocation2 + $0x30] sm:$0xff] }
  0xfe   :  { %v714_v26 = vpop.f32.mrb[2].mxu0  ;;  %v842_v27 = vpop.f32.mrb[2].mxu1  ;;  %v183_v17 = vld [vmem:[#allocation2 + $0x130] sm:$0xff] }
  0xff   :  { %1031 = vst.msk [vmem:[#allocation2] sm:$0xff] %vm16_vm3, %v966_v22  ;;  %1063 = vst.msk [vmem:[#allocation2 + $0x100] sm:$0xff] %vm16_vm3, %v998_v23  ;;  %v967_v28 = vadd.f32 %v714_v26, %v146_v20  ;;  %v999_v29 = vadd.f32 %v842_v27, %v178_v21  ;;  %v716_v30 = vpop.f32.mrb[3].mxu0  ;;  %v844_v31 = vpop.f32.mrb[3].mxu1  ;;  %v152_v20 = vld [vmem:[#allocation2 + $0x38] sm:$0xff] }
 0x100   :  { %v184_v21 = vld [vmem:[#allocation2 + $0x138] sm:$0xff] }
 0x101   :  { %1032 = vst.msk [vmem:[#allocation2 + $0x8] sm:$0xff] %vm16_vm3, %v967_v28  ;;  %1064 = vst.msk [vmem:[#allocation2 + $0x108] sm:$0xff] %vm16_vm3, %v999_v29 }
 0x104   :  { %v719_v34 = vpop.f32.mrb[4].mxu0  ;;  %v847_v35 = vpop.f32.mrb[4].mxu1 }
 0x105   :  { %v968_v38 = vadd.f32 %v719_v34, %v147_v32  ;;  %v1000_v39 = vadd.f32 %v847_v35, %v179_v33  ;;  %v721_v40 = vpop.f32.mrb[5].mxu0  ;;  %v849_v41 = vpop.f32.mrb[5].mxu1 }
 0x106   :  { %v1098_v42 = vld [vmem:[#allocation2] sm:$0xff]  ;;  %v722_v44 = vpop.f32.mrb[6].mxu0  ;;  %v850_v45 = vpop.f32.mrb[6].mxu1 }
 0x107   :  { %v1130_v43 = vld [vmem:[#allocation2 + $0x100] sm:$0xff]  ;;  %v1657_v46 = vpack.c.bf16 %v1098_v42, %v1098_v42  ;;  %1033 = vst.msk [vmem:[#allocation2 + $0x10] sm:$0xff] %vm16_vm3, %v968_v38  ;;  %1065 = vst.msk [vmem:[#allocation2 + $0x110] sm:$0xff] %vm16_vm3, %v1000_v39  ;;  %v969_v48 = vadd.f32 %v722_v44, %v148_v36  ;;  %v1001_v49 = vadd.f32 %v850_v45, %v180_v37  ;;  %v724_v50 = vpop.f32.mrb[7].mxu0  ;;  %v852_v51 = vpop.f32.mrb[7].mxu1  ;;  %v154_v44 = vld [vmem:[#allocation2 + $0x48] sm:$0xff] }
 0x108   :  { %v1689_v47 = vpack.c.bf16 %v1130_v43, %v1130_v43  ;;  %v1099_v52 = vld [vmem:[#allocation2 + $0x8] sm:$0xff]  ;;  %v153_v40 = vld [vmem:[#allocation2 + $0x40] sm:$0xff] }
 0x109   :  { %v1131_v53 = vld [vmem:[#allocation2 + $0x108] sm:$0xff]  ;;  %1419 = vst.msk [vmem:[%s2576_s2] sm:$0xf] %vm1418_vm4, %v1657_v46  ;;  %v1658_v54 = vpack.c.bf16 %v1099_v52, %v1099_v52  ;;  %v185_v41 = vld [vmem:[#allocation2 + $0x140] sm:$0xff] }
 0x10a   :  { %1451 = vst.msk [vmem:[%s2576_s2 + $0x80] sm:$0xf] %vm1418_vm4, %v1689_v47  ;;  %v1690_v55 = vpack.c.bf16 %v1131_v53, %v1131_v53  ;;  %v186_v45 = vld [vmem:[#allocation2 + $0x148] sm:$0xff] }
 0x10b   :  { %1034 = vst.msk [vmem:[#allocation2 + $0x18] sm:$0xff] %vm16_vm3, %v969_v48  ;;  %1066 = vst.msk [vmem:[#allocation2 + $0x118] sm:$0xff] %vm16_vm3, %v1001_v49 }
 0x10c   :  { %1420 = vst.msk [vmem:[%s2576_s2 + $0x4] sm:$0xf] %vm1418_vm4, %v1658_v54  ;;  %1452 = vst.msk [vmem:[%s2576_s2 + $0x84] sm:$0xf] %vm1418_vm4, %v1690_v55  ;;  %v727_v58 = vpop.f32.mrb[8].mxu0  ;;  %v855_v59 = vpop.f32.mrb[8].mxu1 }
 0x10d   :  { %v970_v62 = vadd.f32 %v727_v58, %v149_v56  ;;  %v1002_v63 = vadd.f32 %v855_v59, %v181_v57  ;;  %v729_v0 = vpop.f32.mrb[9].mxu0  ;;  %v857_v1 = vpop.f32.mrb[9].mxu1 }
 0x10e   :  { %v1100_v2 = vld [vmem:[#allocation2 + $0x10] sm:$0xff]  ;;  %v730_v4 = vpop.f32.mrb[10].mxu0  ;;  %v858_v5 = vpop.f32.mrb[10].mxu1 }
 0x10f   :  { %v1132_v3 = vld [vmem:[#allocation2 + $0x110] sm:$0xff]  ;;  %v1659_v6 = vpack.c.bf16 %v1100_v2, %v1100_v2  ;;  %1035 = vst.msk [vmem:[#allocation2 + $0x20] sm:$0xff] %vm16_vm3, %v970_v62  ;;  %1067 = vst.msk [vmem:[#allocation2 + $0x120] sm:$0xff] %vm16_vm3, %v1002_v63  ;;  %v971_v8 = vadd.f32 %v730_v4, %v150_v60  ;;  %v1003_v9 = vadd.f32 %v858_v5, %v182_v61  ;;  %v732_v10 = vpop.f32.mrb[11].mxu0  ;;  %v860_v11 = vpop.f32.mrb[11].mxu1  ;;  %v156_v4 = vld [vmem:[#allocation2 + $0x58] sm:$0xff] }
 0x110   :  { %v1691_v7 = vpack.c.bf16 %v1132_v3, %v1132_v3  ;;  %v155_v0 = vld [vmem:[#allocation2 + $0x50] sm:$0xff]  ;;  %v188_v5 = vld [vmem:[#allocation2 + $0x158] sm:$0xff] }
 0x111   :  { %1421 = vst.msk [vmem:[%s2576_s2 + $0x8] sm:$0xf] %vm1418_vm4, %v1659_v6  ;;  %v187_v1 = vld [vmem:[#allocation2 + $0x150] sm:$0xff] }
 0x112   :  { %v1101_v12 = vld [vmem:[#allocation2 + $0x18] sm:$0xff]  ;;  %1453 = vst.msk [vmem:[%s2576_s2 + $0x88] sm:$0xf] %vm1418_vm4, %v1691_v7 }
 0x113   :  { %v1133_v13 = vld [vmem:[#allocation2 + $0x118] sm:$0xff]  ;;  %v1660_v14 = vpack.c.bf16 %v1101_v12, %v1101_v12  ;;  %1036 = vst.msk [vmem:[#allocation2 + $0x28] sm:$0xff] %vm16_vm3, %v971_v8  ;;  %1068 = vst.msk [vmem:[#allocation2 + $0x128] sm:$0xff] %vm16_vm3, %v1003_v9 }
 0x114   :  { %v1692_v15 = vpack.c.bf16 %v1133_v13, %v1133_v13  ;;  %v735_v18 = vpop.f32.mrb[12].mxu0  ;;  %v863_v19 = vpop.f32.mrb[12].mxu1 }
 0x115   :  { %1422 = vst.msk [vmem:[%s2576_s2 + $0xc] sm:$0xf] %vm1418_vm4, %v1660_v14  ;;  %v972_v22 = vadd.f32 %v735_v18, %v151_v16  ;;  %v1004_v23 = vadd.f32 %v863_v19, %v183_v17  ;;  %v737_v24 = vpop.f32.mrb[13].mxu0  ;;  %v865_v25 = vpop.f32.mrb[13].mxu1 }
 0x116   :  { %1454 = vst.msk [vmem:[%s2576_s2 + $0x8c] sm:$0xf] %vm1418_vm4, %v1692_v15  ;;  %v1102_v26 = vld [vmem:[#allocation2 + $0x20] sm:$0xff]  ;;  %v738_v28 = vpop.f32.mrb[14].mxu0  ;;  %v866_v29 = vpop.f32.mrb[14].mxu1 }
 0x117   :  { %v1134_v27 = vld [vmem:[#allocation2 + $0x120] sm:$0xff]  ;;  %v1661_v30 = vpack.c.bf16 %v1102_v26, %v1102_v26  ;;  %1037 = vst.msk [vmem:[#allocation2 + $0x30] sm:$0xff] %vm16_vm3, %v972_v22  ;;  %1069 = vst.msk [vmem:[#allocation2 + $0x130] sm:$0xff] %vm16_vm3, %v1004_v23  ;;  %v973_v32 = vadd.f32 %v738_v28, %v152_v20  ;;  %v1005_v33 = vadd.f32 %v866_v29, %v184_v21  ;;  %v740_v34 = vpop.f32.mrb[15].mxu0  ;;  %v868_v35 = vpop.f32.mrb[15].mxu1  ;;  %v158_v28 = vld [vmem:[#allocation2 + $0x68] sm:$0xff] }
 0x118   :  { %v1693_v31 = vpack.c.bf16 %v1134_v27, %v1134_v27  ;;  %v157_v24 = vld [vmem:[#allocation2 + $0x60] sm:$0xff]  ;;  %v190_v29 = vld [vmem:[#allocation2 + $0x168] sm:$0xff] }
 0x119   :  { %1423 = vst.msk [vmem:[%s2576_s2 + $0x10] sm:$0xf] %vm1418_vm4, %v1661_v30  ;;  %v189_v25 = vld [vmem:[#allocation2 + $0x160] sm:$0xff] }
 0x11a   :  { %v1103_v36 = vld [vmem:[#allocation2 + $0x28] sm:$0xff]  ;;  %1455 = vst.msk [vmem:[%s2576_s2 + $0x90] sm:$0xf] %vm1418_vm4, %v1693_v31 }
 0x11b   :  { %v1135_v37 = vld [vmem:[#allocation2 + $0x128] sm:$0xff]  ;;  %v1662_v38 = vpack.c.bf16 %v1103_v36, %v1103_v36  ;;  %1038 = vst.msk [vmem:[#allocation2 + $0x38] sm:$0xff] %vm16_vm3, %v973_v32  ;;  %1070 = vst.msk [vmem:[#allocation2 + $0x138] sm:$0xff] %vm16_vm3, %v1005_v33 }
 0x11c   :  { %v1694_v39 = vpack.c.bf16 %v1135_v37, %v1135_v37  ;;  %v743_v42 = vpop.f32.mrb[16].mxu0  ;;  %v871_v43 = vpop.f32.mrb[16].mxu1 }
 0x11d   :  { %1424 = vst.msk [vmem:[%s2576_s2 + $0x14] sm:$0xf] %vm1418_vm4, %v1662_v38  ;;  %v974_v46 = vadd.f32 %v743_v42, %v153_v40  ;;  %v1006_v47 = vadd.f32 %v871_v43, %v185_v41  ;;  %v745_v48 = vpop.f32.mrb[17].mxu0  ;;  %v873_v49 = vpop.f32.mrb[17].mxu1 }
 0x11e   :  { %1456 = vst.msk [vmem:[%s2576_s2 + $0x94] sm:$0xf] %vm1418_vm4, %v1694_v39  ;;  %v1104_v50 = vld [vmem:[#allocation2 + $0x30] sm:$0xff]  ;;  %v746_v52 = vpop.f32.mrb[18].mxu0  ;;  %v874_v53 = vpop.f32.mrb[18].mxu1 }
 0x11f   :  { %v1136_v51 = vld [vmem:[#allocation2 + $0x130] sm:$0xff]  ;;  %v1663_v54 = vpack.c.bf16 %v1104_v50, %v1104_v50  ;;  %1039 = vst.msk [vmem:[#allocation2 + $0x40] sm:$0xff] %vm16_vm3, %v974_v46  ;;  %1071 = vst.msk [vmem:[#allocation2 + $0x140] sm:$0xff] %vm16_vm3, %v1006_v47  ;;  %v975_v56 = vadd.f32 %v746_v52, %v154_v44  ;;  %v1007_v57 = vadd.f32 %v874_v53, %v186_v45  ;;  %v748_v58 = vpop.f32.mrb[19].mxu0  ;;  %v876_v59 = vpop.f32.mrb[19].mxu1  ;;  %v160_v52 = vld [vmem:[#allocation2 + $0x78] sm:$0xff] }
 0x120   :  { %v1695_v55 = vpack.c.bf16 %v1136_v51, %v1136_v51  ;;  %v159_v48 = vld [vmem:[#allocation2 + $0x70] sm:$0xff]  ;;  %v192_v53 = vld [vmem:[#allocation2 + $0x178] sm:$0xff] }
 0x121   :  { %1425 = vst.msk [vmem:[%s2576_s2 + $0x18] sm:$0xf] %vm1418_vm4, %v1663_v54  ;;  %v191_v49 = vld [vmem:[#allocation2 + $0x170] sm:$0xff] }
 0x122   :  { %v1105_v60 = vld [vmem:[#allocation2 + $0x38] sm:$0xff]  ;;  %1457 = vst.msk [vmem:[%s2576_s2 + $0x98] sm:$0xf] %vm1418_vm4, %v1695_v55 }
 0x123   :  { %v1137_v61 = vld [vmem:[#allocation2 + $0x138] sm:$0xff]  ;;  %v1664_v62 = vpack.c.bf16 %v1105_v60, %v1105_v60  ;;  %1040 = vst.msk [vmem:[#allocation2 + $0x48] sm:$0xff] %vm16_vm3, %v975_v56  ;;  %1072 = vst.msk [vmem:[#allocation2 + $0x148] sm:$0xff] %vm16_vm3, %v1007_v57 }
 0x124   :  { %v1696_v63 = vpack.c.bf16 %v1137_v61, %v1137_v61  ;;  %v751_v2 = vpop.f32.mrb[20].mxu0  ;;  %v879_v3 = vpop.f32.mrb[20].mxu1 }
 0x125   :  { %1426 = vst.msk [vmem:[%s2576_s2 + $0x1c] sm:$0xf] %vm1418_vm4, %v1664_v62  ;;  %v976_v6 = vadd.f32 %v751_v2, %v155_v0  ;;  %v1008_v7 = vadd.f32 %v879_v3, %v187_v1  ;;  %v753_v8 = vpop.f32.mrb[21].mxu0  ;;  %v881_v9 = vpop.f32.mrb[21].mxu1 }
 0x126   :  { %1458 = vst.msk [vmem:[%s2576_s2 + $0x9c] sm:$0xf] %vm1418_vm4, %v1696_v63  ;;  %v1106_v10 = vld [vmem:[#allocation2 + $0x40] sm:$0xff]  ;;  %v754_v12 = vpop.f32.mrb[22].mxu0  ;;  %v882_v13 = vpop.f32.mrb[22].mxu1 }
 0x127   :  { %v1138_v11 = vld [vmem:[#allocation2 + $0x140] sm:$0xff]  ;;  %v1665_v14 = vpack.c.bf16 %v1106_v10, %v1106_v10  ;;  %1041 = vst.msk [vmem:[#allocation2 + $0x50] sm:$0xff] %vm16_vm3, %v976_v6  ;;  %1073 = vst.msk [vmem:[#allocation2 + $0x150] sm:$0xff] %vm16_vm3, %v1008_v7  ;;  %v977_v16 = vadd.f32 %v754_v12, %v156_v4  ;;  %v1009_v17 = vadd.f32 %v882_v13, %v188_v5  ;;  %v756_v18 = vpop.f32.mrb[23].mxu0  ;;  %v884_v19 = vpop.f32.mrb[23].mxu1  ;;  %v162_v12 = vld [vmem:[#allocation2 + $0x88] sm:$0xff] }
 0x128   :  { %v1697_v15 = vpack.c.bf16 %v1138_v11, %v1138_v11  ;;  %v161_v8 = vld [vmem:[#allocation2 + $0x80] sm:$0xff]  ;;  %v194_v13 = vld [vmem:[#allocation2 + $0x188] sm:$0xff] }
 0x129   :  { %1427 = vst.msk [vmem:[%s2576_s2 + $0x20] sm:$0xf] %vm1418_vm4, %v1665_v14  ;;  %v193_v9 = vld [vmem:[#allocation2 + $0x180] sm:$0xff] }
 0x12a   :  { %v1107_v20 = vld [vmem:[#allocation2 + $0x48] sm:$0xff]  ;;  %1459 = vst.msk [vmem:[%s2576_s2 + $0xa0] sm:$0xf] %vm1418_vm4, %v1697_v15 }
 0x12b   :  { %v1139_v21 = vld [vmem:[#allocation2 + $0x148] sm:$0xff]  ;;  %v1666_v22 = vpack.c.bf16 %v1107_v20, %v1107_v20  ;;  %1042 = vst.msk [vmem:[#allocation2 + $0x58] sm:$0xff] %vm16_vm3, %v977_v16  ;;  %1074 = vst.msk [vmem:[#allocation2 + $0x158] sm:$0xff] %vm16_vm3, %v1009_v17 }
 0x12c   :  { %v1698_v23 = vpack.c.bf16 %v1139_v21, %v1139_v21  ;;  %v759_v26 = vpop.f32.mrb[24].mxu0  ;;  %v887_v27 = vpop.f32.mrb[24].mxu1 }
 0x12d   :  { %1428 = vst.msk [vmem:[%s2576_s2 + $0x24] sm:$0xf] %vm1418_vm4, %v1666_v22  ;;  %v978_v30 = vadd.f32 %v759_v26, %v157_v24  ;;  %v1010_v31 = vadd.f32 %v887_v27, %v189_v25  ;;  %v761_v32 = vpop.f32.mrb[25].mxu0  ;;  %v889_v33 = vpop.f32.mrb[25].mxu1 }
 0x12e   :  { %1460 = vst.msk [vmem:[%s2576_s2 + $0xa4] sm:$0xf] %vm1418_vm4, %v1698_v23  ;;  %v1108_v34 = vld [vmem:[#allocation2 + $0x50] sm:$0xff]  ;;  %v762_v36 = vpop.f32.mrb[26].mxu0  ;;  %v890_v37 = vpop.f32.mrb[26].mxu1 }
 0x12f   :  { %v1140_v35 = vld [vmem:[#allocation2 + $0x150] sm:$0xff]  ;;  %v1667_v38 = vpack.c.bf16 %v1108_v34, %v1108_v34  ;;  %1043 = vst.msk [vmem:[#allocation2 + $0x60] sm:$0xff] %vm16_vm3, %v978_v30  ;;  %1075 = vst.msk [vmem:[#allocation2 + $0x160] sm:$0xff] %vm16_vm3, %v1010_v31  ;;  %v979_v40 = vadd.f32 %v762_v36, %v158_v28  ;;  %v1011_v41 = vadd.f32 %v890_v37, %v190_v29  ;;  %v764_v42 = vpop.f32.mrb[27].mxu0  ;;  %v892_v43 = vpop.f32.mrb[27].mxu1  ;;  %v164_v36 = vld [vmem:[#allocation2 + $0x98] sm:$0xff] }
 0x130   :  { %v1699_v39 = vpack.c.bf16 %v1140_v35, %v1140_v35  ;;  %v163_v32 = vld [vmem:[#allocation2 + $0x90] sm:$0xff]  ;;  %v196_v37 = vld [vmem:[#allocation2 + $0x198] sm:$0xff] }
 0x131   :  { %1429 = vst.msk [vmem:[%s2576_s2 + $0x28] sm:$0xf] %vm1418_vm4, %v1667_v38  ;;  %v195_v33 = vld [vmem:[#allocation2 + $0x190] sm:$0xff] }
 0x132   :  { %v1109_v44 = vld [vmem:[#allocation2 + $0x58] sm:$0xff]  ;;  %1461 = vst.msk [vmem:[%s2576_s2 + $0xa8] sm:$0xf] %vm1418_vm4, %v1699_v39 }
 0x133   :  { %v1141_v45 = vld [vmem:[#allocation2 + $0x158] sm:$0xff]  ;;  %v1668_v46 = vpack.c.bf16 %v1109_v44, %v1109_v44  ;;  %1044 = vst.msk [vmem:[#allocation2 + $0x68] sm:$0xff] %vm16_vm3, %v979_v40  ;;  %1076 = vst.msk [vmem:[#allocation2 + $0x168] sm:$0xff] %vm16_vm3, %v1011_v41 }
 0x134   :  { %v1700_v47 = vpack.c.bf16 %v1141_v45, %v1141_v45  ;;  %v767_v50 = vpop.f32.mrb[28].mxu0  ;;  %v895_v51 = vpop.f32.mrb[28].mxu1 }
 0x135   :  { %1430 = vst.msk [vmem:[%s2576_s2 + $0x2c] sm:$0xf] %vm1418_vm4, %v1668_v46  ;;  %v980_v54 = vadd.f32 %v767_v50, %v159_v48  ;;  %v1012_v55 = vadd.f32 %v895_v51, %v191_v49  ;;  %v769_v56 = vpop.f32.mrb[29].mxu0  ;;  %v897_v57 = vpop.f32.mrb[29].mxu1 }
 0x136   :  { %1462 = vst.msk [vmem:[%s2576_s2 + $0xac] sm:$0xf] %vm1418_vm4, %v1700_v47  ;;  %v1110_v58 = vld [vmem:[#allocation2 + $0x60] sm:$0xff]  ;;  %v770_v60 = vpop.f32.mrb[30].mxu0  ;;  %v898_v61 = vpop.f32.mrb[30].mxu1 }
 0x137   :  { %v1142_v59 = vld [vmem:[#allocation2 + $0x160] sm:$0xff]  ;;  %v1669_v62 = vpack.c.bf16 %v1110_v58, %v1110_v58  ;;  %1045 = vst.msk [vmem:[#allocation2 + $0x70] sm:$0xff] %vm16_vm3, %v980_v54  ;;  %1077 = vst.msk [vmem:[#allocation2 + $0x170] sm:$0xff] %vm16_vm3, %v1012_v55  ;;  %v981_v0 = vadd.f32 %v770_v60, %v160_v52  ;;  %v1013_v1 = vadd.f32 %v898_v61, %v192_v53  ;;  %v772_v2 = vpop.f32.mrb[31].mxu0  ;;  %v900_v3 = vpop.f32.mrb[31].mxu1  ;;  %v166_v60 = vld [vmem:[#allocation2 + $0xa8] sm:$0xff] }
 0x138   :  { %v1701_v63 = vpack.c.bf16 %v1142_v59, %v1142_v59  ;;  %v165_v56 = vld [vmem:[#allocation2 + $0xa0] sm:$0xff]  ;;  %v198_v61 = vld [vmem:[#allocation2 + $0x1a8] sm:$0xff] }
 0x139   :  { %1431 = vst.msk [vmem:[%s2576_s2 + $0x30] sm:$0xf] %vm1418_vm4, %v1669_v62  ;;  %v197_v57 = vld [vmem:[#allocation2 + $0x1a0] sm:$0xff] }
 0x13a   :  { %v1111_v4 = vld [vmem:[#allocation2 + $0x68] sm:$0xff]  ;;  %1463 = vst.msk [vmem:[%s2576_s2 + $0xb0] sm:$0xf] %vm1418_vm4, %v1701_v63 }
 0x13b   :  { %v1143_v5 = vld [vmem:[#allocation2 + $0x168] sm:$0xff]  ;;  %v1670_v6 = vpack.c.bf16 %v1111_v4, %v1111_v4  ;;  %1046 = vst.msk [vmem:[#allocation2 + $0x78] sm:$0xff] %vm16_vm3, %v981_v0  ;;  %1078 = vst.msk [vmem:[#allocation2 + $0x178] sm:$0xff] %vm16_vm3, %v1013_v1 }
 0x13c   :  { %v1702_v7 = vpack.c.bf16 %v1143_v5, %v1143_v5  ;;  %v775_v10 = vpop.f32.mrb[32].mxu0  ;;  %v903_v11 = vpop.f32.mrb[32].mxu1 }
 0x13d   :  { %1432 = vst.msk [vmem:[%s2576_s2 + $0x34] sm:$0xf] %vm1418_vm4, %v1670_v6  ;;  %v982_v14 = vadd.f32 %v775_v10, %v161_v8  ;;  %v1014_v15 = vadd.f32 %v903_v11, %v193_v9  ;;  %v777_v16 = vpop.f32.mrb[33].mxu0  ;;  %v905_v17 = vpop.f32.mrb[33].mxu1 }
 0x13e   :  { %1464 = vst.msk [vmem:[%s2576_s2 + $0xb4] sm:$0xf] %vm1418_vm4, %v1702_v7  ;;  %v1112_v18 = vld [vmem:[#allocation2 + $0x70] sm:$0xff]  ;;  %v778_v20 = vpop.f32.mrb[34].mxu0  ;;  %v906_v21 = vpop.f32.mrb[34].mxu1 }
 0x13f   :  { %v1144_v19 = vld [vmem:[#allocation2 + $0x170] sm:$0xff]  ;;  %v1671_v22 = vpack.c.bf16 %v1112_v18, %v1112_v18  ;;  %1047 = vst.msk [vmem:[#allocation2 + $0x80] sm:$0xff] %vm16_vm3, %v982_v14  ;;  %1079 = vst.msk [vmem:[#allocation2 + $0x180] sm:$0xff] %vm16_vm3, %v1014_v15  ;;  %v983_v24 = vadd.f32 %v778_v20, %v162_v12  ;;  %v1015_v25 = vadd.f32 %v906_v21, %v194_v13  ;;  %v780_v26 = vpop.f32.mrb[35].mxu0  ;;  %v908_v27 = vpop.f32.mrb[35].mxu1  ;;  %v168_v20 = vld [vmem:[#allocation2 + $0xb8] sm:$0xff] }
 0x140   :  { %v1703_v23 = vpack.c.bf16 %v1144_v19, %v1144_v19  ;;  %v167_v16 = vld [vmem:[#allocation2 + $0xb0] sm:$0xff]  ;;  %v200_v21 = vld [vmem:[#allocation2 + $0x1b8] sm:$0xff] }
 0x141   :  { %1433 = vst.msk [vmem:[%s2576_s2 + $0x38] sm:$0xf] %vm1418_vm4, %v1671_v22  ;;  %v199_v17 = vld [vmem:[#allocation2 + $0x1b0] sm:$0xff] }
 0x142   :  { %v1113_v28 = vld [vmem:[#allocation2 + $0x78] sm:$0xff]  ;;  %1465 = vst.msk [vmem:[%s2576_s2 + $0xb8] sm:$0xf] %vm1418_vm4, %v1703_v23 }
 0x143   :  { %v1145_v29 = vld [vmem:[#allocation2 + $0x178] sm:$0xff]  ;;  %v1672_v30 = vpack.c.bf16 %v1113_v28, %v1113_v28  ;;  %1048 = vst.msk [vmem:[#allocation2 + $0x88] sm:$0xff] %vm16_vm3, %v983_v24  ;;  %1080 = vst.msk [vmem:[#allocation2 + $0x188] sm:$0xff] %vm16_vm3, %v1015_v25 }
 0x144   :  { %v1704_v31 = vpack.c.bf16 %v1145_v29, %v1145_v29  ;;  %v783_v34 = vpop.f32.mrb[36].mxu0  ;;  %v911_v35 = vpop.f32.mrb[36].mxu1 }
 0x145   :  { %1434 = vst.msk [vmem:[%s2576_s2 + $0x3c] sm:$0xf] %vm1418_vm4, %v1672_v30  ;;  %v984_v38 = vadd.f32 %v783_v34, %v163_v32  ;;  %v1016_v39 = vadd.f32 %v911_v35, %v195_v33  ;;  %v785_v40 = vpop.f32.mrb[37].mxu0  ;;  %v913_v41 = vpop.f32.mrb[37].mxu1 }
 0x146   :  { %1466 = vst.msk [vmem:[%s2576_s2 + $0xbc] sm:$0xf] %vm1418_vm4, %v1704_v31  ;;  %v1114_v42 = vld [vmem:[#allocation2 + $0x80] sm:$0xff]  ;;  %v786_v44 = vpop.f32.mrb[38].mxu0  ;;  %v914_v45 = vpop.f32.mrb[38].mxu1 }
 0x147   :  { %v1146_v43 = vld [vmem:[#allocation2 + $0x180] sm:$0xff]  ;;  %v1673_v46 = vpack.c.bf16 %v1114_v42, %v1114_v42  ;;  %1049 = vst.msk [vmem:[#allocation2 + $0x90] sm:$0xff] %vm16_vm3, %v984_v38  ;;  %1081 = vst.msk [vmem:[#allocation2 + $0x190] sm:$0xff] %vm16_vm3, %v1016_v39  ;;  %v985_v48 = vadd.f32 %v786_v44, %v164_v36  ;;  %v1017_v49 = vadd.f32 %v914_v45, %v196_v37  ;;  %v788_v50 = vpop.f32.mrb[39].mxu0  ;;  %v916_v51 = vpop.f32.mrb[39].mxu1  ;;  %v170_v44 = vld [vmem:[#allocation2 + $0xc8] sm:$0xff] }
 0x148   :  { %v1705_v47 = vpack.c.bf16 %v1146_v43, %v1146_v43  ;;  %v169_v40 = vld [vmem:[#allocation2 + $0xc0] sm:$0xff]  ;;  %v202_v45 = vld [vmem:[#allocation2 + $0x1c8] sm:$0xff] }
 0x149   :  { %1435 = vst.msk [vmem:[%s2576_s2 + $0x40] sm:$0xf] %vm1418_vm4, %v1673_v46  ;;  %v201_v41 = vld [vmem:[#allocation2 + $0x1c0] sm:$0xff] }
 0x14a   :  { %v1115_v52 = vld [vmem:[#allocation2 + $0x88] sm:$0xff]  ;;  %1467 = vst.msk [vmem:[%s2576_s2 + $0xc0] sm:$0xf] %vm1418_vm4, %v1705_v47 }
 0x14b   :  { %v1147_v53 = vld [vmem:[#allocation2 + $0x188] sm:$0xff]  ;;  %v1674_v54 = vpack.c.bf16 %v1115_v52, %v1115_v52  ;;  %1050 = vst.msk [vmem:[#allocation2 + $0x98] sm:$0xff] %vm16_vm3, %v985_v48  ;;  %1082 = vst.msk [vmem:[#allocation2 + $0x198] sm:$0xff] %vm16_vm3, %v1017_v49 }
 0x14c   :  { %v1706_v55 = vpack.c.bf16 %v1147_v53, %v1147_v53  ;;  %v791_v58 = vpop.f32.mrb[40].mxu0  ;;  %v919_v59 = vpop.f32.mrb[40].mxu1 }
 0x14d   :  { %1436 = vst.msk [vmem:[%s2576_s2 + $0x44] sm:$0xf] %vm1418_vm4, %v1674_v54  ;;  %v986_v62 = vadd.f32 %v791_v58, %v165_v56  ;;  %v1018_v63 = vadd.f32 %v919_v59, %v197_v57  ;;  %v793_v0 = vpop.f32.mrb[41].mxu0  ;;  %v921_v1 = vpop.f32.mrb[41].mxu1 }
 0x14e   :  { %1468 = vst.msk [vmem:[%s2576_s2 + $0xc4] sm:$0xf] %vm1418_vm4, %v1706_v55  ;;  %v1116_v2 = vld [vmem:[#allocation2 + $0x90] sm:$0xff]  ;;  %v794_v4 = vpop.f32.mrb[42].mxu0  ;;  %v922_v5 = vpop.f32.mrb[42].mxu1 }
 0x14f   :  { %v1148_v3 = vld [vmem:[#allocation2 + $0x190] sm:$0xff]  ;;  %v1675_v6 = vpack.c.bf16 %v1116_v2, %v1116_v2  ;;  %1051 = vst.msk [vmem:[#allocation2 + $0xa0] sm:$0xff] %vm16_vm3, %v986_v62  ;;  %1083 = vst.msk [vmem:[#allocation2 + $0x1a0] sm:$0xff] %vm16_vm3, %v1018_v63  ;;  %v987_v8 = vadd.f32 %v794_v4, %v166_v60  ;;  %v1019_v9 = vadd.f32 %v922_v5, %v198_v61  ;;  %v796_v10 = vpop.f32.mrb[43].mxu0  ;;  %v924_v11 = vpop.f32.mrb[43].mxu1  ;;  %v172_v4 = vld [vmem:[#allocation2 + $0xd8] sm:$0xff] }
 0x150   :  { %v1707_v7 = vpack.c.bf16 %v1148_v3, %v1148_v3  ;;  %v171_v0 = vld [vmem:[#allocation2 + $0xd0] sm:$0xff]  ;;  %v204_v5 = vld [vmem:[#allocation2 + $0x1d8] sm:$0xff] }
 0x151   :  { %1437 = vst.msk [vmem:[%s2576_s2 + $0x48] sm:$0xf] %vm1418_vm4, %v1675_v6  ;;  %v203_v1 = vld [vmem:[#allocation2 + $0x1d0] sm:$0xff] }
 0x152   :  { %v1117_v12 = vld [vmem:[#allocation2 + $0x98] sm:$0xff]  ;;  %1469 = vst.msk [vmem:[%s2576_s2 + $0xc8] sm:$0xf] %vm1418_vm4, %v1707_v7 }
 0x153   :  { %v1149_v13 = vld [vmem:[#allocation2 + $0x198] sm:$0xff]  ;;  %v1676_v14 = vpack.c.bf16 %v1117_v12, %v1117_v12  ;;  %1052 = vst.msk [vmem:[#allocation2 + $0xa8] sm:$0xff] %vm16_vm3, %v987_v8  ;;  %1084 = vst.msk [vmem:[#allocation2 + $0x1a8] sm:$0xff] %vm16_vm3, %v1019_v9 }
 0x154   :  { %v1708_v15 = vpack.c.bf16 %v1149_v13, %v1149_v13  ;;  %v799_v18 = vpop.f32.mrb[44].mxu0  ;;  %v927_v19 = vpop.f32.mrb[44].mxu1 }
 0x155   :  { %1438 = vst.msk [vmem:[%s2576_s2 + $0x4c] sm:$0xf] %vm1418_vm4, %v1676_v14  ;;  %v988_v22 = vadd.f32 %v799_v18, %v167_v16  ;;  %v1020_v23 = vadd.f32 %v927_v19, %v199_v17  ;;  %v801_v24 = vpop.f32.mrb[45].mxu0  ;;  %v929_v25 = vpop.f32.mrb[45].mxu1 }
 0x156   :  { %1470 = vst.msk [vmem:[%s2576_s2 + $0xcc] sm:$0xf] %vm1418_vm4, %v1708_v15  ;;  %v1118_v26 = vld [vmem:[#allocation2 + $0xa0] sm:$0xff]  ;;  %v802_v28 = vpop.f32.mrb[46].mxu0  ;;  %v930_v29 = vpop.f32.mrb[46].mxu1 }
 0x157   :  { %v1150_v27 = vld [vmem:[#allocation2 + $0x1a0] sm:$0xff]  ;;  %v1677_v30 = vpack.c.bf16 %v1118_v26, %v1118_v26  ;;  %1053 = vst.msk [vmem:[#allocation2 + $0xb0] sm:$0xff] %vm16_vm3, %v988_v22  ;;  %1085 = vst.msk [vmem:[#allocation2 + $0x1b0] sm:$0xff] %vm16_vm3, %v1020_v23  ;;  %v989_v32 = vadd.f32 %v802_v28, %v168_v20  ;;  %v1021_v33 = vadd.f32 %v930_v29, %v200_v21  ;;  %v804_v34 = vpop.f32.mrb[47].mxu0  ;;  %v932_v35 = vpop.f32.mrb[47].mxu1  ;;  %v174_v28 = vld [vmem:[#allocation2 + $0xe8] sm:$0xff] }
 0x158   :  { %v1709_v31 = vpack.c.bf16 %v1150_v27, %v1150_v27  ;;  %v173_v24 = vld [vmem:[#allocation2 + $0xe0] sm:$0xff]  ;;  %v206_v29 = vld [vmem:[#allocation2 + $0x1e8] sm:$0xff] }
 0x159   :  { %1439 = vst.msk [vmem:[%s2576_s2 + $0x50] sm:$0xf] %vm1418_vm4, %v1677_v30  ;;  %v205_v25 = vld [vmem:[#allocation2 + $0x1e0] sm:$0xff] }
 0x15a   :  { %v1119_v36 = vld [vmem:[#allocation2 + $0xa8] sm:$0xff]  ;;  %1471 = vst.msk [vmem:[%s2576_s2 + $0xd0] sm:$0xf] %vm1418_vm4, %v1709_v31 }
 0x15b   :  { %v1151_v37 = vld [vmem:[#allocation2 + $0x1a8] sm:$0xff]  ;;  %v1678_v38 = vpack.c.bf16 %v1119_v36, %v1119_v36  ;;  %1054 = vst.msk [vmem:[#allocation2 + $0xb8] sm:$0xff] %vm16_vm3, %v989_v32  ;;  %1086 = vst.msk [vmem:[#allocation2 + $0x1b8] sm:$0xff] %vm16_vm3, %v1021_v33 }
 0x15c   :  { %v1710_v39 = vpack.c.bf16 %v1151_v37, %v1151_v37  ;;  %v807_v42 = vpop.f32.mrb[48].mxu0  ;;  %v935_v43 = vpop.f32.mrb[48].mxu1 }
 0x15d   :  { %1440 = vst.msk [vmem:[%s2576_s2 + $0x54] sm:$0xf] %vm1418_vm4, %v1678_v38  ;;  %v990_v46 = vadd.f32 %v807_v42, %v169_v40  ;;  %v1022_v47 = vadd.f32 %v935_v43, %v201_v41  ;;  %v809_v48 = vpop.f32.mrb[49].mxu0  ;;  %v937_v49 = vpop.f32.mrb[49].mxu1 }
 0x15e   :  { %1472 = vst.msk [vmem:[%s2576_s2 + $0xd4] sm:$0xf] %vm1418_vm4, %v1710_v39  ;;  %v1120_v50 = vld [vmem:[#allocation2 + $0xb0] sm:$0xff]  ;;  %v810_v52 = vpop.f32.mrb[50].mxu0  ;;  %v938_v53 = vpop.f32.mrb[50].mxu1 }
 0x15f   :  { %v1152_v51 = vld [vmem:[#allocation2 + $0x1b0] sm:$0xff]  ;;  %v1679_v54 = vpack.c.bf16 %v1120_v50, %v1120_v50  ;;  %1055 = vst.msk [vmem:[#allocation2 + $0xc0] sm:$0xff] %vm16_vm3, %v990_v46  ;;  %1087 = vst.msk [vmem:[#allocation2 + $0x1c0] sm:$0xff] %vm16_vm3, %v1022_v47  ;;  %v991_v56 = vadd.f32 %v810_v52, %v170_v44  ;;  %v1023_v57 = vadd.f32 %v938_v53, %v202_v45  ;;  %v812_v58 = vpop.f32.mrb[51].mxu0  ;;  %v940_v59 = vpop.f32.mrb[51].mxu1  ;;  %v176_v52 = vld [vmem:[#allocation2 + $0xf8] sm:$0xff] }
 0x160   :  { %v1711_v55 = vpack.c.bf16 %v1152_v51, %v1152_v51  ;;  %v175_v48 = vld [vmem:[#allocation2 + $0xf0] sm:$0xff]  ;;  %v208_v53 = vld [vmem:[#allocation2 + $0x1f8] sm:$0xff] }
 0x161   :  { %1441 = vst.msk [vmem:[%s2576_s2 + $0x58] sm:$0xf] %vm1418_vm4, %v1679_v54  ;;  %v207_v49 = vld [vmem:[#allocation2 + $0x1f0] sm:$0xff] }
 0x162   :  { %v1121_v60 = vld [vmem:[#allocation2 + $0xb8] sm:$0xff]  ;;  %1473 = vst.msk [vmem:[%s2576_s2 + $0xd8] sm:$0xf] %vm1418_vm4, %v1711_v55 }
 0x163   :  { %v1153_v61 = vld [vmem:[#allocation2 + $0x1b8] sm:$0xff]  ;;  %v1680_v62 = vpack.c.bf16 %v1121_v60, %v1121_v60  ;;  %1056 = vst.msk [vmem:[#allocation2 + $0xc8] sm:$0xff] %vm16_vm3, %v991_v56  ;;  %1088 = vst.msk [vmem:[#allocation2 + $0x1c8] sm:$0xff] %vm16_vm3, %v1023_v57 }
 0x164   :  { %v1712_v63 = vpack.c.bf16 %v1153_v61, %v1153_v61  ;;  %v815_v2 = vpop.f32.mrb[52].mxu0  ;;  %v943_v3 = vpop.f32.mrb[52].mxu1 }
 0x165   :  { %1442 = vst.msk [vmem:[%s2576_s2 + $0x5c] sm:$0xf] %vm1418_vm4, %v1680_v62  ;;  %v992_v6 = vadd.f32 %v815_v2, %v171_v0  ;;  %v1024_v7 = vadd.f32 %v943_v3, %v203_v1  ;;  %v817_v8 = vpop.f32.mrb[53].mxu0  ;;  %v945_v9 = vpop.f32.mrb[53].mxu1 }
 0x166   :  { %1474 = vst.msk [vmem:[%s2576_s2 + $0xdc] sm:$0xf] %vm1418_vm4, %v1712_v63  ;;  %v1122_v10 = vld [vmem:[#allocation2 + $0xc0] sm:$0xff]  ;;  %v818_v12 = vpop.f32.mrb[54].mxu0  ;;  %v946_v13 = vpop.f32.mrb[54].mxu1 }
 0x167   :  { %v1154_v11 = vld [vmem:[#allocation2 + $0x1c0] sm:$0xff]  ;;  %v1681_v14 = vpack.c.bf16 %v1122_v10, %v1122_v10  ;;  %1057 = vst.msk [vmem:[#allocation2 + $0xd0] sm:$0xff] %vm16_vm3, %v992_v6  ;;  %1089 = vst.msk [vmem:[#allocation2 + $0x1d0] sm:$0xff] %vm16_vm3, %v1024_v7  ;;  %v993_v16 = vadd.f32 %v818_v12, %v172_v4  ;;  %v1025_v17 = vadd.f32 %v946_v13, %v204_v5  ;;  %v820_v18 = vpop.f32.mrb[55].mxu0  ;;  %v948_v19 = vpop.f32.mrb[55].mxu1 }
 0x168   :  { %v1713_v15 = vpack.c.bf16 %v1154_v11, %v1154_v11 }
 0x169   :  { %1443 = vst.msk [vmem:[%s2576_s2 + $0x60] sm:$0xf] %vm1418_vm4, %v1681_v14 }
 0x16a   :  { %v1123_v20 = vld [vmem:[#allocation2 + $0xc8] sm:$0xff]  ;;  %1475 = vst.msk [vmem:[%s2576_s2 + $0xe0] sm:$0xf] %vm1418_vm4, %v1713_v15 }
 0x16b   :  { %v1155_v21 = vld [vmem:[#allocation2 + $0x1c8] sm:$0xff]  ;;  %v1682_v22 = vpack.c.bf16 %v1123_v20, %v1123_v20  ;;  %1058 = vst.msk [vmem:[#allocation2 + $0xd8] sm:$0xff] %vm16_vm3, %v993_v16  ;;  %1090 = vst.msk [vmem:[#allocation2 + $0x1d8] sm:$0xff] %vm16_vm3, %v1025_v17 }
 0x16c   :  { %v1714_v23 = vpack.c.bf16 %v1155_v21, %v1155_v21  ;;  %v823_v26 = vpop.f32.mrb[56].mxu0  ;;  %v951_v27 = vpop.f32.mrb[56].mxu1 }
 0x16d   :  { %1444 = vst.msk [vmem:[%s2576_s2 + $0x64] sm:$0xf] %vm1418_vm4, %v1682_v22  ;;  %v994_v30 = vadd.f32 %v823_v26, %v173_v24  ;;  %v1026_v31 = vadd.f32 %v951_v27, %v205_v25  ;;  %v825_v32 = vpop.f32.mrb[57].mxu0  ;;  %v953_v33 = vpop.f32.mrb[57].mxu1 }
 0x16e   :  { %1476 = vst.msk [vmem:[%s2576_s2 + $0xe4] sm:$0xf] %vm1418_vm4, %v1714_v23  ;;  %v1124_v34 = vld [vmem:[#allocation2 + $0xd0] sm:$0xff]  ;;  %v826_v36 = vpop.f32.mrb[58].mxu0  ;;  %v954_v37 = vpop.f32.mrb[58].mxu1 }
 0x16f   :  { %v1156_v35 = vld [vmem:[#allocation2 + $0x1d0] sm:$0xff]  ;;  %v1683_v38 = vpack.c.bf16 %v1124_v34, %v1124_v34  ;;  %1059 = vst.msk [vmem:[#allocation2 + $0xe0] sm:$0xff] %vm16_vm3, %v994_v30  ;;  %1091 = vst.msk [vmem:[#allocation2 + $0x1e0] sm:$0xff] %vm16_vm3, %v1026_v31  ;;  %v995_v40 = vadd.f32 %v826_v36, %v174_v28  ;;  %v1027_v41 = vadd.f32 %v954_v37, %v206_v29  ;;  %v828_v42 = vpop.f32.mrb[59].mxu0  ;;  %v956_v43 = vpop.f32.mrb[59].mxu1 }
 0x170   :  { %v1715_v39 = vpack.c.bf16 %v1156_v35, %v1156_v35 }
 0x171   :  { %1445 = vst.msk [vmem:[%s2576_s2 + $0x68] sm:$0xf] %vm1418_vm4, %v1683_v38 }
 0x172   :  { %v1125_v44 = vld [vmem:[#allocation2 + $0xd8] sm:$0xff]  ;;  %1477 = vst.msk [vmem:[%s2576_s2 + $0xe8] sm:$0xf] %vm1418_vm4, %v1715_v39 }
 0x173   :  { %v1157_v45 = vld [vmem:[#allocation2 + $0x1d8] sm:$0xff]  ;;  %v1684_v46 = vpack.c.bf16 %v1125_v44, %v1125_v44  ;;  %1060 = vst.msk [vmem:[#allocation2 + $0xe8] sm:$0xff] %vm16_vm3, %v995_v40  ;;  %1092 = vst.msk [vmem:[#allocation2 + $0x1e8] sm:$0xff] %vm16_vm3, %v1027_v41 }
 0x174   :  { %v1716_v47 = vpack.c.bf16 %v1157_v45, %v1157_v45  ;;  %v831_v50 = vpop.f32.mrb[60].mxu0  ;;  %v959_v51 = vpop.f32.mrb[60].mxu1 }
 0x175   :  { %1446 = vst.msk [vmem:[%s2576_s2 + $0x6c] sm:$0xf] %vm1418_vm4, %v1684_v46  ;;  %v996_v54 = vadd.f32 %v831_v50, %v175_v48  ;;  %v1028_v55 = vadd.f32 %v959_v51, %v207_v49  ;;  %v833_v56 = vpop.f32.mrb[61].mxu0  ;;  %v961_v57 = vpop.f32.mrb[61].mxu1 }
 0x176   :  { %1478 = vst.msk [vmem:[%s2576_s2 + $0xec] sm:$0xf] %vm1418_vm4, %v1716_v47  ;;  %v1126_v58 = vld [vmem:[#allocation2 + $0xe0] sm:$0xff]  ;;  %v834_v60 = vpop.f32.mrb[62].mxu0  ;;  %v962_v61 = vpop.f32.mrb[62].mxu1 }
 0x177   :  { %v1158_v59 = vld [vmem:[#allocation2 + $0x1e0] sm:$0xff]  ;;  %v1685_v62 = vpack.c.bf16 %v1126_v58, %v1126_v58  ;;  %1061 = vst.msk [vmem:[#allocation2 + $0xf0] sm:$0xff] %vm16_vm3, %v996_v54  ;;  %1093 = vst.msk [vmem:[#allocation2 + $0x1f0] sm:$0xff] %vm16_vm3, %v1028_v55  ;;  %v997_v0 = vadd.f32 %v834_v60, %v176_v52  ;;  %v1029_v1 = vadd.f32 %v962_v61, %v208_v53  ;;  %v836_v2 = vpop.f32.mrb[63].mxu0  ;;  %v964_v3 = vpop.f32.mrb[63].mxu1 }
 0x178   :  { %v1717_v63 = vpack.c.bf16 %v1158_v59, %v1158_v59 }
 0x179   :  { %1447 = vst.msk [vmem:[%s2576_s2 + $0x70] sm:$0xf] %vm1418_vm4, %v1685_v62 }
 0x17a   :  { %v1127_v4 = vld [vmem:[#allocation2 + $0xe8] sm:$0xff]  ;;  %1479 = vst.msk [vmem:[%s2576_s2 + $0xf0] sm:$0xf] %vm1418_vm4, %v1717_v63 }
 0x17b   :  { %v1159_v5 = vld [vmem:[#allocation2 + $0x1e8] sm:$0xff]  ;;  %v1686_v6 = vpack.c.bf16 %v1127_v4, %v1127_v4  ;;  %1062 = vst.msk [vmem:[#allocation2 + $0xf8] sm:$0xff] %vm16_vm3, %v997_v0  ;;  %1094 = vst.msk [vmem:[#allocation2 + $0x1f8] sm:$0xff] %vm16_vm3, %v1029_v1 }
 0x17c   :  { %v1718_v7 = vpack.c.bf16 %v1159_v5, %v1159_v5 }
 0x17d   :  { %1448 = vst.msk [vmem:[%s2576_s2 + $0x74] sm:$0xf] %vm1418_vm4, %v1686_v6 }
 0x17e   :  { %1480 = vst.msk [vmem:[%s2576_s2 + $0xf4] sm:$0xf] %vm1418_vm4, %v1718_v7  ;;  %v1128_v8 = vld [vmem:[#allocation2 + $0xf0] sm:$0xff] }
 0x17f   :  { %v1160_v9 = vld [vmem:[#allocation2 + $0x1f0] sm:$0xff]  ;;  %v1687_v10 = vpack.c.bf16 %v1128_v8, %v1128_v8 }
 0x180   :  { %v1719_v11 = vpack.c.bf16 %v1160_v9, %v1160_v9 }
 0x181   :  { %1449 = vst.msk [vmem:[%s2576_s2 + $0x78] sm:$0xf] %vm1418_vm4, %v1687_v10 }
 0x182   :  { %v1129_v12 = vld [vmem:[#allocation2 + $0xf8] sm:$0xff]  ;;  %1481 = vst.msk [vmem:[%s2576_s2 + $0xf8] sm:$0xf] %vm1418_vm4, %v1719_v11 }
 0x183   :  { %v1161_v13 = vld [vmem:[#allocation2 + $0x1f8] sm:$0xff]  ;;  %v1688_v14 = vpack.c.bf16 %v1129_v12, %v1129_v12 }
 0x184   :  { %v1720_v15 = vpack.c.bf16 %v1161_v13, %v1161_v13 }
 0x185   :  { %1450 = vst.msk [vmem:[%s2576_s2 + $0x7c] sm:$0xf] %vm1418_vm4, %v1688_v14 }
 0x186   :  { %1482 = vst.msk [vmem:[%s2576_s2 + $0xfc] sm:$0xf] %vm1418_vm4, %v1720_v15 }

// kernel: densenet_forward.34
= control target key start
LH: loop header
LB: loop body
LE: loop exit
PB: predicated region body
PF: predicated region fallthrough
CT: control target
= control target key end

     0   :  { %vm14_vm0 = vcmask 122880   ;;  %v195_v0 = vmov 0.0   ;;  %vm50_vm1 = vcmask 130048   ;;  %s289_s0 = inlined_call_operand.vmem [shape: bf16[128,16], index: 0, kind: input, shape index: {}]   ;;  %s290_s1 = inlined_call_operand.vmem [shape: f32[1,16], index: 1, kind: output, shape index: {0}]   ;;  %s291_s2 = inlined_call_operand.vmem [shape: f32[1,16], index: 2, kind: output, shape index: {1}]  }
   0x1   :  { %15 = vst.msk [vmem:[%s290_s1] sm:$0x1] %vm14_vm0, %v195_v0  ;;  %v156_v1 = vld [vmem:[%s289_s0] sm:$0xff]   ;;  %v187_v2 = vld [vmem:[%s289_s0 + $0x8] sm:$0xff]   ;;  %16 = vst.msk [vmem:[%s291_s2] sm:$0x1] %vm14_vm0, %v195_v0 }
   0x2   :  { %v157_v3 = vunpack.c.l.bf16 %v156_v1  ;;  %v158_v4 = vunpack.c.h.bf16 %v156_v1  ;;  %v161_v5 = vunpack.c.l.bf16 %v187_v2  ;;  %v188_v6 = vld [vmem:[%s289_s0 + $0x10] sm:$0xff]   ;;  %v162_v7 = vunpack.c.h.bf16 %v187_v2  ;;  %v189_v14 = vld [vmem:[%s289_s0 + $0x18] sm:$0xff]   ;;  %v190_v24 = vld [vmem:[%s289_s0 + $0x20] sm:$0xff]  }
   0x3   :  { %v165_v12 = vunpack.c.l.bf16 %v188_v6  ;;  %v166_v16 = vunpack.c.h.bf16 %v188_v6  ;;  %v169_v22 = vunpack.c.l.bf16 %v189_v14  ;;  %v170_v27 = vunpack.c.h.bf16 %v189_v14  ;;  %v191_v37 = vld [vmem:[%s289_s0 + $0x28] sm:$0xff]   ;;  %v192_v50 = vld [vmem:[%s289_s0 + $0x30] sm:$0xff]   ;;  %v193_v63 = vld [vmem:[%s289_s0 + $0x38] sm:$0xff]  }
   0x4   :  { %v51_v8 = vsel %vm50_vm1, %v157_v3, 0.0  ;;  %v52_v9 = vsel %vm50_vm1, %v158_v4, 0.0  ;;  %v54_v10 = vsel %vm50_vm1, %v161_v5, 0.0  ;;  %v56_v13 = vsel %vm50_vm1, %v162_v7, 0.0 }
   0x5   :  { %v53_v11 = vadd.f32 %v52_v9, %v51_v8  ;;  %v58_v17 = vsel %vm50_vm1, %v165_v12, 0.0  ;;  %v92_v19 = vmul.f32 %v157_v3, %v157_v3  ;;  %v93_v20 = vmul.f32 %v158_v4, %v158_v4 }
   0x6   :  { %v94_v21 = vmul.f32 %v161_v5, %v161_v5  ;;  %v60_v23 = vsel %vm50_vm1, %v166_v16, 0.0  ;;  %v95_v26 = vmul.f32 %v162_v7, %v162_v7  ;;  %v62_v28 = vsel %vm50_vm1, %v169_v22, 0.0 }
   0x7   :  { %v55_v15 = vadd.f32 %v54_v10, %v53_v11  ;;  %v96_v29 = vmul.f32 %v165_v12, %v165_v12  ;;  %v108_v31 = vsel %vm50_vm1, %v92_v19, 0.0  ;;  %v109_v32 = vsel %vm50_vm1, %v93_v20, 0.0 }
   0x8   :  { %v111_v33 = vsel %vm50_vm1, %v94_v21, 0.0  ;;  %v173_v34 = vunpack.c.l.bf16 %v190_v24  ;;  %v64_v35 = vsel %vm50_vm1, %v170_v27, 0.0  ;;  %v110_v36 = vadd.f32 %v109_v32, %v108_v31 }
   0x9   :  { %v57_v18 = vadd.f32 %v56_v13, %v55_v15  ;;  %v97_v39 = vmul.f32 %v166_v16, %v166_v16  ;;  %v113_v40 = vsel %vm50_vm1, %v95_v26, 0.0  ;;  %v174_v41 = vunpack.c.h.bf16 %v190_v24 }
   0xa   :  { %v66_v42 = vsel %vm50_vm1, %v173_v34, 0.0  ;;  %v112_v43 = vadd.f32 %v111_v33, %v110_v36  ;;  %v98_v45 = vmul.f32 %v169_v22, %v169_v22  ;;  %v115_v46 = vsel %vm50_vm1, %v96_v29, 0.0 }
   0xb   :  { %v59_v25 = vadd.f32 %v58_v17, %v57_v18  ;;  %v177_v47 = vunpack.c.l.bf16 %v191_v37  ;;  %v68_v48 = vsel %vm50_vm1, %v174_v41, 0.0  ;;  %v99_v52 = vmul.f32 %v170_v27, %v170_v27 }
   0xc   :  { %v114_v49 = vadd.f32 %v113_v40, %v112_v43  ;;  %v117_v53 = vsel %vm50_vm1, %v97_v39, 0.0  ;;  %v178_v54 = vunpack.c.h.bf16 %v191_v37  ;;  %v100_v58 = vmul.f32 %v173_v34, %v173_v34 }
   0xd   :  { %v61_v30 = vadd.f32 %v60_v23, %v59_v25  ;;  %v70_v55 = vsel %vm50_vm1, %v177_v47, 0.0  ;;  %v119_v59 = vsel %vm50_vm1, %v98_v45, 0.0  ;;  %v181_v60 = vunpack.c.l.bf16 %v192_v50 }
   0xe   :  { %v116_v56 = vadd.f32 %v115_v46, %v114_v49  ;;  %v72_v61 = vsel %vm50_vm1, %v178_v54, 0.0  ;;  %v101_v1 = vmul.f32 %v174_v41, %v174_v41  ;;  %v121_v2 = vsel %vm50_vm1, %v99_v52, 0.0  ;;  %v91_v52 = vld [vmem:[%s291_s2] sm:$0x1] }
   0xf   :  { %v63_v38 = vadd.f32 %v62_v28, %v61_v30  ;;  %v182_v3 = vunpack.c.h.bf16 %v192_v50  ;;  %v74_v4 = vsel %vm50_vm1, %v181_v60, 0.0  ;;  %v102_v7 = vmul.f32 %v177_v47, %v177_v47 }
  0x10   :  { %v118_v62 = vadd.f32 %v117_v53, %v116_v56  ;;  %v123_v8 = vsel %vm50_vm1, %v100_v58, 0.0  ;;  %v185_v9 = vunpack.c.l.bf16 %v193_v63  ;;  %v103_v13 = vmul.f32 %v178_v54, %v178_v54 }
  0x11   :  { %v65_v44 = vadd.f32 %v64_v35, %v63_v38  ;;  %v76_v10 = vsel %vm50_vm1, %v182_v3, 0.0  ;;  %v125_v14 = vsel %vm50_vm1, %v101_v1, 0.0  ;;  %v186_v15 = vunpack.c.h.bf16 %v193_v63 }
  0x12   :  { %v120_v5 = vadd.f32 %v119_v59, %v118_v62  ;;  %v78_v16 = vsel %vm50_vm1, %v185_v9, 0.0  ;;  %v104_v19 = vmul.f32 %v181_v60, %v181_v60  ;;  %v127_v20 = vsel %vm50_vm1, %v102_v7, 0.0 }
  0x13   :  { %v67_v51 = vadd.f32 %v66_v42, %v65_v44  ;;  %v80_v21 = vsel %vm50_vm1, %v186_v15, 0.0  ;;  %v105_v24 = vmul.f32 %v182_v3, %v182_v3  ;;  %v129_v25 = vsel %vm50_vm1, %v103_v13, 0.0  ;;  %v49_v44 = vld [vmem:[%s290_s1] sm:$0x1] }
  0x14   :  { %v122_v11 = vadd.f32 %v121_v2, %v120_v5  ;;  %v106_v28 = vmul.f32 %v185_v9, %v185_v9  ;;  %v131_v29 = vsel %vm50_vm1, %v104_v19, 0.0  ;;  %v107_v32 = vmul.f32 %v186_v15, %v186_v15 }
  0x15   :  { %v69_v57 = vadd.f32 %v68_v48, %v67_v51  ;;  %v133_v33 = vsel %vm50_vm1, %v105_v24, 0.0 }
  0x16   :  { %v124_v17 = vadd.f32 %v123_v8, %v122_v11  ;;  %v135_v36 = vsel %vm50_vm1, %v106_v28, 0.0  ;;  %v137_v39 = vsel %vm50_vm1, %v107_v32, 0.0 }
  0x17   :  { %v71_v0 = vadd.f32 %v70_v55, %v69_v57 }
  0x18   :  { %v126_v22 = vadd.f32 %v125_v14, %v124_v17 }
  0x19   :  { %v73_v6 = vadd.f32 %v72_v61, %v71_v0 }
  0x1a   :  { %v128_v26 = vadd.f32 %v127_v20, %v126_v22 }
  0x1b   :  { %v75_v12 = vadd.f32 %v74_v4, %v73_v6 }
  0x1c   :  { %v130_v30 = vadd.f32 %v129_v25, %v128_v26 }
  0x1d   :  { %v77_v18 = vadd.f32 %v76_v10, %v75_v12 }
  0x1e   :  { %v132_v34 = vadd.f32 %v131_v29, %v130_v30 }
  0x1f   :  { %v79_v23 = vadd.f32 %v78_v16, %v77_v18 }
  0x20   :  { %v134_v37 = vadd.f32 %v133_v33, %v132_v34 }
  0x21   :  { %v81_v27 = vadd.f32 %v80_v21, %v79_v23 }
  0x22   :  { %v136_v40 = vadd.f32 %v135_v36, %v134_v37 }
  0x23   :  { %v82_v31 = vrot.slane %v81_v27, 4 }
  0x24   :  { %v138_v42 = vadd.f32 %v137_v39, %v136_v40 }
  0x25   :  { %v83_v35 = vadd.f32 %v82_v31, %v81_v27 }
  0x26   :  { %v139_v45 = vrot.slane %v138_v42, 4 }
  0x27   :  { %v84_v38 = vrot.slane %v83_v35, 2 }
  0x28   :  { %v140_v47 = vadd.f32 %v139_v45, %v138_v42 }
  0x29   :  { %v85_v41 = vadd.f32 %v84_v38, %v83_v35 }
  0x2a   :  { %v141_v49 = vrot.slane %v140_v47, 2 }
  0x2b   :  { %v86_v43 = vrot.slane %v85_v41, 1 }
  0x2c   :  { %v142_v50 = vadd.f32 %v141_v49, %v140_v47 }
  0x2d   :  { %v87_v46 = vadd.f32 %v86_v43, %v85_v41 }
  0x2e   :  { %v143_v51 = vrot.slane %v142_v50, 1 }
  0x2f   :  { %v88_v48 = vadd.f32 %v87_v46, %v49_v44 }
  0x30   :  { %v144_v53 = vadd.f32 %v143_v51, %v142_v50 }
  0x31   :  { %90 = vst.msk [vmem:[%s290_s1] sm:$0x1] %vm14_vm0, %v88_v48 }
  0x32   :  { %v145_v54 = vadd.f32 %v144_v53, %v91_v52 }
  0x34   :  { %146 = vst.msk [vmem:[%s291_s2] sm:$0x1] %vm14_vm0, %v145_v54 }

// kernel: densenet_forward.33
= control target key start
LH: loop header
LB: loop body
LE: loop exit
PB: predicated region body
PF: predicated region fallthrough
CT: control target
= control target key end

     0   :  { %vm304_vm0 = vcmask 125952   ;;  %s871_s0 = inlined_call_operand.vmem [shape: bf16[128,16], index: 0, kind: input, shape index: {}]   ;;  %s872_s1 = inlined_call_operand.vmem [shape: bf16[128,16], index: 1, kind: input, shape index: {}]   ;;  %s873_s2 = inlined_call_operand.vmem [shape: bf16[128,16], index: 2, kind: input, shape index: {}]   ;;  %s874_s3 = inlined_call_operand.vmem [shape: bf16[128,16], index: 3, kind: input, shape index: {}]   ;;  %s875_s4 = inlined_call_operand.vmem [shape: bf16[128,16], index: 4, kind: input, shape index: {}]   ;;  %s876_s5 = inlined_call_operand.vmem [shape: bf16[128,16], index: 5, kind: input, shape index: {}]   ;;  %s877_s6 = inlined_call_operand.vmem [shape: bf16[128,16], index: 6, kind: input, shape index: {}]   ;;  %s878_s7 = inlined_call_operand.vmem [shape: bf16[128,16], index: 7, kind: input, shape index: {}]   ;;  %s879_s8 = inlined_call_operand.vmem [shape: bf16[128,16], index: 8, kind: input, shape index: {}]   ;;  %s880_s9 = inlined_call_operand.vmem [shape: bf16[128,16], index: 9, kind: output, shape index: {}]  }
   0x1   :  { %v32_v0 = vld [vmem:[%s871_s0] sm:$0xf]  ;;  %v33_v6 = vld [vmem:[%s871_s0 + $0x4] sm:$0xf]  ;;  %v34_v15 = vld [vmem:[%s871_s0 + $0x8] sm:$0xf] }
   0x2   :  { %v48_v1 = vld [vmem:[%s872_s1] sm:$0xf]  ;;  %v49_v7 = vld [vmem:[%s872_s1 + $0x4] sm:$0xf]  ;;  %v50_v16 = vld [vmem:[%s872_s1 + $0x8] sm:$0xf] }
   0x3   :  { %v80_v2 = vld [vmem:[%s873_s2] sm:$0xf]  ;;  %v64_v3 = vmax.bf16 %v48_v1, %v32_v0  ;;  %v81_v8 = vld [vmem:[%s873_s2 + $0x4] sm:$0xf]  ;;  %v65_v10 = vmax.bf16 %v49_v7, %v33_v6  ;;  %v82_v17 = vld [vmem:[%s873_s2 + $0x8] sm:$0xf]  ;;  %v66_v20 = vmax.bf16 %v50_v16, %v34_v15 }
   0x4   :  { %v112_v4 = vld [vmem:[%s874_s3] sm:$0xf]  ;;  %v113_v13 = vld [vmem:[%s874_s3 + $0x4] sm:$0xf]  ;;  %v114_v24 = vld [vmem:[%s874_s3 + $0x8] sm:$0xf] }
   0x5   :  { %v96_v5 = vmax.bf16 %v80_v2, %v64_v3  ;;  %v144_v9 = vld [vmem:[%s875_s4] sm:$0xf]  ;;  %v97_v14 = vmax.bf16 %v81_v8, %v65_v10  ;;  %v145_v19 = vld [vmem:[%s875_s4 + $0x4] sm:$0xf]  ;;  %v98_v26 = vmax.bf16 %v82_v17, %v66_v20  ;;  %v35_v27 = vld [vmem:[%s871_s0 + $0xc] sm:$0xf] }
   0x6   :  { %v176_v12 = vld [vmem:[%s876_s5] sm:$0xf]  ;;  %v177_v23 = vld [vmem:[%s876_s5 + $0x4] sm:$0xf]  ;;  %v51_v28 = vld [vmem:[%s872_s1 + $0xc] sm:$0xf] }
   0x7   :  { %v128_v11 = vmax.bf16 %v112_v4, %v96_v5  ;;  %v208_v21 = vld [vmem:[%s877_s6] sm:$0xf]  ;;  %v129_v22 = vmax.bf16 %v113_v13, %v97_v14  ;;  %v83_v29 = vld [vmem:[%s873_s2 + $0xc] sm:$0xf]  ;;  %v146_v33 = vld [vmem:[%s875_s4 + $0x8] sm:$0xf]  ;;  %v67_v34 = vmax.bf16 %v51_v28, %v35_v27  ;;  %v130_v37 = vmax.bf16 %v114_v24, %v98_v26 }
   0x8   :  { %v240_v30 = vld [vmem:[%s878_s7] sm:$0xf]  ;;  %v209_v36 = vld [vmem:[%s877_s6 + $0x4] sm:$0xf]  ;;  %v178_v38 = vld [vmem:[%s876_s5 + $0x8] sm:$0xf] }
   0x9   :  { %v160_v18 = vmax.bf16 %v144_v9, %v128_v11  ;;  %v272_v31 = vld [vmem:[%s879_s8] sm:$0xf]  ;;  %v161_v32 = vmax.bf16 %v145_v19, %v129_v22  ;;  %v115_v39 = vld [vmem:[%s874_s3 + $0xc] sm:$0xf]  ;;  %v99_v41 = vmax.bf16 %v83_v29, %v67_v34  ;;  %v36_v42 = vld [vmem:[%s871_s0 + $0x10] sm:$0xf]  ;;  %v162_v48 = vmax.bf16 %v146_v33, %v130_v37 }
   0xa   :  { %v52_v43 = vld [vmem:[%s872_s1 + $0x10] sm:$0xf]  ;;  %v241_v46 = vld [vmem:[%s878_s7 + $0x4] sm:$0xf]  ;;  %v147_v49 = vld [vmem:[%s875_s4 + $0xc] sm:$0xf] }
   0xb   :  { %v192_v25 = vmax.bf16 %v176_v12, %v160_v18  ;;  %v193_v40 = vmax.bf16 %v177_v23, %v161_v32  ;;  %v84_v44 = vld [vmem:[%s873_s2 + $0x10] sm:$0xf]  ;;  %v273_v47 = vld [vmem:[%s879_s8 + $0x4] sm:$0xf]  ;;  %v68_v50 = vmax.bf16 %v52_v43, %v36_v42  ;;  %v210_v52 = vld [vmem:[%s877_s6 + $0x8] sm:$0xf]  ;;  %v131_v53 = vmax.bf16 %v115_v39, %v99_v41 }
   0xc   :  { %v179_v54 = vld [vmem:[%s876_s5 + $0xc] sm:$0xf]  ;;  %v116_v55 = vld [vmem:[%s874_s3 + $0x10] sm:$0xf]  ;;  %v194_v57 = vmax.bf16 %v178_v38, %v162_v48  ;;  %v37_v59 = vld [vmem:[%s871_s0 + $0x14] sm:$0xf] }
   0xd   :  { %v224_v35 = vmax.bf16 %v208_v21, %v192_v25  ;;  %v225_v51 = vmax.bf16 %v209_v36, %v193_v40  ;;  %v100_v58 = vmax.bf16 %v84_v44, %v68_v50  ;;  %v53_v60 = vld [vmem:[%s872_s1 + $0x14] sm:$0xf]  ;;  %v242_v63 = vld [vmem:[%s878_s7 + $0x8] sm:$0xf]  ;;  %v163_v1 = vmax.bf16 %v147_v49, %v131_v53  ;;  %v148_v2 = vld [vmem:[%s875_s4 + $0x10] sm:$0xf] }
   0xe   :  { %v85_v61 = vld [vmem:[%s873_s2 + $0x14] sm:$0xf]  ;;  %v274_v0 = vld [vmem:[%s879_s8 + $0x8] sm:$0xf]  ;;  %v69_v3 = vmax.bf16 %v53_v60, %v37_v59  ;;  %v226_v4 = vmax.bf16 %v210_v52, %v194_v57  ;;  %v211_v5 = vld [vmem:[%s877_s6 + $0xc] sm:$0xf] }
   0xf   :  { %v256_v45 = vmax.bf16 %v240_v30, %v224_v35  ;;  %v257_v62 = vmax.bf16 %v241_v46, %v225_v51  ;;  %v132_v6 = vmax.bf16 %v116_v55, %v100_v58  ;;  %v180_v7 = vld [vmem:[%s876_s5 + $0x10] sm:$0xf]  ;;  %v117_v8 = vld [vmem:[%s874_s3 + $0x14] sm:$0xf]  ;;  %v195_v10 = vmax.bf16 %v179_v54, %v163_v1  ;;  %v38_v12 = vld [vmem:[%s871_s0 + $0x18] sm:$0xf] }
  0x10   :  { %v101_v11 = vmax.bf16 %v85_v61, %v69_v3  ;;  %v54_v13 = vld [vmem:[%s872_s1 + $0x18] sm:$0xf]  ;;  %v258_v15 = vmax.bf16 %v242_v63, %v226_v4  ;;  %v243_v16 = vld [vmem:[%s878_s7 + $0xc] sm:$0xf]  ;;  %v149_v19 = vld [vmem:[%s875_s4 + $0x14] sm:$0xf] }
  0x11   :  { %v288_v56 = vmax.bf16 %v272_v31, %v256_v45  ;;  %v289_v9 = vmax.bf16 %v273_v47, %v257_v62  ;;  %v86_v14 = vld [vmem:[%s873_s2 + $0x18] sm:$0xf]  ;;  %v275_v17 = vld [vmem:[%s879_s8 + $0xc] sm:$0xf]  ;;  %v164_v18 = vmax.bf16 %v148_v2, %v132_v6  ;;  %v70_v20 = vmax.bf16 %v54_v13, %v38_v12  ;;  %v212_v22 = vld [vmem:[%s877_s6 + $0x10] sm:$0xf] }
  0x12   :  { %v227_v21 = vmax.bf16 %v211_v5, %v195_v10  ;;  %v133_v23 = vmax.bf16 %v117_v8, %v101_v11  ;;  %v181_v24 = vld [vmem:[%s876_s5 + $0x14] sm:$0xf]  ;;  %v118_v25 = vld [vmem:[%s874_s3 + $0x18] sm:$0xf]  ;;  %v290_v26 = vmax.bf16 %v274_v0, %v258_v15  ;;  %v39_v29 = vld [vmem:[%s871_s0 + $0x1c] sm:$0xf] }
  0x13   :  { %305 = vst.msk [vmem:[%s880_s9] sm:$0xf] %vm304_vm0, %v288_v56  ;;  %306 = vst.msk [vmem:[%s880_s9 + $0x4] sm:$0xf] %vm304_vm0, %v289_v9  ;;  %v196_v27 = vmax.bf16 %v180_v7, %v164_v18  ;;  %v102_v28 = vmax.bf16 %v86_v14, %v70_v20  ;;  %v55_v30 = vld [vmem:[%s872_s1 + $0x1c] sm:$0xf] }
  0x14   :  { %v87_v31 = vld [vmem:[%s873_s2 + $0x1c] sm:$0xf]  ;;  %v259_v32 = vmax.bf16 %v243_v16, %v227_v21  ;;  %v244_v33 = vld [vmem:[%s878_s7 + $0x10] sm:$0xf]  ;;  %v165_v35 = vmax.bf16 %v149_v19, %v133_v23  ;;  %v150_v36 = vld [vmem:[%s875_s4 + $0x18] sm:$0xf]  ;;  %v71_v37 = vmax.bf16 %v55_v30, %v39_v29 }
  0x15   :  { %v276_v34 = vld [vmem:[%s879_s8 + $0x10] sm:$0xf]  ;;  %307 = vst.msk [vmem:[%s880_s9 + $0x8] sm:$0xf] %vm304_vm0, %v290_v26  ;;  %v228_v38 = vmax.bf16 %v212_v22, %v196_v27  ;;  %v213_v39 = vld [vmem:[%s877_s6 + $0x14] sm:$0xf]  ;;  %v134_v40 = vmax.bf16 %v118_v25, %v102_v28 }
  0x16   :  { %v182_v41 = vld [vmem:[%s876_s5 + $0x18] sm:$0xf]  ;;  %v119_v42 = vld [vmem:[%s874_s3 + $0x1c] sm:$0xf]  ;;  %v291_v43 = vmax.bf16 %v275_v17, %v259_v32  ;;  %v197_v44 = vmax.bf16 %v181_v24, %v165_v35  ;;  %v103_v45 = vmax.bf16 %v87_v31, %v71_v37  ;;  %v40_v46 = vld [vmem:[%s871_s0 + $0x20] sm:$0xf] }
  0x17   :  { %v56_v47 = vld [vmem:[%s872_s1 + $0x20] sm:$0xf]  ;;  %v260_v49 = vmax.bf16 %v244_v33, %v228_v38  ;;  %v245_v50 = vld [vmem:[%s878_s7 + $0x14] sm:$0xf]  ;;  %v166_v52 = vmax.bf16 %v150_v36, %v134_v40  ;;  %v151_v53 = vld [vmem:[%s875_s4 + $0x1c] sm:$0xf] }
  0x18   :  { %v88_v48 = vld [vmem:[%s873_s2 + $0x20] sm:$0xf]  ;;  %v277_v51 = vld [vmem:[%s879_s8 + $0x14] sm:$0xf]  ;;  %v72_v54 = vmax.bf16 %v56_v47, %v40_v46  ;;  %308 = vst.msk [vmem:[%s880_s9 + $0xc] sm:$0xf] %vm304_vm0, %v291_v43  ;;  %v229_v55 = vmax.bf16 %v213_v39, %v197_v44  ;;  %v135_v57 = vmax.bf16 %v119_v42, %v103_v45 }
  0x19   :  { %v214_v56 = vld [vmem:[%s877_s6 + $0x18] sm:$0xf]  ;;  %v183_v58 = vld [vmem:[%s876_s5 + $0x1c] sm:$0xf]  ;;  %v120_v59 = vld [vmem:[%s874_s3 + $0x20] sm:$0xf]  ;;  %v292_v60 = vmax.bf16 %v276_v34, %v260_v49  ;;  %v198_v61 = vmax.bf16 %v182_v41, %v166_v52 }
  0x1a   :  { %v104_v62 = vmax.bf16 %v88_v48, %v72_v54  ;;  %v41_v63 = vld [vmem:[%s871_s0 + $0x24] sm:$0xf]  ;;  %v261_v2 = vmax.bf16 %v245_v50, %v229_v55  ;;  %v246_v3 = vld [vmem:[%s878_s7 + $0x18] sm:$0xf]  ;;  %v167_v5 = vmax.bf16 %v151_v53, %v135_v57  ;;  %v152_v6 = vld [vmem:[%s875_s4 + $0x20] sm:$0xf] }
  0x1b   :  { %v57_v0 = vld [vmem:[%s872_s1 + $0x24] sm:$0xf]  ;;  %v278_v4 = vld [vmem:[%s879_s8 + $0x18] sm:$0xf]  ;;  %309 = vst.msk [vmem:[%s880_s9 + $0x10] sm:$0xf] %vm304_vm0, %v292_v60  ;;  %v230_v8 = vmax.bf16 %v214_v56, %v198_v61 }
  0x1c   :  { %v89_v1 = vld [vmem:[%s873_s2 + $0x24] sm:$0xf]  ;;  %v73_v7 = vmax.bf16 %v57_v0, %v41_v63  ;;  %v215_v9 = vld [vmem:[%s877_s6 + $0x1c] sm:$0xf]  ;;  %v136_v10 = vmax.bf16 %v120_v59, %v104_v62  ;;  %v184_v11 = vld [vmem:[%s876_s5 + $0x20] sm:$0xf]  ;;  %v293_v13 = vmax.bf16 %v277_v51, %v261_v2  ;;  %v199_v14 = vmax.bf16 %v183_v58, %v167_v5 }
  0x1d   :  { %v121_v12 = vld [vmem:[%s874_s3 + $0x24] sm:$0xf]  ;;  %v42_v16 = vld [vmem:[%s871_s0 + $0x28] sm:$0xf]  ;;  %v262_v19 = vmax.bf16 %v246_v3, %v230_v8  ;;  %v247_v20 = vld [vmem:[%s878_s7 + $0x1c] sm:$0xf] }
  0x1e   :  { %v105_v15 = vmax.bf16 %v89_v1, %v73_v7  ;;  %v58_v17 = vld [vmem:[%s872_s1 + $0x28] sm:$0xf]  ;;  %v279_v21 = vld [vmem:[%s879_s8 + $0x1c] sm:$0xf]  ;;  %v168_v22 = vmax.bf16 %v152_v6, %v136_v10  ;;  %v153_v23 = vld [vmem:[%s875_s4 + $0x24] sm:$0xf]  ;;  %v231_v25 = vmax.bf16 %v215_v9, %v199_v14 }
  0x1f   :  { %v90_v18 = vld [vmem:[%s873_s2 + $0x28] sm:$0xf]  ;;  %v74_v24 = vmax.bf16 %v58_v17, %v42_v16  ;;  %310 = vst.msk [vmem:[%s880_s9 + $0x14] sm:$0xf] %vm304_vm0, %v293_v13  ;;  %v216_v26 = vld [vmem:[%s877_s6 + $0x20] sm:$0xf]  ;;  %v294_v30 = vmax.bf16 %v278_v4, %v262_v19 }
  0x20   :  { %v137_v27 = vmax.bf16 %v121_v12, %v105_v15  ;;  %v185_v28 = vld [vmem:[%s876_s5 + $0x24] sm:$0xf]  ;;  %v122_v29 = vld [vmem:[%s874_s3 + $0x28] sm:$0xf]  ;;  %v200_v31 = vmax.bf16 %v184_v11, %v168_v22  ;;  %v43_v33 = vld [vmem:[%s871_s0 + $0x2c] sm:$0xf]  ;;  %v263_v36 = vmax.bf16 %v247_v20, %v231_v25 }
  0x21   :  { %v106_v32 = vmax.bf16 %v90_v18, %v74_v24  ;;  %v59_v34 = vld [vmem:[%s872_s1 + $0x2c] sm:$0xf]  ;;  %v248_v37 = vld [vmem:[%s878_s7 + $0x20] sm:$0xf]  ;;  %v154_v40 = vld [vmem:[%s875_s4 + $0x28] sm:$0xf] }
  0x22   :  { %v91_v35 = vld [vmem:[%s873_s2 + $0x2c] sm:$0xf]  ;;  %v280_v38 = vld [vmem:[%s879_s8 + $0x20] sm:$0xf]  ;;  %v169_v39 = vmax.bf16 %v153_v23, %v137_v27  ;;  %v75_v41 = vmax.bf16 %v59_v34, %v43_v33  ;;  %311 = vst.msk [vmem:[%s880_s9 + $0x18] sm:$0xf] %vm304_vm0, %v294_v30  ;;  %v232_v42 = vmax.bf16 %v216_v26, %v200_v31  ;;  %v295_v47 = vmax.bf16 %v279_v21, %v263_v36 }
  0x23   :  { %v217_v43 = vld [vmem:[%s877_s6 + $0x24] sm:$0xf]  ;;  %v138_v44 = vmax.bf16 %v122_v29, %v106_v32  ;;  %v186_v45 = vld [vmem:[%s876_s5 + $0x28] sm:$0xf]  ;;  %v123_v46 = vld [vmem:[%s874_s3 + $0x2c] sm:$0xf] }
  0x24   :  { %v201_v48 = vmax.bf16 %v185_v28, %v169_v39  ;;  %v107_v49 = vmax.bf16 %v91_v35, %v75_v41  ;;  %v44_v50 = vld [vmem:[%s871_s0 + $0x30] sm:$0xf]  ;;  %v264_v53 = vmax.bf16 %v248_v37, %v232_v42  ;;  %v249_v54 = vld [vmem:[%s878_s7 + $0x24] sm:$0xf]  ;;  %v155_v57 = vld [vmem:[%s875_s4 + $0x2c] sm:$0xf] }
  0x25   :  { %v60_v51 = vld [vmem:[%s872_s1 + $0x30] sm:$0xf]  ;;  %v281_v55 = vld [vmem:[%s879_s8 + $0x24] sm:$0xf]  ;;  %v170_v56 = vmax.bf16 %v154_v40, %v138_v44  ;;  %312 = vst.msk [vmem:[%s880_s9 + $0x1c] sm:$0xf] %vm304_vm0, %v295_v47 }
  0x26   :  { %v92_v52 = vld [vmem:[%s873_s2 + $0x30] sm:$0xf]  ;;  %v76_v58 = vmax.bf16 %v60_v51, %v44_v50  ;;  %v233_v59 = vmax.bf16 %v217_v43, %v201_v48  ;;  %v218_v60 = vld [vmem:[%s877_s6 + $0x28] sm:$0xf]  ;;  %v139_v61 = vmax.bf16 %v123_v46, %v107_v49  ;;  %v187_v62 = vld [vmem:[%s876_s5 + $0x2c] sm:$0xf]  ;;  %v296_v0 = vmax.bf16 %v280_v38, %v264_v53 }
  0x27   :  { %v124_v63 = vld [vmem:[%s874_s3 + $0x30] sm:$0xf]  ;;  %v202_v1 = vmax.bf16 %v186_v45, %v170_v56  ;;  %v45_v3 = vld [vmem:[%s871_s0 + $0x34] sm:$0xf]  ;;  %v250_v7 = vld [vmem:[%s878_s7 + $0x28] sm:$0xf] }
  0x28   :  { %v108_v2 = vmax.bf16 %v92_v52, %v76_v58  ;;  %v61_v4 = vld [vmem:[%s872_s1 + $0x34] sm:$0xf]  ;;  %v265_v6 = vmax.bf16 %v249_v54, %v233_v59  ;;  %v282_v8 = vld [vmem:[%s879_s8 + $0x28] sm:$0xf]  ;;  %v171_v9 = vmax.bf16 %v155_v57, %v139_v61  ;;  %v156_v10 = vld [vmem:[%s875_s4 + $0x30] sm:$0xf] }
  0x29   :  { %v93_v5 = vld [vmem:[%s873_s2 + $0x34] sm:$0xf]  ;;  %v77_v11 = vmax.bf16 %v61_v4, %v45_v3  ;;  %313 = vst.msk [vmem:[%s880_s9 + $0x20] sm:$0xf] %vm304_vm0, %v296_v0  ;;  %v234_v12 = vmax.bf16 %v218_v60, %v202_v1  ;;  %v219_v13 = vld [vmem:[%s877_s6 + $0x2c] sm:$0xf] }
  0x2a   :  { %v140_v14 = vmax.bf16 %v124_v63, %v108_v2  ;;  %v188_v15 = vld [vmem:[%s876_s5 + $0x30] sm:$0xf]  ;;  %v125_v16 = vld [vmem:[%s874_s3 + $0x34] sm:$0xf]  ;;  %v297_v17 = vmax.bf16 %v281_v55, %v265_v6  ;;  %v203_v18 = vmax.bf16 %v187_v62, %v171_v9  ;;  %v46_v20 = vld [vmem:[%s871_s0 + $0x38] sm:$0xf] }
  0x2b   :  { %v109_v19 = vmax.bf16 %v93_v5, %v77_v11  ;;  %v62_v21 = vld [vmem:[%s872_s1 + $0x38] sm:$0xf]  ;;  %v266_v23 = vmax.bf16 %v250_v7, %v234_v12  ;;  %v251_v24 = vld [vmem:[%s878_s7 + $0x2c] sm:$0xf]  ;;  %v157_v27 = vld [vmem:[%s875_s4 + $0x34] sm:$0xf] }
  0x2c   :  { %v94_v22 = vld [vmem:[%s873_s2 + $0x38] sm:$0xf]  ;;  %v283_v25 = vld [vmem:[%s879_s8 + $0x2c] sm:$0xf]  ;;  %v172_v26 = vmax.bf16 %v156_v10, %v140_v14  ;;  %v78_v28 = vmax.bf16 %v62_v21, %v46_v20  ;;  %314 = vst.msk [vmem:[%s880_s9 + $0x24] sm:$0xf] %vm304_vm0, %v297_v17  ;;  %v235_v29 = vmax.bf16 %v219_v13, %v203_v18 }
  0x2d   :  { %v220_v30 = vld [vmem:[%s877_s6 + $0x30] sm:$0xf]  ;;  %v141_v31 = vmax.bf16 %v125_v16, %v109_v19  ;;  %v189_v32 = vld [vmem:[%s876_s5 + $0x34] sm:$0xf]  ;;  %v126_v33 = vld [vmem:[%s874_s3 + $0x38] sm:$0xf]  ;;  %v298_v34 = vmax.bf16 %v282_v8, %v266_v23 }
  0x2e   :  { %v204_v35 = vmax.bf16 %v188_v15, %v172_v26  ;;  %v110_v36 = vmax.bf16 %v94_v22, %v78_v28  ;;  %v47_v37 = vld [vmem:[%s871_s0 + $0x3c] sm:$0xf]  ;;  %v267_v40 = vmax.bf16 %v251_v24, %v235_v29  ;;  %v252_v41 = vld [vmem:[%s878_s7 + $0x30] sm:$0xf]  ;;  %v158_v43 = vld [vmem:[%s875_s4 + $0x38] sm:$0xf] }
  0x2f   :  { %v63_v38 = vld [vmem:[%s872_s1 + $0x3c] sm:$0xf]  ;;  %v173_v42 = vmax.bf16 %v157_v27, %v141_v31  ;;  %315 = vst.msk [vmem:[%s880_s9 + $0x28] sm:$0xf] %vm304_vm0, %v298_v34  ;;  %v221_v46 = vld [vmem:[%s877_s6 + $0x34] sm:$0xf] }
  0x30   :  { %v95_v39 = vld [vmem:[%s873_s2 + $0x3c] sm:$0xf]  ;;  %v79_v44 = vmax.bf16 %v63_v38, %v47_v37  ;;  %v236_v45 = vmax.bf16 %v220_v30, %v204_v35  ;;  %v142_v47 = vmax.bf16 %v126_v33, %v110_v36  ;;  %v299_v49 = vmax.bf16 %v283_v25, %v267_v40  ;;  %v284_v50 = vld [vmem:[%s879_s8 + $0x30] sm:$0xf]  ;;  %v190_v52 = vld [vmem:[%s876_s5 + $0x38] sm:$0xf] }
  0x31   :  { %v127_v48 = vld [vmem:[%s874_s3 + $0x3c] sm:$0xf]  ;;  %v205_v51 = vmax.bf16 %v189_v32, %v173_v42  ;;  %v253_v55 = vld [vmem:[%s878_s7 + $0x34] sm:$0xf]  ;;  %v222_v59 = vld [vmem:[%s877_s6 + $0x38] sm:$0xf] }
  0x32   :  { %v111_v53 = vmax.bf16 %v95_v39, %v79_v44  ;;  %v268_v54 = vmax.bf16 %v252_v41, %v236_v45  ;;  %v174_v56 = vmax.bf16 %v158_v43, %v142_v47  ;;  %v159_v57 = vld [vmem:[%s875_s4 + $0x3c] sm:$0xf]  ;;  %316 = vst.msk [vmem:[%s880_s9 + $0x2c] sm:$0xf] %vm304_vm0, %v299_v49  ;;  %v285_v62 = vld [vmem:[%s879_s8 + $0x34] sm:$0xf] }
  0x33   :  { %v237_v58 = vmax.bf16 %v221_v46, %v205_v51  ;;  %v191_v0 = vld [vmem:[%s876_s5 + $0x3c] sm:$0xf]  ;;  %v254_v2 = vld [vmem:[%s878_s7 + $0x38] sm:$0xf] }
  0x34   :  { %v143_v60 = vmax.bf16 %v127_v48, %v111_v53  ;;  %v300_v61 = vmax.bf16 %v284_v50, %v268_v54  ;;  %v206_v63 = vmax.bf16 %v190_v52, %v174_v56  ;;  %v223_v5 = vld [vmem:[%s877_s6 + $0x3c] sm:$0xf]  ;;  %v286_v7 = vld [vmem:[%s879_s8 + $0x38] sm:$0xf] }
  0x35   :  { %v269_v1 = vmax.bf16 %v253_v55, %v237_v58  ;;  %v255_v10 = vld [vmem:[%s878_s7 + $0x3c] sm:$0xf] }
  0x36   :  { %v175_v3 = vmax.bf16 %v159_v57, %v143_v60  ;;  %317 = vst.msk [vmem:[%s880_s9 + $0x30] sm:$0xf] %vm304_vm0, %v300_v61  ;;  %v238_v4 = vmax.bf16 %v222_v59, %v206_v63  ;;  %v287_v13 = vld [vmem:[%s879_s8 + $0x3c] sm:$0xf] }
  0x37   :  { %v301_v6 = vmax.bf16 %v285_v62, %v269_v1 }
  0x38   :  { %v207_v8 = vmax.bf16 %v191_v0, %v175_v3  ;;  %v270_v9 = vmax.bf16 %v254_v2, %v238_v4 }
  0x39   :  { %318 = vst.msk [vmem:[%s880_s9 + $0x34] sm:$0xf] %vm304_vm0, %v301_v6 }
  0x3a   :  { %v239_v11 = vmax.bf16 %v223_v5, %v207_v8  ;;  %v302_v12 = vmax.bf16 %v286_v7, %v270_v9 }
  0x3c   :  { %v271_v14 = vmax.bf16 %v255_v10, %v239_v11  ;;  %319 = vst.msk [vmem:[%s880_s9 + $0x38] sm:$0xf] %vm304_vm0, %v302_v12 }
  0x3e   :  { %v303_v15 = vmax.bf16 %v287_v13, %v271_v14 }
  0x40   :  { %320 = vst.msk [vmem:[%s880_s9 + $0x3c] sm:$0xf] %vm304_vm0, %v303_v15 }

// kernel: densenet_forward.35
= control target key start
LH: loop header
LB: loop body
LE: loop exit
PB: predicated region body
PF: predicated region fallthrough
CT: control target
= control target key end

     0   :  { %vm22_vm0 = vcmask 130048   ;;  %v552_v1 = vmov 0.0   ;;  %vm173_vm1 = vcmask 261120   ;;  %vm411_vm2 = vcmask 125952   ;;  %s754_s1 = inlined_call_operand.vmem [shape: bf16[1,32,16], index: 1, kind: input, shape index: {}]   ;;  %s755_s0 = inlined_call_operand.vmem [shape: bf16[128,32], index: 0, kind: input, shape index: {}]   ;;  %s756_s2 = inlined_call_operand.vmem [shape: f32[1,32], index: 2, kind: input, shape index: {}]   ;;  %s757_s3 = inlined_call_operand.vmem [shape: f32[1,32], index: 3, kind: input, shape index: {}]   ;;  %s758_s4 = inlined_call_operand.vmem [shape: bf16[128,16], index: 4, kind: output, shape index: {}]  }
   0x1   :  { %v550_v0 = vld [vmem:[%s754_s1] sm:$0xff]   ;;  %25 = vst.msk [vmem:[#allocation2 + $0x10] sm:$0xff] %vm22_vm0, %v552_v1  ;;  %23 = vst.msk [vmem:[#allocation2] sm:$0xff] %vm22_vm0, %v552_v1  ;;  %v551_v2 = vld [vmem:[%s754_s1 + $0x8] sm:$0xff]  }
   0x2   :  { %24 = vst.msk [vmem:[#allocation2 + $0x8] sm:$0xff] %vm22_vm0, %v552_v1  ;;  %26 = vst.msk [vmem:[#allocation2 + $0x18] sm:$0xff] %vm22_vm0, %v552_v1  ;;  %525 = vmatprep.subr.bf16.mxu0 %v550_v0  ;;  %545 = vmatprep.subr.bf16.mxu1 %v550_v0  ;;  %v477_v3 = vld [vmem:[%s755_s0] sm:$0xff]   ;;  %v508_v8 = vld [vmem:[%s755_s0 + $0x8] sm:$0xff]  }
   0x3   :  { %27 = vst.msk [vmem:[#allocation2 + $0x20] sm:$0xff] %vm22_vm0, %v552_v1  ;;  %28 = vst.msk [vmem:[#allocation2 + $0x28] sm:$0xff] %vm22_vm0, %v552_v1  ;;  %v606_v4 = vld [vmem:[%s756_s2] ss:$0 sm:$0xff]  ;;  %526 = vmatpush3.bf16.msra.mxu0 %v550_v0  ;;  %547 = vmatpush3.bf16.msra.mxu1 %v550_v0  ;;  %v478_v5 = vunpack.c.l.bf16 %v477_v3  ;;  %v479_v6 = vunpack.c.h.bf16 %v477_v3  ;;  %v512_v9 = vld [vmem:[%s755_s0 + $0x28] sm:$0xff]   ;;  %v482_v13 = vunpack.c.l.bf16 %v508_v8  ;;  %v483_v14 = vunpack.c.h.bf16 %v508_v8 }
   0x4   :  { %29 = vst.msk [vmem:[#allocation2 + $0x30] sm:$0xff] %vm22_vm0, %v552_v1  ;;  %30 = vst.msk [vmem:[#allocation2 + $0x38] sm:$0xff] %vm22_vm0, %v552_v1  ;;  %v511_v7 = vld [vmem:[%s755_s0 + $0x20] sm:$0xff]   ;;  %527 = vmatprep.subr.bf16.mxu0 %v551_v2  ;;  %546 = vmatprep.subr.bf16.mxu1 %v551_v2  ;;  %v509_v15 = vld [vmem:[%s755_s0 + $0x10] sm:$0xff]   ;;  %v498_v18 = vunpack.c.l.bf16 %v512_v9  ;;  %v499_v19 = vunpack.c.h.bf16 %v512_v9 }
   0x5   :  { %31 = vst.msk [vmem:[#allocation2 + $0x40] sm:$0xff] %vm22_vm0, %v552_v1  ;;  %32 = vst.msk [vmem:[#allocation2 + $0x48] sm:$0xff] %vm22_vm0, %v552_v1  ;;  %v620_v10 = vld [vmem:[%s757_s3] ss:$0 sm:$0xff]  ;;  %v494_v11 = vunpack.c.l.bf16 %v511_v7  ;;  %v495_v12 = vunpack.c.h.bf16 %v511_v7  ;;  %v78_v16 = vmul.f32 %v478_v5, %v606_v4  ;;  %v79_v17 = vmul.f32 %v479_v6, %v606_v4  ;;  %v513_v36 = vld [vmem:[%s755_s0 + $0x30] sm:$0xff]  }
   0x6   :  { %33 = vst.msk [vmem:[#allocation2 + $0x50] sm:$0xff] %vm22_vm0, %v552_v1  ;;  %34 = vst.msk [vmem:[#allocation2 + $0x58] sm:$0xff] %vm22_vm0, %v552_v1  ;;  %v80_v22 = vmul.f32 %v482_v13, %v606_v4  ;;  %v81_v23 = vmul.f32 %v483_v14, %v606_v4  ;;  %v88_v26 = vmul.f32 %v498_v18, %v606_v4  ;;  %v486_v27 = vunpack.c.l.bf16 %v509_v15  ;;  %v510_v41 = vld [vmem:[%s755_s0 + $0x18] sm:$0xff]  }
   0x7   :  { %35 = vst.msk [vmem:[#allocation2 + $0x60] sm:$0xff] %vm22_vm0, %v552_v1  ;;  %36 = vst.msk [vmem:[#allocation2 + $0x68] sm:$0xff] %vm22_vm0, %v552_v1  ;;  %v86_v20 = vmul.f32 %v494_v11, %v606_v4  ;;  %v87_v21 = vmul.f32 %v495_v12, %v606_v4  ;;  %528 = vmatpush3.bf16.msra.mxu0 %v551_v2  ;;  %548 = vmatpush3.bf16.msra.mxu1 %v551_v2  ;;  %v487_v45 = vunpack.c.h.bf16 %v509_v15  ;;  %v514_v46 = vld [vmem:[%s755_s0 + $0x38] sm:$0xff]  }
   0x8   :  { %37 = vst.msk [vmem:[#allocation2 + $0x70] sm:$0xff] %vm22_vm0, %v552_v1  ;;  %38 = vst.msk [vmem:[#allocation2 + $0x78] sm:$0xff] %vm22_vm0, %v552_v1  ;;  %v101_v24 = vadd.f32 %v620_v10, %v78_v16  ;;  %v102_v25 = vadd.f32 %v620_v10, %v79_v17  ;;  %v103_v30 = vadd.f32 %v620_v10, %v80_v22  ;;  %v502_v50 = vunpack.c.l.bf16 %v513_v36 }
   0x9   :  { %v109_v28 = vadd.f32 %v620_v10, %v86_v20  ;;  %v110_v29 = vadd.f32 %v620_v10, %v87_v21  ;;  %v104_v31 = vadd.f32 %v620_v10, %v81_v23  ;;  %v89_v34 = vmul.f32 %v499_v19, %v606_v4  ;;  %v141_v23 = vld [vmem:[#allocation2] sm:$0xff] }
   0xa   :  { %v117_v32 = vmax.f32 %v101_v24, 0.0  ;;  %v118_v33 = vmax.f32 %v102_v25, 0.0  ;;  %v111_v35 = vadd.f32 %v620_v10, %v88_v26  ;;  %v119_v39 = vmax.f32 %v103_v30, 0.0  ;;  %v144_v25 = vld [vmem:[#allocation2 + $0x18] sm:$0xff] }
   0xb   :  { %v125_v37 = vmax.f32 %v109_v28, 0.0  ;;  %v126_v38 = vmax.f32 %v110_v29, 0.0  ;;  %v120_v40 = vmax.f32 %v104_v31, 0.0  ;;  %v112_v43 = vadd.f32 %v620_v10, %v89_v34  ;;  %v142_v28 = vld [vmem:[#allocation2 + $0x8] sm:$0xff] }
   0xc   :  { %v133_v42 = vpack.c.bf16 %v118_v33, %v117_v32  ;;  %v127_v44 = vmax.f32 %v111_v35, 0.0  ;;  %v82_v49 = vmul.f32 %v486_v27, %v606_v4  ;;  %v83_v52 = vmul.f32 %v487_v45, %v606_v4  ;;  %v149_v30 = vld [vmem:[#allocation2 + $0x40] sm:$0xff]  ;;  %v147_v45 = vld [vmem:[#allocation2 + $0x30] sm:$0xff] }
   0xd   :  { %v137_v47 = vpack.c.bf16 %v126_v38, %v125_v37  ;;  %v134_v48 = vpack.c.bf16 %v120_v40, %v119_v39  ;;  %v128_v51 = vmax.f32 %v112_v43, 0.0  ;;  %v503_v53 = vunpack.c.h.bf16 %v513_v36  ;;  %v151_v27 = vld [vmem:[#allocation2 + $0x50] sm:$0xff]  ;;  %v152_v34 = vld [vmem:[#allocation2 + $0x58] sm:$0xff]  ;;  %v150_v39 = vld [vmem:[#allocation2 + $0x48] sm:$0xff] }
   0xe   :  { %529 = vmatprep.mubr.msk.bf16.mxu0 %vm173_vm1, %v133_v42  ;;  %v490_v54 = vunpack.c.l.bf16 %v510_v41  ;;  %v105_v55 = vadd.f32 %v620_v10, %v82_v49  ;;  %v90_v56 = vmul.f32 %v502_v50, %v606_v4  ;;  %v491_v57 = vunpack.c.h.bf16 %v510_v41  ;;  %v148_v50 = vld [vmem:[#allocation2 + $0x38] sm:$0xff] }
   0xf   :  { %537 = vmatprep.mubr.msk.bf16.mxu1 %vm173_vm1, %v137_v47  ;;  %530 = vmatmul.mubr.msk.bf16.vlgmr.msra.gmra.mrb[0].mxu0 %vm173_vm1, %v134_v48  ;;  %v506_v58 = vunpack.c.l.bf16 %v514_v46  ;;  %v138_v59 = vpack.c.bf16 %v128_v51, %v127_v44  ;;  %v106_v60 = vadd.f32 %v620_v10, %v83_v52  ;;  %v91_v61 = vmul.f32 %v503_v53, %v606_v4  ;;  %v155_v49 = vld [vmem:[#allocation2 + $0x70] sm:$0xff] }
  0x10   :  { %v84_v62 = vmul.f32 %v490_v54, %v606_v4  ;;  %v121_v63 = vmax.f32 %v105_v55, 0.0  ;;  %v113_v0 = vadd.f32 %v620_v10, %v90_v56  ;;  %v85_v1 = vmul.f32 %v491_v57, %v606_v4  ;;  %v153_v55 = vld [vmem:[#allocation2 + $0x60] sm:$0xff]  ;;  %v146_v56 = vld [vmem:[#allocation2 + $0x28] sm:$0xff] }
  0x11   :  { %v507_v2 = vunpack.c.h.bf16 %v514_v46  ;;  %538 = vmatmul.mubr.msk.bf16.vlgmr.msra.gmra.mrb[0].mxu1 %vm173_vm1, %v138_v59  ;;  %v122_v3 = vmax.f32 %v106_v60, 0.0  ;;  %v114_v5 = vadd.f32 %v620_v10, %v91_v61  ;;  %v92_v7 = vmul.f32 %v506_v58, %v606_v4  ;;  %v145_v46 = vld [vmem:[#allocation2 + $0x20] sm:$0xff] }
  0x12   :  { %v107_v6 = vadd.f32 %v620_v10, %v84_v62  ;;  %v129_v8 = vmax.f32 %v113_v0, 0.0  ;;  %v108_v9 = vadd.f32 %v620_v10, %v85_v1  ;;  %v156_v62 = vld [vmem:[#allocation2 + $0x78] sm:$0xff] }
  0x13   :  { %v93_v11 = vmul.f32 %v507_v2, %v606_v4  ;;  %v135_v12 = vpack.c.bf16 %v122_v3, %v121_v63  ;;  %v130_v13 = vmax.f32 %v114_v5, 0.0  ;;  %v115_v15 = vadd.f32 %v620_v10, %v92_v7  ;;  %v143_v4 = vld [vmem:[#allocation2 + $0x10] sm:$0xff]  ;;  %v154_v7 = vld [vmem:[#allocation2 + $0x68] sm:$0xff] }
  0x14   :  { %v123_v14 = vmax.f32 %v107_v6, 0.0  ;;  %v124_v16 = vmax.f32 %v108_v9, 0.0 }
  0x15   :  { %v116_v17 = vadd.f32 %v620_v10, %v93_v11  ;;  %533 = vmatprep.mubr.msk.bf16.mxu0 %vm173_vm1, %v135_v12  ;;  %v139_v18 = vpack.c.bf16 %v130_v13, %v129_v8  ;;  %v131_v19 = vmax.f32 %v115_v15, 0.0 }
  0x16   :  { %v136_v20 = vpack.c.bf16 %v124_v16, %v123_v14 }
  0x17   :  { %v132_v21 = vmax.f32 %v116_v17, 0.0  ;;  %541 = vmatprep.mubr.msk.bf16.mxu1 %vm173_vm1, %v139_v18 }
  0x18   :  { %534 = vmatmul.mubr.msk.bf16.gmra.mrb[4].mxu0 %vm173_vm1, %v136_v20 }
  0x19   :  { %v140_v22 = vpack.c.bf16 %v132_v21, %v131_v19 }
  0x1b   :  { %542 = vmatmul.mubr.msk.bf16.gmra.mrb[4].mxu1 %vm173_vm1, %v140_v22 }
  0xe2   :  { %v531_v24 = vpop.f32.mrb[0].mxu0 }
  0xe3   :  { %v297_v26 = vadd.f32 %v531_v24, %v143_v4  ;;  %v232_v10 = vpop.f32.mrb[1].mxu0 }
  0xe4   :  { %v295_v29 = vadd.f32 %v232_v10, %v141_v23  ;;  %v532_v31 = vpop.f32.mrb[2].mxu0  ;;  %v539_v32 = vpop.f32.mrb[0].mxu1 }
  0xe5   :  { %314 = vst.msk [vmem:[#allocation2 + $0x10] sm:$0xff] %vm22_vm0, %v297_v26  ;;  %v298_v33 = vadd.f32 %v532_v31, %v144_v25  ;;  %v235_v35 = vpop.f32.mrb[3].mxu0  ;;  %v305_v36 = vadd.f32 %v539_v32, %v151_v27  ;;  %v264_v37 = vpop.f32.mrb[1].mxu1 }
  0xe6   :  { %312 = vst.msk [vmem:[#allocation2] sm:$0xff] %vm22_vm0, %v295_v29  ;;  %v296_v38 = vadd.f32 %v235_v35, %v142_v28  ;;  %v303_v40 = vadd.f32 %v264_v37, %v149_v30  ;;  %v540_v41 = vpop.f32.mrb[2].mxu1 }
  0xe7   :  { %315 = vst.msk [vmem:[#allocation2 + $0x18] sm:$0xff] %vm22_vm0, %v298_v33  ;;  %322 = vst.msk [vmem:[#allocation2 + $0x50] sm:$0xff] %vm22_vm0, %v305_v36  ;;  %v306_v42 = vadd.f32 %v540_v41, %v152_v34  ;;  %v267_v43 = vpop.f32.mrb[3].mxu1 }
  0xe8   :  { %313 = vst.msk [vmem:[#allocation2 + $0x8] sm:$0xff] %vm22_vm0, %v296_v38  ;;  %320 = vst.msk [vmem:[#allocation2 + $0x40] sm:$0xff] %vm22_vm0, %v303_v40  ;;  %v304_v44 = vadd.f32 %v267_v43, %v150_v39 }
  0xe9   :  { %323 = vst.msk [vmem:[#allocation2 + $0x58] sm:$0xff] %vm22_vm0, %v306_v42 }
  0xea   :  { %321 = vst.msk [vmem:[#allocation2 + $0x48] sm:$0xff] %vm22_vm0, %v304_v44 }
  0xeb   :  { %v535_v48 = vpop.f32.mrb[4].mxu0 }
  0xec   :  { %v333_v47 = vld [vmem:[#allocation2 + $0x10] sm:$0xff]  ;;  %v301_v53 = vadd.f32 %v535_v48, %v147_v45  ;;  %v248_v54 = vpop.f32.mrb[5].mxu0 }
  0xed   :  { %v462_v51 = vpack.c.bf16 %v333_v47, %v333_v47  ;;  %v331_v52 = vld [vmem:[#allocation2] sm:$0xff]  ;;  %v299_v60 = vadd.f32 %v248_v54, %v145_v46  ;;  %v536_v61 = vpop.f32.mrb[6].mxu0 }
  0xee   :  { %v460_v57 = vpack.c.bf16 %v331_v52, %v331_v52  ;;  %v334_v58 = vld [vmem:[#allocation2 + $0x18] sm:$0xff]  ;;  %v543_v59 = vpop.f32.mrb[4].mxu1  ;;  %v341_v63 = vld [vmem:[#allocation2 + $0x50] sm:$0xff]  ;;  %318 = vst.msk [vmem:[#allocation2 + $0x30] sm:$0xff] %vm22_vm0, %v301_v53  ;;  %v302_v5 = vadd.f32 %v536_v61, %v148_v50  ;;  %v251_v6 = vpop.f32.mrb[7].mxu0 }
  0xef   :  { %414 = vst.msk [vmem:[%s758_s4 + $0x8] sm:$0xf] %vm411_vm2, %v462_v51  ;;  %v463_v0 = vpack.c.bf16 %v334_v58, %v334_v58  ;;  %v332_v1 = vld [vmem:[#allocation2 + $0x8] sm:$0xff]  ;;  %v309_v2 = vadd.f32 %v543_v59, %v155_v49  ;;  %v280_v3 = vpop.f32.mrb[5].mxu1  ;;  %v470_v8 = vpack.c.bf16 %v341_v63, %v341_v63  ;;  %v339_v9 = vld [vmem:[#allocation2 + $0x40] sm:$0xff]  ;;  %v300_v14 = vadd.f32 %v251_v6, %v146_v56 }
  0xf0   :  { %412 = vst.msk [vmem:[%s758_s4] sm:$0xf] %vm411_vm2, %v460_v57  ;;  %v461_v11 = vpack.c.bf16 %v332_v1, %v332_v1  ;;  %v307_v12 = vadd.f32 %v280_v3, %v153_v55  ;;  %v544_v13 = vpop.f32.mrb[6].mxu1  ;;  %v468_v15 = vpack.c.bf16 %v339_v9, %v339_v9  ;;  %v342_v16 = vld [vmem:[#allocation2 + $0x58] sm:$0xff] }
  0xf1   :  { %316 = vst.msk [vmem:[#allocation2 + $0x20] sm:$0xff] %vm22_vm0, %v299_v60  ;;  %326 = vst.msk [vmem:[#allocation2 + $0x70] sm:$0xff] %vm22_vm0, %v309_v2  ;;  %v310_v17 = vadd.f32 %v544_v13, %v156_v62  ;;  %v283_v18 = vpop.f32.mrb[7].mxu1  ;;  %v471_v19 = vpack.c.bf16 %v342_v16, %v342_v16  ;;  %v340_v20 = vld [vmem:[#allocation2 + $0x48] sm:$0xff] }
  0xf2   :  { %415 = vst.msk [vmem:[%s758_s4 + $0xc] sm:$0xf] %vm411_vm2, %v463_v0  ;;  %422 = vst.msk [vmem:[%s758_s4 + $0x28] sm:$0xf] %vm411_vm2, %v470_v8  ;;  %v308_v21 = vadd.f32 %v283_v18, %v154_v7  ;;  %v469_v22 = vpack.c.bf16 %v340_v20, %v340_v20 }
  0xf3   :  { %319 = vst.msk [vmem:[#allocation2 + $0x38] sm:$0xff] %vm22_vm0, %v302_v5  ;;  %324 = vst.msk [vmem:[#allocation2 + $0x60] sm:$0xff] %vm22_vm0, %v307_v12 }
  0xf4   :  { %413 = vst.msk [vmem:[%s758_s4 + $0x4] sm:$0xf] %vm411_vm2, %v461_v11  ;;  %420 = vst.msk [vmem:[%s758_s4 + $0x20] sm:$0xf] %vm411_vm2, %v468_v15 }
  0xf5   :  { %317 = vst.msk [vmem:[#allocation2 + $0x28] sm:$0xff] %vm22_vm0, %v300_v14  ;;  %327 = vst.msk [vmem:[#allocation2 + $0x78] sm:$0xff] %vm22_vm0, %v310_v17  ;;  %v337_v4 = vld [vmem:[#allocation2 + $0x30] sm:$0xff] }
  0xf6   :  { %423 = vst.msk [vmem:[%s758_s4 + $0x2c] sm:$0xf] %vm411_vm2, %v471_v19  ;;  %421 = vst.msk [vmem:[%s758_s4 + $0x24] sm:$0xf] %vm411_vm2, %v469_v22  ;;  %v466_v23 = vpack.c.bf16 %v337_v4, %v337_v4 }
  0xf7   :  { %325 = vst.msk [vmem:[#allocation2 + $0x68] sm:$0xff] %vm22_vm0, %v308_v21 }
  0xf8   :  { %v335_v24 = vld [vmem:[#allocation2 + $0x20] sm:$0xff]  ;;  %v345_v25 = vld [vmem:[#allocation2 + $0x70] sm:$0xff]  ;;  %418 = vst.msk [vmem:[%s758_s4 + $0x18] sm:$0xf] %vm411_vm2, %v466_v23 }
  0xf9   :  { %v464_v26 = vpack.c.bf16 %v335_v24, %v335_v24  ;;  %v474_v10 = vpack.c.bf16 %v345_v25, %v345_v25 }
  0xfa   :  { %v338_v27 = vld [vmem:[#allocation2 + $0x38] sm:$0xff]  ;;  %v343_v28 = vld [vmem:[#allocation2 + $0x60] sm:$0xff] }
  0xfb   :  { %v467_v29 = vpack.c.bf16 %v338_v27, %v338_v27  ;;  %416 = vst.msk [vmem:[%s758_s4 + $0x10] sm:$0xf] %vm411_vm2, %v464_v26  ;;  %v472_v31 = vpack.c.bf16 %v343_v28, %v343_v28  ;;  %426 = vst.msk [vmem:[%s758_s4 + $0x38] sm:$0xf] %vm411_vm2, %v474_v10 }
  0xfc   :  { %v336_v30 = vld [vmem:[#allocation2 + $0x28] sm:$0xff]  ;;  %v346_v32 = vld [vmem:[#allocation2 + $0x78] sm:$0xff] }
  0xfd   :  { %v465_v33 = vpack.c.bf16 %v336_v30, %v336_v30  ;;  %419 = vst.msk [vmem:[%s758_s4 + $0x1c] sm:$0xf] %vm411_vm2, %v467_v29  ;;  %v475_v34 = vpack.c.bf16 %v346_v32, %v346_v32  ;;  %424 = vst.msk [vmem:[%s758_s4 + $0x30] sm:$0xf] %vm411_vm2, %v472_v31 }
  0xfe   :  { %v344_v35 = vld [vmem:[#allocation2 + $0x68] sm:$0xff] }
  0xff   :  { %417 = vst.msk [vmem:[%s758_s4 + $0x14] sm:$0xf] %vm411_vm2, %v465_v33  ;;  %v473_v36 = vpack.c.bf16 %v344_v35, %v344_v35  ;;  %427 = vst.msk [vmem:[%s758_s4 + $0x3c] sm:$0xf] %vm411_vm2, %v475_v34 }
 0x101   :  { %425 = vst.msk [vmem:[%s758_s4 + $0x34] sm:$0xf] %vm411_vm2, %v473_v36 }

// kernel: densenet_forward.37
= control target key start
LH: loop header
LB: loop body
LE: loop exit
PB: predicated region body
PF: predicated region fallthrough
CT: control target
= control target key end

     0   :  { %vm172_vm0 = vcmask 125952   ;;  %s416_s0 = inlined_call_operand.vmem [shape: bf16[128,16], index: 0, kind: input, shape index: {}]   ;;  %s417_s1 = inlined_call_operand.vmem [shape: f32[1,16], index: 1, kind: input, shape index: {}]   ;;  %s418_s2 = inlined_call_operand.vmem [shape: f32[1,16], index: 2, kind: input, shape index: {}]   ;;  %s419_s3 = inlined_call_operand.vmem [shape: bf16[128,16], index: 3, kind: output, shape index: {}]  }
   0x1   :  { %v228_v0 = vld [vmem:[%s416_s0] sm:$0xff]   ;;  %v259_v4 = vld [vmem:[%s416_s0 + $0x8] sm:$0xff]   ;;  %v260_v5 = vld [vmem:[%s416_s0 + $0x10] sm:$0xff]  }
   0x2   :  { %v292_v1 = vld [vmem:[%s417_s1] ss:$0 sm:$0xff]  ;;  %v229_v2 = vunpack.c.l.bf16 %v228_v0  ;;  %v230_v3 = vunpack.c.h.bf16 %v228_v0  ;;  %v261_v6 = vld [vmem:[%s416_s0 + $0x18] sm:$0xff]   ;;  %v233_v8 = vunpack.c.l.bf16 %v259_v4  ;;  %v234_v9 = vunpack.c.h.bf16 %v259_v4  ;;  %v263_v41 = vld [vmem:[%s416_s0 + $0x28] sm:$0xff]  }
   0x3   :  { %v306_v7 = vld [vmem:[%s418_s2] ss:$0 sm:$0xff]  ;;  %v237_v10 = vunpack.c.l.bf16 %v260_v5  ;;  %v238_v11 = vunpack.c.h.bf16 %v260_v5  ;;  %v241_v14 = vunpack.c.l.bf16 %v261_v6  ;;  %v242_v15 = vunpack.c.h.bf16 %v261_v6  ;;  %v264_v42 = vld [vmem:[%s416_s0 + $0x30] sm:$0xff]   ;;  %v265_v47 = vld [vmem:[%s416_s0 + $0x38] sm:$0xff]  }
   0x4   :  { %v53_v12 = vmul.f32 %v229_v2, %v292_v1  ;;  %v54_v13 = vmul.f32 %v230_v3, %v292_v1  ;;  %v55_v16 = vmul.f32 %v233_v8, %v292_v1  ;;  %v56_v17 = vmul.f32 %v234_v9, %v292_v1  ;;  %v262_v36 = vld [vmem:[%s416_s0 + $0x20] sm:$0xff]  }
   0x5   :  { %v57_v18 = vmul.f32 %v237_v10, %v292_v1  ;;  %v58_v19 = vmul.f32 %v238_v11, %v292_v1  ;;  %v59_v22 = vmul.f32 %v241_v14, %v292_v1  ;;  %v60_v23 = vmul.f32 %v242_v15, %v292_v1 }
   0x6   :  { %v76_v20 = vadd.f32 %v306_v7, %v53_v12  ;;  %v77_v21 = vadd.f32 %v306_v7, %v54_v13  ;;  %v78_v24 = vadd.f32 %v306_v7, %v55_v16  ;;  %v79_v25 = vadd.f32 %v306_v7, %v56_v17 }
   0x7   :  { %v80_v26 = vadd.f32 %v306_v7, %v57_v18  ;;  %v81_v27 = vadd.f32 %v306_v7, %v58_v19  ;;  %v82_v30 = vadd.f32 %v306_v7, %v59_v22  ;;  %v83_v31 = vadd.f32 %v306_v7, %v60_v23 }
   0x8   :  { %v92_v28 = vmax.f32 %v76_v20, 0.0  ;;  %v93_v29 = vmax.f32 %v77_v21, 0.0  ;;  %v94_v32 = vmax.f32 %v78_v24, 0.0  ;;  %v95_v33 = vmax.f32 %v79_v25, 0.0 }
   0x9   :  { %v96_v34 = vmax.f32 %v80_v26, 0.0  ;;  %v97_v35 = vmax.f32 %v81_v27, 0.0  ;;  %v98_v39 = vmax.f32 %v82_v30, 0.0  ;;  %v99_v40 = vmax.f32 %v83_v31, 0.0 }
   0xa   :  { %v211_v37 = vpack.c.bf16 %v92_v28, %v92_v28  ;;  %v212_v38 = vpack.c.bf16 %v93_v29, %v93_v29  ;;  %v213_v43 = vpack.c.bf16 %v94_v32, %v94_v32  ;;  %v214_v44 = vpack.c.bf16 %v95_v33, %v95_v33 }
   0xb   :  { %v215_v45 = vpack.c.bf16 %v96_v34, %v96_v34  ;;  %v216_v46 = vpack.c.bf16 %v97_v35, %v97_v35  ;;  %v217_v48 = vpack.c.bf16 %v98_v39, %v98_v39  ;;  %v218_v49 = vpack.c.bf16 %v99_v40, %v99_v40 }
   0xc   :  { %173 = vst.msk [vmem:[%s419_s3] sm:$0xf] %vm172_vm0, %v211_v37  ;;  %174 = vst.msk [vmem:[%s419_s3 + $0x4] sm:$0xf] %vm172_vm0, %v212_v38  ;;  %v245_v50 = vunpack.c.l.bf16 %v262_v36  ;;  %v246_v51 = vunpack.c.h.bf16 %v262_v36  ;;  %v249_v52 = vunpack.c.l.bf16 %v263_v41  ;;  %v250_v53 = vunpack.c.h.bf16 %v263_v41 }
   0xd   :  { %175 = vst.msk [vmem:[%s419_s3 + $0x8] sm:$0xf] %vm172_vm0, %v213_v43  ;;  %176 = vst.msk [vmem:[%s419_s3 + $0xc] sm:$0xf] %vm172_vm0, %v214_v44  ;;  %v253_v54 = vunpack.c.l.bf16 %v264_v42  ;;  %v254_v55 = vunpack.c.h.bf16 %v264_v42  ;;  %v257_v58 = vunpack.c.l.bf16 %v265_v47  ;;  %v258_v59 = vunpack.c.h.bf16 %v265_v47 }
   0xe   :  { %177 = vst.msk [vmem:[%s419_s3 + $0x10] sm:$0xf] %vm172_vm0, %v215_v45  ;;  %178 = vst.msk [vmem:[%s419_s3 + $0x14] sm:$0xf] %vm172_vm0, %v216_v46  ;;  %v61_v56 = vmul.f32 %v245_v50, %v292_v1  ;;  %v62_v57 = vmul.f32 %v246_v51, %v292_v1  ;;  %v63_v60 = vmul.f32 %v249_v52, %v292_v1 }
   0xf   :  { %179 = vst.msk [vmem:[%s419_s3 + $0x18] sm:$0xf] %vm172_vm0, %v217_v48  ;;  %180 = vst.msk [vmem:[%s419_s3 + $0x1c] sm:$0xf] %vm172_vm0, %v218_v49  ;;  %v64_v61 = vmul.f32 %v250_v53, %v292_v1  ;;  %v65_v62 = vmul.f32 %v253_v54, %v292_v1  ;;  %v66_v63 = vmul.f32 %v254_v55, %v292_v1 }
  0x10   :  { %v84_v0 = vadd.f32 %v306_v7, %v61_v56  ;;  %v85_v2 = vadd.f32 %v306_v7, %v62_v57  ;;  %v67_v3 = vmul.f32 %v257_v58, %v292_v1  ;;  %v68_v4 = vmul.f32 %v258_v59, %v292_v1 }
  0x11   :  { %v86_v5 = vadd.f32 %v306_v7, %v63_v60  ;;  %v87_v6 = vadd.f32 %v306_v7, %v64_v61  ;;  %v88_v8 = vadd.f32 %v306_v7, %v65_v62  ;;  %v89_v9 = vadd.f32 %v306_v7, %v66_v63 }
  0x12   :  { %v100_v10 = vmax.f32 %v84_v0, 0.0  ;;  %v101_v11 = vmax.f32 %v85_v2, 0.0  ;;  %v90_v12 = vadd.f32 %v306_v7, %v67_v3  ;;  %v91_v13 = vadd.f32 %v306_v7, %v68_v4 }
  0x13   :  { %v102_v14 = vmax.f32 %v86_v5, 0.0  ;;  %v103_v15 = vmax.f32 %v87_v6, 0.0  ;;  %v104_v16 = vmax.f32 %v88_v8, 0.0  ;;  %v105_v17 = vmax.f32 %v89_v9, 0.0 }
  0x14   :  { %v219_v18 = vpack.c.bf16 %v100_v10, %v100_v10  ;;  %v220_v1 = vpack.c.bf16 %v101_v11, %v101_v11  ;;  %v106_v19 = vmax.f32 %v90_v12, 0.0  ;;  %v107_v20 = vmax.f32 %v91_v13, 0.0 }
  0x15   :  { %v221_v21 = vpack.c.bf16 %v102_v14, %v102_v14  ;;  %v222_v22 = vpack.c.bf16 %v103_v15, %v103_v15  ;;  %v223_v23 = vpack.c.bf16 %v104_v16, %v104_v16  ;;  %v224_v24 = vpack.c.bf16 %v105_v17, %v105_v17 }
  0x16   :  { %181 = vst.msk [vmem:[%s419_s3 + $0x20] sm:$0xf] %vm172_vm0, %v219_v18  ;;  %182 = vst.msk [vmem:[%s419_s3 + $0x24] sm:$0xf] %vm172_vm0, %v220_v1  ;;  %v225_v7 = vpack.c.bf16 %v106_v19, %v106_v19  ;;  %v226_v25 = vpack.c.bf16 %v107_v20, %v107_v20 }
  0x17   :  { %183 = vst.msk [vmem:[%s419_s3 + $0x28] sm:$0xf] %vm172_vm0, %v221_v21  ;;  %184 = vst.msk [vmem:[%s419_s3 + $0x2c] sm:$0xf] %vm172_vm0, %v222_v22 }
  0x18   :  { %185 = vst.msk [vmem:[%s419_s3 + $0x30] sm:$0xf] %vm172_vm0, %v223_v23  ;;  %186 = vst.msk [vmem:[%s419_s3 + $0x34] sm:$0xf] %vm172_vm0, %v224_v24 }
  0x19   :  { %187 = vst.msk [vmem:[%s419_s3 + $0x38] sm:$0xf] %vm172_vm0, %v225_v7  ;;  %188 = vst.msk [vmem:[%s419_s3 + $0x3c] sm:$0xf] %vm172_vm0, %v226_v25 }

// kernel: densenet_forward.39
= control target key start
LH: loop header
LB: loop body
LE: loop exit
PB: predicated region body
PF: predicated region fallthrough
CT: control target
= control target key end

     0   :  { %vm14_vm0 = vcmask 57344   ;;  %v195_v0 = vmov 0.0   ;;  %vm50_vm1 = vcmask 64512   ;;  %s289_s0 = inlined_call_operand.vmem [shape: bf16[128,8], index: 0, kind: input, shape index: {}]   ;;  %s290_s1 = inlined_call_operand.vmem [shape: f32[1,8], index: 1, kind: output, shape index: {0}]   ;;  %s291_s2 = inlined_call_operand.vmem [shape: f32[1,8], index: 2, kind: output, shape index: {1}]  }
   0x1   :  { %15 = vst.msk [vmem:[%s290_s1] sm:$0x1] %vm14_vm0, %v195_v0  ;;  %v156_v1 = vld [vmem:[%s289_s0] sm:$0xff]   ;;  %v187_v2 = vld [vmem:[%s289_s0 + $0x8] sm:$0xff]   ;;  %16 = vst.msk [vmem:[%s291_s2] sm:$0x1] %vm14_vm0, %v195_v0 }
   0x2   :  { %v157_v3 = vunpack.c.l.bf16 %v156_v1  ;;  %v158_v4 = vunpack.c.h.bf16 %v156_v1  ;;  %v161_v5 = vunpack.c.l.bf16 %v187_v2  ;;  %v188_v6 = vld [vmem:[%s289_s0 + $0x10] sm:$0xff]   ;;  %v162_v7 = vunpack.c.h.bf16 %v187_v2  ;;  %v189_v14 = vld [vmem:[%s289_s0 + $0x18] sm:$0xff]   ;;  %v190_v24 = vld [vmem:[%s289_s0 + $0x20] sm:$0xff]  }
   0x3   :  { %v165_v12 = vunpack.c.l.bf16 %v188_v6  ;;  %v166_v16 = vunpack.c.h.bf16 %v188_v6  ;;  %v169_v22 = vunpack.c.l.bf16 %v189_v14  ;;  %v170_v27 = vunpack.c.h.bf16 %v189_v14  ;;  %v191_v37 = vld [vmem:[%s289_s0 + $0x28] sm:$0xff]   ;;  %v192_v50 = vld [vmem:[%s289_s0 + $0x30] sm:$0xff]   ;;  %v193_v63 = vld [vmem:[%s289_s0 + $0x38] sm:$0xff]  }
   0x4   :  { %v51_v8 = vsel %vm50_vm1, %v157_v3, 0.0  ;;  %v52_v9 = vsel %vm50_vm1, %v158_v4, 0.0  ;;  %v54_v10 = vsel %vm50_vm1, %v161_v5, 0.0  ;;  %v56_v13 = vsel %vm50_vm1, %v162_v7, 0.0 }
   0x5   :  { %v53_v11 = vadd.f32 %v52_v9, %v51_v8  ;;  %v58_v17 = vsel %vm50_vm1, %v165_v12, 0.0  ;;  %v92_v19 = vmul.f32 %v157_v3, %v157_v3  ;;  %v93_v20 = vmul.f32 %v158_v4, %v158_v4 }
   0x6   :  { %v94_v21 = vmul.f32 %v161_v5, %v161_v5  ;;  %v60_v23 = vsel %vm50_vm1, %v166_v16, 0.0  ;;  %v95_v26 = vmul.f32 %v162_v7, %v162_v7  ;;  %v62_v28 = vsel %vm50_vm1, %v169_v22, 0.0 }
   0x7   :  { %v55_v15 = vadd.f32 %v54_v10, %v53_v11  ;;  %v96_v29 = vmul.f32 %v165_v12, %v165_v12  ;;  %v108_v31 = vsel %vm50_vm1, %v92_v19, 0.0  ;;  %v109_v32 = vsel %vm50_vm1, %v93_v20, 0.0 }
   0x8   :  { %v111_v33 = vsel %vm50_vm1, %v94_v21, 0.0  ;;  %v173_v34 = vunpack.c.l.bf16 %v190_v24  ;;  %v64_v35 = vsel %vm50_vm1, %v170_v27, 0.0  ;;  %v110_v36 = vadd.f32 %v109_v32, %v108_v31 }
   0x9   :  { %v57_v18 = vadd.f32 %v56_v13, %v55_v15  ;;  %v97_v39 = vmul.f32 %v166_v16, %v166_v16  ;;  %v113_v40 = vsel %vm50_vm1, %v95_v26, 0.0  ;;  %v174_v41 = vunpack.c.h.bf16 %v190_v24 }
   0xa   :  { %v66_v42 = vsel %vm50_vm1, %v173_v34, 0.0  ;;  %v112_v43 = vadd.f32 %v111_v33, %v110_v36  ;;  %v98_v45 = vmul.f32 %v169_v22, %v169_v22  ;;  %v115_v46 = vsel %vm50_vm1, %v96_v29, 0.0 }
   0xb   :  { %v59_v25 = vadd.f32 %v58_v17, %v57_v18  ;;  %v177_v47 = vunpack.c.l.bf16 %v191_v37  ;;  %v68_v48 = vsel %vm50_vm1, %v174_v41, 0.0  ;;  %v99_v52 = vmul.f32 %v170_v27, %v170_v27 }
   0xc   :  { %v114_v49 = vadd.f32 %v113_v40, %v112_v43  ;;  %v117_v53 = vsel %vm50_vm1, %v97_v39, 0.0  ;;  %v178_v54 = vunpack.c.h.bf16 %v191_v37  ;;  %v100_v58 = vmul.f32 %v173_v34, %v173_v34 }
   0xd   :  { %v61_v30 = vadd.f32 %v60_v23, %v59_v25  ;;  %v70_v55 = vsel %vm50_vm1, %v177_v47, 0.0  ;;  %v119_v59 = vsel %vm50_vm1, %v98_v45, 0.0  ;;  %v181_v60 = vunpack.c.l.bf16 %v192_v50 }
   0xe   :  { %v116_v56 = vadd.f32 %v115_v46, %v114_v49  ;;  %v72_v61 = vsel %vm50_vm1, %v178_v54, 0.0  ;;  %v101_v1 = vmul.f32 %v174_v41, %v174_v41  ;;  %v121_v2 = vsel %vm50_vm1, %v99_v52, 0.0  ;;  %v91_v52 = vld [vmem:[%s291_s2] sm:$0x1] }
   0xf   :  { %v63_v38 = vadd.f32 %v62_v28, %v61_v30  ;;  %v182_v3 = vunpack.c.h.bf16 %v192_v50  ;;  %v74_v4 = vsel %vm50_vm1, %v181_v60, 0.0  ;;  %v102_v7 = vmul.f32 %v177_v47, %v177_v47 }
  0x10   :  { %v118_v62 = vadd.f32 %v117_v53, %v116_v56  ;;  %v123_v8 = vsel %vm50_vm1, %v100_v58, 0.0  ;;  %v185_v9 = vunpack.c.l.bf16 %v193_v63  ;;  %v103_v13 = vmul.f32 %v178_v54, %v178_v54 }
  0x11   :  { %v65_v44 = vadd.f32 %v64_v35, %v63_v38  ;;  %v76_v10 = vsel %vm50_vm1, %v182_v3, 0.0  ;;  %v125_v14 = vsel %vm50_vm1, %v101_v1, 0.0  ;;  %v186_v15 = vunpack.c.h.bf16 %v193_v63 }
  0x12   :  { %v120_v5 = vadd.f32 %v119_v59, %v118_v62  ;;  %v78_v16 = vsel %vm50_vm1, %v185_v9, 0.0  ;;  %v104_v19 = vmul.f32 %v181_v60, %v181_v60  ;;  %v127_v20 = vsel %vm50_vm1, %v102_v7, 0.0 }
  0x13   :  { %v67_v51 = vadd.f32 %v66_v42, %v65_v44  ;;  %v80_v21 = vsel %vm50_vm1, %v186_v15, 0.0  ;;  %v105_v24 = vmul.f32 %v182_v3, %v182_v3  ;;  %v129_v25 = vsel %vm50_vm1, %v103_v13, 0.0  ;;  %v49_v44 = vld [vmem:[%s290_s1] sm:$0x1] }
  0x14   :  { %v122_v11 = vadd.f32 %v121_v2, %v120_v5  ;;  %v106_v28 = vmul.f32 %v185_v9, %v185_v9  ;;  %v131_v29 = vsel %vm50_vm1, %v104_v19, 0.0  ;;  %v107_v32 = vmul.f32 %v186_v15, %v186_v15 }
  0x15   :  { %v69_v57 = vadd.f32 %v68_v48, %v67_v51  ;;  %v133_v33 = vsel %vm50_vm1, %v105_v24, 0.0 }
  0x16   :  { %v124_v17 = vadd.f32 %v123_v8, %v122_v11  ;;  %v135_v36 = vsel %vm50_vm1, %v106_v28, 0.0  ;;  %v137_v39 = vsel %vm50_vm1, %v107_v32, 0.0 }
  0x17   :  { %v71_v0 = vadd.f32 %v70_v55, %v69_v57 }
  0x18   :  { %v126_v22 = vadd.f32 %v125_v14, %v124_v17 }
  0x19   :  { %v73_v6 = vadd.f32 %v72_v61, %v71_v0 }
  0x1a   :  { %v128_v26 = vadd.f32 %v127_v20, %v126_v22 }
  0x1b   :  { %v75_v12 = vadd.f32 %v74_v4, %v73_v6 }
  0x1c   :  { %v130_v30 = vadd.f32 %v129_v25, %v128_v26 }
  0x1d   :  { %v77_v18 = vadd.f32 %v76_v10, %v75_v12 }
  0x1e   :  { %v132_v34 = vadd.f32 %v131_v29, %v130_v30 }
  0x1f   :  { %v79_v23 = vadd.f32 %v78_v16, %v77_v18 }
  0x20   :  { %v134_v37 = vadd.f32 %v133_v33, %v132_v34 }
  0x21   :  { %v81_v27 = vadd.f32 %v80_v21, %v79_v23 }
  0x22   :  { %v136_v40 = vadd.f32 %v135_v36, %v134_v37 }
  0x23   :  { %v82_v31 = vrot.slane %v81_v27, 4 }
  0x24   :  { %v138_v42 = vadd.f32 %v137_v39, %v136_v40 }
  0x25   :  { %v83_v35 = vadd.f32 %v82_v31, %v81_v27 }
  0x26   :  { %v139_v45 = vrot.slane %v138_v42, 4 }
  0x27   :  { %v84_v38 = vrot.slane %v83_v35, 2 }
  0x28   :  { %v140_v47 = vadd.f32 %v139_v45, %v138_v42 }
  0x29   :  { %v85_v41 = vadd.f32 %v84_v38, %v83_v35 }
  0x2a   :  { %v141_v49 = vrot.slane %v140_v47, 2 }
  0x2b   :  { %v86_v43 = vrot.slane %v85_v41, 1 }
  0x2c   :  { %v142_v50 = vadd.f32 %v141_v49, %v140_v47 }
  0x2d   :  { %v87_v46 = vadd.f32 %v86_v43, %v85_v41 }
  0x2e   :  { %v143_v51 = vrot.slane %v142_v50, 1 }
  0x2f   :  { %v88_v48 = vadd.f32 %v87_v46, %v49_v44 }
  0x30   :  { %v144_v53 = vadd.f32 %v143_v51, %v142_v50 }
  0x31   :  { %90 = vst.msk [vmem:[%s290_s1] sm:$0x1] %vm14_vm0, %v88_v48 }
  0x32   :  { %v145_v54 = vadd.f32 %v144_v53, %v91_v52 }
  0x34   :  { %146 = vst.msk [vmem:[%s291_s2] sm:$0x1] %vm14_vm0, %v145_v54 }

// kernel: densenet_forward.38
= control target key start
LH: loop header
LB: loop body
LE: loop exit
PB: predicated region body
PF: predicated region fallthrough
CT: control target
= control target key end

     0   :  { %vm137_vm0 = vcmask 130048   ;;  %vm40_vm1 = vcmask 64512   ;;  %v2796_v16 = vmov 0.0   ;;  %vm2247_vm2 = vcmask 60416   ;;  %s3391_s9 = inlined_call_operand.vmem [shape: bf16[9,16,8], index: 9, kind: input, shape index: {}]   ;;  %s3392_s0 = inlined_call_operand.vmem [shape: bf16[128,16], index: 0, kind: input, shape index: {}]   ;;  %s3393_s1 = inlined_call_operand.vmem [shape: bf16[128,16], index: 1, kind: input, shape index: {}]   ;;  %s3394_s2 = inlined_call_operand.vmem [shape: bf16[128,16], index: 2, kind: input, shape index: {}]   ;;  %s3395_s3 = inlined_call_operand.vmem [shape: bf16[128,16], index: 3, kind: input, shape index: {}]   ;;  %s3396_s4 = inlined_call_operand.vmem [shape: bf16[128,16], index: 4, kind: input, shape index: {}]   ;;  %s3397_s5 = inlined_call_operand.vmem [shape: bf16[128,16], index: 5, kind: input, shape index: {}]   ;;  %s3398_s6 = inlined_call_operand.vmem [shape: bf16[128,16], index: 6, kind: input, shape index: {}]   ;;  %s3399_s7 = inlined_call_operand.vmem [shape: bf16[128,16], index: 7, kind: input, shape index: {}]   ;;  %s3400_s8 = inlined_call_operand.vmem [shape: bf16[128,16], index: 8, kind: input, shape index: {}]   ;;  %s3401_s10 = inlined_call_operand.vmem [shape: bf16[128,8], index: 10, kind: output, shape index: {}]  }
   0x1   :  { %v2715_v0 = vld [vmem:[%s3391_s9] sm:$0xff]   ;;  %v2717_v2 = vld [vmem:[%s3392_s0 + $0x28] sm:$0xff]   ;;  %v2721_v6 = vld [vmem:[%s3392_s0 + $0x30] sm:$0xff]   ;;  %51 = vst.msk [vmem:[#allocation2 + $0x50] sm:$0xff] %vm40_vm1, %v2796_v16 }
   0x2   :  { %v2716_v1 = vld [vmem:[%s3392_s0 + $0x20] sm:$0xff]   ;;  %2712 = vmatprep.subr.bf16.mxu1 %v2715_v0  ;;  %2550 = vmatprep.subr.bf16.mxu0 %v2715_v0  ;;  %v2718_v3 = vld [vmem:[%s3391_s9 + $0x8] sm:$0xff]   ;;  %v2722_v7 = vld [vmem:[%s3392_s0 + $0x38] sm:$0xff]   ;;  %41 = vst.msk [vmem:[#allocation2] sm:$0xff] %vm40_vm1, %v2796_v16 }
   0x3   :  { %2713 = vmatpush3.bf16.msra.mxu1 %v2715_v0  ;;  %2560 = vmatprep.mubr.msk.bf16.mxu1 %vm137_vm0, %v2716_v1  ;;  %v2719_v4 = vld [vmem:[%s3392_s0] sm:$0xff]   ;;  %v2720_v5 = vld [vmem:[%s3392_s0 + $0x8] sm:$0xff]   ;;  %v2723_v8 = vld [vmem:[%s3391_s9 + $0x10] sm:$0xff]   ;;  %42 = vst.msk [vmem:[#allocation2 + $0x8] sm:$0xff] %vm40_vm1, %v2796_v16 }
   0x4   :  { %2551 = vmatpush3.bf16.msra.mxu0 %v2715_v0  ;;  %2568 = vmatprep.subr.bf16.mxu1 %v2718_v3  ;;  %v2724_v9 = vld [vmem:[%s3392_s0 + $0x10] sm:$0xff]   ;;  %v2725_v10 = vld [vmem:[%s3392_s0 + $0x18] sm:$0xff]   ;;  %v2726_v11 = vld [vmem:[%s3393_s1] sm:$0xff]   ;;  %43 = vst.msk [vmem:[#allocation2 + $0x10] sm:$0xff] %vm40_vm1, %v2796_v16 }
   0x5   :  { %2552 = vmatprep.mubr.msk.bf16.mxu0 %vm137_vm0, %v2719_v4  ;;  %2586 = vmatprep.subr.bf16.mxu0 %v2723_v8  ;;  %v2728_v12 = vld [vmem:[%s3391_s9 + $0x18] sm:$0xff]   ;;  %v2730_v13 = vld [vmem:[%s3394_s2] sm:$0xff]   ;;  %v2727_v14 = vld [vmem:[%s3393_s1 + $0x8] sm:$0xff]   ;;  %44 = vst.msk [vmem:[#allocation2 + $0x18] sm:$0xff] %vm40_vm1, %v2796_v16 }
   0x6   :  { %2561 = vmatmul.mubr.msk.bf16.vlgmr.msra.gmra.mrb[0].mxu1 %vm137_vm0, %v2717_v2  ;;  %v2733_v15 = vld [vmem:[%s3391_s9 + $0x20] sm:$0xff]   ;;  %45 = vst.msk [vmem:[#allocation2 + $0x20] sm:$0xff] %vm40_vm1, %v2796_v16  ;;  %46 = vst.msk [vmem:[#allocation2 + $0x28] sm:$0xff] %vm40_vm1, %v2796_v16  ;;  %v2729_v17 = vld [vmem:[%s3393_s1 + $0x10] sm:$0xff]  }
   0x7   :  { %2569 = vmatpush3.bf16.msra.mxu1 %v2718_v3  ;;  %2553 = vmatmul.mubr.msk.bf16.vlgmr.msra.gmra.mrb[0].mxu0 %vm137_vm0, %v2720_v5  ;;  %47 = vst.msk [vmem:[#allocation2 + $0x30] sm:$0xff] %vm40_vm1, %v2796_v16  ;;  %48 = vst.msk [vmem:[#allocation2 + $0x38] sm:$0xff] %vm40_vm1, %v2796_v16  ;;  %v2732_v18 = vld [vmem:[%s3394_s2 + $0x8] sm:$0xff]   ;;  %v2735_v19 = vld [vmem:[%s3394_s2 + $0x10] sm:$0xff]  }
   0x8   :  { %2564 = vmatprep.mubr.msk.bf16.mxu1 %vm137_vm0, %v2721_v6  ;;  %2587 = vmatpush3.bf16.msra.mxu0 %v2723_v8  ;;  %49 = vst.msk [vmem:[#allocation2 + $0x40] sm:$0xff] %vm40_vm1, %v2796_v16  ;;  %50 = vst.msk [vmem:[#allocation2 + $0x48] sm:$0xff] %vm40_vm1, %v2796_v16  ;;  %v2731_v20 = vld [vmem:[%s3393_s1 + $0x18] sm:$0xff]   ;;  %v2734_v21 = vld [vmem:[%s3393_s1 + $0x20] sm:$0xff]  }
   0x9   :  { %2556 = vmatprep.mubr.msk.bf16.mxu0 %vm137_vm0, %v2724_v9  ;;  %2604 = vmatprep.subr.bf16.mxu1 %v2728_v12  ;;  %52 = vst.msk [vmem:[#allocation2 + $0x58] sm:$0xff] %vm40_vm1, %v2796_v16  ;;  %53 = vst.msk [vmem:[#allocation2 + $0x60] sm:$0xff] %vm40_vm1, %v2796_v16  ;;  %v2737_v22 = vld [vmem:[%s3394_s2 + $0x18] sm:$0xff]   ;;  %v2739_v23 = vld [vmem:[%s3394_s2 + $0x20] sm:$0xff]  }
   0xa   :  { %54 = vst.msk [vmem:[#allocation2 + $0x68] sm:$0xff] %vm40_vm1, %v2796_v16  ;;  %55 = vst.msk [vmem:[#allocation2 + $0x70] sm:$0xff] %vm40_vm1, %v2796_v16  ;;  %2622 = vmatprep.subr.bf16.mxu0 %v2733_v15  ;;  %v2746_v24 = vld [vmem:[%s3391_s9 + $0x28] sm:$0xff]   ;;  %v2738_v26 = vld [vmem:[%s3393_s1 + $0x30] sm:$0xff]  }
   0xb   :  { %56 = vst.msk [vmem:[#allocation2 + $0x78] sm:$0xff] %vm40_vm1, %v2796_v16  ;;  %v2736_v25 = vld [vmem:[%s3393_s1 + $0x28] sm:$0xff]   ;;  %v2751_v28 = vld [vmem:[%s3391_s9 + $0x30] sm:$0xff]   ;;  %v2740_v30 = vld [vmem:[%s3393_s1 + $0x38] sm:$0xff]  }
   0xc   :  { %v2741_v27 = vld [vmem:[%s3394_s2 + $0x28] sm:$0xff]   ;;  %v2742_v29 = vld [vmem:[%s3394_s2 + $0x30] sm:$0xff]   ;;  %v2743_v31 = vld [vmem:[%s3395_s3] sm:$0xff]  }
   0xd   :  { %v2744_v32 = vld [vmem:[%s3394_s2 + $0x38] sm:$0xff]   ;;  %v2748_v33 = vld [vmem:[%s3396_s4] sm:$0xff]   ;;  %v2745_v34 = vld [vmem:[%s3395_s3 + $0x8] sm:$0xff]  }
   0xe   :  { %2565 = vmatmul.mubr.msk.bf16.gmra.mrb[4].mxu1 %vm137_vm0, %v2722_v7  ;;  %v2747_v35 = vld [vmem:[%s3395_s3 + $0x10] sm:$0xff]   ;;  %v2750_v36 = vld [vmem:[%s3396_s4 + $0x8] sm:$0xff]   ;;  %v2764_v37 = vld [vmem:[%s3391_s9 + $0x38] sm:$0xff]  }
   0xf   :  { %2557 = vmatmul.mubr.msk.bf16.gmra.mrb[4].mxu0 %vm137_vm0, %v2725_v10  ;;  %2570 = vmatprep.mubr.msk.bf16.mxu1 %vm137_vm0, %v2726_v11  ;;  %v2753_v38 = vld [vmem:[%s3396_s4 + $0x10] sm:$0xff]   ;;  %v2769_v39 = vld [vmem:[%s3391_s9 + $0x40] sm:$0xff]   ;;  %v2749_v40 = vld [vmem:[%s3395_s3 + $0x18] sm:$0xff]  }
  0x10   :  { %2588 = vmatprep.mubr.msk.bf16.mxu0 %vm137_vm0, %v2730_v13  ;;  %v2752_v41 = vld [vmem:[%s3395_s3 + $0x20] sm:$0xff]   ;;  %v2755_v42 = vld [vmem:[%s3396_s4 + $0x18] sm:$0xff]   ;;  %v2754_v44 = vld [vmem:[%s3395_s3 + $0x28] sm:$0xff]  }
  0x11   :  { %v2757_v43 = vld [vmem:[%s3396_s4 + $0x20] sm:$0xff]   ;;  %v2756_v45 = vld [vmem:[%s3395_s3 + $0x30] sm:$0xff]   ;;  %v2759_v46 = vld [vmem:[%s3396_s4 + $0x28] sm:$0xff]  }
  0x12   :  { %v2760_v47 = vld [vmem:[%s3396_s4 + $0x30] sm:$0xff]   ;;  %v2758_v48 = vld [vmem:[%s3395_s3 + $0x38] sm:$0xff]   ;;  %v2761_v49 = vld [vmem:[%s3397_s5] sm:$0xff]  }
  0x13   :  { %v2762_v50 = vld [vmem:[%s3396_s4 + $0x38] sm:$0xff]   ;;  %v2766_v51 = vld [vmem:[%s3398_s6] sm:$0xff]   ;;  %v2763_v52 = vld [vmem:[%s3397_s5 + $0x8] sm:$0xff]  }
  0x14   :  { %v2765_v53 = vld [vmem:[%s3397_s5 + $0x10] sm:$0xff]   ;;  %v2768_v54 = vld [vmem:[%s3398_s6 + $0x8] sm:$0xff]   ;;  %v2767_v56 = vld [vmem:[%s3397_s5 + $0x18] sm:$0xff]  }
  0x15   :  { %v2771_v55 = vld [vmem:[%s3398_s6 + $0x10] sm:$0xff]   ;;  %v2770_v57 = vld [vmem:[%s3397_s5 + $0x20] sm:$0xff]   ;;  %v2773_v58 = vld [vmem:[%s3398_s6 + $0x18] sm:$0xff]  }
  0x16   :  { %2571 = vmatmul.mubr.msk.bf16.vlgmr.msra.gmra.mrb[8].mxu1 %vm137_vm0, %v2727_v14  ;;  %v2775_v59 = vld [vmem:[%s3398_s6 + $0x20] sm:$0xff]   ;;  %v2772_v60 = vld [vmem:[%s3397_s5 + $0x28] sm:$0xff]   ;;  %v2774_v61 = vld [vmem:[%s3397_s5 + $0x30] sm:$0xff]  }
  0x17   :  { %2605 = vmatpush3.bf16.msra.mxu1 %v2728_v12  ;;  %2574 = vmatprep.mubr.msk.bf16.mxu1 %vm137_vm0, %v2729_v17  ;;  %v2777_v62 = vld [vmem:[%s3398_s6 + $0x28] sm:$0xff]   ;;  %v2778_v63 = vld [vmem:[%s3398_s6 + $0x30] sm:$0xff]   ;;  %v2776_v0 = vld [vmem:[%s3397_s5 + $0x38] sm:$0xff]  }
  0x18   :  { %2589 = vmatmul.mubr.msk.bf16.vlgmr.msra.gmra.mrb[8].mxu0 %vm137_vm0, %v2732_v18  ;;  %2640 = vmatprep.subr.bf16.mxu1 %v2746_v24  ;;  %v2779_v1 = vld [vmem:[%s3399_s7] sm:$0xff]   ;;  %v2780_v2 = vld [vmem:[%s3398_s6 + $0x38] sm:$0xff]   ;;  %v2781_v4 = vld [vmem:[%s3399_s7 + $0x8] sm:$0xff]  }
  0x19   :  { %2623 = vmatpush3.bf16.msra.mxu0 %v2733_v15  ;;  %2592 = vmatprep.mubr.msk.bf16.mxu0 %vm137_vm0, %v2735_v19  ;;  %v2783_v3 = vld [vmem:[%s3400_s8] sm:$0xff]   ;;  %v2782_v5 = vld [vmem:[%s3399_s7 + $0x10] sm:$0xff]   ;;  %v2785_v6 = vld [vmem:[%s3400_s8 + $0x8] sm:$0xff]  }
  0x1a   :  { %2658 = vmatprep.subr.bf16.mxu0 %v2751_v28  ;;  %v2787_v7 = vld [vmem:[%s3400_s8 + $0x10] sm:$0xff]   ;;  %v2784_v8 = vld [vmem:[%s3399_s7 + $0x18] sm:$0xff]   ;;  %v2786_v9 = vld [vmem:[%s3399_s7 + $0x20] sm:$0xff]  }
  0x1b   :  { %v2789_v10 = vld [vmem:[%s3400_s8 + $0x18] sm:$0xff]   ;;  %v2791_v11 = vld [vmem:[%s3400_s8 + $0x20] sm:$0xff]   ;;  %v2788_v12 = vld [vmem:[%s3399_s7 + $0x28] sm:$0xff]  }
  0x1c   :  { %v2790_v13 = vld [vmem:[%s3399_s7 + $0x30] sm:$0xff]   ;;  %v2793_v14 = vld [vmem:[%s3400_s8 + $0x28] sm:$0xff]   ;;  %v2792_v16 = vld [vmem:[%s3399_s7 + $0x38] sm:$0xff]  }
  0x1d   :  { %v2794_v15 = vld [vmem:[%s3400_s8 + $0x30] sm:$0xff]   ;;  %v2795_v17 = vld [vmem:[%s3400_s8 + $0x38] sm:$0xff]   ;;  %v81_v19 = vld [vmem:[#allocation2 + $0x40] sm:$0xff] }
  0x1e   :  { %2575 = vmatmul.mubr.msk.bf16.gmra.mrb[12].mxu1 %vm137_vm0, %v2731_v20  ;;  %v83_v18 = vld [vmem:[#allocation2 + $0x50] sm:$0xff] }
  0x1f   :  { %2578 = vmatprep.mubr.msk.bf16.mxu1 %vm137_vm0, %v2734_v21  ;;  %v75_v20 = vld [vmem:[#allocation2 + $0x10] sm:$0xff] }
  0x20   :  { %2593 = vmatmul.mubr.msk.bf16.gmra.mrb[12].mxu0 %vm137_vm0, %v2737_v22  ;;  %v84_v22 = vld [vmem:[#allocation2 + $0x58] sm:$0xff] }
  0x21   :  { %2596 = vmatprep.mubr.msk.bf16.mxu0 %vm137_vm0, %v2739_v23  ;;  %v73_v23 = vld [vmem:[#allocation2] sm:$0xff] }
  0x26   :  { %2579 = vmatmul.mubr.msk.bf16.gmra.mrb[16].mxu1 %vm137_vm0, %v2736_v25 }
  0x27   :  { %2582 = vmatprep.mubr.msk.bf16.mxu1 %vm137_vm0, %v2738_v26  ;;  %v82_v26 = vld [vmem:[#allocation2 + $0x48] sm:$0xff] }
  0x28   :  { %2597 = vmatmul.mubr.msk.bf16.gmra.mrb[16].mxu0 %vm137_vm0, %v2741_v27 }
  0x29   :  { %2600 = vmatprep.mubr.msk.bf16.mxu0 %vm137_vm0, %v2742_v29 }
  0x2e   :  { %2583 = vmatmul.mubr.msk.bf16.gmra.mrb[20].mxu1 %vm137_vm0, %v2740_v30 }
  0x2f   :  { %2606 = vmatprep.mubr.msk.bf16.mxu1 %vm137_vm0, %v2743_v31 }
  0x30   :  { %2601 = vmatmul.mubr.msk.bf16.gmra.mrb[20].mxu0 %vm137_vm0, %v2744_v32 }
  0x31   :  { %2624 = vmatprep.mubr.msk.bf16.mxu0 %vm137_vm0, %v2748_v33  ;;  %v74_v33 = vld [vmem:[#allocation2 + $0x8] sm:$0xff] }
  0x36   :  { %2607 = vmatmul.mubr.msk.bf16.vlgmr.msra.gmra.mrb[24].mxu1 %vm137_vm0, %v2745_v34 }
  0x37   :  { %2641 = vmatpush3.bf16.msra.mxu1 %v2746_v24  ;;  %2610 = vmatprep.mubr.msk.bf16.mxu1 %vm137_vm0, %v2747_v35 }
  0x38   :  { %2625 = vmatmul.mubr.msk.bf16.vlgmr.msra.gmra.mrb[24].mxu0 %vm137_vm0, %v2750_v36  ;;  %2676 = vmatprep.subr.bf16.mxu1 %v2764_v37 }
  0x39   :  { %2659 = vmatpush3.bf16.msra.mxu0 %v2751_v28  ;;  %2628 = vmatprep.mubr.msk.bf16.mxu0 %vm137_vm0, %v2753_v38  ;;  %v76_v28 = vld [vmem:[#allocation2 + $0x18] sm:$0xff] }
  0x3a   :  { %2694 = vmatprep.subr.bf16.mxu0 %v2769_v39 }
  0x3e   :  { %2611 = vmatmul.mubr.msk.bf16.gmra.mrb[28].mxu1 %vm137_vm0, %v2749_v40 }
  0x3f   :  { %2614 = vmatprep.mubr.msk.bf16.mxu1 %vm137_vm0, %v2752_v41 }
  0x40   :  { %2629 = vmatmul.mubr.msk.bf16.gmra.mrb[28].mxu0 %vm137_vm0, %v2755_v42  ;;  %v87_v42 = vld [vmem:[#allocation2 + $0x70] sm:$0xff] }
  0x41   :  { %2632 = vmatprep.mubr.msk.bf16.mxu0 %vm137_vm0, %v2757_v43  ;;  %v85_v43 = vld [vmem:[#allocation2 + $0x60] sm:$0xff] }
  0x46   :  { %2615 = vmatmul.mubr.msk.bf16.gmra.mrb[32].mxu1 %vm137_vm0, %v2754_v44  ;;  %v79_v44 = vld [vmem:[#allocation2 + $0x30] sm:$0xff] }
  0x47   :  { %2618 = vmatprep.mubr.msk.bf16.mxu1 %vm137_vm0, %v2756_v45 }
  0x48   :  { %2633 = vmatmul.mubr.msk.bf16.gmra.mrb[32].mxu0 %vm137_vm0, %v2759_v46  ;;  %v88_v46 = vld [vmem:[#allocation2 + $0x78] sm:$0xff] }
  0x49   :  { %2636 = vmatprep.mubr.msk.bf16.mxu0 %vm137_vm0, %v2760_v47  ;;  %v77_v47 = vld [vmem:[#allocation2 + $0x20] sm:$0xff] }
  0x4e   :  { %2619 = vmatmul.mubr.msk.bf16.gmra.mrb[36].mxu1 %vm137_vm0, %v2758_v48 }
  0x4f   :  { %2642 = vmatprep.mubr.msk.bf16.mxu1 %vm137_vm0, %v2761_v49 }
  0x50   :  { %2637 = vmatmul.mubr.msk.bf16.gmra.mrb[36].mxu0 %vm137_vm0, %v2762_v50  ;;  %v86_v50 = vld [vmem:[#allocation2 + $0x68] sm:$0xff] }
  0x51   :  { %2660 = vmatprep.mubr.msk.bf16.mxu0 %vm137_vm0, %v2766_v51 }
  0x56   :  { %2643 = vmatmul.mubr.msk.bf16.vlgmr.msra.gmra.mrb[40].mxu1 %vm137_vm0, %v2763_v52  ;;  %v80_v52 = vld [vmem:[#allocation2 + $0x38] sm:$0xff] }
  0x57   :  { %2677 = vmatpush3.bf16.msra.mxu1 %v2764_v37  ;;  %2646 = vmatprep.mubr.msk.bf16.mxu1 %vm137_vm0, %v2765_v53 }
  0x58   :  { %2661 = vmatmul.mubr.msk.bf16.vlgmr.msra.gmra.mrb[40].mxu0 %vm137_vm0, %v2768_v54 }
  0x59   :  { %2695 = vmatpush3.bf16.msra.mxu0 %v2769_v39  ;;  %2664 = vmatprep.mubr.msk.bf16.mxu0 %vm137_vm0, %v2771_v55 }
  0x5e   :  { %2647 = vmatmul.mubr.msk.bf16.gmra.mrb[44].mxu1 %vm137_vm0, %v2767_v56 }
  0x5f   :  { %2650 = vmatprep.mubr.msk.bf16.mxu1 %vm137_vm0, %v2770_v57  ;;  %v78_v57 = vld [vmem:[#allocation2 + $0x28] sm:$0xff] }
  0x60   :  { %2665 = vmatmul.mubr.msk.bf16.gmra.mrb[44].mxu0 %vm137_vm0, %v2773_v58 }
  0x61   :  { %2668 = vmatprep.mubr.msk.bf16.mxu0 %vm137_vm0, %v2775_v59 }
  0x66   :  { %2651 = vmatmul.mubr.msk.bf16.gmra.mrb[48].mxu1 %vm137_vm0, %v2772_v60 }
  0x67   :  { %2654 = vmatprep.mubr.msk.bf16.mxu1 %vm137_vm0, %v2774_v61 }
  0x68   :  { %2669 = vmatmul.mubr.msk.bf16.gmra.mrb[48].mxu0 %vm137_vm0, %v2777_v62 }
  0x69   :  { %2672 = vmatprep.mubr.msk.bf16.mxu0 %vm137_vm0, %v2778_v63 }
  0x6e   :  { %2655 = vmatmul.mubr.msk.bf16.gmra.mrb[52].mxu1 %vm137_vm0, %v2776_v0 }
  0x6f   :  { %2678 = vmatprep.mubr.msk.bf16.mxu1 %vm137_vm0, %v2779_v1 }
  0x70   :  { %2673 = vmatmul.mubr.msk.bf16.gmra.mrb[52].mxu0 %vm137_vm0, %v2780_v2 }
  0x71   :  { %2696 = vmatprep.mubr.msk.bf16.mxu0 %vm137_vm0, %v2783_v3 }
  0x76   :  { %2679 = vmatmul.mubr.msk.bf16.vlgmr.msra.gmra.mrb[56].mxu1 %vm137_vm0, %v2781_v4 }
  0x77   :  { %2682 = vmatprep.mubr.msk.bf16.mxu1 %vm137_vm0, %v2782_v5 }
  0x78   :  { %2697 = vmatmul.mubr.msk.bf16.vlgmr.msra.gmra.mrb[56].mxu0 %vm137_vm0, %v2785_v6 }
  0x79   :  { %2700 = vmatprep.mubr.msk.bf16.mxu0 %vm137_vm0, %v2787_v7 }
  0x7e   :  { %2683 = vmatmul.mubr.msk.bf16.gmra.mrb[60].mxu1 %vm137_vm0, %v2784_v8 }
  0x7f   :  { %2686 = vmatprep.mubr.msk.bf16.mxu1 %vm137_vm0, %v2786_v9 }
  0x80   :  { %2701 = vmatmul.mubr.msk.bf16.gmra.mrb[60].mxu0 %vm137_vm0, %v2789_v10 }
  0x81   :  { %2704 = vmatprep.mubr.msk.bf16.mxu0 %vm137_vm0, %v2791_v11 }
  0x86   :  { %2687 = vmatmul.mubr.msk.bf16.gmra.mrb[64].mxu1 %vm137_vm0, %v2788_v12 }
  0x87   :  { %2690 = vmatprep.mubr.msk.bf16.mxu1 %vm137_vm0, %v2790_v13 }
  0x88   :  { %2705 = vmatmul.mubr.msk.bf16.gmra.mrb[64].mxu0 %vm137_vm0, %v2793_v14 }
  0x89   :  { %2708 = vmatprep.mubr.msk.bf16.mxu0 %vm137_vm0, %v2794_v15 }
  0x8e   :  { %2691 = vmatmul.mubr.msk.bf16.gmra.mrb[68].mxu1 %vm137_vm0, %v2792_v16 }
  0x90   :  { %2709 = vmatmul.mubr.msk.bf16.gmra.mrb[68].mxu0 %vm137_vm0, %v2795_v17 }
  0xd9   :  { %v2562_v21 = vpop.f32.mrb[0].mxu1 }
  0xda   :  { %v269_v24 = vadd.f32 %v2562_v21, %v83_v18  ;;  %v228_v25 = vpop.f32.mrb[1].mxu1  ;;  %v2554_v27 = vpop.f32.mrb[0].mxu0 }
  0xdb   :  { %v267_v29 = vadd.f32 %v228_v25, %v81_v19  ;;  %v2563_v30 = vpop.f32.mrb[2].mxu1  ;;  %v261_v31 = vadd.f32 %v2554_v27, %v75_v20  ;;  %v196_v32 = vpop.f32.mrb[1].mxu0 }
  0xdc   :  { %286 = vst.msk [vmem:[#allocation2 + $0x50] sm:$0xff] %vm40_vm1, %v269_v24  ;;  %v270_v34 = vadd.f32 %v2563_v30, %v84_v22  ;;  %v231_v35 = vpop.f32.mrb[3].mxu1  ;;  %v259_v36 = vadd.f32 %v196_v32, %v73_v23  ;;  %v2555_v37 = vpop.f32.mrb[2].mxu0 }
  0xdd   :  { %284 = vst.msk [vmem:[#allocation2 + $0x40] sm:$0xff] %vm40_vm1, %v267_v29  ;;  %v268_v38 = vadd.f32 %v231_v35, %v82_v26  ;;  %278 = vst.msk [vmem:[#allocation2 + $0x10] sm:$0xff] %vm40_vm1, %v261_v31  ;;  %v262_v39 = vadd.f32 %v2555_v37, %v76_v28  ;;  %v199_v40 = vpop.f32.mrb[3].mxu0 }
  0xde   :  { %287 = vst.msk [vmem:[#allocation2 + $0x58] sm:$0xff] %vm40_vm1, %v270_v34  ;;  %276 = vst.msk [vmem:[#allocation2] sm:$0xff] %vm40_vm1, %v259_v36  ;;  %v260_v41 = vadd.f32 %v199_v40, %v74_v33 }
  0xdf   :  { %285 = vst.msk [vmem:[#allocation2 + $0x48] sm:$0xff] %vm40_vm1, %v268_v38  ;;  %279 = vst.msk [vmem:[#allocation2 + $0x18] sm:$0xff] %vm40_vm1, %v262_v39 }
  0xe0   :  { %277 = vst.msk [vmem:[#allocation2 + $0x8] sm:$0xff] %vm40_vm1, %v260_v41 }
  0xe1   :  { %v2566_v45 = vpop.f32.mrb[4].mxu1 }
  0xe2   :  { %v273_v48 = vadd.f32 %v2566_v45, %v87_v42  ;;  %v244_v49 = vpop.f32.mrb[5].mxu1  ;;  %v2558_v51 = vpop.f32.mrb[4].mxu0 }
  0xe3   :  { %v271_v53 = vadd.f32 %v244_v49, %v85_v43  ;;  %v2567_v54 = vpop.f32.mrb[6].mxu1  ;;  %v265_v55 = vadd.f32 %v2558_v51, %v79_v44  ;;  %v212_v56 = vpop.f32.mrb[5].mxu0  ;;  %v318_v42 = vld [vmem:[#allocation2 + $0x50] sm:$0xff] }
  0xe4   :  { %290 = vst.msk [vmem:[#allocation2 + $0x70] sm:$0xff] %vm40_vm1, %v273_v48  ;;  %v274_v58 = vadd.f32 %v2567_v54, %v88_v46  ;;  %v247_v59 = vpop.f32.mrb[7].mxu1  ;;  %v263_v60 = vadd.f32 %v212_v56, %v77_v47  ;;  %v2559_v61 = vpop.f32.mrb[6].mxu0  ;;  %v310_v2 = vld [vmem:[#allocation2 + $0x10] sm:$0xff]  ;;  %v316_v45 = vld [vmem:[#allocation2 + $0x40] sm:$0xff] }
  0xe5   :  { %288 = vst.msk [vmem:[#allocation2 + $0x60] sm:$0xff] %vm40_vm1, %v271_v53  ;;  %v272_v62 = vadd.f32 %v247_v59, %v86_v50  ;;  %282 = vst.msk [vmem:[#allocation2 + $0x30] sm:$0xff] %vm40_vm1, %v265_v55  ;;  %v266_v63 = vadd.f32 %v2559_v61, %v80_v52  ;;  %v215_v0 = vpop.f32.mrb[7].mxu0  ;;  %v308_v3 = vld [vmem:[#allocation2] sm:$0xff]  ;;  %v319_v49 = vld [vmem:[#allocation2 + $0x58] sm:$0xff] }
  0xe6   :  { %291 = vst.msk [vmem:[#allocation2 + $0x78] sm:$0xff] %vm40_vm1, %v274_v58  ;;  %280 = vst.msk [vmem:[#allocation2 + $0x20] sm:$0xff] %vm40_vm1, %v263_v60  ;;  %v264_v1 = vadd.f32 %v215_v0, %v78_v57  ;;  %v311_v5 = vld [vmem:[#allocation2 + $0x18] sm:$0xff]  ;;  %v317_v55 = vld [vmem:[#allocation2 + $0x48] sm:$0xff] }
  0xe7   :  { %289 = vst.msk [vmem:[#allocation2 + $0x68] sm:$0xff] %vm40_vm1, %v272_v62  ;;  %283 = vst.msk [vmem:[#allocation2 + $0x38] sm:$0xff] %vm40_vm1, %v266_v63  ;;  %v309_v8 = vld [vmem:[#allocation2 + $0x8] sm:$0xff] }
  0xe8   :  { %281 = vst.msk [vmem:[#allocation2 + $0x28] sm:$0xff] %vm40_vm1, %v264_v1 }
  0xe9   :  { %v2572_v4 = vpop.f32.mrb[8].mxu1 }
  0xea   :  { %v496_v6 = vadd.f32 %v2572_v4, %v310_v2  ;;  %v431_v7 = vpop.f32.mrb[9].mxu1 }
  0xeb   :  { %v494_v9 = vadd.f32 %v431_v7, %v308_v3  ;;  %v2573_v10 = vpop.f32.mrb[10].mxu1  ;;  %v2590_v11 = vpop.f32.mrb[8].mxu0  ;;  %v322_v2 = vld [vmem:[#allocation2 + $0x70] sm:$0xff] }
  0xec   :  { %512 = vst.msk [vmem:[#allocation2 + $0x10] sm:$0xff] %vm40_vm1, %v496_v6  ;;  %v497_v12 = vadd.f32 %v2573_v10, %v311_v5  ;;  %v434_v13 = vpop.f32.mrb[11].mxu1  ;;  %v665_v14 = vpop.f32.mrb[9].mxu0  ;;  %v314_v18 = vld [vmem:[#allocation2 + $0x30] sm:$0xff]  ;;  %v320_v5 = vld [vmem:[#allocation2 + $0x60] sm:$0xff] }
  0xed   :  { %510 = vst.msk [vmem:[#allocation2] sm:$0xff] %vm40_vm1, %v494_v9  ;;  %v495_v15 = vadd.f32 %v434_v13, %v309_v8  ;;  %v2591_v16 = vpop.f32.mrb[10].mxu0  ;;  %v312_v19 = vld [vmem:[#allocation2 + $0x20] sm:$0xff]  ;;  %v323_v9 = vld [vmem:[#allocation2 + $0x78] sm:$0xff] }
  0xee   :  { %513 = vst.msk [vmem:[#allocation2 + $0x18] sm:$0xff] %vm40_vm1, %v497_v12  ;;  %v668_v17 = vpop.f32.mrb[11].mxu0  ;;  %v315_v21 = vld [vmem:[#allocation2 + $0x38] sm:$0xff] }
  0xef   :  { %511 = vst.msk [vmem:[#allocation2 + $0x8] sm:$0xff] %vm40_vm1, %v495_v15  ;;  %v313_v24 = vld [vmem:[#allocation2 + $0x28] sm:$0xff] }
  0xf0   :  { %v321_v15 = vld [vmem:[#allocation2 + $0x68] sm:$0xff] }
  0xf1   :  { %v2576_v20 = vpop.f32.mrb[12].mxu1 }
  0xf2   :  { %v500_v22 = vadd.f32 %v2576_v20, %v314_v18  ;;  %v447_v23 = vpop.f32.mrb[13].mxu1 }
  0xf3   :  { %v544_v25 = vld [vmem:[#allocation2 + $0x10] sm:$0xff]  ;;  %v498_v26 = vadd.f32 %v447_v23, %v312_v19  ;;  %v2577_v27 = vpop.f32.mrb[14].mxu1  ;;  %v2594_v28 = vpop.f32.mrb[12].mxu0 }
  0xf4   :  { %516 = vst.msk [vmem:[#allocation2 + $0x30] sm:$0xff] %vm40_vm1, %v500_v22  ;;  %v730_v29 = vadd.f32 %v2590_v11, %v544_v25  ;;  %v542_v30 = vld [vmem:[#allocation2] sm:$0xff]  ;;  %v501_v31 = vadd.f32 %v2577_v27, %v315_v21  ;;  %v450_v32 = vpop.f32.mrb[15].mxu1  ;;  %v681_v33 = vpop.f32.mrb[13].mxu0 }
  0xf5   :  { %514 = vst.msk [vmem:[#allocation2 + $0x20] sm:$0xff] %vm40_vm1, %v498_v26  ;;  %v728_v34 = vadd.f32 %v665_v14, %v542_v30  ;;  %v545_v35 = vld [vmem:[#allocation2 + $0x18] sm:$0xff]  ;;  %v499_v36 = vadd.f32 %v450_v32, %v313_v24  ;;  %v2595_v37 = vpop.f32.mrb[14].mxu0 }
  0xf6   :  { %746 = vst.msk [vmem:[#allocation2 + $0x10] sm:$0xff] %vm40_vm1, %v730_v29  ;;  %517 = vst.msk [vmem:[#allocation2 + $0x38] sm:$0xff] %vm40_vm1, %v501_v31  ;;  %v731_v38 = vadd.f32 %v2591_v16, %v545_v35  ;;  %v543_v39 = vld [vmem:[#allocation2 + $0x8] sm:$0xff]  ;;  %v684_v40 = vpop.f32.mrb[15].mxu0 }
  0xf7   :  { %744 = vst.msk [vmem:[#allocation2] sm:$0xff] %vm40_vm1, %v728_v34  ;;  %515 = vst.msk [vmem:[#allocation2 + $0x28] sm:$0xff] %vm40_vm1, %v499_v36  ;;  %v729_v41 = vadd.f32 %v668_v17, %v543_v39 }
  0xf8   :  { %747 = vst.msk [vmem:[#allocation2 + $0x18] sm:$0xff] %vm40_vm1, %v731_v38 }
  0xf9   :  { %745 = vst.msk [vmem:[#allocation2 + $0x8] sm:$0xff] %vm40_vm1, %v729_v41  ;;  %v2580_v43 = vpop.f32.mrb[16].mxu1 }
  0xfa   :  { %v504_v44 = vadd.f32 %v2580_v43, %v318_v42  ;;  %v463_v46 = vpop.f32.mrb[17].mxu1 }
  0xfb   :  { %v548_v47 = vld [vmem:[#allocation2 + $0x30] sm:$0xff]  ;;  %v502_v48 = vadd.f32 %v463_v46, %v316_v45  ;;  %v2581_v50 = vpop.f32.mrb[18].mxu1  ;;  %v2598_v51 = vpop.f32.mrb[16].mxu0 }
  0xfc   :  { %520 = vst.msk [vmem:[#allocation2 + $0x50] sm:$0xff] %vm40_vm1, %v504_v44  ;;  %v734_v52 = vadd.f32 %v2594_v28, %v548_v47  ;;  %v546_v53 = vld [vmem:[#allocation2 + $0x20] sm:$0xff]  ;;  %v505_v54 = vadd.f32 %v2581_v50, %v319_v49  ;;  %v466_v56 = vpop.f32.mrb[19].mxu1  ;;  %v697_v57 = vpop.f32.mrb[17].mxu0 }
  0xfd   :  { %518 = vst.msk [vmem:[#allocation2 + $0x40] sm:$0xff] %vm40_vm1, %v502_v48  ;;  %v732_v58 = vadd.f32 %v681_v33, %v546_v53  ;;  %v549_v59 = vld [vmem:[#allocation2 + $0x38] sm:$0xff]  ;;  %v503_v60 = vadd.f32 %v466_v56, %v317_v55  ;;  %v2599_v61 = vpop.f32.mrb[18].mxu0  ;;  %v778_v26 = vld [vmem:[#allocation2 + $0x10] sm:$0xff] }
  0xfe   :  { %750 = vst.msk [vmem:[#allocation2 + $0x30] sm:$0xff] %vm40_vm1, %v734_v52  ;;  %521 = vst.msk [vmem:[#allocation2 + $0x58] sm:$0xff] %vm40_vm1, %v505_v54  ;;  %v735_v62 = vadd.f32 %v2595_v37, %v549_v59  ;;  %v547_v63 = vld [vmem:[#allocation2 + $0x28] sm:$0xff]  ;;  %v700_v0 = vpop.f32.mrb[19].mxu0  ;;  %v776_v29 = vld [vmem:[#allocation2] sm:$0xff] }
  0xff   :  { %748 = vst.msk [vmem:[#allocation2 + $0x20] sm:$0xff] %vm40_vm1, %v732_v58  ;;  %519 = vst.msk [vmem:[#allocation2 + $0x48] sm:$0xff] %vm40_vm1, %v503_v60  ;;  %v733_v1 = vadd.f32 %v684_v40, %v547_v63  ;;  %v779_v33 = vld [vmem:[#allocation2 + $0x18] sm:$0xff] }
 0x100   :  { %751 = vst.msk [vmem:[#allocation2 + $0x38] sm:$0xff] %vm40_vm1, %v735_v62  ;;  %v777_v39 = vld [vmem:[#allocation2 + $0x8] sm:$0xff] }
 0x101   :  { %749 = vst.msk [vmem:[#allocation2 + $0x28] sm:$0xff] %vm40_vm1, %v733_v1  ;;  %v2584_v3 = vpop.f32.mrb[20].mxu1 }
 0x102   :  { %v508_v4 = vadd.f32 %v2584_v3, %v322_v2  ;;  %v479_v6 = vpop.f32.mrb[21].mxu1 }
 0x103   :  { %v552_v7 = vld [vmem:[#allocation2 + $0x50] sm:$0xff]  ;;  %v506_v8 = vadd.f32 %v479_v6, %v320_v5  ;;  %v2585_v10 = vpop.f32.mrb[22].mxu1  ;;  %v2602_v11 = vpop.f32.mrb[20].mxu0 }
 0x104   :  { %524 = vst.msk [vmem:[#allocation2 + $0x70] sm:$0xff] %vm40_vm1, %v508_v4  ;;  %v738_v12 = vadd.f32 %v2598_v51, %v552_v7  ;;  %v550_v13 = vld [vmem:[#allocation2 + $0x40] sm:$0xff]  ;;  %v509_v14 = vadd.f32 %v2585_v10, %v323_v9  ;;  %v482_v16 = vpop.f32.mrb[23].mxu1  ;;  %v713_v17 = vpop.f32.mrb[21].mxu0 }
 0x105   :  { %522 = vst.msk [vmem:[#allocation2 + $0x60] sm:$0xff] %vm40_vm1, %v506_v8  ;;  %v736_v18 = vadd.f32 %v697_v57, %v550_v13  ;;  %v553_v19 = vld [vmem:[#allocation2 + $0x58] sm:$0xff]  ;;  %v507_v20 = vadd.f32 %v482_v16, %v321_v15  ;;  %v2603_v21 = vpop.f32.mrb[22].mxu0  ;;  %v782_v50 = vld [vmem:[#allocation2 + $0x30] sm:$0xff] }
 0x106   :  { %754 = vst.msk [vmem:[#allocation2 + $0x50] sm:$0xff] %vm40_vm1, %v738_v12  ;;  %525 = vst.msk [vmem:[#allocation2 + $0x78] sm:$0xff] %vm40_vm1, %v509_v14  ;;  %v739_v22 = vadd.f32 %v2599_v61, %v553_v19  ;;  %v551_v23 = vld [vmem:[#allocation2 + $0x48] sm:$0xff]  ;;  %v716_v24 = vpop.f32.mrb[23].mxu0  ;;  %v780_v53 = vld [vmem:[#allocation2 + $0x20] sm:$0xff] }
 0x107   :  { %752 = vst.msk [vmem:[#allocation2 + $0x40] sm:$0xff] %vm40_vm1, %v736_v18  ;;  %523 = vst.msk [vmem:[#allocation2 + $0x68] sm:$0xff] %vm40_vm1, %v507_v20  ;;  %v737_v25 = vadd.f32 %v700_v0, %v551_v23  ;;  %v783_v57 = vld [vmem:[#allocation2 + $0x38] sm:$0xff] }
 0x108   :  { %755 = vst.msk [vmem:[#allocation2 + $0x58] sm:$0xff] %vm40_vm1, %v739_v22  ;;  %v781_v63 = vld [vmem:[#allocation2 + $0x28] sm:$0xff] }
 0x109   :  { %753 = vst.msk [vmem:[#allocation2 + $0x48] sm:$0xff] %vm40_vm1, %v737_v25  ;;  %v2608_v27 = vpop.f32.mrb[24].mxu1 }
 0x10a   :  { %v964_v28 = vadd.f32 %v2608_v27, %v778_v26  ;;  %v899_v30 = vpop.f32.mrb[25].mxu1 }
 0x10b   :  { %v556_v31 = vld [vmem:[#allocation2 + $0x70] sm:$0xff]  ;;  %v962_v32 = vadd.f32 %v899_v30, %v776_v29  ;;  %v2609_v34 = vpop.f32.mrb[26].mxu1  ;;  %v2626_v35 = vpop.f32.mrb[24].mxu0 }
 0x10c   :  { %v742_v36 = vadd.f32 %v2602_v11, %v556_v31  ;;  %980 = vst.msk [vmem:[#allocation2 + $0x10] sm:$0xff] %vm40_vm1, %v964_v28  ;;  %v554_v37 = vld [vmem:[#allocation2 + $0x60] sm:$0xff]  ;;  %v965_v38 = vadd.f32 %v2609_v34, %v779_v33  ;;  %v902_v40 = vpop.f32.mrb[27].mxu1  ;;  %v1133_v41 = vpop.f32.mrb[25].mxu0 }
 0x10d   :  { %v740_v42 = vadd.f32 %v713_v17, %v554_v37  ;;  %978 = vst.msk [vmem:[#allocation2] sm:$0xff] %vm40_vm1, %v962_v32  ;;  %v557_v43 = vld [vmem:[#allocation2 + $0x78] sm:$0xff]  ;;  %v963_v44 = vadd.f32 %v902_v40, %v777_v39  ;;  %v2627_v45 = vpop.f32.mrb[26].mxu0  ;;  %v786_v10 = vld [vmem:[#allocation2 + $0x50] sm:$0xff] }
 0x10e   :  { %758 = vst.msk [vmem:[#allocation2 + $0x70] sm:$0xff] %vm40_vm1, %v742_v36  ;;  %v743_v46 = vadd.f32 %v2603_v21, %v557_v43  ;;  %981 = vst.msk [vmem:[#allocation2 + $0x18] sm:$0xff] %vm40_vm1, %v965_v38  ;;  %v555_v47 = vld [vmem:[#allocation2 + $0x68] sm:$0xff]  ;;  %v1136_v48 = vpop.f32.mrb[27].mxu0  ;;  %v784_v13 = vld [vmem:[#allocation2 + $0x40] sm:$0xff] }
 0x10f   :  { %756 = vst.msk [vmem:[#allocation2 + $0x60] sm:$0xff] %vm40_vm1, %v740_v42  ;;  %v741_v49 = vadd.f32 %v716_v24, %v555_v47  ;;  %979 = vst.msk [vmem:[#allocation2 + $0x8] sm:$0xff] %vm40_vm1, %v963_v44  ;;  %v787_v17 = vld [vmem:[#allocation2 + $0x58] sm:$0xff] }
 0x110   :  { %759 = vst.msk [vmem:[#allocation2 + $0x78] sm:$0xff] %vm40_vm1, %v743_v46  ;;  %v785_v23 = vld [vmem:[#allocation2 + $0x48] sm:$0xff] }
 0x111   :  { %757 = vst.msk [vmem:[#allocation2 + $0x68] sm:$0xff] %vm40_vm1, %v741_v49  ;;  %v2612_v51 = vpop.f32.mrb[28].mxu1 }
 0x112   :  { %v968_v52 = vadd.f32 %v2612_v51, %v782_v50  ;;  %v915_v54 = vpop.f32.mrb[29].mxu1 }
 0x113   :  { %v1012_v55 = vld [vmem:[#allocation2 + $0x10] sm:$0xff]  ;;  %v966_v56 = vadd.f32 %v915_v54, %v780_v53  ;;  %v2613_v58 = vpop.f32.mrb[30].mxu1  ;;  %v2630_v59 = vpop.f32.mrb[28].mxu0 }
 0x114   :  { %984 = vst.msk [vmem:[#allocation2 + $0x30] sm:$0xff] %vm40_vm1, %v968_v52  ;;  %v1198_v60 = vadd.f32 %v2626_v35, %v1012_v55  ;;  %v1010_v61 = vld [vmem:[#allocation2] sm:$0xff]  ;;  %v969_v62 = vadd.f32 %v2613_v58, %v783_v57  ;;  %v918_v0 = vpop.f32.mrb[31].mxu1  ;;  %v1149_v1 = vpop.f32.mrb[29].mxu0 }
 0x115   :  { %982 = vst.msk [vmem:[#allocation2 + $0x20] sm:$0xff] %vm40_vm1, %v966_v56  ;;  %v1196_v2 = vadd.f32 %v1133_v41, %v1010_v61  ;;  %v1013_v3 = vld [vmem:[#allocation2 + $0x18] sm:$0xff]  ;;  %v967_v4 = vadd.f32 %v918_v0, %v781_v63  ;;  %v2631_v5 = vpop.f32.mrb[30].mxu0  ;;  %v790_v34 = vld [vmem:[#allocation2 + $0x70] sm:$0xff] }
 0x116   :  { %1214 = vst.msk [vmem:[#allocation2 + $0x10] sm:$0xff] %vm40_vm1, %v1198_v60  ;;  %985 = vst.msk [vmem:[#allocation2 + $0x38] sm:$0xff] %vm40_vm1, %v969_v62  ;;  %v1199_v6 = vadd.f32 %v2627_v45, %v1013_v3  ;;  %v1011_v7 = vld [vmem:[#allocation2 + $0x8] sm:$0xff]  ;;  %v1152_v8 = vpop.f32.mrb[31].mxu0  ;;  %v788_v37 = vld [vmem:[#allocation2 + $0x60] sm:$0xff] }
 0x117   :  { %1212 = vst.msk [vmem:[#allocation2] sm:$0xff] %vm40_vm1, %v1196_v2  ;;  %983 = vst.msk [vmem:[#allocation2 + $0x28] sm:$0xff] %vm40_vm1, %v967_v4  ;;  %v1197_v9 = vadd.f32 %v1136_v48, %v1011_v7  ;;  %v791_v41 = vld [vmem:[#allocation2 + $0x78] sm:$0xff] }
 0x118   :  { %1215 = vst.msk [vmem:[#allocation2 + $0x18] sm:$0xff] %vm40_vm1, %v1199_v6  ;;  %v789_v47 = vld [vmem:[#allocation2 + $0x68] sm:$0xff] }
 0x119   :  { %1213 = vst.msk [vmem:[#allocation2 + $0x8] sm:$0xff] %vm40_vm1, %v1197_v9  ;;  %v2616_v11 = vpop.f32.mrb[32].mxu1 }
 0x11a   :  { %v972_v12 = vadd.f32 %v2616_v11, %v786_v10  ;;  %v931_v14 = vpop.f32.mrb[33].mxu1 }
 0x11b   :  { %v1016_v15 = vld [vmem:[#allocation2 + $0x30] sm:$0xff]  ;;  %v970_v16 = vadd.f32 %v931_v14, %v784_v13  ;;  %v2617_v18 = vpop.f32.mrb[34].mxu1  ;;  %v2634_v19 = vpop.f32.mrb[32].mxu0 }
 0x11c   :  { %988 = vst.msk [vmem:[#allocation2 + $0x50] sm:$0xff] %vm40_vm1, %v972_v12  ;;  %v1202_v20 = vadd.f32 %v2630_v59, %v1016_v15  ;;  %v1014_v21 = vld [vmem:[#allocation2 + $0x20] sm:$0xff]  ;;  %v973_v22 = vadd.f32 %v2617_v18, %v787_v17  ;;  %v934_v24 = vpop.f32.mrb[35].mxu1  ;;  %v1165_v25 = vpop.f32.mrb[33].mxu0 }
 0x11d   :  { %986 = vst.msk [vmem:[#allocation2 + $0x40] sm:$0xff] %vm40_vm1, %v970_v16  ;;  %v1200_v26 = vadd.f32 %v1149_v1, %v1014_v21  ;;  %v1017_v27 = vld [vmem:[#allocation2 + $0x38] sm:$0xff]  ;;  %v971_v28 = vadd.f32 %v934_v24, %v785_v23  ;;  %v2635_v29 = vpop.f32.mrb[34].mxu0  ;;  %v1246_v58 = vld [vmem:[#allocation2 + $0x10] sm:$0xff] }
 0x11e   :  { %1218 = vst.msk [vmem:[#allocation2 + $0x30] sm:$0xff] %vm40_vm1, %v1202_v20  ;;  %989 = vst.msk [vmem:[#allocation2 + $0x58] sm:$0xff] %vm40_vm1, %v973_v22  ;;  %v1203_v30 = vadd.f32 %v2631_v5, %v1017_v27  ;;  %v1015_v31 = vld [vmem:[#allocation2 + $0x28] sm:$0xff]  ;;  %v1168_v32 = vpop.f32.mrb[35].mxu0  ;;  %v1244_v61 = vld [vmem:[#allocation2] sm:$0xff] }
 0x11f   :  { %1216 = vst.msk [vmem:[#allocation2 + $0x20] sm:$0xff] %vm40_vm1, %v1200_v26  ;;  %987 = vst.msk [vmem:[#allocation2 + $0x48] sm:$0xff] %vm40_vm1, %v971_v28  ;;  %v1201_v33 = vadd.f32 %v1152_v8, %v1015_v31  ;;  %v1247_v1 = vld [vmem:[#allocation2 + $0x18] sm:$0xff] }
 0x120   :  { %1219 = vst.msk [vmem:[#allocation2 + $0x38] sm:$0xff] %vm40_vm1, %v1203_v30  ;;  %v1245_v7 = vld [vmem:[#allocation2 + $0x8] sm:$0xff] }
 0x121   :  { %1217 = vst.msk [vmem:[#allocation2 + $0x28] sm:$0xff] %vm40_vm1, %v1201_v33  ;;  %v2620_v35 = vpop.f32.mrb[36].mxu1 }
 0x122   :  { %v976_v36 = vadd.f32 %v2620_v35, %v790_v34  ;;  %v947_v38 = vpop.f32.mrb[37].mxu1 }
 0x123   :  { %v1020_v39 = vld [vmem:[#allocation2 + $0x50] sm:$0xff]  ;;  %v974_v40 = vadd.f32 %v947_v38, %v788_v37  ;;  %v2621_v42 = vpop.f32.mrb[38].mxu1  ;;  %v2638_v43 = vpop.f32.mrb[36].mxu0 }
 0x124   :  { %992 = vst.msk [vmem:[#allocation2 + $0x70] sm:$0xff] %vm40_vm1, %v976_v36  ;;  %v1206_v44 = vadd.f32 %v2634_v19, %v1020_v39  ;;  %v1018_v45 = vld [vmem:[#allocation2 + $0x40] sm:$0xff]  ;;  %v977_v46 = vadd.f32 %v2621_v42, %v791_v41  ;;  %v950_v48 = vpop.f32.mrb[39].mxu1  ;;  %v1181_v49 = vpop.f32.mrb[37].mxu0 }
 0x125   :  { %990 = vst.msk [vmem:[#allocation2 + $0x60] sm:$0xff] %vm40_vm1, %v974_v40  ;;  %v1204_v50 = vadd.f32 %v1165_v25, %v1018_v45  ;;  %v1021_v51 = vld [vmem:[#allocation2 + $0x58] sm:$0xff]  ;;  %v975_v52 = vadd.f32 %v950_v48, %v789_v47  ;;  %v2639_v53 = vpop.f32.mrb[38].mxu0  ;;  %v1250_v18 = vld [vmem:[#allocation2 + $0x30] sm:$0xff] }
 0x126   :  { %1222 = vst.msk [vmem:[#allocation2 + $0x50] sm:$0xff] %vm40_vm1, %v1206_v44  ;;  %993 = vst.msk [vmem:[#allocation2 + $0x78] sm:$0xff] %vm40_vm1, %v977_v46  ;;  %v1207_v54 = vadd.f32 %v2635_v29, %v1021_v51  ;;  %v1019_v55 = vld [vmem:[#allocation2 + $0x48] sm:$0xff]  ;;  %v1184_v56 = vpop.f32.mrb[39].mxu0  ;;  %v1248_v21 = vld [vmem:[#allocation2 + $0x20] sm:$0xff] }
 0x127   :  { %1220 = vst.msk [vmem:[#allocation2 + $0x40] sm:$0xff] %vm40_vm1, %v1204_v50  ;;  %991 = vst.msk [vmem:[#allocation2 + $0x68] sm:$0xff] %vm40_vm1, %v975_v52  ;;  %v1205_v57 = vadd.f32 %v1168_v32, %v1019_v55  ;;  %v1251_v25 = vld [vmem:[#allocation2 + $0x38] sm:$0xff] }
 0x128   :  { %1223 = vst.msk [vmem:[#allocation2 + $0x58] sm:$0xff] %vm40_vm1, %v1207_v54  ;;  %v1249_v31 = vld [vmem:[#allocation2 + $0x28] sm:$0xff] }
 0x129   :  { %1221 = vst.msk [vmem:[#allocation2 + $0x48] sm:$0xff] %vm40_vm1, %v1205_v57  ;;  %v2644_v59 = vpop.f32.mrb[40].mxu1 }
 0x12a   :  { %v1432_v60 = vadd.f32 %v2644_v59, %v1246_v58  ;;  %v1367_v62 = vpop.f32.mrb[41].mxu1 }
 0x12b   :  { %v1024_v63 = vld [vmem:[#allocation2 + $0x70] sm:$0xff]  ;;  %v1430_v0 = vadd.f32 %v1367_v62, %v1244_v61  ;;  %v2645_v2 = vpop.f32.mrb[42].mxu1  ;;  %v2662_v3 = vpop.f32.mrb[40].mxu0 }
 0x12c   :  { %v1210_v4 = vadd.f32 %v2638_v43, %v1024_v63  ;;  %1448 = vst.msk [vmem:[#allocation2 + $0x10] sm:$0xff] %vm40_vm1, %v1432_v60  ;;  %v1022_v5 = vld [vmem:[#allocation2 + $0x60] sm:$0xff]  ;;  %v1433_v6 = vadd.f32 %v2645_v2, %v1247_v1  ;;  %v1370_v8 = vpop.f32.mrb[43].mxu1  ;;  %v1601_v9 = vpop.f32.mrb[41].mxu0 }
 0x12d   :  { %v1208_v10 = vadd.f32 %v1181_v49, %v1022_v5  ;;  %1446 = vst.msk [vmem:[#allocation2] sm:$0xff] %vm40_vm1, %v1430_v0  ;;  %v1025_v11 = vld [vmem:[#allocation2 + $0x78] sm:$0xff]  ;;  %v1431_v12 = vadd.f32 %v1370_v8, %v1245_v7  ;;  %v2663_v13 = vpop.f32.mrb[42].mxu0  ;;  %v1254_v42 = vld [vmem:[#allocation2 + $0x50] sm:$0xff] }
 0x12e   :  { %1226 = vst.msk [vmem:[#allocation2 + $0x70] sm:$0xff] %vm40_vm1, %v1210_v4  ;;  %v1211_v14 = vadd.f32 %v2639_v53, %v1025_v11  ;;  %1449 = vst.msk [vmem:[#allocation2 + $0x18] sm:$0xff] %vm40_vm1, %v1433_v6  ;;  %v1023_v15 = vld [vmem:[#allocation2 + $0x68] sm:$0xff]  ;;  %v1604_v16 = vpop.f32.mrb[43].mxu0  ;;  %v1252_v45 = vld [vmem:[#allocation2 + $0x40] sm:$0xff] }
 0x12f   :  { %1224 = vst.msk [vmem:[#allocation2 + $0x60] sm:$0xff] %vm40_vm1, %v1208_v10  ;;  %v1209_v17 = vadd.f32 %v1184_v56, %v1023_v15  ;;  %1447 = vst.msk [vmem:[#allocation2 + $0x8] sm:$0xff] %vm40_vm1, %v1431_v12  ;;  %v1255_v49 = vld [vmem:[#allocation2 + $0x58] sm:$0xff] }
 0x130   :  { %1227 = vst.msk [vmem:[#allocation2 + $0x78] sm:$0xff] %vm40_vm1, %v1211_v14  ;;  %v1253_v55 = vld [vmem:[#allocation2 + $0x48] sm:$0xff] }
 0x131   :  { %1225 = vst.msk [vmem:[#allocation2 + $0x68] sm:$0xff] %vm40_vm1, %v1209_v17  ;;  %v2648_v19 = vpop.f32.mrb[44].mxu1 }
 0x132   :  { %v1436_v20 = vadd.f32 %v2648_v19, %v1250_v18  ;;  %v1383_v22 = vpop.f32.mrb[45].mxu1 }
 0x133   :  { %v1480_v23 = vld [vmem:[#allocation2 + $0x10] sm:$0xff]  ;;  %v1434_v24 = vadd.f32 %v1383_v22, %v1248_v21  ;;  %v2649_v26 = vpop.f32.mrb[46].mxu1  ;;  %v2666_v27 = vpop.f32.mrb[44].mxu0 }
 0x134   :  { %1452 = vst.msk [vmem:[#allocation2 + $0x30] sm:$0xff] %vm40_vm1, %v1436_v20  ;;  %v1666_v28 = vadd.f32 %v2662_v3, %v1480_v23  ;;  %v1478_v29 = vld [vmem:[#allocation2] sm:$0xff]  ;;  %v1437_v30 = vadd.f32 %v2649_v26, %v1251_v25  ;;  %v1386_v32 = vpop.f32.mrb[47].mxu1  ;;  %v1617_v33 = vpop.f32.mrb[45].mxu0 }
 0x135   :  { %1450 = vst.msk [vmem:[#allocation2 + $0x20] sm:$0xff] %vm40_vm1, %v1434_v24  ;;  %v1664_v34 = vadd.f32 %v1601_v9, %v1478_v29  ;;  %v1481_v35 = vld [vmem:[#allocation2 + $0x18] sm:$0xff]  ;;  %v1435_v36 = vadd.f32 %v1386_v32, %v1249_v31  ;;  %v2667_v37 = vpop.f32.mrb[46].mxu0  ;;  %v1258_v2 = vld [vmem:[#allocation2 + $0x70] sm:$0xff] }
 0x136   :  { %1682 = vst.msk [vmem:[#allocation2 + $0x10] sm:$0xff] %vm40_vm1, %v1666_v28  ;;  %1453 = vst.msk [vmem:[#allocation2 + $0x38] sm:$0xff] %vm40_vm1, %v1437_v30  ;;  %v1667_v38 = vadd.f32 %v2663_v13, %v1481_v35  ;;  %v1479_v39 = vld [vmem:[#allocation2 + $0x8] sm:$0xff]  ;;  %v1620_v40 = vpop.f32.mrb[47].mxu0  ;;  %v1256_v5 = vld [vmem:[#allocation2 + $0x60] sm:$0xff] }
 0x137   :  { %1680 = vst.msk [vmem:[#allocation2] sm:$0xff] %vm40_vm1, %v1664_v34  ;;  %1451 = vst.msk [vmem:[#allocation2 + $0x28] sm:$0xff] %vm40_vm1, %v1435_v36  ;;  %v1665_v41 = vadd.f32 %v1604_v16, %v1479_v39  ;;  %v1259_v9 = vld [vmem:[#allocation2 + $0x78] sm:$0xff] }
 0x138   :  { %1683 = vst.msk [vmem:[#allocation2 + $0x18] sm:$0xff] %vm40_vm1, %v1667_v38  ;;  %v1257_v15 = vld [vmem:[#allocation2 + $0x68] sm:$0xff] }
 0x139   :  { %1681 = vst.msk [vmem:[#allocation2 + $0x8] sm:$0xff] %vm40_vm1, %v1665_v41  ;;  %v2652_v43 = vpop.f32.mrb[48].mxu1 }
 0x13a   :  { %v1440_v44 = vadd.f32 %v2652_v43, %v1254_v42  ;;  %v1399_v46 = vpop.f32.mrb[49].mxu1 }
 0x13b   :  { %v1484_v47 = vld [vmem:[#allocation2 + $0x30] sm:$0xff]  ;;  %v1438_v48 = vadd.f32 %v1399_v46, %v1252_v45  ;;  %v2653_v50 = vpop.f32.mrb[50].mxu1  ;;  %v2670_v51 = vpop.f32.mrb[48].mxu0 }
 0x13c   :  { %1456 = vst.msk [vmem:[#allocation2 + $0x50] sm:$0xff] %vm40_vm1, %v1440_v44  ;;  %v1670_v52 = vadd.f32 %v2666_v27, %v1484_v47  ;;  %v1482_v53 = vld [vmem:[#allocation2 + $0x20] sm:$0xff]  ;;  %v1441_v54 = vadd.f32 %v2653_v50, %v1255_v49  ;;  %v1402_v56 = vpop.f32.mrb[51].mxu1  ;;  %v1633_v57 = vpop.f32.mrb[49].mxu0 }
 0x13d   :  { %1454 = vst.msk [vmem:[#allocation2 + $0x40] sm:$0xff] %vm40_vm1, %v1438_v48  ;;  %v1668_v58 = vadd.f32 %v1617_v33, %v1482_v53  ;;  %v1485_v59 = vld [vmem:[#allocation2 + $0x38] sm:$0xff]  ;;  %v1439_v60 = vadd.f32 %v1402_v56, %v1253_v55  ;;  %v2671_v61 = vpop.f32.mrb[50].mxu0  ;;  %v1714_v26 = vld [vmem:[#allocation2 + $0x10] sm:$0xff] }
 0x13e   :  { %1686 = vst.msk [vmem:[#allocation2 + $0x30] sm:$0xff] %vm40_vm1, %v1670_v52  ;;  %1457 = vst.msk [vmem:[#allocation2 + $0x58] sm:$0xff] %vm40_vm1, %v1441_v54  ;;  %v1671_v62 = vadd.f32 %v2667_v37, %v1485_v59  ;;  %v1483_v63 = vld [vmem:[#allocation2 + $0x28] sm:$0xff]  ;;  %v1636_v0 = vpop.f32.mrb[51].mxu0  ;;  %v1712_v29 = vld [vmem:[#allocation2] sm:$0xff] }
 0x13f   :  { %1684 = vst.msk [vmem:[#allocation2 + $0x20] sm:$0xff] %vm40_vm1, %v1668_v58  ;;  %1455 = vst.msk [vmem:[#allocation2 + $0x48] sm:$0xff] %vm40_vm1, %v1439_v60  ;;  %v1669_v1 = vadd.f32 %v1620_v40, %v1483_v63  ;;  %v1715_v33 = vld [vmem:[#allocation2 + $0x18] sm:$0xff] }
 0x140   :  { %1687 = vst.msk [vmem:[#allocation2 + $0x38] sm:$0xff] %vm40_vm1, %v1671_v62  ;;  %v1713_v39 = vld [vmem:[#allocation2 + $0x8] sm:$0xff] }
 0x141   :  { %1685 = vst.msk [vmem:[#allocation2 + $0x28] sm:$0xff] %vm40_vm1, %v1669_v1  ;;  %v2656_v3 = vpop.f32.mrb[52].mxu1 }
 0x142   :  { %v1444_v4 = vadd.f32 %v2656_v3, %v1258_v2  ;;  %v1415_v6 = vpop.f32.mrb[53].mxu1 }
 0x143   :  { %v1488_v7 = vld [vmem:[#allocation2 + $0x50] sm:$0xff]  ;;  %v1442_v8 = vadd.f32 %v1415_v6, %v1256_v5  ;;  %v2657_v10 = vpop.f32.mrb[54].mxu1  ;;  %v2674_v11 = vpop.f32.mrb[52].mxu0 }
 0x144   :  { %1460 = vst.msk [vmem:[#allocation2 + $0x70] sm:$0xff] %vm40_vm1, %v1444_v4  ;;  %v1674_v12 = vadd.f32 %v2670_v51, %v1488_v7  ;;  %v1486_v13 = vld [vmem:[#allocation2 + $0x40] sm:$0xff]  ;;  %v1445_v14 = vadd.f32 %v2657_v10, %v1259_v9  ;;  %v1418_v16 = vpop.f32.mrb[55].mxu1  ;;  %v1649_v17 = vpop.f32.mrb[53].mxu0 }
 0x145   :  { %1458 = vst.msk [vmem:[#allocation2 + $0x60] sm:$0xff] %vm40_vm1, %v1442_v8  ;;  %v1672_v18 = vadd.f32 %v1633_v57, %v1486_v13  ;;  %v1489_v19 = vld [vmem:[#allocation2 + $0x58] sm:$0xff]  ;;  %v1443_v20 = vadd.f32 %v1418_v16, %v1257_v15  ;;  %v2675_v21 = vpop.f32.mrb[54].mxu0  ;;  %v1718_v50 = vld [vmem:[#allocation2 + $0x30] sm:$0xff] }
 0x146   :  { %1690 = vst.msk [vmem:[#allocation2 + $0x50] sm:$0xff] %vm40_vm1, %v1674_v12  ;;  %1461 = vst.msk [vmem:[#allocation2 + $0x78] sm:$0xff] %vm40_vm1, %v1445_v14  ;;  %v1675_v22 = vadd.f32 %v2671_v61, %v1489_v19  ;;  %v1487_v23 = vld [vmem:[#allocation2 + $0x48] sm:$0xff]  ;;  %v1652_v24 = vpop.f32.mrb[55].mxu0  ;;  %v1716_v53 = vld [vmem:[#allocation2 + $0x20] sm:$0xff] }
 0x147   :  { %1688 = vst.msk [vmem:[#allocation2 + $0x40] sm:$0xff] %vm40_vm1, %v1672_v18  ;;  %1459 = vst.msk [vmem:[#allocation2 + $0x68] sm:$0xff] %vm40_vm1, %v1443_v20  ;;  %v1673_v25 = vadd.f32 %v1636_v0, %v1487_v23  ;;  %v1719_v57 = vld [vmem:[#allocation2 + $0x38] sm:$0xff] }
 0x148   :  { %1691 = vst.msk [vmem:[#allocation2 + $0x58] sm:$0xff] %vm40_vm1, %v1675_v22  ;;  %v1717_v63 = vld [vmem:[#allocation2 + $0x28] sm:$0xff] }
 0x149   :  { %1689 = vst.msk [vmem:[#allocation2 + $0x48] sm:$0xff] %vm40_vm1, %v1673_v25  ;;  %v2680_v27 = vpop.f32.mrb[56].mxu1 }
 0x14a   :  { %v1900_v28 = vadd.f32 %v2680_v27, %v1714_v26  ;;  %v1835_v30 = vpop.f32.mrb[57].mxu1 }
 0x14b   :  { %v1492_v31 = vld [vmem:[#allocation2 + $0x70] sm:$0xff]  ;;  %v1898_v32 = vadd.f32 %v1835_v30, %v1712_v29  ;;  %v2681_v34 = vpop.f32.mrb[58].mxu1  ;;  %v2698_v35 = vpop.f32.mrb[56].mxu0 }
 0x14c   :  { %v1678_v36 = vadd.f32 %v2674_v11, %v1492_v31  ;;  %1916 = vst.msk [vmem:[#allocation2 + $0x10] sm:$0xff] %vm40_vm1, %v1900_v28  ;;  %v1490_v37 = vld [vmem:[#allocation2 + $0x60] sm:$0xff]  ;;  %v1901_v38 = vadd.f32 %v2681_v34, %v1715_v33  ;;  %v1838_v40 = vpop.f32.mrb[59].mxu1  ;;  %v2069_v41 = vpop.f32.mrb[57].mxu0 }
 0x14d   :  { %v1676_v42 = vadd.f32 %v1649_v17, %v1490_v37  ;;  %1914 = vst.msk [vmem:[#allocation2] sm:$0xff] %vm40_vm1, %v1898_v32  ;;  %v1493_v43 = vld [vmem:[#allocation2 + $0x78] sm:$0xff]  ;;  %v1899_v44 = vadd.f32 %v1838_v40, %v1713_v39  ;;  %v2699_v45 = vpop.f32.mrb[58].mxu0  ;;  %v1722_v10 = vld [vmem:[#allocation2 + $0x50] sm:$0xff] }
 0x14e   :  { %1694 = vst.msk [vmem:[#allocation2 + $0x70] sm:$0xff] %vm40_vm1, %v1678_v36  ;;  %v1679_v46 = vadd.f32 %v2675_v21, %v1493_v43  ;;  %1917 = vst.msk [vmem:[#allocation2 + $0x18] sm:$0xff] %vm40_vm1, %v1901_v38  ;;  %v1491_v47 = vld [vmem:[#allocation2 + $0x68] sm:$0xff]  ;;  %v2072_v48 = vpop.f32.mrb[59].mxu0  ;;  %v1720_v13 = vld [vmem:[#allocation2 + $0x40] sm:$0xff] }
 0x14f   :  { %1692 = vst.msk [vmem:[#allocation2 + $0x60] sm:$0xff] %vm40_vm1, %v1676_v42  ;;  %v1677_v49 = vadd.f32 %v1652_v24, %v1491_v47  ;;  %1915 = vst.msk [vmem:[#allocation2 + $0x8] sm:$0xff] %vm40_vm1, %v1899_v44  ;;  %v1723_v17 = vld [vmem:[#allocation2 + $0x58] sm:$0xff] }
 0x150   :  { %1695 = vst.msk [vmem:[#allocation2 + $0x78] sm:$0xff] %vm40_vm1, %v1679_v46  ;;  %v1721_v23 = vld [vmem:[#allocation2 + $0x48] sm:$0xff] }
 0x151   :  { %1693 = vst.msk [vmem:[#allocation2 + $0x68] sm:$0xff] %vm40_vm1, %v1677_v49  ;;  %v2684_v51 = vpop.f32.mrb[60].mxu1 }
 0x152   :  { %v1904_v52 = vadd.f32 %v2684_v51, %v1718_v50  ;;  %v1851_v54 = vpop.f32.mrb[61].mxu1 }
 0x153   :  { %v1948_v55 = vld [vmem:[#allocation2 + $0x10] sm:$0xff]  ;;  %v1902_v56 = vadd.f32 %v1851_v54, %v1716_v53  ;;  %v2685_v58 = vpop.f32.mrb[62].mxu1  ;;  %v2702_v59 = vpop.f32.mrb[60].mxu0 }
 0x154   :  { %1920 = vst.msk [vmem:[#allocation2 + $0x30] sm:$0xff] %vm40_vm1, %v1904_v52  ;;  %v2134_v60 = vadd.f32 %v2698_v35, %v1948_v55  ;;  %v1946_v61 = vld [vmem:[#allocation2] sm:$0xff]  ;;  %v1905_v62 = vadd.f32 %v2685_v58, %v1719_v57  ;;  %v1854_v0 = vpop.f32.mrb[63].mxu1  ;;  %v2085_v1 = vpop.f32.mrb[61].mxu0 }
 0x155   :  { %1918 = vst.msk [vmem:[#allocation2 + $0x20] sm:$0xff] %vm40_vm1, %v1902_v56  ;;  %v2132_v2 = vadd.f32 %v2069_v41, %v1946_v61  ;;  %v1949_v3 = vld [vmem:[#allocation2 + $0x18] sm:$0xff]  ;;  %v1903_v4 = vadd.f32 %v1854_v0, %v1717_v63  ;;  %v2703_v5 = vpop.f32.mrb[62].mxu0  ;;  %v1726_v42 = vld [vmem:[#allocation2 + $0x70] sm:$0xff] }
 0x156   :  { %2150 = vst.msk [vmem:[#allocation2 + $0x10] sm:$0xff] %vm40_vm1, %v2134_v60  ;;  %1921 = vst.msk [vmem:[#allocation2 + $0x38] sm:$0xff] %vm40_vm1, %v1905_v62  ;;  %v2135_v6 = vadd.f32 %v2699_v45, %v1949_v3  ;;  %v1947_v7 = vld [vmem:[#allocation2 + $0x8] sm:$0xff]  ;;  %v2088_v8 = vpop.f32.mrb[63].mxu0  ;;  %v1724_v45 = vld [vmem:[#allocation2 + $0x60] sm:$0xff] }
 0x157   :  { %2148 = vst.msk [vmem:[#allocation2] sm:$0xff] %vm40_vm1, %v2132_v2  ;;  %1919 = vst.msk [vmem:[#allocation2 + $0x28] sm:$0xff] %vm40_vm1, %v1903_v4  ;;  %v2133_v9 = vadd.f32 %v2072_v48, %v1947_v7  ;;  %v1727_v49 = vld [vmem:[#allocation2 + $0x78] sm:$0xff] }
 0x158   :  { %2151 = vst.msk [vmem:[#allocation2 + $0x18] sm:$0xff] %vm40_vm1, %v2135_v6  ;;  %v1725_v55 = vld [vmem:[#allocation2 + $0x68] sm:$0xff] }
 0x159   :  { %2149 = vst.msk [vmem:[#allocation2 + $0x8] sm:$0xff] %vm40_vm1, %v2133_v9  ;;  %v2688_v11 = vpop.f32.mrb[64].mxu1 }
 0x15a   :  { %v1908_v12 = vadd.f32 %v2688_v11, %v1722_v10  ;;  %v1867_v14 = vpop.f32.mrb[65].mxu1 }
 0x15b   :  { %v1952_v15 = vld [vmem:[#allocation2 + $0x30] sm:$0xff]  ;;  %v1906_v16 = vadd.f32 %v1867_v14, %v1720_v13  ;;  %v2689_v18 = vpop.f32.mrb[66].mxu1  ;;  %v2706_v19 = vpop.f32.mrb[64].mxu0 }
 0x15c   :  { %1924 = vst.msk [vmem:[#allocation2 + $0x50] sm:$0xff] %vm40_vm1, %v1908_v12  ;;  %v2138_v20 = vadd.f32 %v2702_v59, %v1952_v15  ;;  %v1950_v21 = vld [vmem:[#allocation2 + $0x20] sm:$0xff]  ;;  %v1909_v22 = vadd.f32 %v2689_v18, %v1723_v17  ;;  %v1870_v24 = vpop.f32.mrb[67].mxu1  ;;  %v2101_v25 = vpop.f32.mrb[65].mxu0 }
 0x15d   :  { %v2169_v26 = vld [vmem:[#allocation2 + $0x10] sm:$0xff]  ;;  %1922 = vst.msk [vmem:[#allocation2 + $0x40] sm:$0xff] %vm40_vm1, %v1906_v16  ;;  %v2136_v27 = vadd.f32 %v2085_v1, %v1950_v21  ;;  %v1953_v28 = vld [vmem:[#allocation2 + $0x38] sm:$0xff]  ;;  %v1907_v29 = vadd.f32 %v1870_v24, %v1721_v23  ;;  %v2707_v30 = vpop.f32.mrb[66].mxu0 }
 0x15e   :  { %v2455_v31 = vpack.c.bf16 %v2169_v26, %v2169_v26  ;;  %v2167_v32 = vld [vmem:[#allocation2] sm:$0xff]  ;;  %2154 = vst.msk [vmem:[#allocation2 + $0x30] sm:$0xff] %vm40_vm1, %v2138_v20  ;;  %1925 = vst.msk [vmem:[#allocation2 + $0x58] sm:$0xff] %vm40_vm1, %v1909_v22  ;;  %v2139_v33 = vadd.f32 %v2703_v5, %v1953_v28  ;;  %v1951_v34 = vld [vmem:[#allocation2 + $0x28] sm:$0xff]  ;;  %v2104_v35 = vpop.f32.mrb[67].mxu0 }
 0x15f   :  { %v2453_v36 = vpack.c.bf16 %v2167_v32, %v2167_v32  ;;  %v2170_v37 = vld [vmem:[#allocation2 + $0x18] sm:$0xff]  ;;  %2152 = vst.msk [vmem:[#allocation2 + $0x20] sm:$0xff] %vm40_vm1, %v2136_v27  ;;  %1923 = vst.msk [vmem:[#allocation2 + $0x48] sm:$0xff] %vm40_vm1, %v1907_v29  ;;  %v2137_v38 = vadd.f32 %v2088_v8, %v1951_v34 }
 0x160   :  { %2250 = vst.msk [vmem:[%s3401_s10 + $0x8] sm:$0xf] %vm2247_vm2, %v2455_v31  ;;  %v2456_v39 = vpack.c.bf16 %v2170_v37, %v2170_v37  ;;  %v2168_v40 = vld [vmem:[#allocation2 + $0x8] sm:$0xff] }
 0x161   :  { %2155 = vst.msk [vmem:[#allocation2 + $0x38] sm:$0xff] %vm40_vm1, %v2139_v33  ;;  %v2454_v41 = vpack.c.bf16 %v2168_v40, %v2168_v40  ;;  %2153 = vst.msk [vmem:[#allocation2 + $0x28] sm:$0xff] %vm40_vm1, %v2137_v38  ;;  %v2692_v43 = vpop.f32.mrb[68].mxu1 }
 0x162   :  { %2248 = vst.msk [vmem:[%s3401_s10] sm:$0xf] %vm2247_vm2, %v2453_v36  ;;  %2251 = vst.msk [vmem:[%s3401_s10 + $0xc] sm:$0xf] %vm2247_vm2, %v2456_v39  ;;  %v1912_v44 = vadd.f32 %v2692_v43, %v1726_v42  ;;  %v1883_v46 = vpop.f32.mrb[69].mxu1 }
 0x163   :  { %2249 = vst.msk [vmem:[%s3401_s10 + $0x4] sm:$0xf] %vm2247_vm2, %v2454_v41  ;;  %v1956_v47 = vld [vmem:[#allocation2 + $0x50] sm:$0xff]  ;;  %v1910_v48 = vadd.f32 %v1883_v46, %v1724_v45  ;;  %v2693_v50 = vpop.f32.mrb[70].mxu1  ;;  %v2710_v51 = vpop.f32.mrb[68].mxu0 }
 0x164   :  { %1928 = vst.msk [vmem:[#allocation2 + $0x70] sm:$0xff] %vm40_vm1, %v1912_v44  ;;  %v2142_v52 = vadd.f32 %v2706_v19, %v1956_v47  ;;  %v1954_v53 = vld [vmem:[#allocation2 + $0x40] sm:$0xff]  ;;  %v1913_v54 = vadd.f32 %v2693_v50, %v1727_v49  ;;  %v1886_v56 = vpop.f32.mrb[71].mxu1  ;;  %v2117_v57 = vpop.f32.mrb[69].mxu0 }
 0x165   :  { %v2173_v58 = vld [vmem:[#allocation2 + $0x30] sm:$0xff]  ;;  %1926 = vst.msk [vmem:[#allocation2 + $0x60] sm:$0xff] %vm40_vm1, %v1910_v48  ;;  %v2140_v59 = vadd.f32 %v2101_v25, %v1954_v53  ;;  %v1957_v60 = vld [vmem:[#allocation2 + $0x58] sm:$0xff]  ;;  %v1911_v61 = vadd.f32 %v1886_v56, %v1725_v55  ;;  %v2711_v62 = vpop.f32.mrb[70].mxu0 }
 0x166   :  { %v2459_v63 = vpack.c.bf16 %v2173_v58, %v2173_v58  ;;  %v2171_v0 = vld [vmem:[#allocation2 + $0x20] sm:$0xff]  ;;  %2158 = vst.msk [vmem:[#allocation2 + $0x50] sm:$0xff] %vm40_vm1, %v2142_v52  ;;  %1929 = vst.msk [vmem:[#allocation2 + $0x78] sm:$0xff] %vm40_vm1, %v1913_v54  ;;  %v2143_v1 = vadd.f32 %v2707_v30, %v1957_v60  ;;  %v1955_v2 = vld [vmem:[#allocation2 + $0x48] sm:$0xff]  ;;  %v2120_v3 = vpop.f32.mrb[71].mxu0 }
 0x167   :  { %v2457_v4 = vpack.c.bf16 %v2171_v0, %v2171_v0  ;;  %2156 = vst.msk [vmem:[#allocation2 + $0x40] sm:$0xff] %vm40_vm1, %v2140_v59  ;;  %1927 = vst.msk [vmem:[#allocation2 + $0x68] sm:$0xff] %vm40_vm1, %v1911_v61  ;;  %v2141_v6 = vadd.f32 %v2104_v35, %v1955_v2 }
 0x168   :  { %v2174_v5 = vld [vmem:[#allocation2 + $0x38] sm:$0xff]  ;;  %2254 = vst.msk [vmem:[%s3401_s10 + $0x18] sm:$0xf] %vm2247_vm2, %v2459_v63  ;;  %v2172_v8 = vld [vmem:[#allocation2 + $0x28] sm:$0xff] }
 0x169   :  { %v2460_v7 = vpack.c.bf16 %v2174_v5, %v2174_v5  ;;  %2159 = vst.msk [vmem:[#allocation2 + $0x58] sm:$0xff] %vm40_vm1, %v2143_v1  ;;  %v2458_v9 = vpack.c.bf16 %v2172_v8, %v2172_v8  ;;  %2157 = vst.msk [vmem:[#allocation2 + $0x48] sm:$0xff] %vm40_vm1, %v2141_v6 }
 0x16a   :  { %2252 = vst.msk [vmem:[%s3401_s10 + $0x10] sm:$0xf] %vm2247_vm2, %v2457_v4 }
 0x16b   :  { %2255 = vst.msk [vmem:[%s3401_s10 + $0x1c] sm:$0xf] %vm2247_vm2, %v2460_v7  ;;  %2253 = vst.msk [vmem:[%s3401_s10 + $0x14] sm:$0xf] %vm2247_vm2, %v2458_v9  ;;  %v1960_v10 = vld [vmem:[#allocation2 + $0x70] sm:$0xff] }
 0x16c   :  { %v2146_v11 = vadd.f32 %v2710_v51, %v1960_v10  ;;  %v1958_v12 = vld [vmem:[#allocation2 + $0x60] sm:$0xff] }
 0x16d   :  { %v2177_v13 = vld [vmem:[#allocation2 + $0x50] sm:$0xff]  ;;  %v2144_v14 = vadd.f32 %v2117_v57, %v1958_v12  ;;  %v1961_v15 = vld [vmem:[#allocation2 + $0x78] sm:$0xff] }
 0x16e   :  { %v2463_v16 = vpack.c.bf16 %v2177_v13, %v2177_v13  ;;  %v2175_v17 = vld [vmem:[#allocation2 + $0x40] sm:$0xff]  ;;  %2162 = vst.msk [vmem:[#allocation2 + $0x70] sm:$0xff] %vm40_vm1, %v2146_v11  ;;  %v2147_v18 = vadd.f32 %v2711_v62, %v1961_v15  ;;  %v1959_v19 = vld [vmem:[#allocation2 + $0x68] sm:$0xff] }
 0x16f   :  { %v2461_v20 = vpack.c.bf16 %v2175_v17, %v2175_v17  ;;  %2160 = vst.msk [vmem:[#allocation2 + $0x60] sm:$0xff] %vm40_vm1, %v2144_v14  ;;  %v2145_v22 = vadd.f32 %v2120_v3, %v1959_v19 }
 0x170   :  { %v2178_v21 = vld [vmem:[#allocation2 + $0x58] sm:$0xff]  ;;  %2258 = vst.msk [vmem:[%s3401_s10 + $0x28] sm:$0xf] %vm2247_vm2, %v2463_v16  ;;  %v2176_v24 = vld [vmem:[#allocation2 + $0x48] sm:$0xff] }
 0x171   :  { %v2464_v23 = vpack.c.bf16 %v2178_v21, %v2178_v21  ;;  %2163 = vst.msk [vmem:[#allocation2 + $0x78] sm:$0xff] %vm40_vm1, %v2147_v18  ;;  %v2462_v25 = vpack.c.bf16 %v2176_v24, %v2176_v24  ;;  %2161 = vst.msk [vmem:[#allocation2 + $0x68] sm:$0xff] %vm40_vm1, %v2145_v22 }
 0x172   :  { %2256 = vst.msk [vmem:[%s3401_s10 + $0x20] sm:$0xf] %vm2247_vm2, %v2461_v20 }
 0x173   :  { %2259 = vst.msk [vmem:[%s3401_s10 + $0x2c] sm:$0xf] %vm2247_vm2, %v2464_v23  ;;  %2257 = vst.msk [vmem:[%s3401_s10 + $0x24] sm:$0xf] %vm2247_vm2, %v2462_v25 }
 0x175   :  { %v2181_v26 = vld [vmem:[#allocation2 + $0x70] sm:$0xff] }
 0x176   :  { %v2467_v27 = vpack.c.bf16 %v2181_v26, %v2181_v26  ;;  %v2179_v28 = vld [vmem:[#allocation2 + $0x60] sm:$0xff] }
 0x177   :  { %v2465_v29 = vpack.c.bf16 %v2179_v28, %v2179_v28 }
 0x178   :  { %v2182_v30 = vld [vmem:[#allocation2 + $0x78] sm:$0xff]  ;;  %2262 = vst.msk [vmem:[%s3401_s10 + $0x38] sm:$0xf] %vm2247_vm2, %v2467_v27  ;;  %v2180_v32 = vld [vmem:[#allocation2 + $0x68] sm:$0xff] }
 0x179   :  { %v2468_v31 = vpack.c.bf16 %v2182_v30, %v2182_v30  ;;  %2260 = vst.msk [vmem:[%s3401_s10 + $0x30] sm:$0xf] %vm2247_vm2, %v2465_v29  ;;  %v2466_v33 = vpack.c.bf16 %v2180_v32, %v2180_v32 }
 0x17b   :  { %2263 = vst.msk [vmem:[%s3401_s10 + $0x3c] sm:$0xf] %vm2247_vm2, %v2468_v31  ;;  %2261 = vst.msk [vmem:[%s3401_s10 + $0x34] sm:$0xf] %vm2247_vm2, %v2466_v33 }

// kernel: densenet_forward.47
= control target key start
LH: loop header
LB: loop body
LE: loop exit
PB: predicated region body
PF: predicated region fallthrough
CT: control target
= control target key end

     0   :  { %vm14_vm0 = vcmask 122880   ;;  %v81_v0 = vmov 0.0   ;;  %vm26_vm1 = vcmask 130048   ;;  %s133_s0 = inlined_call_operand.vmem [shape: bf16[32,16], index: 0, kind: input, shape index: {}]   ;;  %s134_s1 = inlined_call_operand.vmem [shape: f32[1,16], index: 1, kind: output, shape index: {0}]   ;;  %s135_s2 = inlined_call_operand.vmem [shape: f32[1,16], index: 2, kind: output, shape index: {1}]  }
   0x1   :  { %15 = vst.msk [vmem:[%s134_s1] sm:$0x1] %vm14_vm0, %v81_v0  ;;  %v72_v1 = vld [vmem:[%s133_s0] sm:$0xff]   ;;  %v79_v2 = vld [vmem:[%s133_s0 + $0x8] sm:$0xff]   ;;  %16 = vst.msk [vmem:[%s135_s2] sm:$0x1] %vm14_vm0, %v81_v0 }
   0x2   :  { %v73_v3 = vunpack.c.l.bf16 %v72_v1  ;;  %v74_v4 = vunpack.c.h.bf16 %v72_v1  ;;  %v77_v5 = vunpack.c.l.bf16 %v79_v2  ;;  %v78_v6 = vunpack.c.h.bf16 %v79_v2 }
   0x4   :  { %v27_v7 = vsel %vm26_vm1, %v73_v3, 0.0  ;;  %v28_v8 = vsel %vm26_vm1, %v74_v4, 0.0  ;;  %v30_v9 = vsel %vm26_vm1, %v77_v5, 0.0  ;;  %v44_v11 = vmul.f32 %v73_v3, %v73_v3 }
   0x5   :  { %v29_v10 = vadd.f32 %v28_v8, %v27_v7  ;;  %v45_v12 = vmul.f32 %v74_v4, %v74_v4  ;;  %v46_v13 = vmul.f32 %v77_v5, %v77_v5  ;;  %v32_v14 = vsel %vm26_vm1, %v78_v6, 0.0 }
   0x6   :  { %v47_v15 = vmul.f32 %v78_v6, %v78_v6  ;;  %v48_v17 = vsel %vm26_vm1, %v44_v11, 0.0 }
   0x7   :  { %v31_v16 = vadd.f32 %v30_v9, %v29_v10  ;;  %v49_v18 = vsel %vm26_vm1, %v45_v12, 0.0  ;;  %v51_v19 = vsel %vm26_vm1, %v46_v13, 0.0 }
   0x8   :  { %v50_v20 = vadd.f32 %v49_v18, %v48_v17  ;;  %v53_v22 = vsel %vm26_vm1, %v47_v15, 0.0  ;;  %v25_v33 = vld [vmem:[%s134_s1] sm:$0x1] }
   0x9   :  { %v33_v21 = vadd.f32 %v32_v14, %v31_v16  ;;  %v43_v38 = vld [vmem:[%s135_s2] sm:$0x1] }
   0xa   :  { %v52_v23 = vadd.f32 %v51_v19, %v50_v20 }
   0xb   :  { %v34_v24 = vrot.slane %v33_v21, 4 }
   0xc   :  { %v54_v25 = vadd.f32 %v53_v22, %v52_v23 }
   0xd   :  { %v35_v26 = vadd.f32 %v34_v24, %v33_v21 }
   0xe   :  { %v55_v27 = vrot.slane %v54_v25, 4 }
   0xf   :  { %v36_v28 = vrot.slane %v35_v26, 2 }
  0x10   :  { %v56_v29 = vadd.f32 %v55_v27, %v54_v25 }
  0x11   :  { %v37_v30 = vadd.f32 %v36_v28, %v35_v26 }
  0x12   :  { %v57_v31 = vrot.slane %v56_v29, 2 }
  0x13   :  { %v38_v32 = vrot.slane %v37_v30, 1 }
  0x14   :  { %v58_v34 = vadd.f32 %v57_v31, %v56_v29 }
  0x15   :  { %v39_v35 = vadd.f32 %v38_v32, %v37_v30 }
  0x16   :  { %v59_v36 = vrot.slane %v58_v34, 1 }
  0x17   :  { %v40_v37 = vadd.f32 %v39_v35, %v25_v33 }
  0x18   :  { %v60_v39 = vadd.f32 %v59_v36, %v58_v34 }
  0x19   :  { %42 = vst.msk [vmem:[%s134_s1] sm:$0x1] %vm14_vm0, %v40_v37 }
  0x1a   :  { %v61_v40 = vadd.f32 %v60_v39, %v43_v38 }
  0x1c   :  { %62 = vst.msk [vmem:[%s135_s2] sm:$0x1] %vm14_vm0, %v61_v40 }

// kernel: densenet_forward.46
= control target key start
LH: loop header
LB: loop body
LE: loop exit
PB: predicated region body
PF: predicated region fallthrough
CT: control target
= control target key end

     0   :  { %vm81_vm0 = vcmask 125952   ;;  %s195_s0 = inlined_call_operand.vmem [shape: bf16[32,16], index: 0, kind: input, shape index: {}]   ;;  %s196_s1 = inlined_call_operand.vmem [shape: bf16[32,16], index: 1, kind: input, shape index: {}]   ;;  %s197_s2 = inlined_call_operand.vmem [shape: bf16[32,16], index: 2, kind: input, shape index: {}]   ;;  %s198_s3 = inlined_call_operand.vmem [shape: bf16[32,16], index: 3, kind: input, shape index: {}]   ;;  %s199_s4 = inlined_call_operand.vmem [shape: bf16[32,16], index: 4, kind: output, shape index: {}]  }
   0x1   :  { %v99_v0 = vld [vmem:[%s195_s0] sm:$0xff]   ;;  %v130_v8 = vld [vmem:[%s195_s0 + $0x8] sm:$0xff]  }
   0x2   :  { %v107_v1 = vld [vmem:[%s196_s1] sm:$0xff]   ;;  %v100_v3 = vunpack.c.l.bf16 %v99_v0  ;;  %v101_v7 = vunpack.c.h.bf16 %v99_v0  ;;  %v131_v9 = vld [vmem:[%s196_s1 + $0x8] sm:$0xff]   ;;  %v104_v16 = vunpack.c.l.bf16 %v130_v8  ;;  %v105_v21 = vunpack.c.h.bf16 %v130_v8 }
   0x3   :  { %v115_v2 = vld [vmem:[%s197_s2] sm:$0xff]   ;;  %v108_v4 = vunpack.c.l.bf16 %v107_v1  ;;  %v109_v11 = vunpack.c.h.bf16 %v107_v1  ;;  %v132_v13 = vld [vmem:[%s197_s2 + $0x8] sm:$0xff]   ;;  %v112_v17 = vunpack.c.l.bf16 %v131_v9  ;;  %v113_v22 = vunpack.c.h.bf16 %v131_v9 }
   0x4   :  { %v116_v5 = vunpack.c.l.bf16 %v115_v2  ;;  %v123_v6 = vld [vmem:[%s198_s3] sm:$0xff]   ;;  %v117_v12 = vunpack.c.h.bf16 %v115_v2  ;;  %v133_v14 = vld [vmem:[%s198_s3 + $0x8] sm:$0xff]   ;;  %v120_v18 = vunpack.c.l.bf16 %v132_v13  ;;  %v121_v26 = vunpack.c.h.bf16 %v132_v13 }
   0x5   :  { %v124_v10 = vunpack.c.l.bf16 %v123_v6  ;;  %v33_v15 = vadd.f32 %v108_v4, %v100_v3  ;;  %v34_v19 = vadd.f32 %v109_v11, %v101_v7  ;;  %v125_v20 = vunpack.c.h.bf16 %v123_v6 }
   0x6   :  { %v35_v24 = vadd.f32 %v112_v17, %v104_v16  ;;  %v128_v25 = vunpack.c.l.bf16 %v133_v14  ;;  %v36_v28 = vadd.f32 %v113_v22, %v105_v21  ;;  %v129_v29 = vunpack.c.h.bf16 %v133_v14 }
   0x7   :  { %v45_v23 = vadd.f32 %v116_v5, %v33_v15  ;;  %v46_v27 = vadd.f32 %v117_v12, %v34_v19 }
   0x8   :  { %v47_v31 = vadd.f32 %v120_v18, %v35_v24  ;;  %v48_v33 = vadd.f32 %v121_v26, %v36_v28 }
   0x9   :  { %v57_v30 = vadd.f32 %v124_v10, %v45_v23  ;;  %v58_v32 = vadd.f32 %v125_v20, %v46_v27 }
   0xa   :  { %v59_v35 = vadd.f32 %v128_v25, %v47_v31  ;;  %v60_v37 = vadd.f32 %v129_v29, %v48_v33 }
   0xb   :  { %v61_v34 = vmul.f32 0.25, %v57_v30  ;;  %v62_v36 = vmul.f32 0.25, %v58_v32 }
   0xc   :  { %v63_v39 = vmul.f32 0.25, %v59_v35  ;;  %v64_v41 = vmul.f32 0.25, %v60_v37 }
   0xd   :  { %v94_v38 = vpack.c.bf16 %v61_v34, %v61_v34  ;;  %v95_v40 = vpack.c.bf16 %v62_v36, %v62_v36 }
   0xe   :  { %v96_v42 = vpack.c.bf16 %v63_v39, %v63_v39  ;;  %v97_v43 = vpack.c.bf16 %v64_v41, %v64_v41 }
   0xf   :  { %82 = vst.msk [vmem:[%s199_s4] sm:$0xf] %vm81_vm0, %v94_v38  ;;  %83 = vst.msk [vmem:[%s199_s4 + $0x4] sm:$0xf] %vm81_vm0, %v95_v40 }
  0x10   :  { %84 = vst.msk [vmem:[%s199_s4 + $0x8] sm:$0xf] %vm81_vm0, %v96_v42  ;;  %85 = vst.msk [vmem:[%s199_s4 + $0xc] sm:$0xf] %vm81_vm0, %v97_v43 }

// kernel: densenet_forward.50
= control target key start
LH: loop header
LB: loop body
LE: loop exit
PB: predicated region body
PF: predicated region fallthrough
CT: control target
= control target key end

     0   :  { %vm64_vm0 = vcmask 125952   ;;  %s136_s0 = inlined_call_operand.vmem [shape: bf16[32,16], index: 0, kind: input, shape index: {}]   ;;  %s137_s1 = inlined_call_operand.vmem [shape: f32[1,16], index: 1, kind: input, shape index: {}]   ;;  %s138_s2 = inlined_call_operand.vmem [shape: f32[1,16], index: 2, kind: input, shape index: {}]   ;;  %s139_s3 = inlined_call_operand.vmem [shape: bf16[32,16], index: 3, kind: output, shape index: {}]  }
   0x1   :  { %v84_v0 = vld [vmem:[%s136_s0] sm:$0xff]   ;;  %v91_v4 = vld [vmem:[%s136_s0 + $0x8] sm:$0xff]  }
   0x2   :  { %v73_v1 = vld [vmem:[%s137_s1] ss:$0 sm:$0xff]  ;;  %v85_v2 = vunpack.c.l.bf16 %v84_v0  ;;  %v86_v3 = vunpack.c.h.bf16 %v84_v0  ;;  %v89_v6 = vunpack.c.l.bf16 %v91_v4  ;;  %v90_v7 = vunpack.c.h.bf16 %v91_v4 }
   0x3   :  { %v74_v5 = vld [vmem:[%s138_s2] ss:$0 sm:$0xff] }
   0x4   :  { %v29_v8 = vmul.f32 %v85_v2, %v73_v1  ;;  %v30_v9 = vmul.f32 %v86_v3, %v73_v1  ;;  %v31_v10 = vmul.f32 %v89_v6, %v73_v1  ;;  %v32_v11 = vmul.f32 %v90_v7, %v73_v1 }
   0x6   :  { %v40_v12 = vadd.f32 %v74_v5, %v29_v8  ;;  %v41_v13 = vadd.f32 %v74_v5, %v30_v9  ;;  %v42_v14 = vadd.f32 %v74_v5, %v31_v10  ;;  %v43_v15 = vadd.f32 %v74_v5, %v32_v11 }
   0x8   :  { %v44_v16 = vmax.f32 %v40_v12, 0.0  ;;  %v45_v17 = vmax.f32 %v41_v13, 0.0  ;;  %v46_v18 = vmax.f32 %v42_v14, 0.0  ;;  %v47_v19 = vmax.f32 %v43_v15, 0.0 }
   0xa   :  { %v79_v20 = vpack.c.bf16 %v44_v16, %v44_v16  ;;  %v80_v21 = vpack.c.bf16 %v45_v17, %v45_v17  ;;  %v81_v22 = vpack.c.bf16 %v46_v18, %v46_v18  ;;  %v82_v23 = vpack.c.bf16 %v47_v19, %v47_v19 }
   0xc   :  { %65 = vst.msk [vmem:[%s139_s3] sm:$0xf] %vm64_vm0, %v79_v20  ;;  %66 = vst.msk [vmem:[%s139_s3 + $0x4] sm:$0xf] %vm64_vm0, %v80_v21 }
   0xd   :  { %67 = vst.msk [vmem:[%s139_s3 + $0x8] sm:$0xf] %vm64_vm0, %v81_v22  ;;  %68 = vst.msk [vmem:[%s139_s3 + $0xc] sm:$0xf] %vm64_vm0, %v82_v23 }

// kernel: densenet_forward.48
= control target key start
LH: loop header
LB: loop body
LE: loop exit
PB: predicated region body
PF: predicated region fallthrough
CT: control target
= control target key end

     0   :  { %vm22_vm0 = vcmask 130048   ;;  %v218_v1 = vmov 0.0   ;;  %vm83_vm1 = vcmask 261120   ;;  %vm171_vm2 = vcmask 125952   ;;  %s282_s1 = inlined_call_operand.vmem [shape: bf16[1,32,16], index: 1, kind: input, shape index: {}]   ;;  %s283_s0 = inlined_call_operand.vmem [shape: bf16[32,32], index: 0, kind: input, shape index: {}]   ;;  %s284_s2 = inlined_call_operand.vmem [shape: f32[1,32], index: 2, kind: input, shape index: {}]   ;;  %s285_s3 = inlined_call_operand.vmem [shape: f32[1,32], index: 3, kind: input, shape index: {}]   ;;  %s286_s4 = inlined_call_operand.vmem [shape: bf16[32,16], index: 4, kind: output, shape index: {}]  }
   0x1   :  { %v216_v0 = vld [vmem:[%s282_s1] sm:$0xff]   ;;  %25 = vst.msk [vmem:[#allocation2 + $0x10] sm:$0xff] %vm22_vm0, %v218_v1  ;;  %23 = vst.msk [vmem:[#allocation2] sm:$0xff] %vm22_vm0, %v218_v1  ;;  %v217_v2 = vld [vmem:[%s282_s1 + $0x8] sm:$0xff]  }
   0x2   :  { %24 = vst.msk [vmem:[#allocation2 + $0x8] sm:$0xff] %vm22_vm0, %v218_v1  ;;  %26 = vst.msk [vmem:[#allocation2 + $0x18] sm:$0xff] %vm22_vm0, %v218_v1  ;;  %207 = vmatprep.subr.bf16.mxu0 %v216_v0  ;;  %v195_v3 = vld [vmem:[%s283_s0] sm:$0xff]   ;;  %v202_v4 = vld [vmem:[%s283_s0 + $0x8] sm:$0xff]  }
   0x3   :  { %v180_v5 = vld [vmem:[%s284_s2] ss:$0 sm:$0xff]  ;;  %208 = vmatpush3.bf16.msra.mxu0 %v216_v0  ;;  %v196_v6 = vunpack.c.l.bf16 %v195_v3  ;;  %v197_v7 = vunpack.c.h.bf16 %v195_v3  ;;  %v200_v8 = vunpack.c.l.bf16 %v202_v4  ;;  %v201_v9 = vunpack.c.h.bf16 %v202_v4 }
   0x4   :  { %209 = vmatprep.subr.bf16.mxu0 %v217_v2  ;;  %v181_v10 = vld [vmem:[%s285_s3] ss:$0 sm:$0xff] }
   0x5   :  { %v42_v11 = vmul.f32 %v196_v6, %v180_v5  ;;  %v43_v12 = vmul.f32 %v197_v7, %v180_v5  ;;  %v44_v13 = vmul.f32 %v200_v8, %v180_v5  ;;  %v45_v14 = vmul.f32 %v201_v9, %v180_v5 }
   0x7   :  { %210 = vmatpush3.bf16.msra.mxu0 %v217_v2  ;;  %v53_v15 = vadd.f32 %v181_v10, %v42_v11  ;;  %v54_v16 = vadd.f32 %v181_v10, %v43_v12  ;;  %v55_v17 = vadd.f32 %v181_v10, %v44_v13  ;;  %v56_v18 = vadd.f32 %v181_v10, %v45_v14 }
   0x8   :  { %v65_v25 = vld [vmem:[#allocation2 + $0x10] sm:$0xff]  ;;  %v63_v26 = vld [vmem:[#allocation2] sm:$0xff] }
   0x9   :  { %v57_v19 = vmax.f32 %v53_v15, 0.0  ;;  %v58_v20 = vmax.f32 %v54_v16, 0.0  ;;  %v59_v21 = vmax.f32 %v55_v17, 0.0  ;;  %v60_v22 = vmax.f32 %v56_v18, 0.0  ;;  %v66_v28 = vld [vmem:[#allocation2 + $0x18] sm:$0xff]  ;;  %v64_v31 = vld [vmem:[#allocation2 + $0x8] sm:$0xff] }
   0xb   :  { %v61_v23 = vpack.c.bf16 %v58_v20, %v57_v19  ;;  %v62_v24 = vpack.c.bf16 %v60_v22, %v59_v21 }
   0xd   :  { %211 = vmatprep.mubr.msk.bf16.mxu0 %vm83_vm1, %v61_v23 }
   0xe   :  { %212 = vmatmul.mubr.msk.bf16.vlgmr.msra.gmra.mrb[0].mxu0 %vm83_vm1, %v62_v24 }
  0xe1   :  { %v213_v27 = vpop.f32.mrb[0].mxu0 }
  0xe2   :  { %v141_v29 = vadd.f32 %v213_v27, %v65_v25  ;;  %v124_v30 = vpop.f32.mrb[1].mxu0 }
  0xe3   :  { %v139_v32 = vadd.f32 %v124_v30, %v63_v26  ;;  %v214_v33 = vpop.f32.mrb[2].mxu0 }
  0xe4   :  { %146 = vst.msk [vmem:[#allocation2 + $0x10] sm:$0xff] %vm22_vm0, %v141_v29  ;;  %v142_v34 = vadd.f32 %v214_v33, %v66_v28  ;;  %v127_v35 = vpop.f32.mrb[3].mxu0 }
  0xe5   :  { %144 = vst.msk [vmem:[#allocation2] sm:$0xff] %vm22_vm0, %v139_v32  ;;  %v140_v36 = vadd.f32 %v127_v35, %v64_v31 }
  0xe6   :  { %147 = vst.msk [vmem:[#allocation2 + $0x18] sm:$0xff] %vm22_vm0, %v142_v34 }
  0xe7   :  { %145 = vst.msk [vmem:[#allocation2 + $0x8] sm:$0xff] %vm22_vm0, %v140_v36 }
  0xeb   :  { %v153_v37 = vld [vmem:[#allocation2 + $0x10] sm:$0xff] }
  0xec   :  { %v192_v38 = vpack.c.bf16 %v153_v37, %v153_v37  ;;  %v151_v39 = vld [vmem:[#allocation2] sm:$0xff] }
  0xed   :  { %v190_v40 = vpack.c.bf16 %v151_v39, %v151_v39  ;;  %v154_v41 = vld [vmem:[#allocation2 + $0x18] sm:$0xff] }
  0xee   :  { %174 = vst.msk [vmem:[%s286_s4 + $0x8] sm:$0xf] %vm171_vm2, %v192_v38  ;;  %v193_v42 = vpack.c.bf16 %v154_v41, %v154_v41  ;;  %v152_v43 = vld [vmem:[#allocation2 + $0x8] sm:$0xff] }
  0xef   :  { %172 = vst.msk [vmem:[%s286_s4] sm:$0xf] %vm171_vm2, %v190_v40  ;;  %v191_v44 = vpack.c.bf16 %v152_v43, %v152_v43 }
  0xf0   :  { %175 = vst.msk [vmem:[%s286_s4 + $0xc] sm:$0xf] %vm171_vm2, %v193_v42 }
  0xf1   :  { %173 = vst.msk [vmem:[%s286_s4 + $0x4] sm:$0xf] %vm171_vm2, %v191_v44 }

// kernel: densenet_forward.52
= control target key start
LH: loop header
LB: loop body
LE: loop exit
PB: predicated region body
PF: predicated region fallthrough
CT: control target
= control target key end

     0   :  { %vm14_vm0 = vcmask 57344   ;;  %v81_v0 = vmov 0.0   ;;  %vm26_vm1 = vcmask 64512   ;;  %s133_s0 = inlined_call_operand.vmem [shape: bf16[32,8], index: 0, kind: input, shape index: {}]   ;;  %s134_s1 = inlined_call_operand.vmem [shape: f32[1,8], index: 1, kind: output, shape index: {0}]   ;;  %s135_s2 = inlined_call_operand.vmem [shape: f32[1,8], index: 2, kind: output, shape index: {1}]  }
   0x1   :  { %15 = vst.msk [vmem:[%s134_s1] sm:$0x1] %vm14_vm0, %v81_v0  ;;  %v72_v1 = vld [vmem:[%s133_s0] sm:$0xff]   ;;  %v79_v2 = vld [vmem:[%s133_s0 + $0x8] sm:$0xff]   ;;  %16 = vst.msk [vmem:[%s135_s2] sm:$0x1] %vm14_vm0, %v81_v0 }
   0x2   :  { %v73_v3 = vunpack.c.l.bf16 %v72_v1  ;;  %v74_v4 = vunpack.c.h.bf16 %v72_v1  ;;  %v77_v5 = vunpack.c.l.bf16 %v79_v2  ;;  %v78_v6 = vunpack.c.h.bf16 %v79_v2 }
   0x4   :  { %v27_v7 = vsel %vm26_vm1, %v73_v3, 0.0  ;;  %v28_v8 = vsel %vm26_vm1, %v74_v4, 0.0  ;;  %v30_v9 = vsel %vm26_vm1, %v77_v5, 0.0  ;;  %v44_v11 = vmul.f32 %v73_v3, %v73_v3 }
   0x5   :  { %v29_v10 = vadd.f32 %v28_v8, %v27_v7  ;;  %v45_v12 = vmul.f32 %v74_v4, %v74_v4  ;;  %v46_v13 = vmul.f32 %v77_v5, %v77_v5  ;;  %v32_v14 = vsel %vm26_vm1, %v78_v6, 0.0 }
   0x6   :  { %v47_v15 = vmul.f32 %v78_v6, %v78_v6  ;;  %v48_v17 = vsel %vm26_vm1, %v44_v11, 0.0 }
   0x7   :  { %v31_v16 = vadd.f32 %v30_v9, %v29_v10  ;;  %v49_v18 = vsel %vm26_vm1, %v45_v12, 0.0  ;;  %v51_v19 = vsel %vm26_vm1, %v46_v13, 0.0 }
   0x8   :  { %v50_v20 = vadd.f32 %v49_v18, %v48_v17  ;;  %v53_v22 = vsel %vm26_vm1, %v47_v15, 0.0  ;;  %v25_v33 = vld [vmem:[%s134_s1] sm:$0x1] }
   0x9   :  { %v33_v21 = vadd.f32 %v32_v14, %v31_v16  ;;  %v43_v38 = vld [vmem:[%s135_s2] sm:$0x1] }
   0xa   :  { %v52_v23 = vadd.f32 %v51_v19, %v50_v20 }
   0xb   :  { %v34_v24 = vrot.slane %v33_v21, 4 }
   0xc   :  { %v54_v25 = vadd.f32 %v53_v22, %v52_v23 }
   0xd   :  { %v35_v26 = vadd.f32 %v34_v24, %v33_v21 }
   0xe   :  { %v55_v27 = vrot.slane %v54_v25, 4 }
   0xf   :  { %v36_v28 = vrot.slane %v35_v26, 2 }
  0x10   :  { %v56_v29 = vadd.f32 %v55_v27, %v54_v25 }
  0x11   :  { %v37_v30 = vadd.f32 %v36_v28, %v35_v26 }
  0x12   :  { %v57_v31 = vrot.slane %v56_v29, 2 }
  0x13   :  { %v38_v32 = vrot.slane %v37_v30, 1 }
  0x14   :  { %v58_v34 = vadd.f32 %v57_v31, %v56_v29 }
  0x15   :  { %v39_v35 = vadd.f32 %v38_v32, %v37_v30 }
  0x16   :  { %v59_v36 = vrot.slane %v58_v34, 1 }
  0x17   :  { %v40_v37 = vadd.f32 %v39_v35, %v25_v33 }
  0x18   :  { %v60_v39 = vadd.f32 %v59_v36, %v58_v34 }
  0x19   :  { %42 = vst.msk [vmem:[%s134_s1] sm:$0x1] %vm14_vm0, %v40_v37 }
  0x1a   :  { %v61_v40 = vadd.f32 %v60_v39, %v43_v38 }
  0x1c   :  { %62 = vst.msk [vmem:[%s135_s2] sm:$0x1] %vm14_vm0, %v61_v40 }

// kernel: densenet_forward.51
= control target key start
LH: loop header
LB: loop body
LE: loop exit
PB: predicated region body
PF: predicated region fallthrough
CT: control target
= control target key end

     0   :  { %vm40_vm0 = vcmask 64512   ;;  %vm71_vm1 = vcmask 130048   ;;  %v1066_v1 = vmov 0.0   ;;  %vm879_vm2 = vcmask 60416   ;;  %s1273_s9 = inlined_call_operand.vmem [shape: bf16[9,16,8], index: 9, kind: input, shape index: {}]   ;;  %s1274_s0 = inlined_call_operand.vmem [shape: bf16[32,16], index: 0, kind: input, shape index: {}]   ;;  %s1275_s1 = inlined_call_operand.vmem [shape: bf16[32,16], index: 1, kind: input, shape index: {}]   ;;  %s1276_s2 = inlined_call_operand.vmem [shape: bf16[32,16], index: 2, kind: input, shape index: {}]   ;;  %s1277_s3 = inlined_call_operand.vmem [shape: bf16[32,16], index: 3, kind: input, shape index: {}]   ;;  %s1278_s4 = inlined_call_operand.vmem [shape: bf16[32,16], index: 4, kind: input, shape index: {}]   ;;  %s1279_s5 = inlined_call_operand.vmem [shape: bf16[32,16], index: 5, kind: input, shape index: {}]   ;;  %s1280_s6 = inlined_call_operand.vmem [shape: bf16[32,16], index: 6, kind: input, shape index: {}]   ;;  %s1281_s7 = inlined_call_operand.vmem [shape: bf16[32,16], index: 7, kind: input, shape index: {}]   ;;  %s1282_s8 = inlined_call_operand.vmem [shape: bf16[32,16], index: 8, kind: input, shape index: {}]   ;;  %s1283_s10 = inlined_call_operand.vmem [shape: bf16[32,8], index: 10, kind: output, shape index: {}]  }
   0x1   :  { %v1039_v0 = vld [vmem:[%s1273_s9] sm:$0xff]   ;;  %43 = vst.msk [vmem:[#allocation2 + $0x10] sm:$0xff] %vm40_vm0, %v1066_v1  ;;  %41 = vst.msk [vmem:[#allocation2] sm:$0xff] %vm40_vm0, %v1066_v1  ;;  %v1041_v3 = vld [vmem:[%s1274_s0 + $0x8] sm:$0xff]  }
   0x2   :  { %42 = vst.msk [vmem:[#allocation2 + $0x8] sm:$0xff] %vm40_vm0, %v1066_v1  ;;  %44 = vst.msk [vmem:[#allocation2 + $0x18] sm:$0xff] %vm40_vm0, %v1066_v1  ;;  %v1040_v2 = vld [vmem:[%s1274_s0] sm:$0xff]   ;;  %984 = vmatprep.subr.bf16.mxu0 %v1039_v0  ;;  %v1042_v4 = vld [vmem:[%s1273_s9 + $0x8] sm:$0xff]  }
   0x3   :  { %985 = vmatpush3.bf16.msra.mxu0 %v1039_v0  ;;  %986 = vmatprep.mubr.msk.bf16.mxu0 %vm71_vm1, %v1040_v2  ;;  %v1043_v5 = vld [vmem:[%s1275_s1] sm:$0xff]   ;;  %v1044_v6 = vld [vmem:[%s1275_s1 + $0x8] sm:$0xff]   ;;  %v1045_v7 = vld [vmem:[%s1273_s9 + $0x10] sm:$0xff]  }
   0x4   :  { %990 = vmatprep.subr.bf16.mxu1 %v1042_v4  ;;  %992 = vmatprep.mubr.msk.bf16.mxu1 %vm71_vm1, %v1043_v5  ;;  %v1046_v8 = vld [vmem:[%s1276_s2] sm:$0xff]   ;;  %v1047_v9 = vld [vmem:[%s1276_s2 + $0x8] sm:$0xff]   ;;  %v1048_v10 = vld [vmem:[%s1273_s9 + $0x18] sm:$0xff]  }
   0x5   :  { %991 = vmatpush3.bf16.msra.mxu1 %v1042_v4  ;;  %996 = vmatprep.subr.bf16.mxu0 %v1045_v7  ;;  %v1049_v11 = vld [vmem:[%s1277_s3] sm:$0xff]   ;;  %v1050_v12 = vld [vmem:[%s1277_s3 + $0x8] sm:$0xff]   ;;  %v1057_v18 = vld [vmem:[%s1273_s9 + $0x30] sm:$0xff]  }
   0x6   :  { %987 = vmatmul.mubr.msk.bf16.vlgmr.msra.gmra.mrb[0].mxu0 %vm71_vm1, %v1041_v3  ;;  %1002 = vmatprep.subr.bf16.mxu1 %v1048_v10  ;;  %v1051_v13 = vld [vmem:[%s1273_s9 + $0x20] sm:$0xff]   ;;  %v1054_v15 = vld [vmem:[%s1273_s9 + $0x28] sm:$0xff]   ;;  %v1060_v21 = vld [vmem:[%s1273_s9 + $0x38] sm:$0xff]  }
   0x7   :  { %997 = vmatpush3.bf16.msra.mxu0 %v1045_v7  ;;  %998 = vmatprep.mubr.msk.bf16.mxu0 %vm71_vm1, %v1046_v8  ;;  %v1052_v14 = vld [vmem:[%s1278_s4] sm:$0xff]   ;;  %v1053_v17 = vld [vmem:[%s1278_s4 + $0x8] sm:$0xff]  }
   0x8   :  { %993 = vmatmul.mubr.msk.bf16.vlgmr.msra.gmra.mrb[0].mxu1 %vm71_vm1, %v1044_v6  ;;  %1008 = vmatprep.subr.bf16.mxu0 %v1051_v13  ;;  %v1055_v16 = vld [vmem:[%s1279_s5] sm:$0xff]   ;;  %v1056_v20 = vld [vmem:[%s1279_s5 + $0x8] sm:$0xff]   ;;  %v51_v28 = vld [vmem:[#allocation2 + $0x10] sm:$0xff] }
   0x9   :  { %1003 = vmatpush3.bf16.msra.mxu1 %v1048_v10  ;;  %1004 = vmatprep.mubr.msk.bf16.mxu1 %vm71_vm1, %v1049_v11  ;;  %v1058_v19 = vld [vmem:[%s1280_s6] sm:$0xff]   ;;  %v1059_v24 = vld [vmem:[%s1280_s6 + $0x8] sm:$0xff]   ;;  %v52_v31 = vld [vmem:[#allocation2 + $0x18] sm:$0xff] }
   0xa   :  { %1014 = vmatprep.subr.bf16.mxu1 %v1054_v15  ;;  %v1061_v22 = vld [vmem:[%s1281_s7] sm:$0xff]   ;;  %v1062_v26 = vld [vmem:[%s1281_s7 + $0x8] sm:$0xff]  }
   0xb   :  { %v1063_v23 = vld [vmem:[%s1273_s9 + $0x40] sm:$0xff]   ;;  %v1065_v27 = vld [vmem:[%s1282_s8 + $0x8] sm:$0xff]  }
   0xc   :  { %v1064_v25 = vld [vmem:[%s1282_s8] sm:$0xff]   ;;  %v50_v34 = vld [vmem:[#allocation2 + $0x8] sm:$0xff] }
   0xd   :  { %v49_v29 = vld [vmem:[#allocation2] sm:$0xff] }
   0xe   :  { %999 = vmatmul.mubr.msk.bf16.vlgmr.msra.gmra.mrb[4].mxu0 %vm71_vm1, %v1047_v9 }
   0xf   :  { %1009 = vmatpush3.bf16.msra.mxu0 %v1051_v13  ;;  %1010 = vmatprep.mubr.msk.bf16.mxu0 %vm71_vm1, %v1052_v14 }
  0x10   :  { %1005 = vmatmul.mubr.msk.bf16.vlgmr.msra.gmra.mrb[4].mxu1 %vm71_vm1, %v1050_v12  ;;  %1020 = vmatprep.subr.bf16.mxu0 %v1057_v18 }
  0x11   :  { %1015 = vmatpush3.bf16.msra.mxu1 %v1054_v15  ;;  %1016 = vmatprep.mubr.msk.bf16.mxu1 %vm71_vm1, %v1055_v16 }
  0x12   :  { %1026 = vmatprep.subr.bf16.mxu1 %v1060_v21 }
  0x16   :  { %1011 = vmatmul.mubr.msk.bf16.vlgmr.msra.gmra.mrb[8].mxu0 %vm71_vm1, %v1053_v17 }
  0x17   :  { %1021 = vmatpush3.bf16.msra.mxu0 %v1057_v18  ;;  %1022 = vmatprep.mubr.msk.bf16.mxu0 %vm71_vm1, %v1058_v19 }
  0x18   :  { %1017 = vmatmul.mubr.msk.bf16.vlgmr.msra.gmra.mrb[8].mxu1 %vm71_vm1, %v1056_v20  ;;  %1032 = vmatprep.subr.bf16.mxu0 %v1063_v23 }
  0x19   :  { %1027 = vmatpush3.bf16.msra.mxu1 %v1060_v21  ;;  %1028 = vmatprep.mubr.msk.bf16.mxu1 %vm71_vm1, %v1061_v22 }
  0x1e   :  { %1023 = vmatmul.mubr.msk.bf16.vlgmr.msra.gmra.mrb[12].mxu0 %vm71_vm1, %v1059_v24 }
  0x1f   :  { %1033 = vmatpush3.bf16.msra.mxu0 %v1063_v23  ;;  %1034 = vmatprep.mubr.msk.bf16.mxu0 %vm71_vm1, %v1064_v25 }
  0x20   :  { %1029 = vmatmul.mubr.msk.bf16.vlgmr.msra.gmra.mrb[12].mxu1 %vm71_vm1, %v1062_v26 }
  0x26   :  { %1035 = vmatmul.mubr.msk.bf16.vlgmr.msra.gmra.mrb[16].mxu0 %vm71_vm1, %v1065_v27 }
  0xd9   :  { %v988_v30 = vpop.f32.mrb[0].mxu0 }
  0xda   :  { %v129_v32 = vadd.f32 %v988_v30, %v51_v28  ;;  %v112_v33 = vpop.f32.mrb[1].mxu0 }
  0xdb   :  { %v127_v35 = vadd.f32 %v112_v33, %v49_v29  ;;  %v989_v36 = vpop.f32.mrb[2].mxu0  ;;  %v994_v39 = vpop.f32.mrb[0].mxu1 }
  0xdc   :  { %134 = vst.msk [vmem:[#allocation2 + $0x10] sm:$0xff] %vm40_vm0, %v129_v32  ;;  %v130_v37 = vadd.f32 %v989_v36, %v52_v31  ;;  %v115_v38 = vpop.f32.mrb[3].mxu0  ;;  %v203_v41 = vpop.f32.mrb[1].mxu1 }
  0xdd   :  { %132 = vst.msk [vmem:[#allocation2] sm:$0xff] %vm40_vm0, %v127_v35  ;;  %v128_v40 = vadd.f32 %v115_v38, %v50_v34  ;;  %v995_v42 = vpop.f32.mrb[2].mxu1 }
  0xde   :  { %135 = vst.msk [vmem:[#allocation2 + $0x18] sm:$0xff] %vm40_vm0, %v130_v37  ;;  %v206_v43 = vpop.f32.mrb[3].mxu1 }
  0xdf   :  { %133 = vst.msk [vmem:[#allocation2 + $0x8] sm:$0xff] %vm40_vm0, %v128_v40 }
  0xe1   :  { %v1000_v44 = vpop.f32.mrb[4].mxu0 }
  0xe2   :  { %v293_v45 = vpop.f32.mrb[5].mxu0 }
  0xe3   :  { %v142_v46 = vld [vmem:[#allocation2 + $0x10] sm:$0xff]  ;;  %v1001_v47 = vpop.f32.mrb[6].mxu0  ;;  %v1006_v51 = vpop.f32.mrb[4].mxu1 }
  0xe4   :  { %v220_v48 = vadd.f32 %v994_v39, %v142_v46  ;;  %v140_v49 = vld [vmem:[#allocation2] sm:$0xff]  ;;  %v296_v50 = vpop.f32.mrb[7].mxu0  ;;  %v383_v54 = vpop.f32.mrb[5].mxu1 }
  0xe5   :  { %v218_v52 = vadd.f32 %v203_v41, %v140_v49  ;;  %v143_v53 = vld [vmem:[#allocation2 + $0x18] sm:$0xff]  ;;  %v1007_v57 = vpop.f32.mrb[6].mxu1 }
  0xe6   :  { %224 = vst.msk [vmem:[#allocation2 + $0x10] sm:$0xff] %vm40_vm0, %v220_v48  ;;  %v221_v55 = vadd.f32 %v995_v42, %v143_v53  ;;  %v141_v56 = vld [vmem:[#allocation2 + $0x8] sm:$0xff]  ;;  %v386_v59 = vpop.f32.mrb[7].mxu1 }
  0xe7   :  { %222 = vst.msk [vmem:[#allocation2] sm:$0xff] %vm40_vm0, %v218_v52  ;;  %v219_v58 = vadd.f32 %v206_v43, %v141_v56 }
  0xe8   :  { %225 = vst.msk [vmem:[#allocation2 + $0x18] sm:$0xff] %vm40_vm0, %v221_v55 }
  0xe9   :  { %223 = vst.msk [vmem:[#allocation2 + $0x8] sm:$0xff] %vm40_vm0, %v219_v58  ;;  %v1012_v60 = vpop.f32.mrb[8].mxu0 }
  0xea   :  { %v473_v61 = vpop.f32.mrb[9].mxu0 }
  0xeb   :  { %v1013_v62 = vpop.f32.mrb[10].mxu0  ;;  %v1018_v0 = vpop.f32.mrb[8].mxu1 }
  0xec   :  { %v476_v63 = vpop.f32.mrb[11].mxu0  ;;  %v563_v2 = vpop.f32.mrb[9].mxu1 }
  0xed   :  { %v232_v1 = vld [vmem:[#allocation2 + $0x10] sm:$0xff]  ;;  %v1019_v5 = vpop.f32.mrb[10].mxu1 }
  0xee   :  { %v310_v3 = vadd.f32 %v1000_v44, %v232_v1  ;;  %v230_v4 = vld [vmem:[#allocation2] sm:$0xff]  ;;  %v566_v8 = vpop.f32.mrb[11].mxu1 }
  0xef   :  { %v308_v6 = vadd.f32 %v293_v45, %v230_v4  ;;  %v233_v7 = vld [vmem:[#allocation2 + $0x18] sm:$0xff] }
  0xf0   :  { %314 = vst.msk [vmem:[#allocation2 + $0x10] sm:$0xff] %vm40_vm0, %v310_v3  ;;  %v311_v9 = vadd.f32 %v1001_v47, %v233_v7  ;;  %v231_v10 = vld [vmem:[#allocation2 + $0x8] sm:$0xff] }
  0xf1   :  { %312 = vst.msk [vmem:[#allocation2] sm:$0xff] %vm40_vm0, %v308_v6  ;;  %v309_v11 = vadd.f32 %v296_v50, %v231_v10  ;;  %v1024_v12 = vpop.f32.mrb[12].mxu0 }
  0xf2   :  { %315 = vst.msk [vmem:[#allocation2 + $0x18] sm:$0xff] %vm40_vm0, %v311_v9  ;;  %v653_v13 = vpop.f32.mrb[13].mxu0 }
  0xf3   :  { %313 = vst.msk [vmem:[#allocation2 + $0x8] sm:$0xff] %vm40_vm0, %v309_v11  ;;  %v1025_v14 = vpop.f32.mrb[14].mxu0  ;;  %v1030_v16 = vpop.f32.mrb[12].mxu1 }
  0xf4   :  { %v656_v15 = vpop.f32.mrb[15].mxu0  ;;  %v743_v17 = vpop.f32.mrb[13].mxu1 }
  0xf5   :  { %v1031_v18 = vpop.f32.mrb[14].mxu1 }
  0xf6   :  { %v746_v20 = vpop.f32.mrb[15].mxu1 }
  0xf7   :  { %v322_v19 = vld [vmem:[#allocation2 + $0x10] sm:$0xff] }
  0xf8   :  { %v400_v21 = vadd.f32 %v1006_v51, %v322_v19  ;;  %v320_v22 = vld [vmem:[#allocation2] sm:$0xff] }
  0xf9   :  { %v398_v23 = vadd.f32 %v383_v54, %v320_v22  ;;  %v323_v24 = vld [vmem:[#allocation2 + $0x18] sm:$0xff]  ;;  %v1036_v25 = vpop.f32.mrb[16].mxu0 }
  0xfa   :  { %404 = vst.msk [vmem:[#allocation2 + $0x10] sm:$0xff] %vm40_vm0, %v400_v21  ;;  %v401_v26 = vadd.f32 %v1007_v57, %v323_v24  ;;  %v321_v27 = vld [vmem:[#allocation2 + $0x8] sm:$0xff]  ;;  %v833_v28 = vpop.f32.mrb[17].mxu0 }
  0xfb   :  { %402 = vst.msk [vmem:[#allocation2] sm:$0xff] %vm40_vm0, %v398_v23  ;;  %v399_v29 = vadd.f32 %v386_v59, %v321_v27  ;;  %v1037_v30 = vpop.f32.mrb[18].mxu0 }
  0xfc   :  { %405 = vst.msk [vmem:[#allocation2 + $0x18] sm:$0xff] %vm40_vm0, %v401_v26  ;;  %v836_v31 = vpop.f32.mrb[19].mxu0 }
  0xfd   :  { %403 = vst.msk [vmem:[#allocation2 + $0x8] sm:$0xff] %vm40_vm0, %v399_v29 }
 0x101   :  { %v412_v32 = vld [vmem:[#allocation2 + $0x10] sm:$0xff] }
 0x102   :  { %v490_v33 = vadd.f32 %v1012_v60, %v412_v32  ;;  %v410_v34 = vld [vmem:[#allocation2] sm:$0xff] }
 0x103   :  { %v488_v35 = vadd.f32 %v473_v61, %v410_v34  ;;  %v413_v36 = vld [vmem:[#allocation2 + $0x18] sm:$0xff] }
 0x104   :  { %494 = vst.msk [vmem:[#allocation2 + $0x10] sm:$0xff] %vm40_vm0, %v490_v33  ;;  %v491_v37 = vadd.f32 %v1013_v62, %v413_v36  ;;  %v411_v38 = vld [vmem:[#allocation2 + $0x8] sm:$0xff] }
 0x105   :  { %492 = vst.msk [vmem:[#allocation2] sm:$0xff] %vm40_vm0, %v488_v35  ;;  %v489_v39 = vadd.f32 %v476_v63, %v411_v38 }
 0x106   :  { %495 = vst.msk [vmem:[#allocation2 + $0x18] sm:$0xff] %vm40_vm0, %v491_v37 }
 0x107   :  { %493 = vst.msk [vmem:[#allocation2 + $0x8] sm:$0xff] %vm40_vm0, %v489_v39 }
 0x10b   :  { %v502_v40 = vld [vmem:[#allocation2 + $0x10] sm:$0xff] }
 0x10c   :  { %v580_v41 = vadd.f32 %v1018_v0, %v502_v40  ;;  %v500_v42 = vld [vmem:[#allocation2] sm:$0xff] }
 0x10d   :  { %v578_v43 = vadd.f32 %v563_v2, %v500_v42  ;;  %v503_v44 = vld [vmem:[#allocation2 + $0x18] sm:$0xff] }
 0x10e   :  { %584 = vst.msk [vmem:[#allocation2 + $0x10] sm:$0xff] %vm40_vm0, %v580_v41  ;;  %v581_v45 = vadd.f32 %v1019_v5, %v503_v44  ;;  %v501_v46 = vld [vmem:[#allocation2 + $0x8] sm:$0xff] }
 0x10f   :  { %582 = vst.msk [vmem:[#allocation2] sm:$0xff] %vm40_vm0, %v578_v43  ;;  %v579_v47 = vadd.f32 %v566_v8, %v501_v46 }
 0x110   :  { %585 = vst.msk [vmem:[#allocation2 + $0x18] sm:$0xff] %vm40_vm0, %v581_v45 }
 0x111   :  { %583 = vst.msk [vmem:[#allocation2 + $0x8] sm:$0xff] %vm40_vm0, %v579_v47 }
 0x115   :  { %v592_v48 = vld [vmem:[#allocation2 + $0x10] sm:$0xff] }
 0x116   :  { %v670_v49 = vadd.f32 %v1024_v12, %v592_v48  ;;  %v590_v50 = vld [vmem:[#allocation2] sm:$0xff] }
 0x117   :  { %v668_v51 = vadd.f32 %v653_v13, %v590_v50  ;;  %v593_v52 = vld [vmem:[#allocation2 + $0x18] sm:$0xff] }
 0x118   :  { %674 = vst.msk [vmem:[#allocation2 + $0x10] sm:$0xff] %vm40_vm0, %v670_v49  ;;  %v671_v53 = vadd.f32 %v1025_v14, %v593_v52  ;;  %v591_v54 = vld [vmem:[#allocation2 + $0x8] sm:$0xff] }
 0x119   :  { %672 = vst.msk [vmem:[#allocation2] sm:$0xff] %vm40_vm0, %v668_v51  ;;  %v669_v55 = vadd.f32 %v656_v15, %v591_v54 }
 0x11a   :  { %675 = vst.msk [vmem:[#allocation2 + $0x18] sm:$0xff] %vm40_vm0, %v671_v53 }
 0x11b   :  { %673 = vst.msk [vmem:[#allocation2 + $0x8] sm:$0xff] %vm40_vm0, %v669_v55 }
 0x11f   :  { %v682_v56 = vld [vmem:[#allocation2 + $0x10] sm:$0xff] }
 0x120   :  { %v760_v57 = vadd.f32 %v1030_v16, %v682_v56  ;;  %v680_v58 = vld [vmem:[#allocation2] sm:$0xff] }
 0x121   :  { %v758_v59 = vadd.f32 %v743_v17, %v680_v58  ;;  %v683_v60 = vld [vmem:[#allocation2 + $0x18] sm:$0xff] }
 0x122   :  { %764 = vst.msk [vmem:[#allocation2 + $0x10] sm:$0xff] %vm40_vm0, %v760_v57  ;;  %v761_v61 = vadd.f32 %v1031_v18, %v683_v60  ;;  %v681_v62 = vld [vmem:[#allocation2 + $0x8] sm:$0xff] }
 0x123   :  { %762 = vst.msk [vmem:[#allocation2] sm:$0xff] %vm40_vm0, %v758_v59  ;;  %v759_v63 = vadd.f32 %v746_v20, %v681_v62 }
 0x124   :  { %765 = vst.msk [vmem:[#allocation2 + $0x18] sm:$0xff] %vm40_vm0, %v761_v61 }
 0x125   :  { %763 = vst.msk [vmem:[#allocation2 + $0x8] sm:$0xff] %vm40_vm0, %v759_v63 }
 0x129   :  { %v772_v0 = vld [vmem:[#allocation2 + $0x10] sm:$0xff] }
 0x12a   :  { %v850_v1 = vadd.f32 %v1036_v25, %v772_v0  ;;  %v770_v2 = vld [vmem:[#allocation2] sm:$0xff] }
 0x12b   :  { %v848_v3 = vadd.f32 %v833_v28, %v770_v2  ;;  %v773_v4 = vld [vmem:[#allocation2 + $0x18] sm:$0xff] }
 0x12c   :  { %854 = vst.msk [vmem:[#allocation2 + $0x10] sm:$0xff] %vm40_vm0, %v850_v1  ;;  %v851_v5 = vadd.f32 %v1037_v30, %v773_v4  ;;  %v771_v6 = vld [vmem:[#allocation2 + $0x8] sm:$0xff] }
 0x12d   :  { %852 = vst.msk [vmem:[#allocation2] sm:$0xff] %vm40_vm0, %v848_v3  ;;  %v849_v7 = vadd.f32 %v836_v31, %v771_v6 }
 0x12e   :  { %855 = vst.msk [vmem:[#allocation2 + $0x18] sm:$0xff] %vm40_vm0, %v851_v5 }
 0x12f   :  { %853 = vst.msk [vmem:[#allocation2 + $0x8] sm:$0xff] %vm40_vm0, %v849_v7 }
 0x133   :  { %v861_v8 = vld [vmem:[#allocation2 + $0x10] sm:$0xff] }
 0x134   :  { %v955_v9 = vpack.c.bf16 %v861_v8, %v861_v8  ;;  %v859_v10 = vld [vmem:[#allocation2] sm:$0xff] }
 0x135   :  { %v953_v11 = vpack.c.bf16 %v859_v10, %v859_v10  ;;  %v862_v12 = vld [vmem:[#allocation2 + $0x18] sm:$0xff] }
 0x136   :  { %882 = vst.msk [vmem:[%s1283_s10 + $0x8] sm:$0xf] %vm879_vm2, %v955_v9  ;;  %v956_v13 = vpack.c.bf16 %v862_v12, %v862_v12  ;;  %v860_v14 = vld [vmem:[#allocation2 + $0x8] sm:$0xff] }
 0x137   :  { %880 = vst.msk [vmem:[%s1283_s10] sm:$0xf] %vm879_vm2, %v953_v11  ;;  %v954_v15 = vpack.c.bf16 %v860_v14, %v860_v14 }
 0x138   :  { %883 = vst.msk [vmem:[%s1283_s10 + $0xc] sm:$0xf] %vm879_vm2, %v956_v13 }
 0x139   :  { %881 = vst.msk [vmem:[%s1283_s10 + $0x4] sm:$0xf] %vm879_vm2, %v954_v15 }

// kernel: densenet_forward.58
= control target key start
LH: loop header
LB: loop body
LE: loop exit
PB: predicated region body
PF: predicated region fallthrough
CT: control target
= control target key end

     0   :  { %vm18_vm0 = vcmask 254976   ;;  %v106_v0 = vmov 0.0   ;;  %vm55_vm1 = vcmask 261120   ;;  %vm76_vm2 = vcmask 1041409   ;;  %s144_s0 = inlined_call_operand.vmem [shape: bf16[2,16,32], index: 0, kind: input, shape index: {}]   ;;  %s145_s1 = inlined_call_operand.vmem [shape: f32[1,1,32], index: 1, kind: input, shape index: {}]   ;;  %s146_s2 = inlined_call_operand.vmem [shape: f32[1,1,32], index: 2, kind: input, shape index: {}]   ;;  %s147_s3 = inlined_call_operand.vmem [shape: bf16[2,32], index: 3, kind: output, shape index: {}]  }
   0x1   :  { %19 = vst.msk [vmem:[#allocation2] sm:$0x3] %vm18_vm0, %v106_v0  ;;  %v97_v1 = vld [vmem:[%s144_s0] sm:$0xff]   ;;  %v104_v2 = vld [vmem:[%s144_s0 + $0x8] sm:$0xff]   ;;  %vm88_vm3 = vcmask 253952  }
   0x2   :  { %v94_v3 = vld [vmem:[%s145_s1] ss:$0 sm:$0xff]  ;;  %v98_v4 = vunpack.c.l.bf16 %v97_v1  ;;  %v99_v5 = vunpack.c.h.bf16 %v97_v1  ;;  %v102_v6 = vunpack.c.l.bf16 %v104_v2  ;;  %v103_v7 = vunpack.c.h.bf16 %v104_v2 }
   0x3   :  { %v95_v8 = vld [vmem:[%s146_s2] ss:$0 sm:$0xff] }
   0x4   :  { %v35_v9 = vmul.f32 %v98_v4, %v94_v3  ;;  %v36_v10 = vmul.f32 %v99_v5, %v94_v3  ;;  %v37_v11 = vmul.f32 %v102_v6, %v94_v3  ;;  %v38_v12 = vmul.f32 %v103_v7, %v94_v3 }
   0x6   :  { %v46_v13 = vadd.f32 %v95_v8, %v35_v9  ;;  %v47_v14 = vadd.f32 %v95_v8, %v36_v10  ;;  %v48_v15 = vadd.f32 %v95_v8, %v37_v11  ;;  %v49_v16 = vadd.f32 %v95_v8, %v38_v12 }
   0x8   :  { %v50_v17 = vmax.f32 %v46_v13, 0.0  ;;  %v51_v18 = vmax.f32 %v47_v14, 0.0  ;;  %v52_v19 = vmax.f32 %v48_v15, 0.0  ;;  %v53_v20 = vmax.f32 %v49_v16, 0.0  ;;  %v54_v37 = vld [vmem:[#allocation2] sm:$0x3] }
   0xa   :  { %v56_v21 = vsel %vm55_vm1, %v50_v17, 0.0  ;;  %v57_v22 = vsel %vm55_vm1, %v51_v18, 0.0  ;;  %v65_v23 = vsel %vm55_vm1, %v52_v19, 0.0  ;;  %v66_v24 = vsel %vm55_vm1, %v53_v20, 0.0 }
   0xb   :  { %v58_v25 = vadd.f32 %v57_v22, %v56_v21  ;;  %v67_v26 = vadd.f32 %v66_v24, %v65_v23 }
   0xd   :  { %v59_v27 = vrot.slane %v58_v25, 4  ;;  %v68_v28 = vrot.slane %v67_v26, 4 }
   0xf   :  { %v60_v29 = vadd.f32 %v59_v27, %v58_v25  ;;  %v69_v30 = vadd.f32 %v68_v28, %v67_v26 }
  0x11   :  { %v61_v31 = vrot.slane %v60_v29, 2  ;;  %v70_v32 = vrot.slane %v69_v30, 2 }
  0x13   :  { %v62_v33 = vadd.f32 %v61_v31, %v60_v29  ;;  %v71_v34 = vadd.f32 %v70_v32, %v69_v30 }
  0x15   :  { %v63_v35 = vrot.slane %v62_v33, 1  ;;  %v72_v36 = vrot.slane %v71_v34, 1 }
  0x17   :  { %v64_v38 = vadd.f32 %v63_v35, %v62_v33  ;;  %v73_v39 = vadd.f32 %v72_v36, %v71_v34 }
  0x19   :  { %v77_v40 = vsel %vm76_vm2, %v73_v39, %v64_v38 }
  0x1a   :  { %v79_v41 = vadd.f32 %v77_v40, %v54_v37 }
  0x1c   :  { %81 = vst.msk [vmem:[#allocation2] sm:$0x3] %vm18_vm0, %v79_v41 }
  0x23   :  { %v85_v42 = vld [vmem:[#allocation2] sm:$0x3] }
  0x24   :  { %v86_v43 = vmul.f32 0.0625, %v85_v42 }
  0x26   :  { %v87_v44 = vpack.c.bf16 %v86_v43, %v86_v43 }
  0x28   :  { %89 = vst.msk [vmem:[%s147_s3] sm:$0x1] %vm88_vm3, %v87_v44 }

// kernel: densenet_forward.59
= control target key start
LH: loop header
LB: loop body
LE: loop exit
PB: predicated region body
PF: predicated region fallthrough
CT: control target
= control target key end

     0   :  { %v146_v1 = vmov 0.0   ;;  %vm147_vm0 = vmmov 0   ;;  %vm17_vm1 = vcmask 74752   ;;  %s188_s0 = inlined_call_operand.vmem [shape: bf16[2,32], index: 0, kind: input, shape index: {}]   ;;  %s189_s1 = inlined_call_operand.vmem [shape: bf16[1,32,10], index: 1, kind: input, shape index: {}]   ;;  %s190_s2 = inlined_call_operand.hbm [shape: f32[2,10], index: 2, kind: output, shape index: {}]  }
   0x1   :  { %v120_v0 = vld [vmem:[%s189_s1] sm:$0xff]   ;;  %109 = vmatprep.subr.bf16.mxu0 %v146_v1  ;;  %v121_v2 = vld [vmem:[%s189_s1 + $0x8] sm:$0xff]   ;;  %113 = vmatprep.mubr.msk.bf16.mxu0 %vm147_vm0, %v146_v1 }
   0x2   :  { %110 = vmatpush3.bf16.msra.mxu0 %v120_v0 }
   0x3   :  { %7 = vsyncpa [#allocation4], 0  ;;  %111 = vmatprep.subr.bf16.mxu0 %v146_v1  ;;  %18 = vst.msk [vmem:[#allocation2] sm:$0x3] %vm17_vm1, %v146_v1  ;;  %v19_v3 = vld [vmem:[%s188_s0] sm:$0x1] }
   0x4   :  { %vm37_vm2 = vcmask 261120   ;;  %s148_s1 = smov [#allocation3]  }
   0x5   :  { %s95_s15 = sshll.u32 %s148_s1, 4  ;;  %s96_s15 = int_to_ptr.vmem [resolvable:$true] %s95_s15 }
   0x6   :  { %112 = vmatpush3.bf16.msra.mxu0 %v121_v2  ;;  %s122_s16 = scalar_lea.vmem %s96_s15, 32  ;;  %p127_p1 = scmp.lt.s32.totalorder %s96_s15, %s96_s15 }
   0x7   :  { %p123_p0 = scmp.ne.s32.totalorder %s96_s15, %s122_s16  ;;  %p128_p2 = scmp.lt.s32.totalorder %s122_s16, %s122_s16 }
   0x9   :  { %114 = vmatmul.mubr.msk.bf16.vlgmr.msra.gmra.mrb[0].mxu0 %vm37_vm2, %v19_v3  ;;  %p129_p3 = por %p128_p2, %p127_p1 }
   0xa   :  { %v20_v4 = vld [vmem:[#allocation2] sm:$0x3] }
   0xb   :  { %p130_p4 = pnand %p129_p3, %p123_p0 }
  0xdc   :  { %v75_v5 = vpop.f32.mrb[0].mxu0 }
  0xdd   :  { %v81_v6 = vadd.f32 %v75_v5, %v20_v4  ;;  %v115_v7 = vpop.f32.mrb[1].mxu0 }
  0xde   :  { %v78_v8 = vpop.f32.mrb[2].mxu0 }
  0xdf   :  { %83 = vst.msk [vmem:[#allocation2] sm:$0x3] %vm17_vm1, %v81_v6  ;;  %v116_v9 = vpop.f32.mrb[3].mxu0 }
  0xe6   :  { %v87_v10 = vld [vmem:[#allocation2] sm:$0x3] }
  0xe7   :  { %88 = vst.msk [vmem:[#allocation3] sm:$0x3] %vm17_vm1, %v87_v10 }
  0xe8   :  { %133 = shalt.err (!%p130_p4)
}
  0xe9   :  { %s134_s18 = scalar_lea.hbm %s190_s2, 32 }
  0xea   :  { %p135_p5 = scmp.ne.s32.totalorder %s190_s2, %s134_s18  ;;  %p138_p6 = scmp.lt.u32.totalorder %s134_s18, %s190_s2 }
  0xec   :  { %p140_p7 = pnand %p138_p6, %p135_p5 }
  0xee   :  { %143 = shalt.err (!%p140_p7)
}
  0xef   :  { %98 = dma.vmem_to_hbm [thread:$0]  %s96_s15, 32, %s190_s2, [#allocation4]  }
  0xf0   :  { %144 = dma.done.wait [#allocation4], 32  }
  0xf1   :  { %145 = vsyncadd [#allocation4], 4294967264 }
  0xf2   :  { %102 = vsyncpa [#allocation4], 1 }

</bundles_post_ra>
